<compile_context>
chip_gen: v5e
topology: v5e:2x2
jax: 0.10.0
libtpu: 0.0.40
codegen_flags: <defaults>
</compile_context>

<pallas_src>
import functools

import jax
import jax.numpy as jnp
from jax.experimental import pallas as pl
from jax.experimental.pallas import tpu as pltpu


# ----------------------------- Pallas kernel --------------------------------
def mamba_model_kernel(x_ref, a_w_ref, a_b_ref, m_w_ref, m_b_ref, v_ref, c_ref,
                       out_ref, *, n_fused):
    """One batch block of the MAMBAModel forward (layer-pair-fused form).

    x_ref   : (TB*S, F)        f32   batch block, flattened to 2D, feature-last
    a_w_ref : (F, Dp)          bf16  W1 of layer 0 (D padded to 128)
    a_b_ref : (1, Dp)          f32   b1 of layer 0
    m_w_ref : (L-1, Dp, Dp)    bf16  fused W2_l @ W1_{l+1}
    m_b_ref : (L-1, 1, Dp)     f32   fused b2_l @ W1_{l+1} + b1_{l+1}
    v_ref   : (S, Dp)          f32   last W2 folded into fc weight
    c_ref   : (1, 1)           f32   fc bias + folded b2 contribution
    out_ref : (TB, 1)          f32
    """
    rows, _ = x_ref.shape
    state, dp = v_ref.shape
    tb = rows // state

    # Entry: s_0 = silu(x @ W1_0 + b1_0), 128-lane-wide from here on.
    s = jnp.dot(x_ref[...].astype(jnp.bfloat16), a_w_ref[...],
                preferred_element_type=jnp.float32) + a_b_ref[...]     # (rows, Dp)
    s = s * jax.nn.sigmoid(s)                                          # SiLU, f32

    # Interior fused layers: s_{l+1} = silu(s_l @ (W2_l W1_{l+1}) + (b2_l W1_{l+1} + b1_{l+1}))
    def step(l, s):
        z = jnp.dot(s.astype(jnp.bfloat16), m_w_ref[l],
                    preferred_element_type=jnp.float32) + m_b_ref[l]   # (rows, Dp)
        return z * jax.nn.sigmoid(z)

    s = jax.lax.fori_loop(0, n_fused, step, s)                         # (rows, Dp) f32

    # Exit (last W2 + Flatten + fc folded):  out[b] = sum_{s,d} s[b,s,d] * V[s,d] + c
    # Leading-dim-only reshape (lane dim unchanged, S=120 is a multiple of 8).
    s3 = s.reshape(tb, state, dp)                                      # (TB, S, Dp)
    red = jnp.sum(s3 * v_ref[...][None, :, :], axis=2)                 # (TB, S)
    out_ref[...] = jnp.sum(red, axis=1, keepdims=True) + c_ref[...]


# ------------------------------ wrapper --------------------------------------
def mamba_model_forward(x, params, *, tb=8):
    """x: (B, S, F) f32. params: unpadded f32 weights from init_params."""
    w1, b1, w2, b2, wfc, bfc = params
    B, S, F = x.shape
    L, _, D = w1.shape
    out_dim = bfc.shape[-1]
    # TODO(synk): generalize the folded fc packing for output_dim > 1.
    assert out_dim == 1, "kernel folds fc as (S, Dp); only output_dim=1 supported"
    assert B % tb == 0, "batch must be divisible by the batch tile"
    assert L >= 2

    f32 = jnp.float32
    Dp = ((D + 127) // 128) * 128

    # --- algebraic fold (f32, exact): interior (D->F)(F->D) pairs, last (D->F) into fc.
    a_w = w1[0]                                                     # (F, D)
    a_b = b1[0]                                                     # (1, D)
    m_w = jnp.einsum("ldf,lfe->lde", w2[:-1], w1[1:])               # (L-1, D, D)
    m_b = jnp.einsum("lof,lfe->loe", b2[:-1], w1[1:]) + b1[1:]      # (L-1, 1, D)
    v = jnp.einsum("sf,df->sd", wfc, w2[-1])                        # (S, D)
    c = (jnp.sum(wfc * b2[-1]).reshape(1, 1) + bfc).astype(f32)     # (1, 1)

    # --- pad state dim to the 128-lane boundary (padded rows/cols are zero: exact).
    pad_d = ((0, 0), (0, Dp - D))
    a_wp = jnp.pad(a_w, pad_d).astype(jnp.bfloat16)                              # (F, Dp)
    a_bp = jnp.pad(a_b, pad_d).astype(f32)                                       # (1, Dp)
    m_wp = jnp.pad(m_w, ((0, 0), (0, Dp - D), (0, Dp - D))).astype(jnp.bfloat16)  # (L-1,Dp,Dp)
    m_bp = jnp.pad(m_b, ((0, 0), (0, 0), (0, Dp - D))).astype(f32)               # (L-1,1,Dp)
    vp = jnp.pad(v, pad_d).astype(f32)                                           # (S, Dp)

    x2 = x.reshape(B * S, F).astype(f32)                           # (B*S, F)
    rows = tb * S

    kernel = functools.partial(mamba_model_kernel, n_fused=L - 1)

    def resident(arr):
        # Weights: full-array block, same block every grid step -> stays in VMEM.
        ndim = arr.ndim
        return pl.BlockSpec(arr.shape, lambda i: (0,) * ndim)

    return pl.pallas_call(
        kernel,
        out_shape=jax.ShapeDtypeStruct((B, out_dim), f32),
        grid=(B // tb,),
        in_specs=[
            pl.BlockSpec((rows, F), lambda i: (i, 0)),             # x batch block
            resident(a_wp), resident(a_bp),
            resident(m_wp), resident(m_bp),
            resident(vp), resident(c),
        ],
        out_specs=pl.BlockSpec((tb, out_dim), lambda i: (i, 0)),
        compiler_params=pltpu.CompilerParams(
            dimension_semantics=("parallel",)),
    )(x2, a_wp, a_bp, m_wp, m_bp, vp, c)


# --------------------------- parameter init ----------------------------------
def init_params(key, n_features, state_dim, hidden_size, output_dim):
    """PyTorch-Linear-style init. Weights stored (in, out), unpadded, f32."""
    L = 2 * hidden_size  # SelectiveSSM + Sequential per hidden step, identical math
    keys = jax.random.split(key, 6)

    def uni(k, shape, fan_in):
        bound = 1.0 / jnp.sqrt(jnp.float32(fan_in))
        return jax.random.uniform(k, shape, jnp.float32, -bound, bound)

    w1 = uni(keys[0], (L, n_features, state_dim), n_features)
    b1 = uni(keys[1], (L, 1, state_dim), n_features)
    w2 = uni(keys[2], (L, state_dim, n_features), state_dim)
    b2 = uni(keys[3], (L, 1, n_features), state_dim)
    # fc: Linear(state_dim * n_features -> 1); stored as (S, F) so that the
    # flattened PyTorch index s*F + f maps to wfc[s, f].
    wfc = uni(keys[4], (state_dim, n_features), state_dim * n_features)
    bfc = uni(keys[5], (1, output_dim), state_dim * n_features)
    return w1, b1, w2, b2, wfc, bfc


# --------------------------- pure-JAX reference -------------------------------
def reference_forward(x, params):
    """True module semantics: unfused, full f32, layer by layer."""
    w1, b1, w2, b2, wfc, bfc = params
    h = x.astype(jnp.float32)
    for l in range(w1.shape[0]):
        s = jnp.einsum("bsf,fd->bsd", h, w1[l]) + b1[l]
        s = s * jax.nn.sigmoid(s)
        h = jnp.einsum("bsd,df->bsf", s, w2[l]) + b2[l]
    flat = h.reshape(h.shape[0], -1)                      # (B, S*F), index s*F + f
    return flat @ wfc.reshape(-1, bfc.shape[-1]) + bfc    # (B, 1)


# ------------------------------- main -----------------------------------------
if __name__ == "__main__":
    # Small, module-consistent shapes.
    n_features = 16
    state_dim = 120          # hardcoded in MAMBAModel.__init__
    hidden_size = 4          # small stand-in for the default 32 (-> L = 8 layers)
    output_dim = 1
    batch = 16               # 2 batch tiles of 8 -> exercises the parallel grid

    key = jax.random.PRNGKey(0)
    kx, kp = jax.random.split(key)
    x = jax.random.normal(kx, (batch, state_dim, n_features), jnp.float32)
    params = init_params(kp, n_features, state_dim, hidden_size, output_dim)

    out = mamba_model_forward(x, params, tb=8)
    out = jax.block_until_ready(out)

    ref = reference_forward(x, params)
    assert out.shape == (batch, output_dim), out.shape
    # Kernel uses bf16 MXU operands (and exact f32 weight folding); reference is pure f32.
    assert jnp.allclose(out, ref, atol=5e-3, rtol=5e-2), (
        float(jnp.max(jnp.abs(out - ref))))

    print("KERNEL_OK")
</pallas_src>

<mosaic_0001>
module attributes {stable_mosaic.version = 11 : i64} {
  func.func @mamba_model_kernel(%arg0: i32, %arg1: memref<960x16xf32, #tpu.memory_space<vmem>>, %arg2: memref<16x128xbf16, #tpu.memory_space<vmem>>, %arg3: memref<1x128xf32, #tpu.memory_space<vmem>>, %arg4: memref<7x128x128xbf16, #tpu.memory_space<vmem>>, %arg5: memref<7x1x128xf32, #tpu.memory_space<vmem>>, %arg6: memref<120x128xf32, #tpu.memory_space<vmem>>, %arg7: memref<1x1xf32, #tpu.memory_space<vmem>>, %arg8: memref<8x1xf32, #tpu.memory_space<vmem>>) attributes {dimension_semantics = [#tpu.dimension_semantics<parallel>], iteration_bounds = array<i64: 2>, scalar_prefetch = 0 : i64, scratch_operands = 0 : i64, tpu.core_type = #tpu.core_type<tc>, window_params = [{transform_indices = @transform_0, window_bounds = array<i64: 960, 16>}, {pipeline_mode = #tpu.pipeline_mode<synchronous>, transform_indices = @transform_1, window_bounds = array<i64: 16, 128>}, {pipeline_mode = #tpu.pipeline_mode<synchronous>, transform_indices = @transform_2, window_bounds = array<i64: 1, 128>}, {pipeline_mode = #tpu.pipeline_mode<synchronous>, transform_indices = @transform_3, window_bounds = array<i64: 7, 128, 128>}, {pipeline_mode = #tpu.pipeline_mode<synchronous>, transform_indices = @transform_4, window_bounds = array<i64: 7, 1, 128>}, {pipeline_mode = #tpu.pipeline_mode<synchronous>, transform_indices = @transform_5, window_bounds = array<i64: 120, 128>}, {pipeline_mode = #tpu.pipeline_mode<synchronous>, transform_indices = @transform_6, window_bounds = array<i64: 1, 1>}, {transform_indices = @transform_7, window_bounds = array<i64: 8, 1>}]} {
    %c0 = arith.constant 0 : index
    %c0_0 = arith.constant 0 : index
    %0 = vector.load %arg1[%c0, %c0_0] : memref<960x16xf32, #tpu.memory_space<vmem>>, vector<960x16xf32>
    %1 = arith.truncf %0 : vector<960x16xf32> to vector<960x16xbf16>
    %c0_1 = arith.constant 0 : index
    %c0_2 = arith.constant 0 : index
    %2 = vector.load %arg2[%c0_1, %c0_2] : memref<16x128xbf16, #tpu.memory_space<vmem>>, vector<16x128xbf16>
    %cst = arith.constant dense<0.000000e+00> : vector<960x128xf32>
    %3 = tpu.matmul %1, %2, %cst {dimension_numbers = #tpu.dot_dimension_numbers<[1], [0], [0], [1], [0, 0, 1, 1], [], []>} : vector<960x16xbf16>, vector<16x128xbf16>, vector<960x128xf32> -> vector<960x128xf32>
    %c0_3 = arith.constant 0 : index
    %c0_4 = arith.constant 0 : index
    %4 = vector.load %arg3[%c0_3, %c0_4] : memref<1x128xf32, #tpu.memory_space<vmem>>, vector<1x128xf32>
    %5 = vector.broadcast %4 : vector<1x128xf32> to vector<960x128xf32>
    %6 = arith.addf %3, %5 : vector<960x128xf32>
    %7 = arith.negf %6 : vector<960x128xf32>
    %8 = math.exp %7 : vector<960x128xf32>
    %cst_5 = arith.constant 1.000000e+00 : f32
    %9 = vector.broadcast %cst_5 : f32 to vector<960x128xf32>
    %10 = arith.addf %9, %8 : vector<960x128xf32>
    %11 = arith.divf %9, %10 : vector<960x128xf32>
    %12 = arith.mulf %6, %11 : vector<960x128xf32>
    %c0_i32 = arith.constant 0 : i32
    %c7_i32 = arith.constant 7 : i32
    %13 = arith.addi %c0_i32, %c7_i32 : i32
    %c1_i32 = arith.constant 1 : i32
    %14 = scf.for %arg9 = %c0_i32 to %13 step %c1_i32 iter_args(%arg10 = %12) -> (vector<960x128xf32>)  : i32 {
      %27 = arith.truncf %arg10 : vector<960x128xf32> to vector<960x128xbf16>
      %28 = arith.index_cast %arg9 : i32 to index
      %c0_15 = arith.constant 0 : index
      %c0_16 = arith.constant 0 : index
      %29 = vector.load %arg4[%28, %c0_15, %c0_16] : memref<7x128x128xbf16, #tpu.memory_space<vmem>>, vector<1x128x128xbf16>
      %30 = vector.shape_cast %29 : vector<1x128x128xbf16> to vector<128x128xbf16>
      %cst_17 = arith.constant dense<0.000000e+00> : vector<960x128xf32>
      %31 = tpu.matmul %27, %30, %cst_17 {dimension_numbers = #tpu.dot_dimension_numbers<[1], [0], [0], [1], [0, 0, 1, 1], [], []>} : vector<960x128xbf16>, vector<128x128xbf16>, vector<960x128xf32> -> vector<960x128xf32>
      %32 = arith.index_cast %arg9 : i32 to index
      %c0_18 = arith.constant 0 : index
      %c0_19 = arith.constant 0 : index
      %33 = vector.load %arg5[%32, %c0_18, %c0_19] : memref<7x1x128xf32, #tpu.memory_space<vmem>>, vector<1x1x128xf32>
      %34 = vector.shape_cast %33 : vector<1x1x128xf32> to vector<1x128xf32>
      %35 = vector.broadcast %34 : vector<1x128xf32> to vector<960x128xf32>
      %36 = arith.addf %31, %35 : vector<960x128xf32>
      %37 = arith.negf %36 : vector<960x128xf32>
      %38 = math.exp %37 : vector<960x128xf32>
      %cst_20 = arith.constant 1.000000e+00 : f32
      %39 = vector.broadcast %cst_20 : f32 to vector<960x128xf32>
      %40 = arith.addf %39, %38 : vector<960x128xf32>
      %41 = arith.divf %39, %40 : vector<960x128xf32>
      %42 = arith.mulf %36, %41 : vector<960x128xf32>
      scf.yield %42 : vector<960x128xf32>
    }
    %c7_i32_6 = arith.constant 7 : i32
    %15 = vector.shape_cast %14 : vector<960x128xf32> to vector<8x120x128xf32>
    %c0_7 = arith.constant 0 : index
    %c0_8 = arith.constant 0 : index
    %16 = vector.load %arg6[%c0_7, %c0_8] : memref<120x128xf32, #tpu.memory_space<vmem>>, vector<120x128xf32>
    %17 = vector.shape_cast %16 : vector<120x128xf32> to vector<1x120x128xf32>
    %18 = vector.broadcast %17 : vector<1x120x128xf32> to vector<8x120x128xf32>
    %19 = arith.mulf %15, %18 : vector<8x120x128xf32>
    %cst_9 = arith.constant dense<0.000000e+00> : vector<8x120xf32>
    %20 = vector.multi_reduction <add>, %19, %cst_9 [2] : vector<8x120x128xf32> to vector<8x120xf32>
    %cst_10 = arith.constant dense<0.000000e+00> : vector<8xf32>
    %21 = vector.multi_reduction <add>, %20, %cst_10 [1] : vector<8x120xf32> to vector<8xf32>
    %22 = vector.shape_cast %21 : vector<8xf32> to vector<8x1xf32>
    %c0_11 = arith.constant 0 : index
    %c0_12 = arith.constant 0 : index
    %23 = vector.load %arg7[%c0_11, %c0_12] : memref<1x1xf32, #tpu.memory_space<vmem>>, vector<1x1xf32>
    %24 = vector.broadcast %23 : vector<1x1xf32> to vector<8x1xf32>
    %25 = arith.addf %22, %24 : vector<8x1xf32>
    %c0_13 = arith.constant 0 : index
    %c0_14 = arith.constant 0 : index
    %26 = vector.load %arg8[%c0_13, %c0_14] : memref<8x1xf32, #tpu.memory_space<vmem>>, vector<8x1xf32>
    tpu.vector_store %arg8[%c0_13, %c0_14], %25 {strides = array<i32>} : memref<8x1xf32, #tpu.memory_space<vmem>>, vector<8x1xf32>,
    return
  }
  func.func @transform_0(%arg0: i32) -> (i32, i32) {
    %c0_i32 = arith.constant 0 : i32
    %c0_i32_0 = arith.constant 0 : i32
    return %arg0, %c0_i32 : i32, i32
  }
  func.func @transform_1(%arg0: i32) -> (i32, i32) {
    %c0_i32 = arith.constant 0 : i32
    %c0_i32_0 = arith.constant 0 : i32
    %c0_i32_1 = arith.constant 0 : i32
    return %c0_i32, %c0_i32_0 : i32, i32
  }
  func.func @transform_2(%arg0: i32) -> (i32, i32) {
    %c0_i32 = arith.constant 0 : i32
    %c0_i32_0 = arith.constant 0 : i32
    %c0_i32_1 = arith.constant 0 : i32
    return %c0_i32, %c0_i32_0 : i32, i32
  }
  func.func @transform_3(%arg0: i32) -> (i32, i32, i32) {
    %c0_i32 = arith.constant 0 : i32
    %c0_i32_0 = arith.constant 0 : i32
    %c0_i32_1 = arith.constant 0 : i32
    %c0_i32_2 = arith.constant 0 : i32
    return %c0_i32, %c0_i32_0, %c0_i32_1 : i32, i32, i32
  }
  func.func @transform_4(%arg0: i32) -> (i32, i32, i32) {
    %c0_i32 = arith.constant 0 : i32
    %c0_i32_0 = arith.constant 0 : i32
    %c0_i32_1 = arith.constant 0 : i32
    %c0_i32_2 = arith.constant 0 : i32
    return %c0_i32, %c0_i32_0, %c0_i32_1 : i32, i32, i32
  }
  func.func @transform_5(%arg0: i32) -> (i32, i32) {
    %c0_i32 = arith.constant 0 : i32
    %c0_i32_0 = arith.constant 0 : i32
    %c0_i32_1 = arith.constant 0 : i32
    return %c0_i32, %c0_i32_0 : i32, i32
  }
  func.func @transform_6(%arg0: i32) -> (i32, i32) {
    %c0_i32 = arith.constant 0 : i32
    %c0_i32_0 = arith.constant 0 : i32
    %c0_i32_1 = arith.constant 0 : i32
    return %c0_i32, %c0_i32_0 : i32, i32
  }
  func.func @transform_7(%arg0: i32) -> (i32, i32) {
    %c0_i32 = arith.constant 0 : i32
    %c0_i32_0 = arith.constant 0 : i32
    return %arg0, %c0_i32 : i32, i32
  }
}

</mosaic_0001>

<bundles_post_ra>
// kernel: tpu_custom_call.1
= control target key start
LH: loop header
LB: loop body
LE: loop exit
PB: predicated region body
PF: predicated region fallthrough
CT: control target
= control target key end

     0   :  { %s10885_s26 = smov 0   ;;  %s18100_s0 = inlined_call_operand.vmem [shape: f32[1920,16], index: 0, kind: input, shape index: {}]   ;;  %s18101_s1 = inlined_call_operand.vmem [shape: bf16[16,128], index: 1, kind: input, shape index: {}]   ;;  %s18102_s2 = inlined_call_operand.vmem [shape: f32[1,128], index: 2, kind: input, shape index: {}]   ;;  %s18103_s3 = inlined_call_operand.vmem [shape: bf16[7,128,128], index: 3, kind: input, shape index: {}]   ;;  %s18104_s4 = inlined_call_operand.vmem [shape: f32[7,1,128], index: 4, kind: input, shape index: {}]   ;;  %s18105_s5 = inlined_call_operand.vmem [shape: f32[120,128], index: 5, kind: input, shape index: {}]   ;;  %s18106_s6 = inlined_call_operand.<no memory space> [shape: f32[1,1], index: 6, kind: input, shape index: {}]   ;;  %s18107_s7 = inlined_call_operand.vmem [shape: f32[16,1], index: 7, kind: output, shape index: {}]  }
   0x1   :  { %v12_v0 = vstv %s18106_s6 }
   0x2   :  { %13 = vst [vmem:[#allocation2] sm:$0x1] %v12_v0 }
   0x3 LB: > { %s7535_s27 = sadd.s32 4294967295, %s10356_s26   ;;  %p7539_p0 = scmp.ge.s32.totalorder %s10356_s26, 1  ;;  %s10356_s26 = sphi %s10885_s26, %s19_s26  }
   0x4   : > { %p240_p1 = scmp.lt.s32.totalorder %s10356_s26, 3 }
   0x6   : > { %p241_p2 = pnand %p7539_p0, %p240_p1 }
   0x8   : > { %244 = sbr.rel (%p241_p2) target bundleno = 2128 (0x850), region = 48 }
   0xd   : > { %p277_p3 = scmp.lt.s32.totalorder %s7535_s27, 1  ;;  %v7882_v1 = vld [vmem:[%s18101_s1] sm:$0xff]  ;;  %s271_s6 = smul.u32 120, %s7535_s27  ;;  %vm474_vm0 = vcmask 130048  }
   0xe   : > { %662 = vmatpush.bf16.msra.mxu0 %v7882_v1  ;;  %7892 = vmatpush.bf16.msra.mxu1 %v7882_v1  ;;  %s14047_s25 = smov 0  }
   0xf   : > { %s19428_s27 = smov (!%p277_p3, %s7535_s27), 1  ;;  %7893 = vmatpush.bf16.msra.mxu2 %v7882_v1  ;;  %7894 = vmatpush.bf16.msra.mxu3 %v7882_v1  ;;  %p272_p4 = scmp.lt.s32.totalorder %s271_s6, 239 }
  0x10   : > { %s7541_s30 = sshll.u32 %s19428_s27, 3 }
  0x11   : > { %s10899_s10 = scalar_lea.vmem %s18107_s7, %s7541_s30  ;;  %s19430_s6 = smov (!%p272_p4, %s271_s6), 239 }
  0x12   : > { %s7540_s11 = sshll.u32 %s19430_s6, 3 }
  0x13   : > { %s10904_s14 = scalar_lea.vmem %s18100_s0, %s7540_s11 }
  0x14   : > { %v282_v2 = vld [vmem:[%s10904_s14] sm:$0xff]  ;;  %v283_v3 = vld [vmem:[%s10904_s14 + $0x8] sm:$0xff]  ;;  %v312_v4 = vld [vmem:[%s10904_s14 + $0xf0] sm:$0xff] }
  0x15   : > { %v402_v5 = vpack.c.bf16 %v283_v3, %v282_v2  ;;  %v313_v6 = vld [vmem:[%s10904_s14 + $0xf8] sm:$0xff]  ;;  %v342_v7 = vld [vmem:[%s10904_s14 + $0x1e0] sm:$0xff]  ;;  %v343_v8 = vld [vmem:[%s10904_s14 + $0x1e8] sm:$0xff] }
  0x16   : > { %v417_v9 = vpack.c.bf16 %v313_v6, %v312_v4  ;;  %v432_v10 = vpack.c.bf16 %v343_v8, %v342_v7  ;;  %v372_v11 = vld [vmem:[%s10904_s14 + $0x2d0] sm:$0xff]  ;;  %v373_v12 = vld [vmem:[%s10904_s14 + $0x2d8] sm:$0xff]  ;;  %v314_v16 = vld [vmem:[%s10904_s14 + $0x100] sm:$0xff] }
  0x17   : > { %7546 = vmatmul.msk.bf16.vlgmr.msra.gmra.mxu0 %vm474_vm0, %v402_v5  ;;  %v447_v13 = vpack.c.bf16 %v373_v12, %v372_v11  ;;  %v284_v14 = vld [vmem:[%s10904_s14 + $0x10] sm:$0xff]  ;;  %v285_v15 = vld [vmem:[%s10904_s14 + $0x18] sm:$0xff]  ;;  %v315_v17 = vld [vmem:[%s10904_s14 + $0x108] sm:$0xff] }
  0x18   : > { %7561 = vmatmul.msk.bf16.vlgmr.msra.gmra.mxu1 %vm474_vm0, %v417_v9  ;;  %7576 = vmatmul.msk.bf16.vlgmr.msra.gmra.mxu2 %vm474_vm0, %v432_v10  ;;  %v344_v18 = vld [vmem:[%s10904_s14 + $0x1f0] sm:$0xff]  ;;  %v345_v19 = vld [vmem:[%s10904_s14 + $0x1f8] sm:$0xff]  ;;  %v374_v20 = vld [vmem:[%s10904_s14 + $0x2e0] sm:$0xff]  ;;  %v403_v22 = vpack.c.bf16 %v285_v15, %v284_v14  ;;  %v418_v23 = vpack.c.bf16 %v315_v17, %v314_v16 }
  0x19   : > { %7591 = vmatmul.msk.bf16.vlgmr.msra.gmra.mxu3 %vm474_vm0, %v447_v13  ;;  %v375_v21 = vld [vmem:[%s10904_s14 + $0x2e8] sm:$0xff]  ;;  %v433_v24 = vpack.c.bf16 %v345_v19, %v344_v18  ;;  %v286_v26 = vld [vmem:[%s10904_s14 + $0x20] sm:$0xff]  ;;  %v316_v28 = vld [vmem:[%s10904_s14 + $0x110] sm:$0xff] }
  0x1a   : > { %v448_v25 = vpack.c.bf16 %v375_v21, %v374_v20  ;;  %v287_v27 = vld [vmem:[%s10904_s14 + $0x28] sm:$0xff]  ;;  %v317_v29 = vld [vmem:[%s10904_s14 + $0x118] sm:$0xff]  ;;  %v346_v30 = vld [vmem:[%s10904_s14 + $0x200] sm:$0xff] }
  0x1b   : > { %v347_v31 = vld [vmem:[%s10904_s14 + $0x208] sm:$0xff]  ;;  %v376_v32 = vld [vmem:[%s10904_s14 + $0x2f0] sm:$0xff]  ;;  %v377_v33 = vld [vmem:[%s10904_s14 + $0x2f8] sm:$0xff]  ;;  %v404_v34 = vpack.c.bf16 %v287_v27, %v286_v26  ;;  %v419_v35 = vpack.c.bf16 %v317_v29, %v316_v28 }
  0x1c   : > { %v434_v36 = vpack.c.bf16 %v347_v31, %v346_v30  ;;  %v449_v37 = vpack.c.bf16 %v377_v33, %v376_v32  ;;  %v288_v38 = vld [vmem:[%s10904_s14 + $0x30] sm:$0xff]  ;;  %v289_v39 = vld [vmem:[%s10904_s14 + $0x38] sm:$0xff]  ;;  %v318_v40 = vld [vmem:[%s10904_s14 + $0x120] sm:$0xff] }
  0x1d   : > { %v319_v41 = vld [vmem:[%s10904_s14 + $0x128] sm:$0xff]  ;;  %v348_v42 = vld [vmem:[%s10904_s14 + $0x210] sm:$0xff]  ;;  %v349_v43 = vld [vmem:[%s10904_s14 + $0x218] sm:$0xff]  ;;  %v405_v46 = vpack.c.bf16 %v289_v39, %v288_v38 }
  0x1e   : > { %v378_v44 = vld [vmem:[%s10904_s14 + $0x300] sm:$0xff]  ;;  %v379_v45 = vld [vmem:[%s10904_s14 + $0x308] sm:$0xff]  ;;  %v420_v47 = vpack.c.bf16 %v319_v41, %v318_v40  ;;  %v435_v48 = vpack.c.bf16 %v349_v43, %v348_v42  ;;  %v320_v52 = vld [vmem:[%s10904_s14 + $0x130] sm:$0xff] }
  0x1f   : > { %v450_v49 = vpack.c.bf16 %v379_v45, %v378_v44  ;;  %v290_v50 = vld [vmem:[%s10904_s14 + $0x40] sm:$0xff]  ;;  %v291_v51 = vld [vmem:[%s10904_s14 + $0x48] sm:$0xff]  ;;  %v321_v53 = vld [vmem:[%s10904_s14 + $0x138] sm:$0xff] }
  0x20   : > { %v350_v54 = vld [vmem:[%s10904_s14 + $0x220] sm:$0xff]  ;;  %v351_v55 = vld [vmem:[%s10904_s14 + $0x228] sm:$0xff]  ;;  %v380_v56 = vld [vmem:[%s10904_s14 + $0x310] sm:$0xff]  ;;  %v406_v58 = vpack.c.bf16 %v291_v51, %v290_v50  ;;  %v421_v59 = vpack.c.bf16 %v321_v53, %v320_v52 }
  0x21   : > { %v381_v57 = vld [vmem:[%s10904_s14 + $0x318] sm:$0xff]  ;;  %v436_v60 = vpack.c.bf16 %v351_v55, %v350_v54  ;;  %v292_v62 = vld [vmem:[%s10904_s14 + $0x50] sm:$0xff]  ;;  %v322_v0 = vld [vmem:[%s10904_s14 + $0x140] sm:$0xff] }
  0x22   : > { %v451_v61 = vpack.c.bf16 %v381_v57, %v380_v56  ;;  %v293_v63 = vld [vmem:[%s10904_s14 + $0x58] sm:$0xff]  ;;  %v323_v1 = vld [vmem:[%s10904_s14 + $0x148] sm:$0xff]  ;;  %v352_v2 = vld [vmem:[%s10904_s14 + $0x230] sm:$0xff] }
  0x23   : > { %v353_v3 = vld [vmem:[%s10904_s14 + $0x238] sm:$0xff]  ;;  %v382_v4 = vld [vmem:[%s10904_s14 + $0x320] sm:$0xff]  ;;  %v383_v5 = vld [vmem:[%s10904_s14 + $0x328] sm:$0xff]  ;;  %v407_v6 = vpack.c.bf16 %v293_v63, %v292_v62  ;;  %v422_v7 = vpack.c.bf16 %v323_v1, %v322_v0 }
  0x24   : > { %v437_v8 = vpack.c.bf16 %v353_v3, %v352_v2  ;;  %v452_v9 = vpack.c.bf16 %v383_v5, %v382_v4  ;;  %v294_v10 = vld [vmem:[%s10904_s14 + $0x60] sm:$0xff]  ;;  %v295_v11 = vld [vmem:[%s10904_s14 + $0x68] sm:$0xff]  ;;  %v324_v12 = vld [vmem:[%s10904_s14 + $0x150] sm:$0xff] }
  0x25   : > { %v325_v13 = vld [vmem:[%s10904_s14 + $0x158] sm:$0xff]  ;;  %v354_v14 = vld [vmem:[%s10904_s14 + $0x240] sm:$0xff]  ;;  %v355_v15 = vld [vmem:[%s10904_s14 + $0x248] sm:$0xff]  ;;  %v408_v18 = vpack.c.bf16 %v295_v11, %v294_v10 }
  0x26   : > { %v384_v16 = vld [vmem:[%s10904_s14 + $0x330] sm:$0xff]  ;;  %v385_v17 = vld [vmem:[%s10904_s14 + $0x338] sm:$0xff]  ;;  %v423_v19 = vpack.c.bf16 %v325_v13, %v324_v12  ;;  %v438_v20 = vpack.c.bf16 %v355_v15, %v354_v14  ;;  %v386_v28 = vld [vmem:[%s10904_s14 + $0x340] sm:$0xff] }
  0x27   : > { %7547 = vmatmul.msk.bf16.gmra.mxu0 %vm474_vm0, %v403_v22  ;;  %v453_v21 = vpack.c.bf16 %v385_v17, %v384_v16  ;;  %v296_v22 = vld [vmem:[%s10904_s14 + $0x70] sm:$0xff]  ;;  %v357_v27 = vld [vmem:[%s10904_s14 + $0x258] sm:$0xff]  ;;  %v387_v29 = vld [vmem:[%s10904_s14 + $0x348] sm:$0xff] }
  0x28   : > { %7562 = vmatmul.msk.bf16.gmra.mxu1 %vm474_vm0, %v418_v23  ;;  %7577 = vmatmul.msk.bf16.gmra.mxu2 %vm474_vm0, %v433_v24  ;;  %v297_v23 = vld [vmem:[%s10904_s14 + $0x78] sm:$0xff]  ;;  %v326_v24 = vld [vmem:[%s10904_s14 + $0x160] sm:$0xff]  ;;  %v356_v26 = vld [vmem:[%s10904_s14 + $0x250] sm:$0xff]  ;;  %v454_v33 = vpack.c.bf16 %v387_v29, %v386_v28 }
  0x29   : > { %7592 = vmatmul.msk.bf16.gmra.mxu3 %vm474_vm0, %v448_v25  ;;  %v327_v25 = vld [vmem:[%s10904_s14 + $0x168] sm:$0xff]  ;;  %v409_v30 = vpack.c.bf16 %v297_v23, %v296_v22  ;;  %v439_v32 = vpack.c.bf16 %v357_v27, %v356_v26  ;;  %v329_v38 = vld [vmem:[%s10904_s14 + $0x178] sm:$0xff]  ;;  %v358_v39 = vld [vmem:[%s10904_s14 + $0x260] sm:$0xff] }
  0x2a   : > { %v424_v31 = vpack.c.bf16 %v327_v25, %v326_v24  ;;  %v359_v40 = vld [vmem:[%s10904_s14 + $0x268] sm:$0xff]  ;;  %v388_v41 = vld [vmem:[%s10904_s14 + $0x350] sm:$0xff]  ;;  %v389_v42 = vld [vmem:[%s10904_s14 + $0x358] sm:$0xff] }
  0x2b   : > { %v300_v3 = vld [vmem:[%s10904_s14 + $0x90] sm:$0xff]  ;;  %v301_v4 = vld [vmem:[%s10904_s14 + $0x98] sm:$0xff]  ;;  %v330_v5 = vld [vmem:[%s10904_s14 + $0x180] sm:$0xff] }
  0x2c   : > { %v361_v10 = vld [vmem:[%s10904_s14 + $0x278] sm:$0xff]  ;;  %v390_v11 = vld [vmem:[%s10904_s14 + $0x360] sm:$0xff]  ;;  %v391_v12 = vld [vmem:[%s10904_s14 + $0x368] sm:$0xff]  ;;  %v411_v14 = vpack.c.bf16 %v301_v4, %v300_v3 }
  0x2d   : > { %v456_v22 = vpack.c.bf16 %v391_v12, %v390_v11 }
  0x37   : > { %7548 = vmatmul.msk.bf16.gmra.mxu0 %vm474_vm0, %v404_v34  ;;  %v11005_v34 = vld [vmem:[%s18102_s2] ss:$0 sm:$0xff] }
  0x38   : > { %7563 = vmatmul.msk.bf16.gmra.mxu1 %vm474_vm0, %v419_v35  ;;  %7578 = vmatmul.msk.bf16.gmra.mxu2 %vm474_vm0, %v434_v36  ;;  %v298_v35 = vld [vmem:[%s10904_s14 + $0x80] sm:$0xff]  ;;  %v299_v36 = vld [vmem:[%s10904_s14 + $0x88] sm:$0xff] }
  0x39   : > { %7593 = vmatmul.msk.bf16.gmra.mxu3 %vm474_vm0, %v449_v37  ;;  %v328_v37 = vld [vmem:[%s10904_s14 + $0x170] sm:$0xff]  ;;  %v410_v43 = vpack.c.bf16 %v299_v36, %v298_v35 }
  0x3a   : > { %v425_v45 = vpack.c.bf16 %v329_v38, %v328_v37 }
  0x47   : > { %7549 = vmatmul.msk.bf16.gmra.mxu0 %vm474_vm0, %v405_v46  ;;  %v440_v46 = vpack.c.bf16 %v359_v40, %v358_v39 }
  0x48   : > { %7564 = vmatmul.msk.bf16.gmra.mxu1 %vm474_vm0, %v420_v47  ;;  %7579 = vmatmul.msk.bf16.gmra.mxu2 %vm474_vm0, %v435_v48 }
  0x49   : > { %7594 = vmatmul.msk.bf16.gmra.mxu3 %vm474_vm0, %v450_v49  ;;  %v455_v49 = vpack.c.bf16 %v389_v42, %v388_v41 }
  0x57   : > { %7550 = vmatmul.msk.bf16.gmra.mxu0 %vm474_vm0, %v406_v58 }
  0x58   : > { %7565 = vmatmul.msk.bf16.gmra.mxu1 %vm474_vm0, %v421_v59  ;;  %7580 = vmatmul.msk.bf16.gmra.mxu2 %vm474_vm0, %v436_v60 }
  0x59   : > { %7595 = vmatmul.msk.bf16.gmra.mxu3 %vm474_vm0, %v451_v61 }
  0x67   : > { %7551 = vmatmul.msk.bf16.gmra.mxu0 %vm474_vm0, %v407_v6 }
  0x68   : > { %7566 = vmatmul.msk.bf16.gmra.mxu1 %vm474_vm0, %v422_v7  ;;  %7581 = vmatmul.msk.bf16.gmra.mxu2 %vm474_vm0, %v437_v8  ;;  %v331_v8 = vld [vmem:[%s10904_s14 + $0x188] sm:$0xff] }
  0x69   : > { %7596 = vmatmul.msk.bf16.gmra.mxu3 %vm474_vm0, %v452_v9  ;;  %v360_v9 = vld [vmem:[%s10904_s14 + $0x270] sm:$0xff] }
  0x77   : > { %7552 = vmatmul.msk.bf16.gmra.mxu0 %vm474_vm0, %v408_v18  ;;  %v426_v18 = vpack.c.bf16 %v331_v8, %v330_v5 }
  0x78   : > { %7567 = vmatmul.msk.bf16.gmra.mxu1 %vm474_vm0, %v423_v19  ;;  %7582 = vmatmul.msk.bf16.gmra.mxu2 %vm474_vm0, %v438_v20  ;;  %v441_v19 = vpack.c.bf16 %v361_v10, %v360_v9 }
  0x79   : > { %7597 = vmatmul.msk.bf16.gmra.mxu3 %vm474_vm0, %v453_v21 }
  0x87   : > { %7553 = vmatmul.msk.bf16.gmra.mxu0 %vm474_vm0, %v409_v30 }
  0x88   : > { %7568 = vmatmul.msk.bf16.gmra.mxu1 %vm474_vm0, %v424_v31  ;;  %7583 = vmatmul.msk.bf16.gmra.mxu2 %vm474_vm0, %v439_v32 }
  0x89   : > { %7598 = vmatmul.msk.bf16.gmra.mxu3 %vm474_vm0, %v454_v33 }
  0x94   : > { %v664_v44 = vpop.f32.mrf.mxu0 }
  0x95   : > { %v11016_v47 = vadd.f32 %v11005_v34, %v664_v44  ;;  %v739_v48 = vpop.f32.mrf.mxu1 }
  0x96   : > { %v11019_v50 = vadd.f32 %v11005_v34, %v739_v48 }
  0x97   : > { %v7606_v51 = vmul.f32 -1.442695, %v11016_v47  ;;  %7554 = vmatmul.msk.bf16.gmra.mxu0 %vm474_vm0, %v410_v43 }
  0x98   : > { %v7636_v52 = vmul.f32 -1.442695, %v11019_v50  ;;  %7569 = vmatmul.msk.bf16.gmra.mxu1 %vm474_vm0, %v425_v45  ;;  %7584 = vmatmul.msk.bf16.gmra.mxu2 %vm474_vm0, %v440_v46 }
  0x99   : > { %8896 = vpow2.f32 %v7606_v51  ;;  %7599 = vmatmul.msk.bf16.gmra.mxu3 %vm474_vm0, %v455_v49 }
  0x9a   : > { %8898 = vpow2.f32 %v7636_v52 }
  0x9b   : > { %v814_v53 = vpop.f32.mrf.mxu2 }
  0x9c   : > { %v11028_v54 = vadd.f32 %v11005_v34, %v814_v53  ;;  %v889_v55 = vpop.f32.mrf.mxu3  ;;  %v666_v56 = vpop.f32.mrf.mxu0 }
  0x9d   : > { %v11031_v57 = vadd.f32 %v11005_v34, %v889_v55  ;;  %v11034_v58 = vadd.f32 %v11005_v34, %v666_v56  ;;  %v741_v59 = vpop.f32.mrf.mxu1 }
  0x9e   : > { %v7666_v60 = vmul.f32 -1.442695, %v11028_v54  ;;  %v11038_v61 = vadd.f32 %v11005_v34, %v741_v59 }
  0x9f   : > { %v8897_v62 = vpop.eup %8896  ;;  %v7696_v63 = vmul.f32 -1.442695, %v11031_v57  ;;  %v7607_v2 = vmul.f32 -1.442695, %v11034_v58 }
  0xa0   : > { %v8899_v0 = vpop.eup %8898  ;;  %v11041_v1 = vadd.f32 1.0, %v8897_v62  ;;  %8900 = vpow2.f32 %v7666_v60  ;;  %v7637_v7 = vmul.f32 -1.442695, %v11038_v61 }
  0xa1   : > { %v11047_v6 = vadd.f32 1.0, %v8899_v0  ;;  %8902 = vpow2.f32 %v7696_v63 }
  0xa2   : > { %8904 = vrcp.f32 %v11041_v1  ;;  %v1453_v20 = vand.u32 2147483647, %v11041_v1  ;;  %v1455_v21 = vand.u32 2147483648, %v11041_v1  ;;  %vm1449_vm1 = vweird.f32 %v11041_v1 }
  0xa3   : > { %8906 = vrcp.f32 %v11047_v6  ;;  %v816_v13 = vpop.f32.mrf.mxu2  ;;  %v1903_v24 = vand.u32 2147483647, %v11047_v6  ;;  %v1905_v25 = vand.u32 2147483648, %v11047_v6  ;;  %vm1899_vm2 = vweird.f32 %v11047_v6 }
  0xa4   : > { %8908 = vpow2.f32 %v7607_v2  ;;  %v11058_v15 = vadd.f32 %v11005_v34, %v816_v13  ;;  %v891_v16 = vpop.f32.mrf.mxu3  ;;  %v669_v17 = vpop.f32.mrf.mxu0  ;;  %vm11081_vm3 = vcmp.eq.f32.partialorder %v1453_v20, 8.507059e+37  ;;  %v1456_v38 = vor.u32 1.1754944e-38, %v1455_v21 }
  0xa5   : > { %8910 = vpow2.f32 %v7637_v7  ;;  %v11066_v27 = vadd.f32 %v11005_v34, %v891_v16  ;;  %v11071_v30 = vadd.f32 %v11005_v34, %v669_v17  ;;  %v744_v33 = vpop.f32.mrf.mxu1  ;;  %vm11088_vm4 = vcmp.eq.f32.partialorder %v1903_v24, 8.507059e+37 }
  0xa6   : > { %v8901_v23 = vpop.eup %8900  ;;  %v7667_v26 = vmul.f32 -1.442695, %v11058_v15  ;;  %v1906_v42 = vor.u32 1.1754944e-38, %v1905_v25  ;;  %v11096_v48 = vadd.f32 %v11005_v34, %v744_v33 }
  0xa7   : > { %v8903_v28 = vpop.eup %8902  ;;  %v11068_v29 = vadd.f32 1.0, %v8901_v23  ;;  %7555 = vmatmul.msk.bf16.gmra.mxu0 %vm474_vm0, %v411_v14  ;;  %v7697_v43 = vmul.f32 -1.442695, %v11066_v27  ;;  %v7608_v46 = vmul.f32 -1.442695, %v11071_v30 }
  0xa8   : > { %v8905_v31 = vpop.eup %8904  ;;  %v11076_v32 = vadd.f32 1.0, %v8903_v28  ;;  %7570 = vmatmul.msk.bf16.gmra.mxu1 %vm474_vm0, %v426_v18  ;;  %7585 = vmatmul.msk.bf16.gmra.mxu2 %vm474_vm0, %v441_v19  ;;  %v11109_v2 = vmul.f32 -1.442695, %v11096_v48 }
  0xa9   : > { %v8907_v35 = vpop.eup %8906  ;;  %v1445_v36 = vmul.f32 %v8905_v31, %v11041_v1  ;;  %8912 = vrcp.f32 %v11068_v29  ;;  %7600 = vmatmul.msk.bf16.gmra.mxu3 %vm474_vm0, %v456_v22  ;;  %vm1450_vm5 = vweird.f32 %v8905_v31  ;;  %v2353_v51 = vand.u32 2147483647, %v11068_v29 }
  0xaa   : > { %v8909_v39 = vpop.eup %8908  ;;  %v1895_v40 = vmul.f32 %v8907_v35, %v11047_v6  ;;  %8914 = vpow2.f32 %v7667_v26  ;;  %v2355_v52 = vand.u32 2147483648, %v11068_v29  ;;  %v2805_v55 = vand.u32 2147483648, %v11076_v32  ;;  %vm1451_vm8 = vmor %vm1449_vm1, %vm1450_vm5 }
  0xab   : > { %v8911_v44 = vpop.eup %8910  ;;  %v1446_v45 = vsub.f32 1.0, %v1445_v36  ;;  %8916 = vrcp.f32 %v11076_v32  ;;  %v11101_v56 = vadd.f32 1.0, %v8909_v39  ;;  %vm1900_vm6 = vweird.f32 %v8907_v35  ;;  %v819_v8 = vpop.f32.mrf.mxu2 }
  0xac   : > { %v1896_v49 = vsub.f32 1.0, %v1895_v40  ;;  %v11103_v59 = vadd.f32 1.0, %v8911_v44  ;;  %v2803_v62 = vand.u32 2147483647, %v11076_v32  ;;  %8918 = vpow2.f32 %v7697_v43  ;;  %vm1901_vm11 = vmor %vm1899_vm2, %vm1900_vm6 }
  0xad   : > { %v1447_v53 = vmul.f32 %v8905_v31, %v1446_v45  ;;  %vm2349_vm7 = vweird.f32 %v11068_v29  ;;  %8920 = vrcp.f32 %v11101_v56  ;;  %vm11115_vm9 = vcmp.eq.f32.partialorder %v2353_v51, 8.507059e+37 }
  0xae   : > { %v1897_v60 = vmul.f32 %v8907_v35, %v1896_v49  ;;  %vm2799_vm10 = vweird.f32 %v11076_v32  ;;  %v2356_v11 = vor.u32 1.1754944e-38, %v2355_v52  ;;  %v2806_v12 = vor.u32 1.1754944e-38, %v2805_v55 }
  0xaf   : > { %v8913_v63 = vpop.eup %8912  ;;  %v1448_v0 = vadd.f32 %v8905_v31, %v1447_v53  ;;  %8922 = vrcp.f32 %v11103_v59  ;;  %vm11127_vm12 = vcmp.eq.f32.partialorder %v2803_v62, 8.507059e+37  ;;  %v1468_v19 = vand.u32 2147483647, %v11101_v56 }
  0xb0   : > { %v8915_v3 = vpop.eup %8914  ;;  %v1898_v4 = vadd.f32 %v8907_v35, %v1897_v60  ;;  %v2345_v5 = vmul.f32 %v8913_v63, %v11068_v29  ;;  %v11138_v20 = vadd.f32 %v11005_v34, %v819_v8  ;;  %vm2350_vm13 = vweird.f32 %v8913_v63  ;;  %v894_v60 = vpop.f32.mrf.mxu3 }
  0xb1   : > { %v8917_v9 = vpop.eup %8916  ;;  %v1452_v10 = vsel %vm1451_vm8, %v8905_v31, %v1448_v0  ;;  %vm1464_vm14 = vweird.f32 %v11101_v56  ;;  %v11145_v26 = vadd.f32 1.0, %v8915_v3  ;;  %8924 = vpow2.f32 %v7608_v46  ;;  %vm2351_vm1 = vmor %vm2349_vm7, %vm2350_vm13 }
  0xb2   : > { %v1457_v1 = vsel %vm11081_vm3, %v1456_v38, %v1452_v10  ;;  %v1902_v13 = vsel %vm1901_vm11, %v8907_v35, %v1898_v4  ;;  %v2346_v14 = vsub.f32 1.0, %v2345_v5  ;;  %v2795_v16 = vmul.f32 %v8917_v9, %v11076_v32  ;;  %v8919_v21 = vpop.eup %8918 }
  0xb3   : > { %v11132_v18 = vmul.f32 %v1457_v1, %v11016_v47   ;;  %v1907_v6 = vsel %vm11088_vm4, %v1906_v42, %v1902_v13  ;;  %v8921_v25 = vpop.eup %8920  ;;  %v1470_v47 = vand.u32 2147483648, %v11101_v56  ;;  %vm2800_vm15 = vweird.f32 %v8917_v9 }
  0xb4   : > { %v11141_v22 = vmul.f32 %v1907_v6, %v11019_v50   ;;  %v2347_v23 = vmul.f32 %v8913_v63, %v2346_v14  ;;  %v2796_v24 = vsub.f32 1.0, %v2795_v16  ;;  %v1460_v33 = vmul.f32 %v8921_v25, %v11101_v56  ;;  %vm2801_vm3 = vmor %vm2799_vm10, %vm2800_vm15 }
  0xb5   : > { %18121 = vst [vmem:[#allocation3_spill] sm:$0xff] %v11132_v18  ;;  %v8923_v35 = vpop.eup %8922  ;;  %vm11150_vm2 = vcmp.eq.f32.partialorder %v1468_v19, 8.507059e+37  ;;  %v1918_v36 = vand.u32 2147483647, %v11103_v59  ;;  %8926 = vrcp.f32 %v11145_v26  ;;  %v11156_v37 = vadd.f32 1.0, %v8919_v21  ;;  %v746_v19 = vpop.f32.mrf.mxu1 }
  0xb6   : > { %18122 = vst [vmem:[#allocation4_spill] sm:$0xff] %v11141_v22  ;;  %v2348_v28 = vadd.f32 %v8913_v63, %v2347_v23  ;;  %v2797_v31 = vmul.f32 %v8917_v9, %v2796_v24  ;;  %v1461_v40 = vsub.f32 1.0, %v1460_v33  ;;  %v1910_v41 = vmul.f32 %v8923_v35, %v11103_v59 }
  0xb7   : > { %vm1465_vm4 = vweird.f32 %v8921_v25  ;;  %vm1914_vm5 = vweird.f32 %v11103_v59  ;;  %v1920_v29 = vand.u32 2147483648, %v11103_v59  ;;  %v8925_v49 = vpop.eup %8924  ;;  %v1471_v52 = vor.u32 1.1754944e-38, %v1470_v47 }
  0xb8   : > { %v2352_v38 = vsel %vm2351_vm1, %v8913_v63, %v2348_v28  ;;  %v2798_v39 = vadd.f32 %v8917_v9, %v2797_v31  ;;  %v1462_v45 = vmul.f32 %v8921_v25, %v1461_v40  ;;  %v1911_v46 = vsub.f32 1.0, %v1910_v41  ;;  %vm1466_vm8 = vmor %vm1464_vm14, %vm1465_vm4  ;;  %v821_v31 = vpop.f32.mrf.mxu2  ;;  %v896_v41 = vpop.f32.mrf.mxu3 }
  0xb9   : > { %v2357_v42 = vsel %vm11115_vm9, %v2356_v11, %v2352_v38  ;;  %vm11170_vm6 = vcmp.eq.f32.partialorder %v1918_v36, 8.507059e+37  ;;  %8928 = vrcp.f32 %v11156_v37  ;;  %vm1915_vm7 = vweird.f32 %v8923_v35 }
  0xba   : > { %v11166_v43 = vmul.f32 %v2357_v42, %v11028_v54   ;;  %v2802_v44 = vsel %vm2801_vm3, %v8917_v9, %v2798_v39  ;;  %v1463_v55 = vadd.f32 %v8921_v25, %v1462_v45  ;;  %v1912_v54 = vmul.f32 %v8923_v35, %v1911_v46  ;;  %vm1916_vm9 = vmor %vm1914_vm5, %vm1915_vm7 }
  0xbb   : > { %v2807_v51 = vsel %vm11127_vm12, %v2806_v12, %v2802_v44  ;;  %v8927_v62 = vpop.eup %8926  ;;  %v2368_v63 = vand.u32 2147483647, %v11145_v26  ;;  %v2370_v0 = vand.u32 2147483648, %v11145_v26  ;;  %v11183_v3 = vadd.f32 1.0, %v8925_v49  ;;  %v671_v12 = vpop.f32.mrf.mxu0 }
  0xbc   : > { %18125 = vst [vmem:[#allocation5_spill] sm:$0xff] %v11166_v43  ;;  %v11176_v32 = vmul.f32 %v2807_v51, %v11031_v57   ;;  %8930 = vpow2.f32 %v11109_v2  ;;  %v1467_v4 = vsel %vm1466_vm8, %v8921_v25, %v1463_v55  ;;  %v1913_v57 = vadd.f32 %v8923_v35, %v1912_v54 }
  0xbd   : > { %v1921_v5 = vor.u32 1.1754944e-38, %v1920_v29  ;;  %v2360_v7 = vmul.f32 %v8927_v62, %v11145_v26  ;;  %v1472_v8 = vsel %vm11150_vm2, %v1471_v52, %v1467_v4  ;;  %vm2364_vm10 = vweird.f32 %v11145_v26 }
  0xbe   : > { %18128 = vst [vmem:[#allocation6_spill] sm:$0xff] %v11176_v32  ;;  %v2818_v56 = vand.u32 2147483647, %v11156_v37  ;;  %8932 = vrcp.f32 %v11183_v3  ;;  %v11195_v9 = vmul.f32 %v1472_v8, %v11034_v58   ;;  %v1917_v2 = vsel %vm1916_vm9, %v8923_v35, %v1913_v57  ;;  %v302_v57 = vld [vmem:[%s10904_s14 + $0xa0] sm:$0xff] }
  0xbf   : > { %v2361_v10 = vsub.f32 1.0, %v2360_v7  ;;  %v2820_v11 = vand.u32 2147483648, %v11156_v37  ;;  %v8929_v1 = vpop.eup %8928  ;;  %v1922_v13 = vsel %vm11170_vm6, %v1921_v5, %v1917_v2  ;;  %vm11200_vm11 = vcmp.eq.f32.partialorder %v2368_v63, 8.507059e+37  ;;  %v303_v2 = vld [vmem:[%s10904_s14 + $0xa8] sm:$0xff] }
  0xc0   : > { %18129 = vst [vmem:[#allocation7_spill] sm:$0xff] %v11195_v9  ;;  %v2371_v14 = vor.u32 1.1754944e-38, %v2370_v0  ;;  %v7668_v16 = vmul.f32 -1.442695, %v11138_v20  ;;  %v11206_v17 = vmul.f32 %v1922_v13, %v11038_v61   ;;  %vm2365_vm12 = vweird.f32 %v8927_v62  ;;  %v363_v13 = vld [vmem:[%s10904_s14 + $0x288] sm:$0xff] }
  0xc1   : > { %v2362_v58 = vmul.f32 %v8927_v62, %v2361_v10  ;;  %v2810_v6 = vmul.f32 %v8929_v1, %v11156_v37  ;;  %vm2814_vm13 = vweird.f32 %v11156_v37  ;;  %vm11210_vm14 = vcmp.eq.f32.partialorder %v2818_v56, 8.507059e+37  ;;  %vm2366_vm15 = vmor %vm2364_vm10, %vm2365_vm12  ;;  %v332_v10 = vld [vmem:[%s10904_s14 + $0x190] sm:$0xff] }
  0xc2   : > { %18132 = vst [vmem:[#allocation8_spill] sm:$0xff] %v11206_v17  ;;  %v8931_v21 = vpop.eup %8930  ;;  %8934 = vpow2.f32 %v7668_v16  ;;  %v11215_v24 = vadd.f32 %v11005_v34, %v894_v60  ;;  %v2821_v61 = vor.u32 1.1754944e-38, %v2820_v11  ;;  %vm1479_vm1 = vweird.f32 %v11183_v3 }
  0xc3   : > { %v2363_v25 = vadd.f32 %v8927_v62, %v2362_v58  ;;  %v2811_v47 = vsub.f32 1.0, %v2810_v6  ;;  %v11217_v28 = vadd.f32 1.0, %v8931_v21  ;;  %v11224_v50 = vadd.f32 %v11005_v34, %v671_v12 }
  0xc4   : > { %v8933_v33 = vpop.eup %8932  ;;  %v7698_v35 = vmul.f32 -1.442695, %v11215_v24  ;;  %v11227_v36 = vadd.f32 %v11005_v34, %v746_v19  ;;  %vm2815_vm2 = vweird.f32 %v8929_v1  ;;  %v1483_v42 = vand.u32 2147483647, %v11183_v3 }
  0xc5   : > { %v2367_v38 = vsel %vm2366_vm15, %v8927_v62, %v2363_v25  ;;  %v2812_v39 = vmul.f32 %v8929_v1, %v2811_v47  ;;  %v1475_v40 = vmul.f32 %v8933_v33, %v11183_v3  ;;  %8936 = vrcp.f32 %v11217_v28  ;;  %vm2816_vm3 = vmor %vm2814_vm13, %vm2815_vm2  ;;  %v674_v62 = vpop.f32.mrf.mxu0 }
  0xc6   : > { %v2372_v26 = vsel %vm11200_vm11, %v2371_v14, %v2367_v38  ;;  %v11235_v29 = vadd.f32 %v11005_v34, %v821_v31  ;;  %v1485_v49 = vand.u32 2147483648, %v11183_v3  ;;  %8938 = vpow2.f32 %v7698_v35  ;;  %v333_v3 = vld [vmem:[%s10904_s14 + $0x198] sm:$0xff] }
  0xc7   : > { %v11238_v44 = vmul.f32 %v2372_v26, %v11058_v15   ;;  %v2813_v45 = vadd.f32 %v8929_v1, %v2812_v39  ;;  %v1476_v46 = vsub.f32 1.0, %v1475_v40  ;;  %v7609_v52 = vmul.f32 -1.442695, %v11224_v50 }
  0xc8   : > { %v8935_v51 = vpop.eup %8934  ;;  %v7639_v53 = vmul.f32 -1.442695, %v11227_v36  ;;  %v11246_v55 = vadd.f32 %v11005_v34, %v896_v41  ;;  %vm1480_vm4 = vweird.f32 %v8933_v33  ;;  %v7669_v63 = vmul.f32 -1.442695, %v11235_v29 }
  0xc9   : > { %18135 = vst [vmem:[#allocation9_spill] sm:$0xff] %v11238_v44  ;;  %v2817_v54 = vsel %vm2816_vm3, %v8929_v1, %v2813_v45  ;;  %v1477_v15 = vmul.f32 %v8933_v33, %v1476_v46  ;;  %v11248_v60 = vadd.f32 1.0, %v8935_v51  ;;  %8940 = vpow2.f32 %v7609_v52  ;;  %vm11260_vm5 = vmor %vm1479_vm1, %vm1480_vm4  ;;  %v362_v1 = vld [vmem:[%s10904_s14 + $0x280] sm:$0xff] }
  0xca   : > { %v2822_v37 = vsel %vm11210_vm14, %v2821_v61, %v2817_v54  ;;  %v1486_v8 = vor.u32 1.1754944e-38, %v1485_v49  ;;  %v7699_v56 = vmul.f32 -1.442695, %v11246_v55  ;;  %vm1484_vm6 = vcmp.eq.f32.partialorder %v1483_v42, 8.507059e+37  ;;  %v749_v54 = vpop.f32.mrf.mxu1 }
  0xcb   : > { %v11254_v0 = vmul.f32 %v2822_v37, %v11066_v27   ;;  %v1478_v4 = vadd.f32 %v8933_v33, %v1477_v15  ;;  %8942 = vrcp.f32 %v11248_v60  ;;  %v8937_v5 = vpop.eup %8936  ;;  %v11266_v27 = vadd.f32 %v11005_v34, %v674_v62 }
  0xcc   : > { %8944 = vpow2.f32 %v7639_v53  ;;  %v1925_v12 = vmul.f32 %v8937_v5, %v11217_v28  ;;  %vm1929_vm7 = vweird.f32 %v11217_v28  ;;  %v8939_v59 = vpop.eup %8938  ;;  %v1933_v16 = vand.u32 2147483647, %v11217_v28 }
  0xcd   : > { %18136 = vst [vmem:[#allocation10_spill] sm:$0xff] %v11254_v0  ;;  %v1482_v11 = vsel %vm11260_vm5, %v8933_v33, %v1478_v4  ;;  %v1935_v58 = vand.u32 2147483648, %v11217_v28  ;;  %8946 = vpow2.f32 %v7669_v63  ;;  %v11282_v21 = vadd.f32 1.0, %v8939_v59 }
  0xce   : > { %v1487_v14 = vsel %vm1484_vm6, %v1486_v8, %v1482_v11  ;;  %v1926_v19 = vsub.f32 1.0, %v1925_v12  ;;  %v7610_v23 = vmul.f32 -1.442695, %v11266_v27  ;;  %8948 = vpow2.f32 %v7699_v56  ;;  %v392_v56 = vld [vmem:[%s10904_s14 + $0x370] sm:$0xff] }
  0xcf   : > { %v11280_v6 = vmul.f32 %v1487_v14, %v11071_v30   ;;  %v8941_v25 = vpop.eup %8940  ;;  %v412_v47 = vpack.c.bf16 %v303_v2, %v302_v57  ;;  %v427_v61 = vpack.c.bf16 %v333_v3, %v332_v10  ;;  %v442_v31 = vpack.c.bf16 %v363_v13, %v362_v1  ;;  %v393_v2 = vld [vmem:[%s10904_s14 + $0x378] sm:$0xff] }
  0xd0   : > { %v1927_v35 = vmul.f32 %v8937_v5, %v1926_v19  ;;  %vm1930_vm8 = vweird.f32 %v8937_v5  ;;  %v2383_v38 = vand.u32 2147483647, %v11248_v60  ;;  %8950 = vrcp.f32 %v11282_v21 }
  0xd1   : > { %18139 = vst [vmem:[#allocation11_spill] sm:$0xff] %v11280_v6  ;;  %v8943_v33 = vpop.eup %8942  ;;  %vm11287_vm9 = vcmp.eq.f32.partialorder %v1933_v16, 8.507059e+37  ;;  %v2385_v41 = vand.u32 2147483648, %v11248_v60  ;;  %v11293_v26 = vadd.f32 1.0, %v8941_v25  ;;  %7556 = vmatmul.msk.bf16.gmra.mxu0 %vm474_vm0, %v412_v47  ;;  %7571 = vmatmul.msk.bf16.gmra.mxu1 %vm474_vm0, %v427_v61  ;;  %v1936_v45 = vor.u32 1.1754944e-38, %v1935_v58  ;;  %vm1931_vm10 = vmor %vm1929_vm7, %vm1930_vm8 }
  0xd2   : > { %v8945_v39 = vpop.eup %8944  ;;  %v2375_v40 = vmul.f32 %v8943_v33, %v11248_v60  ;;  %v1928_v42 = vadd.f32 %v8937_v5, %v1927_v35  ;;  %8952 = vpow2.f32 %v7610_v23  ;;  %7586 = vmatmul.msk.bf16.gmra.mxu2 %vm474_vm0, %v442_v31  ;;  %v2833_v52 = vand.u32 2147483647, %v11282_v21 }
  0xd3   : > { %v11297_v46 = vadd.f32 1.0, %v8945_v39  ;;  %v8947_v49 = vpop.eup %8946  ;;  %v2835_v53 = vand.u32 2147483648, %v11282_v21  ;;  %8954 = vrcp.f32 %v11293_v26  ;;  %vm2379_vm11 = vweird.f32 %v11248_v60 }
  0xd4   : > { %v2376_v51 = vsub.f32 1.0, %v2375_v40  ;;  %v1932_v15 = vsel %vm1931_vm10, %v8937_v5, %v1928_v42  ;;  %vm11307_vm12 = vcmp.eq.f32.partialorder %v2383_v38, 8.507059e+37  ;;  %v8949_v28 = vpop.eup %8948  ;;  %vm2380_vm13 = vweird.f32 %v8943_v33 }
  0xd5   : > { %8956 = vrcp.f32 %v11297_v46  ;;  %v1937_v37 = vsel %vm11287_vm9, %v1936_v45, %v1932_v15  ;;  %v2386_v4 = vor.u32 1.1754944e-38, %v2385_v41  ;;  %vm2829_vm14 = vweird.f32 %v11282_v21  ;;  %vm2381_vm1 = vmor %vm2379_vm11, %vm2380_vm13  ;;  %v824_v45 = vpop.f32.mrf.mxu2  ;;  %v899_v15 = vpop.f32.mrf.mxu3 }
  0xd6   : > { %v2377_v63 = vmul.f32 %v8943_v33, %v2376_v51  ;;  %v8951_v57 = vpop.eup %8950  ;;  %v11315_v7 = vmul.f32 %v1937_v37, %v11096_v48   ;;  %v1498_v5 = vand.u32 2147483647, %v11293_v26  ;;  %v11320_v8 = vadd.f32 %v11005_v34, %v749_v54 }
  0xd7   : > { %v2825_v11 = vmul.f32 %v8951_v57, %v11282_v21  ;;  %vm11325_vm15 = vcmp.eq.f32.partialorder %v2833_v52, 8.507059e+37  ;;  %v2836_v3 = vor.u32 1.1754944e-38, %v2835_v53  ;;  %vm1494_vm2 = vweird.f32 %v11293_v26 }
  0xd8   : > { %18144 = vst [vmem:[#allocation12_spill] sm:$0xff] %v11315_v7  ;;  %v2378_v10 = vadd.f32 %v8943_v33, %v2377_v63  ;;  %v8953_v1 = vpop.eup %8952  ;;  %v1500_v48 = vand.u32 2147483648, %v11293_v26  ;;  %v1948_v13 = vand.u32 2147483647, %v11297_v46  ;;  %v1950_v59 = vand.u32 2147483648, %v11297_v46 }
  0xd9   : > { %v11335_v14 = vadd.f32 1.0, %v8947_v49  ;;  %v8955_v16 = vpop.eup %8954  ;;  %v2826_v19 = vsub.f32 1.0, %v2825_v11  ;;  %vm1944_vm3 = vweird.f32 %v11297_v46  ;;  %v11338_v23 = vadd.f32 1.0, %v8949_v28 }
  0xda   : > { %v2382_v58 = vsel %vm2381_vm1, %v8943_v33, %v2378_v10  ;;  %v457_v25 = vpack.c.bf16 %v393_v2, %v392_v56  ;;  %vm2830_vm4 = vweird.f32 %v8951_v57  ;;  %v1490_v61 = vmul.f32 %v8955_v16, %v11293_v26 }
  0xdb   : > { %v8957_v60 = vpop.eup %8956  ;;  %v2387_v47 = vsel %vm11307_vm12, %v2386_v4, %v2382_v58  ;;  %vm11343_vm5 = vcmp.eq.f32.partialorder %v1498_v5, 8.507059e+37  ;;  %8958 = vrcp.f32 %v11335_v14  ;;  %v2827_v35 = vmul.f32 %v8951_v57, %v2826_v19  ;;  %vm2831_vm7 = vmor %vm2829_vm14, %vm2830_vm4  ;;  %v751_v58 = vpop.f32.mrf.mxu1 }
  0xdc   : > { %v11349_v33 = vmul.f32 %v2387_v47, %v11138_v20   ;;  %v1940_v38 = vmul.f32 %v8957_v60, %v11297_v46  ;;  %v11352_v39 = vadd.f32 1.0, %v8953_v1  ;;  %7601 = vmatmul.msk.bf16.gmra.mxu3 %vm474_vm0, %v457_v25  ;;  %v1491_v30 = vsub.f32 1.0, %v1490_v61 }
  0xdd   : > { %v1501_v40 = vor.u32 1.1754944e-38, %v1500_v48  ;;  %vm11355_vm6 = vcmp.eq.f32.partialorder %v1948_v13, 8.507059e+37  ;;  %v2398_v42 = vand.u32 2147483647, %v11335_v14  ;;  %v2828_v49 = vadd.f32 %v8951_v57, %v2827_v35  ;;  %v676_v48 = vpop.f32.mrf.mxu0 }
  0xde   : > { %18149 = vst [vmem:[#allocation13_spill] sm:$0xff] %v11349_v33  ;;  %v1941_v51 = vsub.f32 1.0, %v1940_v38  ;;  %v2400_v20 = vand.u32 2147483648, %v11335_v14  ;;  %8960 = vrcp.f32 %v11338_v23  ;;  %v1492_v52 = vmul.f32 %v8955_v16, %v1491_v30  ;;  %v826_v38 = vpop.f32.mrf.mxu2 }
  0xdf   : > { %vm1495_vm8 = vweird.f32 %v8955_v16  ;;  %v1951_v53 = vor.u32 1.1754944e-38, %v1950_v59  ;;  %v7640_v54 = vmul.f32 -1.442695, %v11320_v8  ;;  %v2832_v62 = vsel %vm2831_vm7, %v8951_v57, %v2828_v49 }
  0xe0   : > { %v1942_v28 = vmul.f32 %v8957_v60, %v1941_v51  ;;  %vm1945_vm9 = vweird.f32 %v8957_v60  ;;  %8962 = vrcp.f32 %v11352_v39  ;;  %v2837_v63 = vsel %vm11325_vm15, %v2836_v3, %v2832_v62  ;;  %vm1496_vm11 = vmor %vm1494_vm2, %vm1495_vm8  ;;  %v901_v51 = vpop.f32.mrf.mxu3 }
  0xe1   : > { %v8959_v37 = vpop.eup %8958  ;;  %v1493_v4 = vadd.f32 %v8955_v16, %v1492_v52  ;;  %vm2394_vm10 = vweird.f32 %v11335_v14  ;;  %v2850_v21 = vand.u32 2147483648, %v11338_v23  ;;  %v11372_v5 = vmul.f32 %v2837_v63, %v11215_v24   ;;  %vm1946_vm13 = vmor %vm1944_vm3, %vm1945_vm9 }
  0xe2   : > { %v1943_v57 = vadd.f32 %v8957_v60, %v1942_v28  ;;  %v2390_v56 = vmul.f32 %v8959_v37, %v11335_v14  ;;  %vm11377_vm12 = vcmp.eq.f32.partialorder %v2398_v42, 8.507059e+37  ;;  %v2401_v10 = vor.u32 1.1754944e-38, %v2400_v20 }
  0xe3   : > { %18152 = vst [vmem:[#allocation14_spill] sm:$0xff] %v11372_v5  ;;  %v1497_v11 = vsel %vm1496_vm11, %v8955_v16, %v1493_v4  ;;  %vm2395_vm14 = vweird.f32 %v8959_v37  ;;  %vm2844_vm15 = vweird.f32 %v11338_v23  ;;  %v2848_v24 = vand.u32 2147483647, %v11338_v23 }
  0xe4   : > { %vm1509_vm1 = vweird.f32 %v11352_v39  ;;  %v8961_v26 = vpop.eup %8960  ;;  %v1502_v12 = vsel %vm11343_vm5, %v1501_v40, %v1497_v11  ;;  %v1947_v3 = vsel %vm1946_vm13, %v8957_v60, %v1943_v57  ;;  %v2391_v1 = vsub.f32 1.0, %v2390_v56  ;;  %vm2396_vm3 = vmor %vm2394_vm10, %vm2395_vm14 }
  0xe5   : > { %8964 = vpow2.f32 %v7640_v54  ;;  %v11389_v13 = vmul.f32 %v1502_v12, %v11224_v50   ;;  %v1952_v46 = vsel %vm11355_vm6, %v1951_v53, %v1947_v3  ;;  %v2840_v59 = vmul.f32 %v8961_v26, %v11338_v23  ;;  %v679_v11 = vpop.f32.mrf.mxu0 }
  0xe6   : > { %v2851_v16 = vor.u32 1.1754944e-38, %v2850_v21  ;;  %v8963_v19 = vpop.eup %8962  ;;  %v11395_v25 = vmul.f32 %v1952_v46, %v11227_v36   ;;  %v2392_v47 = vmul.f32 %v8959_v37, %v2391_v1  ;;  %v1513_v60 = vand.u32 2147483647, %v11352_v39  ;;  %v335_v1 = vld [vmem:[%s10904_s14 + $0x1a8] sm:$0xff]  ;;  %v365_v46 = vld [vmem:[%s10904_s14 + $0x298] sm:$0xff] }
  0xe7   : > { %18155 = vst [vmem:[#allocation15_spill] sm:$0xff] %v11389_v13  ;;  %v1515_v61 = vand.u32 2147483648, %v11352_v39  ;;  %v2841_v31 = vsub.f32 1.0, %v2840_v59  ;;  %vm2845_vm2 = vweird.f32 %v8961_v26  ;;  %v1505_v50 = vmul.f32 %v8963_v19, %v11352_v39 }
  0xe8   : > { %18156 = vst [vmem:[#allocation16_spill] sm:$0xff] %v11395_v25  ;;  %v11401_v35 = vadd.f32 %v11005_v34, %v824_v45  ;;  %v2393_v30 = vadd.f32 %v8959_v37, %v2392_v47  ;;  %v11404_v40 = vadd.f32 %v11005_v34, %v899_v15  ;;  %v11407_v36 = vadd.f32 %v11005_v34, %v676_v48  ;;  %vm2846_vm5 = vmor %vm2844_vm15, %vm2845_vm2  ;;  %v364_v48 = vld [vmem:[%s10904_s14 + $0x290] sm:$0xff]  ;;  %v395_v47 = vld [vmem:[%s10904_s14 + $0x388] sm:$0xff] }
  0xe9   : > { %v11410_v41 = vadd.f32 %v11005_v34, %v751_v58  ;;  %v2842_v42 = vmul.f32 %v8961_v26, %v2841_v31  ;;  %v1506_v49 = vsub.f32 1.0, %v1505_v50  ;;  %vm1510_vm4 = vweird.f32 %v8963_v19  ;;  %v394_v58 = vld [vmem:[%s10904_s14 + $0x380] sm:$0xff] }
  0xea   : > { %v7670_v45 = vmul.f32 -1.442695, %v11401_v35  ;;  %v2397_v52 = vsel %vm2396_vm3, %v8959_v37, %v2393_v30  ;;  %v7700_v53 = vmul.f32 -1.442695, %v11404_v40  ;;  %v7611_v54 = vmul.f32 -1.442695, %v11407_v36  ;;  %vm1511_vm7 = vmor %vm1509_vm1, %vm1510_vm4 }
  0xeb   : > { %v8965_v20 = vpop.eup %8964  ;;  %v11419_v15 = vadd.f32 %v11005_v34, %v826_v38  ;;  %v2402_v14 = vsel %vm11377_vm12, %v2401_v10, %v2397_v52  ;;  %v2843_v62 = vadd.f32 %v8961_v26, %v2842_v42  ;;  %v1507_v28 = vmul.f32 %v8963_v19, %v1506_v49 }
  0xec   : > { %v11423_v63 = vadd.f32 1.0, %v8965_v20  ;;  %v11426_v4 = vmul.f32 %v2402_v14, %v11235_v29   ;;  %8966 = vpow2.f32 %v7670_v45  ;;  %v7641_v37 = vmul.f32 -1.442695, %v11410_v41  ;;  %v304_v29 = vld [vmem:[%s10904_s14 + $0xb0] sm:$0xff] }
  0xed   : > { %v11433_v21 = vadd.f32 %v11005_v34, %v901_v51  ;;  %v2847_v57 = vsel %vm2846_vm5, %v8961_v26, %v2843_v62  ;;  %vm2849_vm6 = vcmp.eq.f32.partialorder %v2848_v24, 8.507059e+37  ;;  %v1508_v56 = vadd.f32 %v8963_v19, %v1507_v28  ;;  %v305_v24 = vld [vmem:[%s10904_s14 + $0xb8] sm:$0xff]  ;;  %v334_v26 = vld [vmem:[%s10904_s14 + $0x1a0] sm:$0xff] }
  0xee   : > { %18157 = vst [vmem:[#allocation17_spill] sm:$0xff] %v11426_v4  ;;  %8968 = vrcp.f32 %v11423_v63  ;;  %v2852_v2 = vsel %vm2849_vm6, %v2851_v16, %v2847_v57  ;;  %v1516_v23 = vor.u32 1.1754944e-38, %v1515_v61  ;;  %v7671_v10 = vmul.f32 -1.442695, %v11419_v15  ;;  %v754_v16 = vpop.f32.mrf.mxu1 }
  0xef   : > { %8970 = vpow2.f32 %v7700_v53  ;;  %v11444_v12 = vmul.f32 %v2852_v2, %v11246_v55   ;;  %v1512_v3 = vsel %vm1511_vm7, %v8963_v19, %v1508_v56  ;;  %vm1514_vm8 = vcmp.eq.f32.partialorder %v1513_v60, 8.507059e+37  ;;  %v904_v2 = vpop.f32.mrf.mxu3 }
  0xf0   : > { %8972 = vpow2.f32 %v7611_v54  ;;  %v1517_v39 = vsel %vm1514_vm8, %v1516_v23, %v1512_v3  ;;  %v7701_v59 = vmul.f32 -1.442695, %v11433_v21  ;;  %v11456_v31 = vadd.f32 %v11005_v34, %v679_v11 }
  0xf1   : > { %18158 = vst [vmem:[#allocation18_spill] sm:$0xff] %v11444_v12  ;;  %8974 = vpow2.f32 %v7641_v37  ;;  %v11453_v61 = vmul.f32 %v1517_v39, %v11266_v27   ;;  %v413_v19 = vpack.c.bf16 %v305_v24, %v304_v29  ;;  %v428_v60 = vpack.c.bf16 %v335_v1, %v334_v26  ;;  %v829_v37 = vpop.f32.mrf.mxu2 }
  0xf2   : > { %v8967_v55 = vpop.eup %8966  ;;  %8976 = vpow2.f32 %v7671_v10  ;;  %v443_v50 = vpack.c.bf16 %v365_v46, %v364_v48  ;;  %v7612_v42 = vmul.f32 -1.442695, %v11456_v31  ;;  %v11462_v49 = vadd.f32 %v11005_v34, %v754_v16 }
  0xf3   : > { %18159 = vst [vmem:[#allocation19_spill] sm:$0xff] %v11453_v61  ;;  %v11458_v30 = vadd.f32 1.0, %v8967_v55  ;;  %v458_v45 = vpack.c.bf16 %v395_v47, %v394_v58  ;;  %8978 = vpow2.f32 %v7701_v59  ;;  %7557 = vmatmul.msk.bf16.gmra.mxu0 %vm474_vm0, %v413_v19  ;;  %7572 = vmatmul.msk.bf16.gmra.mxu1 %vm474_vm0, %v428_v60  ;;  %v1963_v52 = vand.u32 2147483647, %v11423_v63 }
  0xf4   : > { %v8969_v38 = vpop.eup %8968  ;;  %v1965_v53 = vand.u32 2147483648, %v11423_v63  ;;  %7587 = vmatmul.msk.bf16.gmra.mxu2 %vm474_vm0, %v443_v50  ;;  %vm1959_vm9 = vweird.f32 %v11423_v63  ;;  %v7642_v29 = vmul.f32 -1.442695, %v11462_v49  ;;  %v11489_v3 = vadd.f32 %v11005_v34, %v829_v37 }
  0xf5   : > { %v8971_v51 = vpop.eup %8970  ;;  %v1955_v27 = vmul.f32 %v8969_v38, %v11423_v63  ;;  %8980 = vrcp.f32 %v11458_v30  ;;  %7602 = vmatmul.msk.bf16.gmra.mxu3 %vm474_vm0, %v458_v45  ;;  %v2415_v57 = vand.u32 2147483648, %v11458_v30  ;;  %vm1960_vm10 = vweird.f32 %v8969_v38 }
  0xf6   : > { %v8973_v20 = vpop.eup %8972  ;;  %v11473_v62 = vadd.f32 1.0, %v8971_v51  ;;  %8982 = vpow2.f32 %v7612_v42  ;;  %v2413_v11 = vand.u32 2147483647, %v11458_v30  ;;  %vm11483_vm11 = vcmp.eq.f32.partialorder %v1963_v52, 8.507059e+37  ;;  %vm1961_vm12 = vmor %vm1959_vm9, %vm1960_vm10 }
  0xf7   : > { %v8975_v54 = vpop.eup %8974  ;;  %v1956_v14 = vsub.f32 1.0, %v1955_v27  ;;  %v11475_v28 = vadd.f32 1.0, %v8973_v20  ;;  %v1966_v26 = vor.u32 1.1754944e-38, %v1965_v53  ;;  %v11494_v39 = vadd.f32 %v11005_v34, %v904_v2 }
  0xf8   : > { %v11478_v56 = vadd.f32 1.0, %v8975_v54  ;;  %v8977_v23 = vpop.eup %8976  ;;  %8984 = vrcp.f32 %v11473_v62  ;;  %v2865_v46 = vand.u32 2147483648, %v11473_v62  ;;  %vm2409_vm13 = vweird.f32 %v11458_v30 }
  0xf9   : > { %v1957_v10 = vmul.f32 %v8969_v38, %v1956_v14  ;;  %8986 = vrcp.f32 %v11475_v28  ;;  %v8979_v1 = vpop.eup %8978  ;;  %v2416_v16 = vor.u32 1.1754944e-38, %v2415_v57  ;;  %v2863_v58 = vand.u32 2147483647, %v11473_v62 }
  0xfa   : > { %8988 = vrcp.f32 %v11478_v56  ;;  %vm11501_vm14 = vcmp.eq.f32.partialorder %v2413_v11, 8.507059e+37  ;;  %v1528_v34 = vand.u32 2147483647, %v11475_v28  ;;  %v1530_v60 = vand.u32 2147483648, %v11475_v28 }
  0xfb   : > { %v1958_v48 = vadd.f32 %v8969_v38, %v1957_v10  ;;  %v8981_v59 = vpop.eup %8980  ;;  %8990 = vpow2.f32 %v7642_v29  ;;  %vm2859_vm15 = vweird.f32 %v11473_v62  ;;  %v1978_v42 = vand.u32 2147483647, %v11478_v56 }
  0xfc   : > { %v2405_v55 = vmul.f32 %v8981_v59, %v11458_v30  ;;  %v8983_v50 = vpop.eup %8982  ;;  %v11511_v45 = vadd.f32 1.0, %v8977_v23  ;;  %v2866_v20 = vor.u32 1.1754944e-38, %v2865_v46  ;;  %vm1524_vm1 = vweird.f32 %v11475_v28 }
  0xfd   : > { %v1962_v47 = vsel %vm1961_vm12, %v8969_v38, %v1958_v48  ;;  %v11517_v52 = vadd.f32 1.0, %v8979_v1  ;;  %vm11520_vm2 = vcmp.eq.f32.partialorder %v2863_v58, 8.507059e+37  ;;  %vm1974_vm3 = vweird.f32 %v11478_v56 }
  0xfe   : > { %v1967_v63 = vsel %vm11483_vm11, %v1966_v26, %v1962_v47  ;;  %v8985_v38 = vpop.eup %8984  ;;  %v2406_v27 = vsub.f32 1.0, %v2405_v55  ;;  %v1980_v37 = vand.u32 2147483648, %v11478_v56  ;;  %8992 = vrcp.f32 %v11511_v45 }
  0xff   : > { %v11514_v51 = vmul.f32 %v1967_v63, %v11320_v8   ;;  %v8987_v53 = vpop.eup %8986  ;;  %v2855_v54 = vmul.f32 %v8985_v38, %v11473_v62  ;;  %vm2410_vm4 = vweird.f32 %v8981_v59  ;;  %vm11528_vm5 = vcmp.eq.f32.partialorder %v1528_v34, 8.507059e+37 }
 0x100   : > { %v8989_v8 = vpop.eup %8988  ;;  %v2407_v57 = vmul.f32 %v8981_v59, %v2406_v27  ;;  %v1520_v29 = vmul.f32 %v8987_v53, %v11475_v28  ;;  %v1531_v23 = vor.u32 1.1754944e-38, %v1530_v60  ;;  %vm11533_vm6 = vcmp.eq.f32.partialorder %v1978_v42, 8.507059e+37  ;;  %vm2411_vm8 = vmor %vm2409_vm13, %vm2410_vm4 }
 0x101   : > { %18164 = vst [vmem:[#allocation20_spill] sm:$0xff] %v11514_v51  ;;  %v8991_v10 = vpop.eup %8990  ;;  %v2856_v11 = vsub.f32 1.0, %v2855_v54  ;;  %v1970_v24 = vmul.f32 %v8989_v8, %v11478_v56  ;;  %v11537_v1 = vadd.f32 1.0, %v8983_v50  ;;  %vm2860_vm7 = vweird.f32 %v8985_v38  ;;  %v401_v51 = vld [vmem:[%s10904_s14 + $0x3b8] sm:$0xff] }
 0x102   : > { %v2408_v48 = vadd.f32 %v8981_v59, %v2407_v57  ;;  %v1521_v46 = vsub.f32 1.0, %v1520_v29  ;;  %8994 = vrcp.f32 %v11517_v52  ;;  %v1981_v55 = vor.u32 1.1754944e-38, %v1980_v37  ;;  %vm2861_vm12 = vmor %vm2859_vm15, %vm2860_vm7 }
 0x103   : > { %v2857_v58 = vmul.f32 %v8985_v38, %v2856_v11  ;;  %v1971_v47 = vsub.f32 1.0, %v1970_v24  ;;  %v2428_v34 = vand.u32 2147483647, %v11511_v45  ;;  %vm1525_vm9 = vweird.f32 %v8987_v53 }
 0x104   : > { %v2412_v60 = vsel %vm2411_vm8, %v8981_v59, %v2408_v48  ;;  %v1522_v63 = vmul.f32 %v8987_v53, %v1521_v46  ;;  %vm2424_vm10 = vweird.f32 %v11511_v45  ;;  %v8993_v50 = vpop.eup %8992  ;;  %vm1975_vm11 = vweird.f32 %v8989_v8  ;;  %vm1526_vm13 = vmor %vm1524_vm1, %vm1525_vm9 }
 0x105   : > { %v2417_v42 = vsel %vm11501_vm14, %v2416_v16, %v2412_v60  ;;  %v2858_v27 = vadd.f32 %v8985_v38, %v2857_v58  ;;  %v1972_v54 = vmul.f32 %v8989_v8, %v1971_v47  ;;  %v2420_v59 = vmul.f32 %v8993_v50, %v11511_v45  ;;  %vm1976_vm15 = vmor %vm1974_vm3, %vm1975_vm11  ;;  %v681_v47 = vpop.f32.mrf.mxu0 }
 0x106   : > { %v11547_v30 = vmul.f32 %v2417_v42, %v11401_v35   ;;  %v1523_v37 = vadd.f32 %v8987_v53, %v1522_v63  ;;  %v2430_v57 = vand.u32 2147483648, %v11511_v45  ;;  %vm11556_vm14 = vcmp.eq.f32.partialorder %v2428_v34, 8.507059e+37  ;;  %v756_v63 = vpop.f32.mrf.mxu1 }
 0x107   : > { %v2862_v29 = vsel %vm2861_vm12, %v8985_v38, %v2858_v27  ;;  %v1973_v16 = vadd.f32 %v8989_v8, %v1972_v54  ;;  %v2878_v35 = vand.u32 2147483647, %v11517_v52  ;;  %v2421_v48 = vsub.f32 1.0, %v2420_v59 }
 0x108   : > { %18171 = vst [vmem:[#allocation21_spill] sm:$0xff] %v11547_v30  ;;  %v8995_v11 = vpop.eup %8994  ;;  %v2867_v62 = vsel %vm11520_vm2, %v2866_v20, %v2862_v29  ;;  %v1527_v24 = vsel %vm1526_vm13, %v8987_v53, %v1523_v37  ;;  %8996 = vrcp.f32 %v11537_v1  ;;  %vm2425_vm1 = vweird.f32 %v8993_v50 }
 0x109   : > { %v11567_v28 = vmul.f32 %v2867_v62, %v11404_v40   ;;  %v1532_v38 = vsel %vm11528_vm5, %v1531_v23, %v1527_v24  ;;  %v1977_v46 = vsel %vm1976_vm15, %v8989_v8, %v1973_v16  ;;  %v2870_v58 = vmul.f32 %v8995_v11, %v11517_v52  ;;  %vm2426_vm3 = vmor %vm2424_vm10, %vm2425_vm1  ;;  %v831_v16 = vpop.f32.mrf.mxu2  ;;  %v906_v24 = vpop.f32.mrf.mxu3 }
 0x10a   : > { %v11573_v14 = vmul.f32 %v1532_v38, %v11407_v36   ;;  %v1982_v56 = vsel %vm11533_vm6, %v1981_v55, %v1977_v46  ;;  %v2422_v20 = vmul.f32 %v8993_v50, %v2421_v48  ;;  %vm2874_vm2 = vweird.f32 %v11517_v52 }
 0x10b   : > { %v11578_v53 = vmul.f32 %v1982_v56, %v11410_v41   ;;  %v2871_v40 = vsub.f32 1.0, %v2870_v58  ;;  %v2880_v2 = vand.u32 2147483648, %v11517_v52  ;;  %v2431_v23 = vor.u32 1.1754944e-38, %v2430_v57  ;;  %v11591_v41 = vld [vmem:[%s18102_s2] ss:$0 sm:$0xff] }
 0x10c   : > { %18174 = vst [vmem:[#allocation22_spill] sm:$0xff] %v11573_v14  ;;  %v2423_v8 = vadd.f32 %v8993_v50, %v2422_v20  ;;  %v11582_v34 = vadd.f32 1.0, %v8991_v10  ;;  %v7672_v36 = vmul.f32 -1.442695, %v11489_v3  ;;  %vm2875_vm4 = vweird.f32 %v8995_v11 }
 0x10d   : > { %18175 = vst [vmem:[#allocation23_spill] sm:$0xff] %v11578_v53  ;;  %v2872_v26 = vmul.f32 %v8995_v11, %v2871_v40  ;;  %v7702_v55 = vmul.f32 -1.442695, %v11494_v39  ;;  %v11594_v60 = vadd.f32 %v11591_v41, %v681_v47  ;;  %vm11596_vm5 = vcmp.eq.f32.partialorder %v2878_v35, 8.507059e+37  ;;  %vm2876_vm6 = vmor %vm2874_vm2, %vm2875_vm4  ;;  %v684_v58 = vpop.f32.mrf.mxu0 }
 0x10e   : > { %v8997_v10 = vpop.eup %8996  ;;  %v2427_v42 = vsel %vm2426_vm3, %v8993_v50, %v2423_v8  ;;  %v1543_v45 = vand.u32 2147483647, %v11537_v1  ;;  %8998 = vrcp.f32 %v11582_v34  ;;  %v2881_v59 = vor.u32 1.1754944e-38, %v2880_v2 }
 0x10f   : > { %v2432_v54 = vsel %vm11556_vm14, %v2431_v23, %v2427_v42  ;;  %v2873_v37 = vadd.f32 %v8995_v11, %v2872_v26  ;;  %v1535_v57 = vmul.f32 %v8997_v10, %v11537_v1  ;;  %vm1539_vm7 = vweird.f32 %v11537_v1  ;;  %v307_v26 = vld [vmem:[%s10904_s14 + $0xc8] sm:$0xff] }
 0x110   : > { %v11606_v29 = vmul.f32 %v2432_v54, %v11419_v15   ;;  %v1545_v50 = vand.u32 2147483648, %v11537_v1  ;;  %9000 = vpow2.f32 %v7672_v36  ;;  %v7613_v62 = vmul.f32 -1.442695, %v11594_v60  ;;  %v306_v36 = vld [vmem:[%s10904_s14 + $0xc0] sm:$0xff] }
 0x111   : > { %v2877_v35 = vsel %vm2876_vm6, %v8995_v11, %v2873_v37  ;;  %v1536_v19 = vsub.f32 1.0, %v1535_v57  ;;  %9002 = vpow2.f32 %v7702_v55  ;;  %vm1540_vm8 = vweird.f32 %v8997_v10  ;;  %v759_v57 = vpop.f32.mrf.mxu1  ;;  %v909_v61 = vpop.f32.mrf.mxu3 }
 0x112   : > { %18178 = vst [vmem:[#allocation24_spill] sm:$0xff] %v11606_v29  ;;  %v2882_v15 = vsel %vm11596_vm5, %v2881_v59, %v2877_v35  ;;  %vm11616_vm9 = vcmp.eq.f32.partialorder %v1543_v45, 8.507059e+37  ;;  %v11621_v52 = vadd.f32 %v11591_v41, %v756_v63  ;;  %9004 = vpow2.f32 %v7613_v62  ;;  %vm1541_vm11 = vmor %vm1539_vm7, %vm1540_vm8 }
 0x113   : > { %v11624_v11 = vmul.f32 %v2882_v15, %v11433_v21   ;;  %v1537_v38 = vmul.f32 %v8997_v10, %v1536_v19  ;;  %v11627_v46 = vadd.f32 %v11591_v41, %v831_v16  ;;  %v1546_v56 = vor.u32 1.1754944e-38, %v1545_v50 }
 0x114   : > { %v8999_v47 = vpop.eup %8998  ;;  %vm1989_vm10 = vweird.f32 %v11582_v34  ;;  %v7643_v20 = vmul.f32 -1.442695, %v11621_v52  ;;  %v11632_v40 = vadd.f32 %v11591_v41, %v906_v24  ;;  %v1993_v21 = vand.u32 2147483647, %v11582_v34  ;;  %v337_v24 = vld [vmem:[%s10904_s14 + $0x1b8] sm:$0xff] }
 0x115   : > { %v1538_v2 = vadd.f32 %v8997_v10, %v1537_v38  ;;  %v1985_v8 = vmul.f32 %v8999_v47, %v11582_v34  ;;  %v7673_v23 = vmul.f32 -1.442695, %v11627_v46  ;;  %v1995_v63 = vand.u32 2147483648, %v11582_v34 }
 0x116   : > { %v9001_v55 = vpop.eup %9000  ;;  %9006 = vpow2.f32 %v7643_v20  ;;  %v7703_v42 = vmul.f32 -1.442695, %v11632_v40  ;;  %v11645_v27 = vadd.f32 %v11591_v41, %v684_v58  ;;  %v414_v16 = vpack.c.bf16 %v307_v26, %v306_v36 }
 0x117   : > { %v9003_v45 = vpop.eup %9002  ;;  %v1542_v54 = vsel %vm1541_vm11, %v8997_v10, %v1538_v2  ;;  %v1986_v37 = vsub.f32 1.0, %v1985_v8  ;;  %v11647_v59 = vadd.f32 1.0, %v9001_v55  ;;  %9008 = vpow2.f32 %v7673_v23  ;;  %v336_v10 = vld [vmem:[%s10904_s14 + $0x1b0] sm:$0xff] }
 0x118   : > { %v1547_v1 = vsel %vm11616_vm9, %v1546_v56, %v1542_v54  ;;  %v11651_v50 = vadd.f32 1.0, %v9003_v45  ;;  %9010 = vpow2.f32 %v7703_v42  ;;  %v9005_v35 = vpop.eup %9004  ;;  %vm1990_vm12 = vweird.f32 %v8999_v47  ;;  %7558 = vmatmul.msk.bf16.gmra.mxu0 %vm474_vm0, %v414_v16 }
 0x119   : > { %v11654_v19 = vmul.f32 %v1547_v1, %v11456_v31   ;;  %v1987_v62 = vmul.f32 %v8999_v47, %v1986_v37  ;;  %9012 = vrcp.f32 %v11647_v59  ;;  %v11661_v15 = vadd.f32 %v11591_v41, %v759_v57  ;;  %vm1991_vm14 = vmor %vm1989_vm10, %vm1990_vm12 }
 0x11a   : > { %9014 = vrcp.f32 %v11651_v50  ;;  %vm1994_vm13 = vcmp.eq.f32.partialorder %v1993_v21, 8.507059e+37  ;;  %v11664_v38 = vadd.f32 1.0, %v9005_v35  ;;  %v7614_v31 = vmul.f32 -1.442695, %v11645_v27 }
 0x11b   : > { %18181 = vst [vmem:[#allocation25_spill] sm:$0xff] %v11654_v19  ;;  %v1988_v48 = vadd.f32 %v8999_v47, %v1987_v62  ;;  %v1996_v56 = vor.u32 1.1754944e-38, %v1995_v63  ;;  %v2443_v20 = vand.u32 2147483647, %v11647_v59  ;;  %v2445_v2 = vand.u32 2147483648, %v11647_v59  ;;  %v367_v62 = vld [vmem:[%s10904_s14 + $0x2a8] sm:$0xff] }
 0x11c   : > { %v9007_v58 = vpop.eup %9006  ;;  %v429_v8 = vpack.c.bf16 %v337_v24, %v336_v10  ;;  %v2893_v26 = vand.u32 2147483647, %v11651_v50  ;;  %v2895_v21 = vand.u32 2147483648, %v11651_v50  ;;  %9016 = vrcp.f32 %v11664_v38 }
 0x11d   : > { %v9009_v23 = vpop.eup %9008  ;;  %v1992_v36 = vsel %vm1991_vm14, %v8999_v47, %v1988_v48  ;;  %vm2439_vm15 = vweird.f32 %v11647_v59  ;;  %v11676_v34 = vmul.f32 -1.442695, %v11661_v15  ;;  %vm2889_vm1 = vweird.f32 %v11651_v50 }
 0x11e   : > { %v9011_v55 = vpop.eup %9010  ;;  %v1997_v42 = vsel %vm1994_vm13, %v1996_v56, %v1992_v36  ;;  %7573 = vmatmul.msk.bf16.gmra.mxu1 %vm474_vm0, %v429_v8  ;;  %v11683_v47 = vadd.f32 1.0, %v9007_v58  ;;  %v11685_v54 = vadd.f32 1.0, %v9009_v23  ;;  %9018 = vpow2.f32 %v7614_v31 }
 0x11f   : > { %v9013_v63 = vpop.eup %9012  ;;  %v11680_v45 = vmul.f32 %v1997_v42, %v11462_v49   ;;  %vm11688_vm2 = vcmp.eq.f32.partialorder %v2443_v20, 8.507059e+37  ;;  %v2446_v16 = vor.u32 1.1754944e-38, %v2445_v2  ;;  %v1558_v35 = vand.u32 2147483647, %v11664_v38 }
 0x120   : > { %v9015_v37 = vpop.eup %9014  ;;  %v2435_v57 = vmul.f32 %v9013_v63, %v11647_v59  ;;  %vm11694_vm3 = vcmp.eq.f32.partialorder %v2893_v26, 8.507059e+37  ;;  %v2896_v10 = vor.u32 1.1754944e-38, %v2895_v21  ;;  %v1560_v24 = vand.u32 2147483648, %v11664_v38 }
 0x121   : > { %18182 = vst [vmem:[#allocation26_spill] sm:$0xff] %v11680_v45  ;;  %v2885_v49 = vmul.f32 %v9015_v37, %v11651_v50  ;;  %9020 = vrcp.f32 %v11683_v47  ;;  %vm1554_vm4 = vweird.f32 %v11664_v38  ;;  %v11702_v31 = vadd.f32 1.0, %v9011_v55 }
 0x122   : > { %v2436_v48 = vsub.f32 1.0, %v2435_v57  ;;  %9022 = vrcp.f32 %v11685_v54  ;;  %v9017_v58 = vpop.eup %9016  ;;  %vm2440_vm5 = vweird.f32 %v9013_v63  ;;  %v2010_v20 = vand.u32 2147483648, %v11683_v47 }
 0x123   : > { %v2886_v56 = vsub.f32 1.0, %v2885_v49  ;;  %v2460_v2 = vand.u32 2147483648, %v11685_v54  ;;  %v1550_v23 = vmul.f32 %v9017_v58, %v11664_v38  ;;  %vm11707_vm6 = vcmp.eq.f32.partialorder %v1558_v35, 8.507059e+37  ;;  %vm11718_vm10 = vmor %vm2439_vm15, %vm2440_vm5 }
 0x124   : > { %v2437_v8 = vmul.f32 %v9013_v63, %v2436_v48  ;;  %v2008_v26 = vand.u32 2147483647, %v11683_v47  ;;  %v9019_v21 = vpop.eup %9018  ;;  %vm2890_vm7 = vweird.f32 %v9015_v37  ;;  %v1561_v55 = vor.u32 1.1754944e-38, %v1560_v24 }
 0x125   : > { %v2887_v42 = vmul.f32 %v9015_v37, %v2886_v56  ;;  %v2458_v57 = vand.u32 2147483647, %v11685_v54  ;;  %v1551_v18 = vsub.f32 1.0, %v1550_v23  ;;  %vm1555_vm8 = vweird.f32 %v9017_v58  ;;  %vm2891_vm12 = vmor %vm2889_vm1, %vm2890_vm7 }
 0x126   : > { %v2438_v49 = vadd.f32 %v9013_v63, %v2437_v8  ;;  %vm2004_vm9 = vweird.f32 %v11683_v47  ;;  %9024 = vrcp.f32 %v11702_v31  ;;  %v2011_v9 = vor.u32 1.1754944e-38, %v2010_v20  ;;  %vm1556_vm15 = vmor %vm1554_vm4, %vm1555_vm8 }
 0x127   : > { %v9021_v48 = vpop.eup %9020  ;;  %v2888_v56 = vadd.f32 %v9015_v37, %v2887_v42  ;;  %vm2454_vm11 = vweird.f32 %v11685_v54  ;;  %v11723_v24 = vor.u32 1.1754944e-38, %v2460_v2  ;;  %v2908_v8 = vand.u32 2147483647, %v11702_v31  ;;  %v834_v2 = vpop.f32.mrf.mxu2 }
 0x128   : > { %v9023_v23 = vpop.eup %9022  ;;  %v2442_v6 = vsel %vm11718_vm10, %v9013_v63, %v2438_v49  ;;  %v1552_v59 = vmul.f32 %v9017_v58, %v1551_v18  ;;  %v2000_v13 = vmul.f32 %v9021_v48, %v11683_v47  ;;  %vm11732_vm13 = vcmp.eq.f32.partialorder %v2008_v26, 8.507059e+37 }
 0x129   : > { %v11736_v20 = vadd.f32 1.0, %v9019_v21  ;;  %v2447_v14 = vsel %vm11688_vm2, %v2446_v16, %v2442_v6  ;;  %v2892_v35 = vsel %vm2891_vm12, %v9015_v37, %v2888_v56  ;;  %v2450_v63 = vmul.f32 %v9023_v23, %v11685_v54  ;;  %v308_v56 = vld [vmem:[%s10904_s14 + $0xd0] sm:$0xff] }
 0x12a   : > { %vm11741_vm14 = vcmp.eq.f32.partialorder %v2458_v57, 8.507059e+37  ;;  %v2910_v18 = vand.u32 2147483648, %v11702_v31  ;;  %v11747_v26 = vmul.f32 %v2447_v14, %v11489_v3   ;;  %v2897_v21 = vsel %vm11694_vm3, %v2896_v10, %v2892_v35  ;;  %v397_v35 = vld [vmem:[%s10904_s14 + $0x398] sm:$0xff] }
 0x12b   : > { %v1553_v49 = vadd.f32 %v9017_v58, %v1552_v59  ;;  %v2001_v1 = vsub.f32 1.0, %v2000_v13  ;;  %v11752_v6 = vmul.f32 %v2897_v21, %v11494_v39   ;;  %vm2005_vm1 = vweird.f32 %v9021_v48  ;;  %v366_v13 = vld [vmem:[%s10904_s14 + $0x2a0] sm:$0xff]  ;;  %v686_v39 = vpop.f32.mrf.mxu0  ;;  %v396_v59 = vld [vmem:[%s10904_s14 + $0x390] sm:$0xff] }
 0x12c   : > { %18195 = vst [vmem:[#allocation27_spill] sm:$0xff] %v11747_v26  ;;  %v2451_v37 = vsub.f32 1.0, %v2450_v63  ;;  %vm2904_vm2 = vweird.f32 %v11702_v31  ;;  %v9025_v3 = vpop.eup %9024  ;;  %vm2455_vm5 = vweird.f32 %v9023_v23  ;;  %9026 = vrcp.f32 %v11736_v20 }
 0x12d   : > { %v1557_v14 = vsel %vm1556_vm15, %v9017_v58, %v1553_v49  ;;  %v2002_v16 = vmul.f32 %v9021_v48, %v2001_v1  ;;  %v2900_v57 = vmul.f32 %v9025_v3, %v11702_v31  ;;  %vm11764_vm3 = vcmp.eq.f32.partialorder %v2908_v8, 8.507059e+37  ;;  %v761_v58 = vpop.f32.mrf.mxu1  ;;  %vm2456_vm8 = vmor %vm2454_vm11, %vm2455_vm5 }
 0x12e   : > { %v1562_v10 = vsel %vm11707_vm6, %v1561_v55, %v1557_v14  ;;  %v2452_v38 = vmul.f32 %v9023_v23, %v2451_v37  ;;  %vm2905_vm4 = vweird.f32 %v9025_v3  ;;  %v2911_v49 = vor.u32 1.1754944e-38, %v2910_v18  ;;  %vm2006_vm6 = vmor %vm2004_vm9, %vm2005_vm1 }
 0x12f   : > { %v11771_v63 = vmul.f32 %v1562_v10, %v11594_v60   ;;  %v2003_v21 = vadd.f32 %v9021_v48, %v2002_v16  ;;  %v2901_v55 = vsub.f32 1.0, %v2900_v57  ;;  %vm1569_vm7 = vweird.f32 %v11736_v20  ;;  %vm2906_vm10 = vmor %vm2904_vm2, %vm2905_vm4 }
 0x130   : > { %v2453_v36 = vadd.f32 %v9023_v23, %v2452_v38  ;;  %9028 = vpow2.f32 %v11676_v34  ;;  %v444_v8 = vpack.c.bf16 %v367_v62, %v366_v13  ;;  %v1573_v60 = vand.u32 2147483647, %v11736_v20  ;;  %v911_v62 = vpop.f32.mrf.mxu3 }
 0x131   : > { %18198 = vst [vmem:[#allocation28_spill] sm:$0xff] %v11771_v63  ;;  %v2007_v1 = vsel %vm2006_vm6, %v9021_v48, %v2003_v21  ;;  %v1575_v18 = vand.u32 2147483648, %v11736_v20  ;;  %v459_v37 = vpack.c.bf16 %v397_v35, %v396_v59  ;;  %v2902_v16 = vmul.f32 %v9025_v3, %v2901_v55 }
 0x132   : > { %v2012_v47 = vsel %vm11732_vm13, %v2011_v9, %v2007_v1  ;;  %v2457_v14 = vsel %vm2456_vm8, %v9023_v23, %v2453_v36  ;;  %7588 = vmatmul.msk.bf16.gmra.mxu2 %vm474_vm0, %v444_v8  ;;  %v11787_v34 = vadd.f32 %v11591_v41, %v834_v2  ;;  %v9027_v48 = vpop.eup %9026  ;;  %v11797_v42 = vadd.f32 %v11591_v41, %v909_v61  ;;  %v836_v23 = vpop.f32.mrf.mxu2 }
 0x133   : > { %v11790_v13 = vmul.f32 %v2012_v47, %v11621_v52   ;;  %v2462_v54 = vsel %vm11741_vm14, %v11723_v24, %v2457_v14  ;;  %7603 = vmatmul.msk.bf16.gmra.mxu3 %vm474_vm0, %v459_v37  ;;  %v11800_v9 = vadd.f32 %v11591_v41, %v686_v39  ;;  %v2903_v10 = vadd.f32 %v9025_v3, %v2902_v16  ;;  %v689_v36 = vpop.f32.mrf.mxu0  ;;  %v339_v14 = vld [vmem:[%s10904_s14 + $0x1c8] sm:$0xff] }
 0x134   : > { %v11803_v2 = vmul.f32 %v2462_v54, %v11627_v46   ;;  %v1565_v52 = vmul.f32 %v9027_v48, %v11736_v20  ;;  %vm1570_vm9 = vweird.f32 %v9027_v48  ;;  %v7674_v24 = vmul.f32 -1.442695, %v11787_v34 }
 0x135   : > { %18199 = vst [vmem:[#allocation29_spill] sm:$0xff] %v11790_v13  ;;  %v7704_v61 = vmul.f32 -1.442695, %v11797_v42  ;;  %v7615_v50 = vmul.f32 -1.442695, %v11800_v9  ;;  %v11813_v39 = vadd.f32 %v11591_v41, %v761_v58  ;;  %v2907_v46 = vsel %vm2906_vm10, %v9025_v3, %v2903_v10  ;;  %v764_v1 = vpop.f32.mrf.mxu1  ;;  %vm1571_vm11 = vmor %vm1569_vm7, %vm1570_vm9  ;;  %v369_v10 = vld [vmem:[%s10904_s14 + $0x2b8] sm:$0xff] }
 0x136   : > { %18200 = vst [vmem:[#allocation30_spill] sm:$0xff] %v11803_v2  ;;  %v9029_v38 = vpop.eup %9028  ;;  %v1566_v57 = vsub.f32 1.0, %v1565_v52  ;;  %v11816_v59 = vadd.f32 %v11591_v41, %v836_v23  ;;  %v11819_v31 = vadd.f32 %v11591_v41, %v911_v62  ;;  %v2912_v35 = vsel %vm11764_vm3, %v2911_v49, %v2907_v46  ;;  %v309_v49 = vld [vmem:[%s10904_s14 + $0xd8] sm:$0xff]  ;;  %v368_v62 = vld [vmem:[%s10904_s14 + $0x2b0] sm:$0xff] }
 0x137   : > { %v11823_v21 = vadd.f32 1.0, %v9029_v38  ;;  %9030 = vpow2.f32 %v7674_v24  ;;  %v7645_v58 = vmul.f32 -1.442695, %v11813_v39  ;;  %v11827_v3 = vmul.f32 %v2912_v35, %v11632_v40   ;;  %v338_v40 = vld [vmem:[%s10904_s14 + $0x1c0] sm:$0xff] }
 0x138   : > { %v1567_v55 = vmul.f32 %v9027_v48, %v1566_v57  ;;  %9032 = vpow2.f32 %v7704_v61  ;;  %v7675_v8 = vmul.f32 -1.442695, %v11816_v59  ;;  %v11834_v47 = vadd.f32 %v11591_v41, %v689_v36  ;;  %v398_v61 = vld [vmem:[%s10904_s14 + $0x3a0] sm:$0xff] }
 0x139   : > { %9034 = vrcp.f32 %v11823_v21  ;;  %v1576_v16 = vor.u32 1.1754944e-38, %v1575_v18  ;;  %v7705_v54 = vmul.f32 -1.442695, %v11819_v31  ;;  %v11843_v23 = vadd.f32 %v11591_v41, %v764_v1 }
 0x13a   : > { %v1568_v37 = vadd.f32 %v9027_v48, %v1567_v55  ;;  %9036 = vpow2.f32 %v7615_v50  ;;  %vm1574_vm12 = vcmp.eq.f32.partialorder %v1573_v60, 8.507059e+37  ;;  %v415_v24 = vpack.c.bf16 %v309_v49, %v308_v56  ;;  %v399_v50 = vld [vmem:[%s10904_s14 + $0x3a8] sm:$0xff] }
 0x13b   : > { %9038 = vpow2.f32 %v7645_v58  ;;  %v2023_v20 = vand.u32 2147483647, %v11823_v21  ;;  %v430_v57 = vpack.c.bf16 %v339_v14, %v338_v40  ;;  %v7616_v36 = vmul.f32 -1.442695, %v11834_v47 }
 0x13c   : > { %v1572_v52 = vsel %vm1571_vm11, %v9027_v48, %v1568_v37  ;;  %9040 = vpow2.f32 %v7675_v8  ;;  %7559 = vmatmul.msk.bf16.gmra.mxu0 %vm474_vm0, %v415_v24  ;;  %v445_v60 = vpack.c.bf16 %v369_v10, %v368_v62  ;;  %v7646_v8 = vmul.f32 -1.442695, %v11843_v23  ;;  %v839_v10 = vpop.f32.mrf.mxu2 }
 0x13d   : > { %v9031_v38 = vpop.eup %9030  ;;  %v1577_v46 = vsel %vm1574_vm12, %v1576_v16, %v1572_v52  ;;  %9042 = vpow2.f32 %v7705_v54  ;;  %7574 = vmatmul.msk.bf16.gmra.mxu1 %vm474_vm0, %v430_v57  ;;  %v460_v1 = vpack.c.bf16 %v399_v50, %v398_v61  ;;  %vm2019_vm13 = vweird.f32 %v11823_v21 }
 0x13e   : > { %v9033_v18 = vpop.eup %9032  ;;  %v11851_v35 = vmul.f32 %v1577_v46, %v11645_v27   ;;  %v11853_v58 = vadd.f32 1.0, %v9031_v38  ;;  %vm11864_vm14 = vcmp.eq.f32.partialorder %v2023_v20, 8.507059e+37  ;;  %v2025_v40 = vand.u32 2147483648, %v11823_v21 }
 0x13f   : > { %v9035_v48 = vpop.eup %9034  ;;  %v11857_v55 = vadd.f32 1.0, %v9033_v18  ;;  %v11885_v18 = vadd.f32 %v11591_v41, %v839_v10 }
 0x140   : > { %18201 = vst [vmem:[#allocation31_spill] sm:$0xff] %v11851_v35  ;;  %v9037_v56 = vpop.eup %9036  ;;  %v2015_v27 = vmul.f32 %v9035_v48, %v11823_v21  ;;  %9044 = vrcp.f32 %v11853_v58  ;;  %v2475_v54 = vand.u32 2147483648, %v11853_v58  ;;  %v2473_v52 = vand.u32 2147483647, %v11853_v58 }
 0x141   : > { %v9039_v49 = vpop.eup %9038  ;;  %9046 = vrcp.f32 %v11857_v55  ;;  %v11871_v62 = vadd.f32 1.0, %v9037_v56  ;;  %v2925_v24 = vand.u32 2147483648, %v11857_v55  ;;  %vm2020_vm15 = vweird.f32 %v9035_v48 }
 0x142   : > { %v9041_v14 = vpop.eup %9040  ;;  %v2016_v16 = vsub.f32 1.0, %v2015_v27  ;;  %9048 = vpow2.f32 %v7616_v36  ;;  %7589 = vmatmul.msk.bf16.gmra.mxu2 %vm474_vm0, %v445_v60  ;;  %v11876_v61 = vadd.f32 1.0, %v9039_v49  ;;  %v2923_v38 = vand.u32 2147483647, %v11857_v55  ;;  %vm2021_vm5 = vmor %vm2019_vm13, %vm2020_vm15 }
 0x143   : > { %9050 = vpow2.f32 %v7646_v8  ;;  %7604 = vmatmul.msk.bf16.gmra.mxu3 %vm474_vm0, %v460_v1  ;;  %v9043_v46 = vpop.eup %9042  ;;  %v2026_v20 = vor.u32 1.1754944e-38, %v2025_v40  ;;  %v11882_v57 = vadd.f32 1.0, %v9041_v14  ;;  %vm2469_vm1 = vweird.f32 %v11853_v58 }
 0x144   : > { %v2017_v50 = vmul.f32 %v9035_v48, %v2016_v16  ;;  %9052 = vrcp.f32 %v11871_v62  ;;  %v2476_v8 = vor.u32 1.1754944e-38, %v2475_v54  ;;  %vm2919_vm2 = vweird.f32 %v11857_v55 }
 0x145   : > { %9054 = vrcp.f32 %v11876_v61  ;;  %vm11892_vm3 = vcmp.eq.f32.partialorder %v2473_v52, 8.507059e+37  ;;  %v2926_v49 = vor.u32 1.1754944e-38, %v2925_v24  ;;  %v1588_v40 = vand.u32 2147483647, %v11871_v62 }
 0x146   : > { %v9045_v36 = vpop.eup %9044  ;;  %v2018_v60 = vadd.f32 %v9035_v48, %v2017_v50  ;;  %v1590_v14 = vand.u32 2147483648, %v11871_v62  ;;  %vm11899_vm4 = vcmp.eq.f32.partialorder %v2923_v38, 8.507059e+37  ;;  %v2038_v21 = vand.u32 2147483647, %v11876_v61 }
 0x147   : > { %v9047_v1 = vpop.eup %9046  ;;  %v2465_v56 = vmul.f32 %v9045_v36, %v11853_v58  ;;  %v2040_v52 = vand.u32 2147483648, %v11876_v61  ;;  %vm1584_vm6 = vweird.f32 %v11871_v62  ;;  %9056 = vrcp.f32 %v11882_v57 }
 0x148   : > { %v9049_v16 = vpop.eup %9048  ;;  %v2022_v10 = vsel %vm2021_vm5, %v9035_v48, %v2018_v60  ;;  %v2915_v54 = vmul.f32 %v9047_v1, %v11857_v55  ;;  %vm2470_vm7 = vweird.f32 %v9045_v36  ;;  %vm2034_vm8 = vweird.f32 %v11876_v61 }
 0x149   : > { %v9051_v19 = vpop.eup %9050  ;;  %v2027_v24 = vsel %vm11864_vm14, %v2026_v20, %v2022_v10  ;;  %v2466_v63 = vsub.f32 1.0, %v2465_v56  ;;  %vm2920_vm9 = vweird.f32 %v9047_v1  ;;  %vm11914_vm10 = vcmp.eq.f32.partialorder %v1588_v40, 8.507059e+37  ;;  %vm2471_vm12 = vmor %vm2469_vm1, %vm2470_vm7 }
 0x14a   : > { %v9053_v48 = vpop.eup %9052  ;;  %v11910_v60 = vmul.f32 %v2027_v24, %v11661_v15   ;;  %v2916_v38 = vsub.f32 1.0, %v2915_v54  ;;  %v1591_v20 = vor.u32 1.1754944e-38, %v1590_v14  ;;  %vm11919_vm11 = vcmp.eq.f32.partialorder %v2038_v21, 8.507059e+37  ;;  %vm2921_vm5 = vmor %vm2919_vm2, %vm2920_vm9 }
 0x14b   : > { %v9055_v35 = vpop.eup %9054  ;;  %v2467_v22 = vmul.f32 %v9045_v36, %v2466_v63  ;;  %v1580_v17 = vmul.f32 %v9053_v48, %v11871_v62  ;;  %v2041_v54 = vor.u32 1.1754944e-38, %v2040_v52  ;;  %v2488_v63 = vand.u32 2147483647, %v11882_v57 }
 0x14c   : > { %18208 = vst [vmem:[#allocation32_spill] sm:$0xff] %v11910_v60  ;;  %v2917_v56 = vmul.f32 %v9047_v1, %v2916_v38  ;;  %v2030_v10 = vmul.f32 %v9055_v35, %v11876_v61  ;;  %v11924_v25 = vadd.f32 1.0, %v9043_v46  ;;  %vm1585_vm13 = vweird.f32 %v9053_v48 }
 0x14d   : > { %v2468_v24 = vadd.f32 %v9045_v36, %v2467_v22  ;;  %v1581_v7 = vsub.f32 1.0, %v1580_v17  ;;  %vm2035_vm14 = vweird.f32 %v9055_v35  ;;  %vm2484_vm15 = vweird.f32 %v11882_v57  ;;  %v9057_v21 = vpop.eup %9056  ;;  %vm1586_vm1 = vmor %vm1584_vm6, %vm1585_vm13 }
 0x14e   : > { %v2918_v40 = vadd.f32 %v9047_v1, %v2917_v56  ;;  %v2031_v14 = vsub.f32 1.0, %v2030_v10  ;;  %9058 = vrcp.f32 %v11924_v25  ;;  %v11934_v17 = vadd.f32 1.0, %v9049_v16  ;;  %vm2036_vm2 = vmor %vm2034_vm8, %vm2035_vm14 }
 0x14f   : > { %v2472_v38 = vsel %vm2471_vm12, %v9045_v36, %v2468_v24  ;;  %v1582_v22 = vmul.f32 %v9053_v48, %v1581_v7  ;;  %v2480_v56 = vmul.f32 %v9057_v21, %v11882_v57  ;;  %v2490_v7 = vand.u32 2147483648, %v11882_v57  ;;  %v914_v24 = vpop.f32.mrf.mxu3 }
 0x150   : > { %v2477_v58 = vsel %vm11892_vm3, %v2476_v8, %v2472_v38  ;;  %v2922_v46 = vsel %vm2921_vm5, %v9047_v1, %v2918_v40  ;;  %v2032_v52 = vmul.f32 %v9055_v35, %v2031_v14  ;;  %v11951_v27 = vadd.f32 1.0, %v9051_v19  ;;  %v766_v19 = vpop.f32.mrf.mxu1 }
 0x151   : > { %v11940_v10 = vmul.f32 %v2477_v58, %v11787_v34   ;;  %v2927_v36 = vsel %vm11899_vm4, %v2926_v49, %v2922_v46  ;;  %v1583_v55 = vadd.f32 %v9053_v48, %v1582_v22  ;;  %v2481_v1 = vsub.f32 1.0, %v2480_v56 }
 0x152   : > { %v11946_v16 = vmul.f32 %v2927_v36, %v11797_v42   ;;  %v2033_v8 = vadd.f32 %v9055_v35, %v2032_v52  ;;  %vm2485_vm3 = vweird.f32 %v9057_v21  ;;  %v2938_v49 = vand.u32 2147483647, %v11924_v25  ;;  %v691_v42 = vpop.f32.mrf.mxu0 }
 0x153   : > { %18213 = vst [vmem:[#allocation33_spill] sm:$0xff] %v11940_v10  ;;  %v1587_v34 = vsel %vm1586_vm1, %v9053_v48, %v1583_v55  ;;  %9060 = vrcp.f32 %v11934_v17  ;;  %v2482_v40 = vmul.f32 %v9057_v21, %v2481_v1  ;;  %v2940_v14 = vand.u32 2147483648, %v11924_v25  ;;  %vm2486_vm6 = vmor %vm2484_vm15, %vm2485_vm3  ;;  %v841_v1 = vpop.f32.mrf.mxu2 }
 0x154   : > { %v1592_v50 = vsel %vm11914_vm10, %v1591_v20, %v1587_v34  ;;  %v2037_v62 = vsel %vm2036_vm2, %v9055_v35, %v2033_v8  ;;  %v9059_v38 = vpop.eup %9058  ;;  %vm11966_vm4 = vcmp.eq.f32.partialorder %v2488_v63, 8.507059e+37  ;;  %v2491_v58 = vor.u32 1.1754944e-38, %v2490_v7 }
 0x155   : > { %v11962_v48 = vmul.f32 %v1592_v50, %v11800_v9   ;;  %v2042_v61 = vsel %vm11919_vm11, %v2041_v54, %v2037_v62  ;;  %v2483_v35 = vadd.f32 %v9057_v21, %v2482_v40  ;;  %v2930_v20 = vmul.f32 %v9059_v38, %v11924_v25 }
 0x156   : > { %v11971_v37 = vmul.f32 %v2042_v61, %v11813_v39   ;;  %v1603_v46 = vand.u32 2147483647, %v11934_v17  ;;  %vm2934_vm7 = vweird.f32 %v11924_v25  ;;  %vm11979_vm8 = vcmp.eq.f32.partialorder %v2938_v49, 8.507059e+37  ;;  %v311_v25 = vld [vmem:[%s10904_s14 + $0xe8] sm:$0xff] }
 0x157   : > { %18214 = vst [vmem:[#allocation34_spill] sm:$0xff] %v11962_v48  ;;  %vm1599_vm9 = vweird.f32 %v11934_v17  ;;  %9062 = vrcp.f32 %v11951_v27  ;;  %v2487_v39 = vsel %vm2486_vm6, %v9057_v21, %v2483_v35  ;;  %v2931_v15 = vsub.f32 1.0, %v2930_v20  ;;  %v916_v50 = vpop.f32.mrf.mxu3  ;;  %v371_v48 = vld [vmem:[%s10904_s14 + $0x2c8] sm:$0xff] }
 0x158   : > { %18217 = vst [vmem:[#allocation35_spill] sm:$0xff] %v11971_v37  ;;  %vm2935_vm10 = vweird.f32 %v9059_v38  ;;  %v2941_v54 = vor.u32 1.1754944e-38, %v2940_v14  ;;  %v2492_v52 = vsel %vm11966_vm4, %v2491_v58, %v2487_v39  ;;  %v1605_v57 = vand.u32 2147483648, %v11934_v17  ;;  %v769_v39 = vpop.f32.mrf.mxu1 }
 0x159   : > { %v9061_v63 = vpop.eup %9060  ;;  %v7676_v56 = vmul.f32 -1.442695, %v11885_v18  ;;  %v11990_v36 = vadd.f32 %v11591_v41, %v914_v24  ;;  %v11993_v55 = vmul.f32 %v2492_v52, %v11816_v59   ;;  %v2932_v7 = vmul.f32 %v9059_v38, %v2931_v15  ;;  %vm2936_vm13 = vmor %vm2934_vm7, %vm2935_vm10  ;;  %v310_v15 = vld [vmem:[%s10904_s14 + $0xe0] sm:$0xff] }
 0x15a   : > { %v1595_v21 = vmul.f32 %v9061_v63, %v11934_v17  ;;  %vm11996_vm11 = vcmp.eq.f32.partialorder %v1603_v46, 8.507059e+37  ;;  %vm2049_vm12 = vweird.f32 %v11951_v27  ;;  %v2053_v34 = vand.u32 2147483647, %v11951_v27  ;;  %v694_v35 = vpop.f32.mrf.mxu0 }
 0x15b   : > { %18220 = vst [vmem:[#allocation36_spill] sm:$0xff] %v11993_v55  ;;  %v2055_v49 = vand.u32 2147483648, %v11951_v27  ;;  %9064 = vpow2.f32 %v7676_v56  ;;  %v7706_v24 = vmul.f32 -1.442695, %v11990_v36  ;;  %v2933_v59 = vadd.f32 %v9059_v38, %v2932_v7 }
 0x15c   : > { %v1596_v62 = vsub.f32 1.0, %v1595_v21  ;;  %v12005_v40 = vadd.f32 %v11591_v41, %v691_v42  ;;  %v12008_v14 = vadd.f32 %v11591_v41, %v766_v19  ;;  %vm1600_vm14 = vweird.f32 %v9061_v63 }
 0x15d   : > { %v9063_v61 = vpop.eup %9062  ;;  %v1606_v22 = vor.u32 1.1754944e-38, %v1605_v57  ;;  %9066 = vpow2.f32 %v7706_v24  ;;  %v12014_v58 = vadd.f32 %v11591_v41, %v841_v1  ;;  %v2937_v20 = vsel %vm2936_vm13, %v9059_v38, %v2933_v59  ;;  %v341_v59 = vld [vmem:[%s10904_s14 + $0x1d8] sm:$0xff]  ;;  %vm1601_vm15 = vmor %vm1599_vm9, %vm1600_vm14 }
 0x15e   : > { %v1597_v42 = vmul.f32 %v9061_v63, %v1596_v62  ;;  %v2045_v46 = vmul.f32 %v9063_v61, %v11951_v27  ;;  %v12018_v19 = vadd.f32 %v11591_v41, %v916_v50  ;;  %v2942_v52 = vsel %vm11979_vm8, %v2941_v54, %v2937_v20  ;;  %v340_v50 = vld [vmem:[%s10904_s14 + $0x1d0] sm:$0xff] }
 0x15f   : > { %v7617_v57 = vmul.f32 -1.442695, %v12005_v40  ;;  %v7647_v56 = vmul.f32 -1.442695, %v12008_v14  ;;  %v7677_v7 = vmul.f32 -1.442695, %v12014_v58  ;;  %v12028_v38 = vmul.f32 %v2942_v52, %v11819_v31  }
 0x160   : > { %v1598_v21 = vadd.f32 %v9061_v63, %v1597_v42  ;;  %v2046_v1 = vsub.f32 1.0, %v2045_v46  ;;  %v12031_v24 = vadd.f32 %v11591_v41, %v694_v35  ;;  %vm2050_vm5 = vweird.f32 %v9063_v61  ;;  %v370_v42 = vld [vmem:[%s10904_s14 + $0x2c0] sm:$0xff] }
 0x161   : > { %v9065_v62 = vpop.eup %9064  ;;  %9068 = vpow2.f32 %v7617_v57  ;;  %v12039_v31 = vadd.f32 %v11591_v41, %v769_v39  ;;  %v416_v9 = vpack.c.bf16 %v311_v25, %v310_v15  ;;  %v431_v52 = vpack.c.bf16 %v341_v59, %v340_v50  ;;  %v400_v57 = vld [vmem:[%s10904_s14 + $0x3b0] sm:$0xff]  ;;  %vm2051_vm1 = vmor %vm2049_vm12, %vm2050_vm5 }
 0x162   : > { %v1602_v54 = vsel %vm1601_vm15, %v9061_v63, %v1598_v21  ;;  %v2047_v20 = vmul.f32 %v9063_v61, %v2046_v1  ;;  %v12041_v35 = vadd.f32 1.0, %v9065_v62  ;;  %9070 = vpow2.f32 %v7647_v56 }
 0x163   : > { %v9067_v46 = vpop.eup %9066  ;;  %v1607_v17 = vsel %vm11996_vm11, %v1606_v22, %v1602_v54  ;;  %9072 = vpow2.f32 %v7677_v7  ;;  %7560 = vmatmul.msk.bf16.gmra.mxu0 %vm474_vm0, %v416_v9  ;;  %v7707_v15 = vmul.f32 -1.442695, %v12018_v19  ;;  %vm2054_vm2 = vcmp.eq.f32.partialorder %v2053_v34, 8.507059e+37  ;;  %7575 = vmatmul.msk.bf16.gmra.mxu1 %vm474_vm0, %v431_v52 }
 0x164   : > { %v12051_v39 = vmul.f32 %v1607_v17, %v11834_v47   ;;  %v2048_v63 = vadd.f32 %v9063_v61, %v2047_v20  ;;  %9074 = vrcp.f32 %v12041_v35  ;;  %v2056_v8 = vor.u32 1.1754944e-38, %v2055_v49  ;;  %v844_v20 = vpop.f32.mrf.mxu2 }
 0x165   : > { %v12058_v22 = vadd.f32 1.0, %v9067_v46  ;;  %v7618_v25 = vmul.f32 -1.442695, %v12031_v24  ;;  %v7648_v47 = vmul.f32 -1.442695, %v12039_v31  ;;  %v446_v7 = vpack.c.bf16 %v371_v48, %v370_v42 }
 0x166   : > { %18223 = vst [vmem:[#allocation37_spill] sm:$0xff] %v12051_v39  ;;  %v2052_v56 = vsel %vm2051_vm1, %v9063_v61, %v2048_v63  ;;  %v461_v21 = vpack.c.bf16 %v401_v51, %v400_v57  ;;  %v2503_v59 = vand.u32 2147483647, %v12041_v35  ;;  %v2505_v49 = vand.u32 2147483648, %v12041_v35  ;;  %v919_v57 = vpop.f32.mrf.mxu3 }
 0x167   : > { %v9069_v1 = vpop.eup %9068  ;;  %v2057_v50 = vsel %vm2054_vm2, %v2056_v8, %v2052_v56  ;;  %9076 = vrcp.f32 %v12058_v22  ;;  %7590 = vmatmul.msk.bf16.gmra.mxu2 %vm474_vm0, %v446_v7  ;;  %v2953_v9 = vand.u32 2147483647, %v12058_v22  ;;  %v2955_v54 = vand.u32 2147483648, %v12058_v22 }
 0x168   : > { %v9071_v27 = vpop.eup %9070  ;;  %v12066_v34 = vmul.f32 %v2057_v50, %v11843_v23   ;;  %9078 = vpow2.f32 %v7707_v15  ;;  %7605 = vmatmul.msk.bf16.gmra.mxu3 %vm474_vm0, %v461_v21  ;;  %v12071_v48 = vadd.f32 1.0, %v9069_v1  ;;  %vm2499_vm3 = vweird.f32 %v12041_v35 }
 0x169   : > { %v9073_v61 = vpop.eup %9072  ;;  %v12073_v51 = vadd.f32 1.0, %v9071_v27  ;;  %9080 = vpow2.f32 %v7618_v25  ;;  %vm12081_vm0 = vcmp.eq.f32.partialorder %v2503_v59, 8.507059e+37  ;;  %v2506_v17 = vor.u32 1.1754944e-38, %v2505_v49 }
 0x16a   : > { %18224 = vst [vmem:[#allocation38_spill] sm:$0xff] %v12066_v34  ;;  %v9075_v62 = vpop.eup %9074  ;;  %v12077_v23 = vadd.f32 1.0, %v9073_v61  ;;  %9082 = vpow2.f32 %v7648_v47  ;;  %vm2949_vm4 = vweird.f32 %v12058_v22  ;;  %v1620_v52 = vand.u32 2147483648, %v12071_v48 }
 0x16b   : > { %v2495_v42 = vmul.f32 %v9075_v62, %v12041_v35  ;;  %9084 = vrcp.f32 %v12071_v48  ;;  %v2070_v8 = vand.u32 2147483648, %v12073_v51  ;;  %v12092_v25 = vadd.f32 %v11591_v41, %v844_v20 }
 0x16c   : > { %9086 = vrcp.f32 %v12073_v51  ;;  %vm12095_vm6 = vcmp.eq.f32.partialorder %v2953_v9, 8.507059e+37  ;;  %v2956_v21 = vor.u32 1.1754944e-38, %v2955_v54  ;;  %v1618_v1 = vand.u32 2147483647, %v12071_v48  ;;  %v846_v35 = vpop.f32.mrf.mxu2 }
 0x16d   : > { %v9077_v63 = vpop.eup %9076  ;;  %v2496_v15 = vsub.f32 1.0, %v2495_v42  ;;  %9088 = vrcp.f32 %v12077_v23  ;;  %vm2500_vm7 = vweird.f32 %v9075_v62  ;;  %v2068_v27 = vand.u32 2147483647, %v12073_v51 }
 0x16e   : > { %v9079_v56 = vpop.eup %9078  ;;  %v2945_v47 = vmul.f32 %v9077_v63, %v12058_v22  ;;  %v12102_v49 = vadd.f32 %v11591_v41, %v919_v57  ;;  %vm2950_vm8 = vweird.f32 %v9077_v63  ;;  %vm1614_vm9 = vweird.f32 %v12071_v48  ;;  %vm2501_vm11 = vmor %vm2499_vm3, %vm2500_vm7 }
 0x16f   : > { %v9081_v50 = vpop.eup %9080  ;;  %v2497_v59 = vmul.f32 %v9075_v62, %v2496_v15  ;;  %v1621_v9 = vor.u32 1.1754944e-38, %v1620_v52  ;;  %vm2064_vm10 = vweird.f32 %v12073_v51  ;;  %v2071_v54 = vor.u32 1.1754944e-38, %v2070_v8  ;;  %vm2951_vm5 = vmor %vm2949_vm4, %vm2950_vm8 }
 0x170   : > { %v9083_v61 = vpop.eup %9082  ;;  %v2946_v20 = vsub.f32 1.0, %v2945_v47  ;;  %v2518_v53 = vand.u32 2147483647, %v12077_v23  ;;  %v12107_v15 = vadd.f32 1.0, %v9079_v56  ;;  %vm12113_vm12 = vcmp.eq.f32.partialorder %v1618_v1, 8.507059e+37 }
 0x171   : > { %v9085_v42 = vpop.eup %9084  ;;  %v2498_v39 = vadd.f32 %v9075_v62, %v2497_v59  ;;  %vm2514_vm13 = vweird.f32 %v12077_v23  ;;  %v2520_v52 = vand.u32 2147483648, %v12077_v23  ;;  %v12119_v8 = vadd.f32 1.0, %v9081_v50 }
 0x172   : > { %v9087_v45 = vpop.eup %9086  ;;  %v2947_v41 = vmul.f32 %v9077_v63, %v2946_v20  ;;  %v1610_v57 = vmul.f32 %v9085_v42, %v12071_v48  ;;  %vm1615_vm14 = vweird.f32 %v9085_v42  ;;  %vm12122_vm15 = vcmp.eq.f32.partialorder %v2068_v27, 8.507059e+37 }
 0x173   : > { %v9089_v56 = vpop.eup %9088  ;;  %v2502_v59 = vsel %vm2501_vm11, %v9075_v62, %v2498_v39  ;;  %v2060_v13 = vmul.f32 %v9087_v45, %v12073_v51  ;;  %v12126_v20 = vadd.f32 1.0, %v9083_v61  ;;  %vm2065_vm1 = vweird.f32 %v9087_v45  ;;  %vm1616_vm3 = vmor %vm1614_vm9, %vm1615_vm14 }
 0x174   : > { %v2507_v1 = vsel %vm12081_vm0, %v2506_v17, %v2502_v59  ;;  %v2948_v60 = vadd.f32 %v9077_v63, %v2947_v41  ;;  %v1611_v37 = vsub.f32 1.0, %v1610_v57  ;;  %v2510_v34 = vmul.f32 %v9089_v56, %v12077_v23  ;;  %v696_v57 = vpop.f32.mrf.mxu0  ;;  %vm2066_vm4 = vmor %vm2064_vm10, %vm2065_vm1 }
 0x175   : > { %v12132_v50 = vmul.f32 %v2507_v1, %v11885_v18   ;;  %v2061_v39 = vsub.f32 1.0, %v2060_v13  ;;  %9090 = vrcp.f32 %v12107_v15  ;;  %vm2515_vm2 = vweird.f32 %v9089_v56 }
 0x176   : > { %v2952_v62 = vsel %vm2951_vm5, %v9077_v63, %v2948_v60  ;;  %v1612_v27 = vmul.f32 %v9085_v42, %v1611_v37  ;;  %v2511_v61 = vsub.f32 1.0, %v2510_v34  ;;  %v2968_v41 = vand.u32 2147483647, %v12107_v15  ;;  %v771_v60 = vpop.f32.mrf.mxu1  ;;  %vm2516_vm7 = vmor %vm2514_vm13, %vm2515_vm2 }
 0x177   : > { %18233 = vst [vmem:[#allocation39_spill] sm:$0xff] %v12132_v50  ;;  %v2957_v46 = vsel %vm12095_vm6, %v2956_v21, %v2952_v62  ;;  %v2062_v17 = vmul.f32 %v9087_v45, %v2061_v39  ;;  %v2970_v18 = vand.u32 2147483648, %v12107_v15  ;;  %9092 = vrcp.f32 %v12119_v8 }
 0x178   : > { %v12143_v22 = vmul.f32 %v2957_v46, %v11990_v36   ;;  %v1613_v13 = vadd.f32 %v9085_v42, %v1612_v27  ;;  %v2512_v59 = vmul.f32 %v9089_v56, %v2511_v61  ;;  %vm12149_vm0 = vcmp.eq.f32.partialorder %v2518_v53, 8.507059e+37 }
 0x179   : > { %v2063_v37 = vadd.f32 %v9087_v45, %v2062_v17  ;;  %v2521_v63 = vor.u32 1.1754944e-38, %v2520_v52  ;;  %v7678_v7 = vmul.f32 -1.442695, %v12092_v25  ;;  %vm2964_vm6 = vweird.f32 %v12107_v15 }
 0x17a   : > { %v1617_v21 = vsel %vm1616_vm3, %v9085_v42, %v1613_v13  ;;  %v2513_v36 = vadd.f32 %v9089_v56, %v2512_v59  ;;  %v2971_v1 = vor.u32 1.1754944e-38, %v2970_v18  ;;  %v1635_v52 = vand.u32 2147483648, %v12119_v8 }
 0x17b   : > { %v9091_v39 = vpop.eup %9090  ;;  %v1622_v48 = vsel %vm12113_vm12, %v1621_v9, %v1617_v21  ;;  %v2067_v53 = vsel %vm2066_vm4, %v9087_v45, %v2063_v37  ;;  %9094 = vrcp.f32 %v12126_v20  ;;  %vm12171_vm8 = vcmp.eq.f32.partialorder %v2968_v41, 8.507059e+37 }
 0x17c   : > { %v12166_v51 = vmul.f32 %v1622_v48, %v12005_v40   ;;  %v2072_v42 = vsel %vm12122_vm15, %v2071_v54, %v2067_v53  ;;  %v2517_v62 = vsel %vm2516_vm7, %v9089_v56, %v2513_v36  ;;  %v2960_v27 = vmul.f32 %v9091_v39, %v12107_v15  ;;  %v699_v21 = vpop.f32.mrf.mxu0 }
 0x17d   : > { %v12176_v45 = vmul.f32 %v2072_v42, %v12008_v14   ;;  %v2522_v23 = vsel %vm12149_vm0, %v2521_v63, %v2517_v62  ;;  %vm1629_vm9 = vweird.f32 %v12119_v8  ;;  %v1633_v40 = vand.u32 2147483647, %v12119_v8  ;;  %v9093_v47 = vpop.eup %9092 }
 0x17e   : > { %18236 = vst [vmem:[#allocation40_spill] sm:$0xff] %v12166_v51  ;;  %v12183_v54 = vmul.f32 %v2522_v23, %v12014_v58   ;;  %v2961_v56 = vsub.f32 1.0, %v2960_v27  ;;  %vm2965_vm10 = vweird.f32 %v9091_v39  ;;  %vm2079_vm11 = vweird.f32 %v12126_v20  ;;  %v12192_v58 = vld [vmem:[%s18102_s2] ss:$0 sm:$0xff]  ;;  %v774_v53 = vpop.f32.mrf.mxu1 }
 0x17f   : > { %18239 = vst [vmem:[#allocation41_spill] sm:$0xff] %v12176_v45  ;;  %v1625_v61 = vmul.f32 %v9093_v47, %v12119_v8  ;;  %v1636_v14 = vor.u32 1.1754944e-38, %v1635_v52  ;;  %v2083_v46 = vand.u32 2147483647, %v12126_v20  ;;  %9096 = vpow2.f32 %v7678_v7  ;;  %v921_v7 = vpop.f32.mrf.mxu3  ;;  %vm2966_vm14 = vmor %vm2964_vm6, %vm2965_vm10 }
 0x180   : > { %18240 = vst [vmem:[#allocation42_spill] sm:$0xff] %v12183_v54  ;;  %v2962_v17 = vmul.f32 %v9091_v39, %v2961_v56  ;;  %vm1630_vm12 = vweird.f32 %v9093_v47  ;;  %v7708_v41 = vmul.f32 -1.442695, %v12102_v49  ;;  %v12195_v18 = vadd.f32 %v12192_v58, %v696_v57 }
 0x181   : > { %v9095_v13 = vpop.eup %9094  ;;  %v1626_v59 = vsub.f32 1.0, %v1625_v61  ;;  %v2085_v37 = vand.u32 2147483648, %v12126_v20  ;;  %v12199_v34 = vadd.f32 %v12192_v58, %v771_v60  ;;  %v12202_v63 = vadd.f32 %v12192_v58, %v846_v35  ;;  %vm1631_vm15 = vmor %vm1629_vm9, %vm1630_vm12 }
 0x182   : > { %v2963_v36 = vadd.f32 %v9091_v39, %v2962_v17  ;;  %v2075_v48 = vmul.f32 %v9095_v13, %v12126_v20  ;;  %vm2080_vm13 = vweird.f32 %v9095_v13  ;;  %9098 = vpow2.f32 %v7708_v41 }
 0x183   : > { %v1627_v57 = vmul.f32 %v9093_v47, %v1626_v59  ;;  %v7619_v52 = vmul.f32 -1.442695, %v12195_v18  ;;  %v7649_v60 = vmul.f32 -1.442695, %v12199_v34  ;;  %v7679_v42 = vmul.f32 -1.442695, %v12202_v63  ;;  %vm2081_vm1 = vmor %vm2079_vm11, %vm2080_vm13 }
 0x184   : > { %v2967_v62 = vsel %vm2966_vm14, %v9091_v39, %v2963_v36  ;;  %v2076_v27 = vsub.f32 1.0, %v2075_v48  ;;  %v12212_v23 = vadd.f32 %v12192_v58, %v921_v7  ;;  %v12215_v56 = vadd.f32 %v12192_v58, %v699_v21 }
 0x185   : > { %v9097_v35 = vpop.eup %9096  ;;  %v2972_v15 = vsel %vm12171_vm8, %v2971_v1, %v2967_v62  ;;  %v1628_v61 = vadd.f32 %v9093_v47, %v1627_v57  ;;  %9100 = vpow2.f32 %v7619_v52  ;;  %v12220_v17 = vadd.f32 %v12192_v58, %v774_v53  ;;  %v849_v52 = vpop.f32.mrf.mxu2 }
 0x186   : > { %v12223_v41 = vmul.f32 %v2972_v15, %v12018_v19   ;;  %v2077_v39 = vmul.f32 %v9095_v13, %v2076_v27  ;;  %v12228_v59 = vadd.f32 1.0, %v9097_v35  ;;  %9102 = vpow2.f32 %v7649_v60 }
 0x187   : > { %v1632_v7 = vsel %vm1631_vm15, %v9093_v47, %v1628_v61  ;;  %vm1634_vm5 = vcmp.eq.f32.partialorder %v1633_v40, 8.507059e+37  ;;  %9104 = vpow2.f32 %v7679_v42  ;;  %v7709_v36 = vmul.f32 -1.442695, %v12212_v23 }
 0x188   : > { %v9099_v1 = vpop.eup %9098  ;;  %v1637_v9 = vsel %vm1634_vm5, %v1636_v14, %v1632_v7  ;;  %v2078_v21 = vadd.f32 %v9095_v13, %v2077_v39  ;;  %9106 = vrcp.f32 %v12228_v59  ;;  %v2086_v8 = vor.u32 1.1754944e-38, %v2085_v37 }
 0x189   : > { %v12233_v19 = vmul.f32 %v1637_v9, %v12031_v24   ;;  %v12238_v48 = vadd.f32 1.0, %v9099_v1  ;;  %v7620_v40 = vmul.f32 -1.442695, %v12215_v56  ;;  %vm2084_vm2 = vcmp.eq.f32.partialorder %v2083_v46, 8.507059e+37 }
 0x18a   : > { %v2082_v47 = vsel %vm2081_vm1, %v9095_v13, %v2078_v21  ;;  %v7650_v14 = vmul.f32 -1.442695, %v12220_v17  ;;  %v2533_v20 = vand.u32 2147483647, %v12228_v59  ;;  %v2535_v37 = vand.u32 2147483648, %v12228_v59 }
 0x18b   : > { %18241 = vst [vmem:[#allocation43_spill] sm:$0xff] %v12233_v19  ;;  %v9101_v53 = vpop.eup %9100  ;;  %v2087_v57 = vsel %vm2084_vm2, %v2086_v8, %v2082_v47  ;;  %9108 = vrcp.f32 %v12238_v48  ;;  %v2983_v27 = vand.u32 2147483647, %v12238_v48  ;;  %v2985_v61 = vand.u32 2147483648, %v12238_v48 }
 0x18c   : > { %v9103_v24 = vpop.eup %9102  ;;  %v12244_v60 = vmul.f32 %v2087_v57, %v12039_v31   ;;  %9110 = vpow2.f32 %v7709_v36  ;;  %v12248_v62 = vadd.f32 1.0, %v9101_v53  ;;  %v12256_v31 = vadd.f32 %v12192_v58, %v849_v52 }
 0x18d   : > { %v9105_v42 = vpop.eup %9104  ;;  %v12250_v46 = vadd.f32 1.0, %v9103_v24  ;;  %9112 = vpow2.f32 %v7620_v40  ;;  %vm2529_vm3 = vweird.f32 %v12228_v59  ;;  %vm12262_vm0 = vcmp.eq.f32.partialorder %v2533_v20, 8.507059e+37 }
 0x18e   : > { %18242 = vst [vmem:[#allocation44_spill] sm:$0xff] %v12244_v60  ;;  %v9107_v13 = vpop.eup %9106  ;;  %v12253_v35 = vadd.f32 1.0, %v9105_v42  ;;  %9114 = vpow2.f32 %v7650_v14  ;;  %v2536_v7 = vor.u32 1.1754944e-38, %v2535_v37  ;;  %vm2979_vm4 = vweird.f32 %v12238_v48 }
 0x18f   : > { %v2525_v15 = vmul.f32 %v9107_v13, %v12228_v59  ;;  %9116 = vrcp.f32 %v12248_v62  ;;  %v1650_v21 = vand.u32 2147483648, %v12248_v62  ;;  %vm12271_vm6 = vcmp.eq.f32.partialorder %v2983_v27, 8.507059e+37 }
 0x190   : > { %9118 = vrcp.f32 %v12250_v46  ;;  %v1648_v47 = vand.u32 2147483647, %v12248_v62  ;;  %v7680_v14 = vmul.f32 -1.442695, %v12256_v31  ;;  %vm2530_vm7 = vweird.f32 %v9107_v13 }
 0x191   : > { %v9109_v1 = vpop.eup %9108  ;;  %v2526_v9 = vsub.f32 1.0, %v2525_v15  ;;  %9120 = vrcp.f32 %v12253_v35  ;;  %v2986_v52 = vor.u32 1.1754944e-38, %v2985_v61  ;;  %v2098_v24 = vand.u32 2147483647, %v12250_v46  ;;  %vm2531_vm11 = vmor %vm2529_vm3, %vm2530_vm7 }
 0x192   : > { %v9111_v36 = vpop.eup %9110  ;;  %v2975_v8 = vmul.f32 %v9109_v1, %v12238_v48  ;;  %vm2980_vm8 = vweird.f32 %v9109_v1  ;;  %vm1644_vm9 = vweird.f32 %v12248_v62  ;;  %v2100_v42 = vand.u32 2147483648, %v12250_v46 }
 0x193   : > { %v9113_v53 = vpop.eup %9112  ;;  %v2527_v57 = vmul.f32 %v9107_v13, %v2526_v9  ;;  %v1651_v51 = vor.u32 1.1754944e-38, %v1650_v21  ;;  %vm2094_vm10 = vweird.f32 %v12250_v46  ;;  %v2548_v19 = vand.u32 2147483647, %v12253_v35  ;;  %vm2981_vm14 = vmor %vm2979_vm4, %vm2980_vm8 }
 0x194   : > { %v9115_v20 = vpop.eup %9114  ;;  %v2976_v37 = vsub.f32 1.0, %v2975_v8  ;;  %v12282_v45 = vadd.f32 1.0, %v9111_v36  ;;  %vm12288_vm12 = vcmp.eq.f32.partialorder %v1648_v47, 8.507059e+37  ;;  %v2550_v21 = vand.u32 2147483648, %v12253_v35 }
 0x195   : > { %v9117_v27 = vpop.eup %9116  ;;  %v2528_v15 = vadd.f32 %v9107_v13, %v2527_v57  ;;  %v12293_v57 = vadd.f32 1.0, %v9113_v53  ;;  %vm12296_vm13 = vcmp.eq.f32.partialorder %v2098_v24, 8.507059e+37  ;;  %v12300_v59 = vadd.f32 1.0, %v9115_v20 }
 0x196   : > { %v9119_v9 = vpop.eup %9118  ;;  %v2977_v61 = vmul.f32 %v9109_v1, %v2976_v37  ;;  %v1640_v8 = vmul.f32 %v9117_v27, %v12248_v62  ;;  %9122 = vpow2.f32 %v7680_v14  ;;  %vm1645_vm15 = vweird.f32 %v9117_v27  ;;  %v701_v62 = vpop.f32.mrf.mxu0 }
 0x197   : > { %v9121_v43 = vpop.eup %9120  ;;  %v2532_v44 = vsel %vm2531_vm11, %v9107_v13, %v2528_v15  ;;  %v2090_v36 = vmul.f32 %v9119_v9, %v12250_v46  ;;  %9124 = vrcp.f32 %v12282_v45  ;;  %vm2095_vm5 = vweird.f32 %v9119_v9  ;;  %vm1646_vm2 = vmor %vm1644_vm9, %vm1645_vm15 }
 0x198   : > { %v2537_v47 = vsel %vm12262_vm0, %v2536_v7, %v2532_v44  ;;  %v2978_v37 = vadd.f32 %v9109_v1, %v2977_v61  ;;  %v1641_v4 = vsub.f32 1.0, %v1640_v8  ;;  %v2540_v30 = vmul.f32 %v9121_v43, %v12253_v35  ;;  %vm2096_vm0 = vmor %vm2094_vm10, %vm2095_vm5 }
 0x199   : > { %v12306_v53 = vmul.f32 %v2537_v47, %v12092_v25   ;;  %v2091_v13 = vsub.f32 1.0, %v2090_v36  ;;  %vm2545_vm1 = vweird.f32 %v9121_v43  ;;  %v2998_v25 = vand.u32 2147483647, %v12282_v45  ;;  %v924_v36 = vpop.f32.mrf.mxu3 }
 0x19a   : > { %v2982_v24 = vsel %vm2981_vm14, %v9109_v1, %v2978_v37  ;;  %v1642_v14 = vmul.f32 %v9117_v27, %v1641_v4  ;;  %v2541_v39 = vsub.f32 1.0, %v2540_v30  ;;  %9126 = vrcp.f32 %v12293_v57 }
 0x19b   : > { %18251 = vst [vmem:[#allocation45_spill] sm:$0xff] %v12306_v53  ;;  %v2987_v44 = vsel %vm12271_vm6, %v2986_v52, %v2982_v24  ;;  %v2092_v7 = vmul.f32 %v9119_v9, %v2091_v13  ;;  %v2101_v30 = vor.u32 1.1754944e-38, %v2100_v42  ;;  %vm2544_vm3 = vweird.f32 %v12253_v35 }
 0x19c   : > { %v12316_v20 = vmul.f32 %v2987_v44, %v12102_v49   ;;  %v1643_v48 = vadd.f32 %v9117_v27, %v1642_v14  ;;  %v2542_v15 = vmul.f32 %v9121_v43, %v2541_v39  ;;  %v9123_v61 = vpop.eup %9122  ;;  %v3000_v1 = vand.u32 2147483648, %v12282_v45  ;;  %vm2546_vm6 = vmor %vm2544_vm3, %vm2545_vm1  ;;  %v776_v14 = vpop.f32.mrf.mxu1 }
 0x19d   : > { %v2093_v4 = vadd.f32 %v9119_v9, %v2092_v7  ;;  %vm12327_vm4 = vcmp.eq.f32.partialorder %v2548_v19, 8.507059e+37  ;;  %v2551_v8 = vor.u32 1.1754944e-38, %v2550_v21  ;;  %v9125_v47 = vpop.eup %9124  ;;  %vm2994_vm7 = vweird.f32 %v12282_v45 }
 0x19e   : > { %v1647_v40 = vsel %vm1646_vm2, %v9117_v27, %v1643_v48  ;;  %v2543_v49 = vadd.f32 %v9121_v43, %v2542_v15  ;;  %9128 = vrcp.f32 %v12300_v59  ;;  %v2990_v21 = vmul.f32 %v9125_v47, %v12282_v45  ;;  %v851_v15 = vpop.f32.mrf.mxu2 }
 0x19f   : > { %v1652_v42 = vsel %vm12288_vm12, %v1651_v51, %v1647_v40  ;;  %v2097_v35 = vsel %vm2096_vm0, %v9119_v9, %v2093_v4  ;;  %vm12342_vm8 = vcmp.eq.f32.partialorder %v2998_v25, 8.507059e+37  ;;  %v3001_v9 = vor.u32 1.1754944e-38, %v3000_v1 }
 0x1a0   : > { %v12337_v46 = vmul.f32 %v1652_v42, %v12195_v18   ;;  %v2102_v19 = vsel %vm12296_vm13, %v2101_v30, %v2097_v35  ;;  %v2547_v27 = vsel %vm2546_vm6, %v9121_v43, %v2543_v49  ;;  %v1663_v18 = vand.u32 2147483647, %v12293_v57  ;;  %v9127_v13 = vpop.eup %9126 }
 0x1a1   : > { %v12347_v51 = vmul.f32 %v2102_v19, %v12199_v34   ;;  %v2552_v60 = vsel %vm12327_vm4, %v2551_v8, %v2547_v27  ;;  %v2991_v43 = vsub.f32 1.0, %v2990_v21  ;;  %vm1659_vm9 = vweird.f32 %v12293_v57  ;;  %v926_v21 = vpop.f32.mrf.mxu3 }
 0x1a2   : > { %18254 = vst [vmem:[#allocation46_spill] sm:$0xff] %v12337_v46  ;;  %v12353_v33 = vmul.f32 %v2552_v60, %v12202_v63   ;;  %v1665_v24 = vand.u32 2147483648, %v12293_v57  ;;  %vm2995_vm10 = vweird.f32 %v9125_v47  ;;  %v1655_v34 = vmul.f32 %v9127_v13, %v12293_v57  ;;  %v704_v60 = vpop.f32.mrf.mxu0 }
 0x1a3   : > { %18257 = vst [vmem:[#allocation47_spill] sm:$0xff] %v12347_v51  ;;  %v2113_v39 = vand.u32 2147483647, %v12300_v59  ;;  %v12359_v44 = vadd.f32 1.0, %v9123_v61  ;;  %v2992_v7 = vmul.f32 %v9125_v47, %v2991_v43  ;;  %v2115_v25 = vand.u32 2147483648, %v12300_v59  ;;  %vm2996_vm14 = vmor %vm2994_vm7, %vm2995_vm10 }
 0x1a4   : > { %18258 = vst [vmem:[#allocation48_spill] sm:$0xff] %v12353_v33  ;;  %v12363_v48 = vadd.f32 %v12192_v58, %v924_v36  ;;  %v12366_v63 = vadd.f32 %v12192_v58, %v701_v62  ;;  %v9129_v4 = vpop.eup %9128  ;;  %v1656_v30 = vsub.f32 1.0, %v1655_v34  ;;  %vm12368_vm11 = vcmp.eq.f32.partialorder %v1663_v18, 8.507059e+37 }
 0x1a5   : > { %vm2109_vm12 = vweird.f32 %v12300_v59  ;;  %9130 = vrcp.f32 %v12359_v44  ;;  %v2993_v61 = vadd.f32 %v9125_v47, %v2992_v7  ;;  %vm1660_vm13 = vweird.f32 %v9127_v13 }
 0x1a6   : > { %v1666_v40 = vor.u32 1.1754944e-38, %v1665_v24  ;;  %v2105_v49 = vmul.f32 %v9129_v4, %v12300_v59  ;;  %v1657_v52 = vmul.f32 %v9127_v13, %v1656_v30  ;;  %vm12378_vm15 = vcmp.eq.f32.partialorder %v2113_v39, 8.507059e+37  ;;  %vm1661_vm1 = vmor %vm1659_vm9, %vm1660_vm13  ;;  %v779_v30 = vpop.f32.mrf.mxu1 }
 0x1a7   : > { %v7710_v36 = vmul.f32 -1.442695, %v12363_v48  ;;  %v7621_v62 = vmul.f32 -1.442695, %v12366_v63  ;;  %v2997_v42 = vsel %vm2996_vm14, %v9125_v47, %v2993_v61  ;;  %v2116_v19 = vor.u32 1.1754944e-38, %v2115_v25 }
 0x1a8   : > { %v2106_v35 = vsub.f32 1.0, %v2105_v49  ;;  %v12385_v27 = vadd.f32 %v12192_v58, %v776_v14  ;;  %v3002_v45 = vsel %vm12342_vm8, %v3001_v9, %v2997_v42  ;;  %v1658_v18 = vadd.f32 %v9127_v13, %v1657_v52 }
 0x1a9   : > { %vm2110_vm5 = vweird.f32 %v9129_v4  ;;  %9132 = vpow2.f32 %v7710_v36  ;;  %v12390_v43 = vmul.f32 %v3002_v45, %v12212_v23   ;;  %v12397_v39 = vadd.f32 %v12192_v58, %v851_v15  ;;  %v854_v36 = vpop.f32.mrf.mxu2 }
 0x1aa   : > { %v2107_v47 = vmul.f32 %v9129_v4, %v2106_v35  ;;  %9134 = vpow2.f32 %v7621_v62  ;;  %v7651_v24 = vmul.f32 -1.442695, %v12385_v27  ;;  %v1662_v34 = vsel %vm1661_vm1, %v9127_v13, %v1658_v18  ;;  %vm2111_vm2 = vmor %vm2109_vm12, %vm2110_vm5 }
 0x1ab   : > { %v9131_v14 = vpop.eup %9130  ;;  %v12400_v37 = vadd.f32 %v12192_v58, %v926_v21  ;;  %v12403_v9 = vadd.f32 %v12192_v58, %v704_v60  ;;  %v1667_v23 = vsel %vm12368_vm11, %v1666_v40, %v1662_v34  ;;  %v2563_v25 = vand.u32 2147483647, %v12359_v44 }
 0x1ac   : > { %v2108_v57 = vadd.f32 %v9129_v4, %v2107_v47  ;;  %v2555_v7 = vmul.f32 %v9131_v14, %v12359_v44  ;;  %v12410_v13 = vmul.f32 %v1667_v23, %v12215_v56   ;;  %9136 = vpow2.f32 %v7651_v24 }
 0x1ad   : > { %v7681_v15 = vmul.f32 -1.442695, %v12397_v39  ;;  %v7711_v61 = vmul.f32 -1.442695, %v12400_v37  ;;  %v2565_v49 = vand.u32 2147483648, %v12359_v44  ;;  %vm2560_vm3 = vweird.f32 %v9131_v14 }
 0x1ae   : > { %18263 = vst [vmem:[#allocation49_spill] sm:$0xff] %v12410_v13  ;;  %v2112_v1 = vsel %vm2111_vm2, %v9129_v4, %v2108_v57  ;;  %v2556_v40 = vsub.f32 1.0, %v2555_v7  ;;  %v7622_v52 = vmul.f32 -1.442695, %v12403_v9  ;;  %v12422_v59 = vadd.f32 %v12192_v58, %v779_v30  ;;  %v929_v30 = vpop.f32.mrf.mxu3 }
 0x1af   : > { %v9133_v62 = vpop.eup %9132  ;;  %v2117_v56 = vsel %vm12378_vm15, %v2116_v19, %v2112_v1  ;;  %9138 = vpow2.f32 %v7681_v15  ;;  %v12432_v45 = vadd.f32 %v12192_v58, %v854_v36  ;;  %vm2559_vm0 = vweird.f32 %v12359_v44 }
 0x1b0   : > { %v9135_v42 = vpop.eup %9134  ;;  %v12425_v35 = vmul.f32 %v2117_v56, %v12220_v17   ;;  %v2557_v4 = vmul.f32 %v9131_v14, %v2556_v40  ;;  %v12427_v21 = vadd.f32 1.0, %v9133_v62  ;;  %9140 = vpow2.f32 %v7711_v61  ;;  %vm2561_vm4 = vmor %vm2559_vm0, %vm2560_vm3 }
 0x1b1   : > { %v12429_v60 = vadd.f32 1.0, %v9135_v42  ;;  %9142 = vpow2.f32 %v7622_v52  ;;  %v2566_v17 = vor.u32 1.1754944e-38, %v2565_v49  ;;  %vm2564_vm6 = vcmp.eq.f32.partialorder %v2563_v25, 8.507059e+37 }
 0x1b2   : > { %18264 = vst [vmem:[#allocation50_spill] sm:$0xff] %v12425_v35  ;;  %v2558_v8 = vadd.f32 %v9131_v14, %v2557_v4  ;;  %9144 = vrcp.f32 %v12427_v21  ;;  %v9137_v19 = vpop.eup %9136  ;;  %v7652_v24 = vmul.f32 -1.442695, %v12422_v59  ;;  %v3013_v57 = vand.u32 2147483647, %v12427_v21 }
 0x1b3   : > { %9146 = vrcp.f32 %v12429_v60  ;;  %v12438_v47 = vadd.f32 1.0, %v9137_v19  ;;  %v3015_v44 = vand.u32 2147483648, %v12427_v21  ;;  %v7682_v7 = vmul.f32 -1.442695, %v12432_v45 }
 0x1b4   : > { %v2562_v18 = vsel %vm2561_vm4, %v9131_v14, %v2558_v8  ;;  %v1678_v14 = vand.u32 2147483647, %v12429_v60  ;;  %v1680_v25 = vand.u32 2147483648, %v12429_v60  ;;  %vm3009_vm7 = vweird.f32 %v12427_v21  ;;  %v706_v8 = vpop.f32.mrf.mxu0 }
 0x1b5   : > { %v9139_v34 = vpop.eup %9138  ;;  %v2567_v23 = vsel %vm2564_vm6, %v2566_v17, %v2562_v18  ;;  %9148 = vrcp.f32 %v12438_v47  ;;  %vm1674_vm8 = vweird.f32 %v12429_v60  ;;  %vm12460_vm9 = vcmp.eq.f32.partialorder %v3013_v57, 8.507059e+37 }
 0x1b6   : > { %v9141_v15 = vpop.eup %9140  ;;  %v12445_v61 = vmul.f32 %v2567_v23, %v12256_v31   ;;  %v12450_v40 = vadd.f32 1.0, %v9139_v34  ;;  %9150 = vpow2.f32 %v7652_v24  ;;  %v12457_v31 = vadd.f32 %v12192_v58, %v929_v30 }
 0x1b7   : > { %v9143_v1 = vpop.eup %9142  ;;  %v12452_v49 = vadd.f32 1.0, %v9141_v15  ;;  %v3016_v42 = vor.u32 1.1754944e-38, %v3015_v44  ;;  %v2128_v4 = vand.u32 2147483647, %v12438_v47  ;;  %9152 = vpow2.f32 %v7682_v7 }
 0x1b8   : > { %18265 = vst [vmem:[#allocation51_spill] sm:$0xff] %v12445_v61  ;;  %v9145_v52 = vpop.eup %9144  ;;  %vm12466_vm10 = vcmp.eq.f32.partialorder %v1678_v14, 8.507059e+37  ;;  %v1681_v18 = vor.u32 1.1754944e-38, %v1680_v25  ;;  %v2130_v24 = vand.u32 2147483648, %v12438_v47  ;;  %9154 = vrcp.f32 %v12450_v40 }
 0x1b9   : > { %v9147_v36 = vpop.eup %9146  ;;  %v3005_v62 = vmul.f32 %v9145_v52, %v12427_v21  ;;  %vm2124_vm11 = vweird.f32 %v12438_v47  ;;  %9156 = vrcp.f32 %v12452_v49  ;;  %v12474_v23 = vadd.f32 1.0, %v9143_v1 }
 0x1ba   : > { %v1670_v19 = vmul.f32 %v9147_v36, %v12429_v60  ;;  %vm3010_vm12 = vweird.f32 %v9145_v52  ;;  %v7712_v7 = vmul.f32 -1.442695, %v12457_v31  ;;  %v12478_v30 = vadd.f32 %v12192_v58, %v706_v8 }
 0x1bb   : > { %v3006_v34 = vsub.f32 1.0, %v3005_v62  ;;  %v9149_v57 = vpop.eup %9148  ;;  %vm12481_vm13 = vcmp.eq.f32.partialorder %v2128_v4, 8.507059e+37  ;;  %v2578_v62 = vand.u32 2147483647, %v12450_v40  ;;  %vm1675_vm14 = vweird.f32 %v9147_v36  ;;  %vm3011_vm5 = vmor %vm3009_vm7, %vm3010_vm12 }
 0x1bc   : > { %v1671_v44 = vsub.f32 1.0, %v1670_v19  ;;  %v2120_v14 = vmul.f32 %v9149_v57, %v12438_v47  ;;  %v9151_v46 = vpop.eup %9150  ;;  %v2131_v13 = vor.u32 1.1754944e-38, %v2130_v24  ;;  %v2580_v19 = vand.u32 2147483648, %v12450_v40  ;;  %vm1676_vm3 = vmor %vm1674_vm8, %vm1675_vm14  ;;  %v781_v47 = vpop.f32.mrf.mxu1 }
 0x1bd   : > { %v3007_v15 = vmul.f32 %v9145_v52, %v3006_v34  ;;  %v9153_v51 = vpop.eup %9152  ;;  %vm2574_vm15 = vweird.f32 %v12450_v40  ;;  %9158 = vrcp.f32 %v12474_v23  ;;  %vm2125_vm1 = vweird.f32 %v9149_v57 }
 0x1be   : > { %v1672_v1 = vmul.f32 %v9147_v36, %v1671_v44  ;;  %v2121_v29 = vsub.f32 1.0, %v2120_v14  ;;  %v9155_v8 = vpop.eup %9154  ;;  %vm3024_vm2 = vweird.f32 %v12452_v49  ;;  %v3028_v24 = vand.u32 2147483647, %v12452_v49  ;;  %vm2126_vm4 = vmor %vm2124_vm11, %vm2125_vm1 }
 0x1bf   : > { %v3008_v35 = vadd.f32 %v9145_v52, %v3007_v15  ;;  %v3030_v34 = vand.u32 2147483648, %v12452_v49  ;;  %v9157_v44 = vpop.eup %9156  ;;  %v2570_v26 = vmul.f32 %v9155_v8, %v12450_v40  ;;  %vm12499_vm0 = vcmp.eq.f32.partialorder %v2578_v62, 8.507059e+37 }
 0x1c0   : > { %v1673_v4 = vadd.f32 %v9147_v36, %v1672_v1  ;;  %v2122_v14 = vmul.f32 %v9149_v57, %v2121_v29  ;;  %v12503_v1 = vadd.f32 1.0, %v9151_v46  ;;  %v2581_v55 = vor.u32 1.1754944e-38, %v2580_v19 }
 0x1c1   : > { %v3012_v15 = vsel %vm3011_vm5, %v9145_v52, %v3008_v35  ;;  %v3020_v35 = vmul.f32 %v9157_v44, %v12452_v49  ;;  %v2571_v62 = vsub.f32 1.0, %v2570_v26  ;;  %vm12519_vm6 = vcmp.eq.f32.partialorder %v3028_v24, 8.507059e+37 }
 0x1c2   : > { %v3017_v2 = vsel %vm12460_vm9, %v3016_v42, %v3012_v15  ;;  %v1677_v10 = vsel %vm1676_vm3, %v9147_v36, %v1673_v4  ;;  %v2123_v60 = vadd.f32 %v9149_v57, %v2122_v14  ;;  %v3031_v56 = vor.u32 1.1754944e-38, %v3030_v34 }
 0x1c3   : > { %v12509_v52 = vmul.f32 %v3017_v2, %v12363_v48   ;;  %v1682_v29 = vsel %vm12466_vm10, %v1681_v18, %v1677_v10  ;;  %v3021_v46 = vsub.f32 1.0, %v3020_v35  ;;  %v9159_v2 = vpop.eup %9158  ;;  %v2572_v42 = vmul.f32 %v9155_v8, %v2571_v62  ;;  %v931_v35 = vpop.f32.mrf.mxu3 }
 0x1c4   : > { %v12514_v50 = vmul.f32 %v1682_v29, %v12366_v63   ;;  %v2127_v48 = vsel %vm2126_vm4, %v9149_v57, %v2123_v60  ;;  %vm2575_vm7 = vweird.f32 %v9155_v8  ;;  %9160 = vrcp.f32 %v12503_v1 }
 0x1c5   : > { %v2132_v26 = vsel %vm12481_vm13, %v2131_v13, %v2127_v48  ;;  %v3022_v10 = vmul.f32 %v9157_v44, %v3021_v46  ;;  %vm3025_vm8 = vweird.f32 %v9157_v44  ;;  %v1685_v63 = vmul.f32 %v9159_v2, %v12474_v23  ;;  %vm2576_vm9 = vmor %vm2574_vm15, %vm2575_vm7 }
 0x1c6   : > { %18274 = vst [vmem:[#allocation52_spill] sm:$0xff] %v12514_v50  ;;  %v12528_v17 = vmul.f32 %v2132_v26, %v12385_v27   ;;  %v2573_v18 = vadd.f32 %v9155_v8, %v2572_v42  ;;  %v1693_v19 = vand.u32 2147483647, %v12474_v23  ;;  %v1695_v57 = vand.u32 2147483648, %v12474_v23  ;;  %vm3026_vm10 = vmor %vm3024_vm2, %vm3025_vm8 }
 0x1c7   : > { %v3023_v4 = vadd.f32 %v9157_v44, %v3022_v10  ;;  %v1686_v24 = vsub.f32 1.0, %v1685_v63  ;;  %v12534_v25 = vadd.f32 1.0, %v9153_v51  ;;  %9162 = vpow2.f32 %v7712_v7 }
 0x1c8   : > { %18277 = vst [vmem:[#allocation53_spill] sm:$0xff] %v12528_v17  ;;  %v2577_v13 = vsel %vm2576_vm9, %v9155_v8, %v2573_v18  ;;  %vm1689_vm11 = vweird.f32 %v12474_v23  ;;  %vm1690_vm12 = vweird.f32 %v9159_v2  ;;  %v7623_v27 = vmul.f32 -1.442695, %v12478_v30  ;;  %v856_v8 = vpop.f32.mrf.mxu2  ;;  %v709_v18 = vpop.f32.mrf.mxu0 }
 0x1c9   : > { %v2582_v34 = vsel %vm12499_vm0, %v2581_v55, %v2577_v13  ;;  %v3027_v15 = vsel %vm3026_vm10, %v9157_v44, %v3023_v4  ;;  %v1687_v40 = vmul.f32 %v9159_v2, %v1686_v24  ;;  %9164 = vrcp.f32 %v12534_v25  ;;  %vm1691_vm14 = vmor %vm1689_vm11, %vm1690_vm12 }
 0x1ca   : > { %v9161_v14 = vpop.eup %9160  ;;  %v12544_v51 = vmul.f32 %v2582_v34, %v12397_v39   ;;  %v3032_v49 = vsel %vm12519_vm6, %v3031_v56, %v3027_v15  ;;  %vm12548_vm13 = vcmp.eq.f32.partialorder %v1693_v19, 8.507059e+37  ;;  %v1696_v44 = vor.u32 1.1754944e-38, %v1695_v57  ;;  %v784_v19 = vpop.f32.mrf.mxu1 }
 0x1cb   : > { %v12553_v21 = vmul.f32 %v3032_v49, %v12400_v37   ;;  %v1688_v55 = vadd.f32 %v9159_v2, %v1687_v40  ;;  %v2135_v29 = vmul.f32 %v9161_v14, %v12503_v1  ;;  %vm2139_vm15 = vweird.f32 %v12503_v1 }
 0x1cc   : > { %18278 = vst [vmem:[#allocation54_spill] sm:$0xff] %v12544_v51  ;;  %v2145_v39 = vand.u32 2147483648, %v12503_v1  ;;  %9166 = vpow2.f32 %v7623_v27  ;;  %v12562_v60 = vadd.f32 %v12192_v58, %v781_v47  ;;  %v12565_v36 = vadd.f32 %v12192_v58, %v856_v8 }
 0x1cd   : > { %v9163_v62 = vpop.eup %9162  ;;  %v1692_v46 = vsel %vm1691_vm14, %v9159_v2, %v1688_v55  ;;  %v2136_v37 = vsub.f32 1.0, %v2135_v29  ;;  %v12568_v56 = vadd.f32 %v12192_v58, %v931_v35  ;;  %v2143_v48 = vand.u32 2147483647, %v12503_v1 }
 0x1ce   : > { %v1697_v23 = vsel %vm12548_vm13, %v1696_v44, %v1692_v46  ;;  %v12573_v42 = vadd.f32 1.0, %v9163_v62  ;;  %v7653_v26 = vmul.f32 -1.442695, %v12562_v60  ;;  %vm2140_vm5 = vweird.f32 %v9161_v14 }
 0x1cf   : > { %v9165_v10 = vpop.eup %9164  ;;  %v12577_v63 = vmul.f32 %v1697_v23, %v12403_v9   ;;  %v2137_v2 = vmul.f32 %v9161_v14, %v2136_v37  ;;  %v7683_v47 = vmul.f32 -1.442695, %v12565_v36  ;;  %v2146_v57 = vor.u32 1.1754944e-38, %v2145_v39  ;;  %vm2141_vm1 = vmor %vm2139_vm15, %vm2140_vm5 }
 0x1d0   : > { %v2585_v4 = vmul.f32 %v9165_v10, %v12534_v25  ;;  %9168 = vrcp.f32 %v12573_v42  ;;  %v7713_v24 = vmul.f32 -1.442695, %v12568_v56  ;;  %v2593_v27 = vand.u32 2147483647, %v12534_v25  ;;  %v859_v1 = vpop.f32.mrf.mxu2 }
 0x1d1   : > { %18281 = vst [vmem:[#allocation55_spill] sm:$0xff] %v12577_v63  ;;  %v2138_v13 = vadd.f32 %v9161_v14, %v2137_v2  ;;  %v2595_v34 = vand.u32 2147483648, %v12534_v25  ;;  %9170 = vpow2.f32 %v7653_v26  ;;  %v12588_v40 = vadd.f32 %v12192_v58, %v709_v18 }
 0x1d2   : > { %v9167_v9 = vpop.eup %9166  ;;  %v2586_v15 = vsub.f32 1.0, %v2585_v4  ;;  %9172 = vpow2.f32 %v7683_v47  ;;  %v12591_v49 = vadd.f32 %v12192_v58, %v784_v19  ;;  %vm2144_vm2 = vcmp.eq.f32.partialorder %v2143_v48, 8.507059e+37 }
 0x1d3   : > { %v2142_v7 = vsel %vm2141_vm1, %v9161_v14, %v2138_v13  ;;  %vm2590_vm3 = vweird.f32 %v9165_v10  ;;  %v12593_v8 = vadd.f32 1.0, %v9167_v9  ;;  %9174 = vpow2.f32 %v7713_v24 }
 0x1d4   : > { %v2147_v35 = vsel %vm2144_vm2, %v2146_v57, %v2142_v7  ;;  %v2587_v55 = vmul.f32 %v9165_v10, %v2586_v15  ;;  %v7624_v44 = vmul.f32 -1.442695, %v12588_v40  ;;  %vm2589_vm0 = vweird.f32 %v12534_v25 }
 0x1d5   : > { %v12597_v29 = vmul.f32 %v2147_v35, %v12422_v59   ;;  %vm12600_vm4 = vcmp.eq.f32.partialorder %v2593_v27, 8.507059e+37  ;;  %9176 = vrcp.f32 %v12593_v8  ;;  %v2596_v46 = vor.u32 1.1754944e-38, %v2595_v34  ;;  %vm2591_vm6 = vmor %vm2589_vm0, %vm2590_vm3 }
 0x1d6   : > { %v9169_v14 = vpop.eup %9168  ;;  %v2588_v62 = vadd.f32 %v9165_v10, %v2587_v55  ;;  %9178 = vpow2.f32 %v7624_v44  ;;  %v7654_v37 = vmul.f32 -1.442695, %v12591_v49  ;;  %v3043_v48 = vand.u32 2147483647, %v12573_v42 }
 0x1d7   : > { %18282 = vst [vmem:[#allocation56_spill] sm:$0xff] %v12597_v29  ;;  %v9171_v23 = vpop.eup %9170  ;;  %v3035_v59 = vmul.f32 %v9169_v14, %v12573_v42  ;;  %v3045_v25 = vand.u32 2147483648, %v12573_v42  ;;  %v12611_v26 = vadd.f32 %v12192_v58, %v859_v1  ;;  %v1708_v18 = vand.u32 2147483647, %v12593_v8 }
 0x1d8   : > { %v9173_v2 = vpop.eup %9172  ;;  %v2592_v47 = vsel %vm2591_vm6, %v9165_v10, %v2588_v62  ;;  %v1710_v19 = vand.u32 2147483648, %v12593_v8  ;;  %v12615_v57 = vadd.f32 1.0, %v9171_v23  ;;  %9180 = vpow2.f32 %v7654_v37 }
 0x1d9   : > { %v2597_v4 = vsel %vm12600_vm4, %v2596_v46, %v2592_v47  ;;  %v3036_v24 = vsub.f32 1.0, %v3035_v59  ;;  %v12619_v13 = vadd.f32 1.0, %v9173_v2  ;;  %v9175_v27 = vpop.eup %9174  ;;  %vm3039_vm7 = vweird.f32 %v12573_v42 }
 0x1da   : > { %v12622_v34 = vmul.f32 %v2597_v4, %v12432_v45   ;;  %9182 = vrcp.f32 %v12615_v57  ;;  %v7684_v58 = vmul.f32 -1.442695, %v12611_v26  ;;  %vm3040_vm8 = vweird.f32 %v9169_v14 }
 0x1db   : > { %v9177_v10 = vpop.eup %9176  ;;  %v3037_v9 = vmul.f32 %v9169_v14, %v3036_v24  ;;  %vm12627_vm9 = vcmp.eq.f32.partialorder %v3043_v48, 8.507059e+37  ;;  %9184 = vrcp.f32 %v12619_v13  ;;  %v3046_v35 = vor.u32 1.1754944e-38, %v3045_v25  ;;  %vm3041_vm12 = vmor %vm3039_vm7, %vm3040_vm8 }
 0x1dc   : > { %18285 = vst [vmem:[#allocation57_spill] sm:$0xff] %v12622_v34  ;;  %v9179_v7 = vpop.eup %9178  ;;  %v1700_v45 = vmul.f32 %v9177_v10, %v12593_v8  ;;  %vm1704_vm10 = vweird.f32 %v12593_v8  ;;  %vm12634_vm11 = vcmp.eq.f32.partialorder %v1708_v18, 8.507059e+37  ;;  %v1711_v1 = vor.u32 1.1754944e-38, %v1710_v19 }
 0x1dd   : > { %v3038_v44 = vadd.f32 %v9169_v14, %v3037_v9  ;;  %v2158_v39 = vand.u32 2147483647, %v12615_v57  ;;  %v12639_v62 = vadd.f32 1.0, %v9175_v27  ;;  %v2160_v37 = vand.u32 2147483648, %v12615_v57 }
 0x1de   : > { %v1701_v46 = vsub.f32 1.0, %v1700_v45  ;;  %v12644_v23 = vadd.f32 1.0, %v9179_v7  ;;  %9186 = vpow2.f32 %v7684_v58  ;;  %v9181_v59 = vpop.eup %9180  ;;  %vm2154_vm13 = vweird.f32 %v12615_v57  ;;  %v12721_v45 = vld [vmem:[%s18102_s2] ss:$0 sm:$0xff] }
 0x1df   : > { %v3042_v48 = vsel %vm3041_vm12, %v9169_v14, %v3038_v44  ;;  %v2608_v25 = vand.u32 2147483647, %v12619_v13  ;;  %v2610_v2 = vand.u32 2147483648, %v12619_v13  ;;  %9188 = vrcp.f32 %v12639_v62 }
 0x1e0   : > { %v9183_v47 = vpop.eup %9182  ;;  %v3047_v42 = vsel %vm12627_vm9, %v3046_v35, %v3042_v48  ;;  %v1702_v18 = vmul.f32 %v9177_v10, %v1701_v46  ;;  %vm1705_vm14 = vweird.f32 %v9177_v10  ;;  %vm2604_vm15 = vweird.f32 %v12619_v13  ;;  %v934_v35 = vpop.f32.mrf.mxu3 }
 0x1e1   : > { %v9185_v19 = vpop.eup %9184  ;;  %v12654_v4 = vmul.f32 %v3047_v42, %v12457_v31   ;;  %v2150_v14 = vmul.f32 %v9183_v47, %v12615_v57  ;;  %vm12657_vm5 = vcmp.eq.f32.partialorder %v2158_v39, 8.507059e+37  ;;  %v3060_v27 = vand.u32 2147483648, %v12639_v62  ;;  %vm1706_vm1 = vmor %vm1704_vm10, %vm1705_vm14 }
 0x1e2   : > { %9190 = vrcp.f32 %v12644_v23  ;;  %v1703_v58 = vadd.f32 %v9177_v10, %v1702_v18  ;;  %v2161_v9 = vor.u32 1.1754944e-38, %v2160_v37  ;;  %v2600_v15 = vmul.f32 %v9185_v19, %v12619_v13 }
 0x1e3   : > { %v3058_v7 = vand.u32 2147483647, %v12639_v62  ;;  %v2151_v31 = vsub.f32 1.0, %v2150_v14  ;;  %vm2155_vm2 = vweird.f32 %v9183_v47  ;;  %vm12667_vm3 = vcmp.eq.f32.partialorder %v2608_v25, 8.507059e+37  ;;  %v711_v25 = vpop.f32.mrf.mxu0 }
 0x1e4   : > { %v2611_v44 = vor.u32 1.1754944e-38, %v2610_v2  ;;  %v9187_v39 = vpop.eup %9186  ;;  %v1707_v46 = vsel %vm1706_vm1, %v9177_v10, %v1703_v58  ;;  %v2601_v48 = vsub.f32 1.0, %v2600_v15  ;;  %vm2605_vm0 = vweird.f32 %v9185_v19  ;;  %vm2156_vm8 = vmor %vm2154_vm13, %vm2155_vm2 }
 0x1e5   : > { %vm3054_vm4 = vweird.f32 %v12639_v62  ;;  %v12672_v37 = vadd.f32 1.0, %v9181_v59  ;;  %v9189_v42 = vpop.eup %9188  ;;  %v1712_v8 = vsel %vm12634_vm11, %v1711_v1, %v1707_v46  ;;  %v2152_v18 = vmul.f32 %v9183_v47, %v2151_v31  ;;  %vm2606_vm10 = vmor %vm2604_vm15, %vm2605_vm0 }
 0x1e6   : > { %v3061_v14 = vor.u32 1.1754944e-38, %v3060_v27  ;;  %v12676_v50 = vadd.f32 1.0, %v9187_v39  ;;  %v12679_v63 = vmul.f32 %v1712_v8, %v12478_v30   ;;  %v2602_v2 = vmul.f32 %v9185_v19, %v2601_v48  ;;  %v786_v48 = vpop.f32.mrf.mxu1 }
 0x1e7   : > { %v3050_v10 = vmul.f32 %v9189_v42, %v12639_v62  ;;  %vm12682_vm6 = vcmp.eq.f32.partialorder %v3058_v7, 8.507059e+37  ;;  %vm1719_vm7 = vweird.f32 %v12644_v23  ;;  %v2153_v55 = vadd.f32 %v9183_v47, %v2152_v18 }
 0x1e8   : > { %18294 = vst [vmem:[#allocation58_spill] sm:$0xff] %v12679_v63  ;;  %v9191_v59 = vpop.eup %9190  ;;  %v1723_v1 = vand.u32 2147483647, %v12644_v23  ;;  %v1725_v27 = vand.u32 2147483648, %v12644_v23  ;;  %9192 = vrcp.f32 %v12672_v37  ;;  %v2603_v30 = vadd.f32 %v9185_v19, %v2602_v2 }
 0x1e9   : > { %v3051_v15 = vsub.f32 1.0, %v3050_v10  ;;  %vm3055_vm9 = vweird.f32 %v9189_v42  ;;  %v1715_v7 = vmul.f32 %v9191_v59, %v12644_v23  ;;  %v2157_v31 = vsel %vm2156_vm8, %v9183_v47, %v2153_v55  ;;  %v861_v10 = vpop.f32.mrf.mxu2 }
 0x1ea   : > { %v2173_v39 = vand.u32 2147483647, %v12672_v37  ;;  %v2175_v46 = vand.u32 2147483648, %v12672_v37  ;;  %9194 = vrcp.f32 %v12676_v50  ;;  %v2162_v57 = vsel %vm12657_vm5, %v2161_v9, %v2157_v31  ;;  %vm3056_vm13 = vmor %vm3054_vm4, %vm3055_vm9 }
 0x1eb   : > { %v2607_v8 = vsel %vm2606_vm10, %v9185_v19, %v2603_v30  ;;  %v3052_v18 = vmul.f32 %v9189_v42, %v3051_v15  ;;  %v1716_v2 = vsub.f32 1.0, %v1715_v7  ;;  %v12703_v47 = vmul.f32 %v2162_v57, %v12562_v60   ;;  %v936_v19 = vpop.f32.mrf.mxu3 }
 0x1ec   : > { %v2612_v13 = vsel %vm12667_vm3, %v2611_v44, %v2607_v8  ;;  %vm12707_vm11 = vcmp.eq.f32.partialorder %v1723_v1, 8.507059e+37  ;;  %v1726_v63 = vor.u32 1.1754944e-38, %v1725_v27  ;;  %vm1720_vm12 = vweird.f32 %v9191_v59 }
 0x1ed   : > { %18297 = vst [vmem:[#allocation59_spill] sm:$0xff] %v12703_v47  ;;  %v12712_v17 = vmul.f32 %v2612_v13, %v12565_v36   ;;  %v3053_v24 = vadd.f32 %v9189_v42, %v3052_v18  ;;  %v1717_v9 = vmul.f32 %v9191_v59, %v1716_v2  ;;  %vm2169_vm14 = vweird.f32 %v12672_v37  ;;  %vm1721_vm1 = vmor %vm1719_vm7, %vm1720_vm12 }
 0x1ee   : > { %v9193_v30 = vpop.eup %9192  ;;  %v2176_v60 = vor.u32 1.1754944e-38, %v2175_v46  ;;  %v12724_v36 = vadd.f32 %v12721_v45, %v934_v35  ;;  %v12727_v44 = vadd.f32 %v12721_v45, %v711_v25  ;;  %vm12730_vm15 = vcmp.eq.f32.partialorder %v2173_v39, 8.507059e+37  ;;  %v714_v39 = vpop.f32.mrf.mxu0 }
 0x1ef   : > { %18300 = vst [vmem:[#allocation60_spill] sm:$0xff] %v12712_v17  ;;  %v3057_v1 = vsel %vm3056_vm13, %v9189_v42, %v3053_v24  ;;  %v1718_v27 = vadd.f32 %v9191_v59, %v1717_v9  ;;  %v2165_v15 = vmul.f32 %v9193_v30, %v12672_v37  ;;  %vm2619_vm5 = vweird.f32 %v12676_v50  ;;  %v789_v55 = vpop.f32.mrf.mxu1 }
 0x1f0   : > { %v9195_v7 = vpop.eup %9194  ;;  %v3062_v31 = vsel %vm12682_vm6, %v3061_v14, %v3057_v1  ;;  %v2623_v35 = vand.u32 2147483647, %v12676_v50  ;;  %v2625_v42 = vand.u32 2147483648, %v12676_v50  ;;  %v7714_v25 = vmul.f32 -1.442695, %v12724_v36 }
 0x1f1   : > { %v12744_v46 = vmul.f32 %v3062_v31, %v12568_v56   ;;  %v1722_v57 = vsel %vm1721_vm1, %v9191_v59, %v1718_v27  ;;  %v2166_v8 = vsub.f32 1.0, %v2165_v15  ;;  %v2615_v18 = vmul.f32 %v9195_v7, %v12676_v50  ;;  %v864_v27 = vpop.f32.mrf.mxu2 }
 0x1f2   : > { %v1727_v14 = vsel %vm12707_vm11, %v1726_v63, %v1722_v57  ;;  %vm2170_vm2 = vweird.f32 %v9193_v30  ;;  %9196 = vpow2.f32 %v7714_v25  ;;  %v7625_v23 = vmul.f32 -1.442695, %v12727_v44 }
 0x1f3   : > { %v12751_v58 = vmul.f32 %v1727_v14, %v12588_v40   ;;  %v2167_v2 = vmul.f32 %v9193_v30, %v2166_v8  ;;  %v2616_v13 = vsub.f32 1.0, %v2615_v18  ;;  %v12754_v24 = vadd.f32 %v12721_v45, %v786_v48  ;;  %vm2171_vm0 = vmor %vm2169_vm14, %vm2170_vm2  ;;  %v939_v57 = vpop.f32.mrf.mxu3 }
 0x1f4   : > { %9198 = vpow2.f32 %v7625_v23  ;;  %v12757_v56 = vadd.f32 %v12721_v45, %v861_v10  ;;  %v12760_v59 = vadd.f32 %v12721_v45, %v936_v19  ;;  %v12763_v63 = vadd.f32 %v12721_v45, %v714_v39 }
 0x1f5   : > { %18303 = vst [vmem:[#allocation61_spill] sm:$0xff] %v12751_v58  ;;  %v2168_v9 = vadd.f32 %v9193_v30, %v2167_v2  ;;  %v2617_v1 = vmul.f32 %v9195_v7, %v2616_v13  ;;  %vm2620_vm3 = vweird.f32 %v9195_v7  ;;  %v7655_v40 = vmul.f32 -1.442695, %v12754_v24 }
 0x1f6   : > { %vm12769_vm4 = vcmp.eq.f32.partialorder %v2623_v35, 8.507059e+37  ;;  %v2626_v10 = vor.u32 1.1754944e-38, %v2625_v42  ;;  %v7685_v19 = vmul.f32 -1.442695, %v12757_v56  ;;  %v7715_v15 = vmul.f32 -1.442695, %v12760_v59  ;;  %vm2621_vm6 = vmor %vm2619_vm5, %vm2620_vm3  ;;  %v716_v62 = vpop.f32.mrf.mxu0 }
 0x1f7   : > { %v2172_v31 = vsel %vm2171_vm0, %v9193_v30, %v2168_v9  ;;  %v2618_v25 = vadd.f32 %v9195_v7, %v2617_v1  ;;  %9200 = vpow2.f32 %v7655_v40  ;;  %v12776_v39 = vadd.f32 %v12721_v45, %v789_v55 }
 0x1f8   : > { %v9197_v8 = vpop.eup %9196  ;;  %v2177_v37 = vsel %vm12730_vm15, %v2176_v60, %v2172_v31  ;;  %9202 = vpow2.f32 %v7685_v19  ;;  %v7626_v35 = vmul.f32 -1.442695, %v12763_v63  ;;  %v12785_v42 = vadd.f32 %v12721_v45, %v864_v27 }
 0x1f9   : > { %v12788_v30 = vmul.f32 %v2177_v37, %v12591_v49   ;;  %v2622_v18 = vsel %vm2621_vm6, %v9195_v7, %v2618_v25  ;;  %v12790_v14 = vadd.f32 1.0, %v9197_v8  ;;  %9204 = vpow2.f32 %v7715_v15  ;;  %v791_v15 = vpop.f32.mrf.mxu1  ;;  %v866_v31 = vpop.f32.mrf.mxu2 }
 0x1fa   : > { %v9199_v23 = vpop.eup %9198  ;;  %v2627_v60 = vsel %vm12769_vm4, %v2626_v10, %v2622_v18  ;;  %v12795_v50 = vadd.f32 %v12721_v45, %v939_v57  ;;  %v7656_v49 = vmul.f32 -1.442695, %v12776_v39  ;;  %v7686_v7 = vmul.f32 -1.442695, %v12785_v42 }
 0x1fb   : > { %18306 = vst [vmem:[#allocation62_spill] sm:$0xff] %v12788_v30  ;;  %v12798_v2 = vmul.f32 %v2627_v60, %v12611_v26   ;;  %9206 = vrcp.f32 %v12790_v14  ;;  %v12802_v13 = vadd.f32 1.0, %v9199_v23  ;;  %v12806_v9 = vadd.f32 %v12721_v45, %v716_v62 }
 0x1fc   : > { %9208 = vpow2.f32 %v7626_v35  ;;  %v3073_v40 = vand.u32 2147483647, %v12790_v14  ;;  %v7716_v26 = vmul.f32 -1.442695, %v12795_v50  ;;  %v3075_v48 = vand.u32 2147483648, %v12790_v14 }
 0x1fd   : > { %18307 = vst [vmem:[#allocation63_spill] sm:$0xff] %v12798_v2  ;;  %v9201_v55 = vpop.eup %9200  ;;  %9210 = vrcp.f32 %v12802_v13  ;;  %vm3069_vm7 = vweird.f32 %v12790_v14  ;;  %v1738_v8 = vand.u32 2147483647, %v12802_v13  ;;  %v7627_v37 = vmul.f32 -1.442695, %v12806_v9 }
 0x1fe   : > { %v9203_v1 = vpop.eup %9202  ;;  %v12812_v10 = vadd.f32 1.0, %v9201_v55  ;;  %9212 = vpow2.f32 %v7656_v49  ;;  %vm12823_vm8 = vcmp.eq.f32.partialorder %v3073_v40, 8.507059e+37  ;;  %v12829_v23 = vadd.f32 %v12721_v45, %v791_v15 }
 0x1ff   : > { %v9205_v27 = vpop.eup %9204  ;;  %v12814_v19 = vadd.f32 1.0, %v9203_v1  ;;  %9214 = vpow2.f32 %v7686_v7  ;;  %v12832_v60 = vadd.f32 %v12721_v45, %v866_v31  ;;  %v3076_v49 = vor.u32 1.1754944e-38, %v3075_v48 }
 0x200   : > { %v12816_v25 = vadd.f32 1.0, %v9205_v27  ;;  %9216 = vrcp.f32 %v12812_v10  ;;  %vm1734_vm9 = vweird.f32 %v12802_v13  ;;  %v1740_v7 = vand.u32 2147483648, %v12802_v13 }
 0x201   : > { %v9207_v57 = vpop.eup %9206  ;;  %9218 = vrcp.f32 %v12814_v19  ;;  %v2188_v40 = vand.u32 2147483647, %v12812_v10  ;;  %v2190_v27 = vand.u32 2147483648, %v12812_v10  ;;  %vm12840_vm10 = vcmp.eq.f32.partialorder %v1738_v8, 8.507059e+37 }
 0x202   : > { %v3065_v35 = vmul.f32 %v9207_v57, %v12790_v14  ;;  %v9209_v62 = vpop.eup %9208  ;;  %9220 = vpow2.f32 %v7716_v26  ;;  %v2638_v48 = vand.u32 2147483647, %v12814_v19  ;;  %v2640_v29 = vand.u32 2147483648, %v12814_v19 }
 0x203   : > { %v9211_v55 = vpop.eup %9210  ;;  %9222 = vrcp.f32 %v12816_v25  ;;  %vm3070_vm11 = vweird.f32 %v9207_v57  ;;  %v12846_v47 = vadd.f32 1.0, %v9209_v62  ;;  %v12849_v30 = vmul.f32 -1.442695, %v12829_v23 }
 0x204   : > { %v3066_v1 = vsub.f32 1.0, %v3065_v35  ;;  %v9213_v15 = vpop.eup %9212  ;;  %v1730_v58 = vmul.f32 %v9211_v55, %v12802_v13  ;;  %9224 = vpow2.f32 %v7627_v37  ;;  %v1741_v33 = vor.u32 1.1754944e-38, %v1740_v7  ;;  %vm3071_vm5 = vmor %vm3069_vm7, %vm3070_vm11 }
 0x205   : > { %v9215_v26 = vpop.eup %9214  ;;  %vm2184_vm12 = vweird.f32 %v12812_v10  ;;  %vm2634_vm13 = vweird.f32 %v12814_v19  ;;  %vm1735_vm14 = vweird.f32 %v9211_v55  ;;  %vm12854_vm15 = vcmp.eq.f32.partialorder %v2188_v40, 8.507059e+37 }
 0x206   : > { %v3067_v35 = vmul.f32 %v9207_v57, %v3066_v1  ;;  %v9217_v54 = vpop.eup %9216  ;;  %v1731_v53 = vsub.f32 1.0, %v1730_v58  ;;  %v2191_v62 = vor.u32 1.1754944e-38, %v2190_v27  ;;  %vm12862_vm1 = vcmp.eq.f32.partialorder %v2638_v48, 8.507059e+37  ;;  %vm1736_vm3 = vmor %vm1734_vm9, %vm1735_vm14 }
 0x207   : > { %v9219_v8 = vpop.eup %9218  ;;  %v2180_v37 = vmul.f32 %v9217_v54, %v12812_v10  ;;  %vm3084_vm2 = vweird.f32 %v12816_v25  ;;  %v3088_v40 = vand.u32 2147483647, %v12816_v25  ;;  %9226 = vrcp.f32 %v12846_v47 }
 0x208   : > { %v3068_v61 = vadd.f32 %v9207_v57, %v3067_v35  ;;  %v9221_v51 = vpop.eup %9220  ;;  %v1732_v58 = vmul.f32 %v9211_v55, %v1731_v53  ;;  %v2630_v7 = vmul.f32 %v9219_v8, %v12814_v19  ;;  %v2641_v35 = vor.u32 1.1754944e-38, %v2640_v29 }
 0x209   : > { %v9223_v17 = vpop.eup %9222  ;;  %v2181_v27 = vsub.f32 1.0, %v2180_v37  ;;  %v12869_v32 = vadd.f32 1.0, %v9213_v15  ;;  %vm2185_vm0 = vweird.f32 %v9217_v54  ;;  %vm2635_vm4 = vweird.f32 %v9219_v8 }
 0x20a   : > { %v3072_v2 = vsel %vm3071_vm5, %v9207_v57, %v3068_v61  ;;  %v9225_v14 = vpop.eup %9224  ;;  %v1733_v48 = vadd.f32 %v9211_v55, %v1732_v58  ;;  %v2631_v0 = vsub.f32 1.0, %v2630_v7  ;;  %v3080_v5 = vmul.f32 %v9223_v17, %v12816_v25  ;;  %vm2186_vm6 = vmor %vm2184_vm12, %vm2185_vm0 }
 0x20b   : > { %v3077_v53 = vsel %vm12823_vm8, %v3076_v49, %v3072_v2  ;;  %v2182_v61 = vmul.f32 %v9217_v54, %v2181_v27  ;;  %v3090_v57 = vand.u32 2147483648, %v12816_v25  ;;  %9228 = vrcp.f32 %v12869_v32  ;;  %vm2636_vm8 = vmor %vm2634_vm13, %vm2635_vm4 }
 0x20c   : > { %v12875_v29 = vmul.f32 %v3077_v53, %v12724_v36   ;;  %v1737_v15 = vsel %vm1736_vm3, %v9211_v55, %v1733_v48  ;;  %v2632_v37 = vmul.f32 %v9219_v8, %v2631_v0  ;;  %v3081_v18 = vsub.f32 1.0, %v3080_v5  ;;  %v941_v5 = vpop.f32.mrf.mxu3 }
 0x20d   : > { %v1742_v2 = vsel %vm12840_vm10, %v1741_v33, %v1737_v15  ;;  %v2183_v49 = vadd.f32 %v9217_v54, %v2182_v61  ;;  %v12884_v36 = vadd.f32 1.0, %v9215_v26  ;;  %vm3085_vm7 = vweird.f32 %v9223_v17  ;;  %v9227_v0 = vpop.eup %9226 }
 0x20e   : > { %v12887_v58 = vmul.f32 %v1742_v2, %v12727_v44   ;;  %v2633_v13 = vadd.f32 %v9219_v8, %v2632_v37  ;;  %v3082_v7 = vmul.f32 %v9223_v17, %v3081_v18  ;;  %vm12893_vm9 = vcmp.eq.f32.partialorder %v3088_v40, 8.507059e+37  ;;  %vm3086_vm10 = vmor %vm3084_vm2, %vm3085_vm7 }
 0x20f   : > { %v2187_v55 = vsel %vm2186_vm6, %v9217_v54, %v2183_v49  ;;  %v1753_v33 = vand.u32 2147483647, %v12846_v47  ;;  %v12898_v31 = vadd.f32 1.0, %v9221_v51  ;;  %v1745_v27 = vmul.f32 %v9227_v0, %v12846_v47 }
 0x210   : > { %18316 = vst [vmem:[#allocation64_spill] sm:$0xff] %v12887_v58  ;;  %v2192_v44 = vsel %vm12854_vm15, %v2191_v62, %v2187_v55  ;;  %v2637_v10 = vsel %vm2636_vm8, %v9219_v8, %v2633_v13  ;;  %v3083_v26 = vadd.f32 %v9223_v17, %v3082_v7  ;;  %v3091_v40 = vor.u32 1.1754944e-38, %v3090_v57 }
 0x211   : > { %v12904_v54 = vmul.f32 %v2192_v44, %v12754_v24   ;;  %v2642_v19 = vsel %vm12862_vm1, %v2641_v35, %v2637_v10  ;;  %v1755_v51 = vand.u32 2147483648, %v12846_v47  ;;  %v1746_v8 = vsub.f32 1.0, %v1745_v27  ;;  %v9229_v48 = vpop.eup %9228 }
 0x212   : > { %v12912_v53 = vmul.f32 %v2642_v19, %v12757_v56   ;;  %v3087_v1 = vsel %vm3086_vm10, %v9223_v17, %v3083_v26  ;;  %v2203_v62 = vand.u32 2147483647, %v12869_v32  ;;  %vm1749_vm11 = vweird.f32 %v12846_v47  ;;  %v719_v26 = vpop.f32.mrf.mxu0 }
 0x213   : > { %18319 = vst [vmem:[#allocation65_spill] sm:$0xff] %v12904_v54  ;;  %v3092_v24 = vsel %vm12893_vm9, %v3091_v40, %v3087_v1  ;;  %vm12918_vm12 = vcmp.eq.f32.partialorder %v1753_v33, 8.507059e+37  ;;  %9230 = vrcp.f32 %v12884_v36  ;;  %v1747_v56 = vmul.f32 %v9227_v0, %v1746_v8 }
 0x214   : > { %18320 = vst [vmem:[#allocation66_spill] sm:$0xff] %v12912_v53  ;;  %v12924_v25 = vmul.f32 %v3092_v24, %v12760_v59   ;;  %vm1750_vm13 = vweird.f32 %v9227_v0  ;;  %v2195_v17 = vmul.f32 %v9229_v48, %v12869_v32  ;;  %v1756_v35 = vor.u32 1.1754944e-38, %v1755_v51 }
 0x215   : > { %vm2199_vm14 = vweird.f32 %v12869_v32  ;;  %v2205_v61 = vand.u32 2147483648, %v12869_v32  ;;  %9232 = vrcp.f32 %v12898_v31  ;;  %v1748_v57 = vadd.f32 %v9227_v0, %v1747_v56  ;;  %vm1751_vm5 = vmor %vm1749_vm11, %vm1750_vm13 }
 0x216   : > { %v2196_v15 = vsub.f32 1.0, %v2195_v17  ;;  %vm12930_vm15 = vcmp.eq.f32.partialorder %v2203_v62, 8.507059e+37  ;;  %v2653_v59 = vand.u32 2147483647, %v12884_v36  ;;  %v2655_v18 = vand.u32 2147483648, %v12884_v36 }
 0x217   : > { %v12938_v2 = vadd.f32 1.0, %v9225_v14  ;;  %9234 = vpow2.f32 %v12849_v30  ;;  %v7687_v49 = vmul.f32 -1.442695, %v12832_v60  ;;  %v1752_v13 = vsel %vm1751_vm5, %v9227_v0, %v1748_v57  ;;  %v794_v57 = vpop.f32.mrf.mxu1 }
 0x218   : > { %v2197_v7 = vmul.f32 %v9229_v48, %v2196_v15  ;;  %vm2200_vm1 = vweird.f32 %v9229_v48  ;;  %v3103_v55 = vand.u32 2147483647, %v12898_v31  ;;  %v1757_v44 = vsel %vm12918_vm12, %v1756_v35, %v1752_v13 }
 0x219   : > { %v9231_v33 = vpop.eup %9230  ;;  %v2206_v47 = vor.u32 1.1754944e-38, %v2205_v61  ;;  %vm2649_vm2 = vweird.f32 %v12884_v36  ;;  %9236 = vrcp.f32 %v12938_v2  ;;  %v12948_v14 = vmul.f32 %v1757_v44, %v12763_v63   ;;  %vm2201_vm4 = vmor %vm2199_vm14, %vm2200_vm1 }
 0x21a   : > { %v2198_v30 = vadd.f32 %v9229_v48, %v2197_v7  ;;  %v2645_v0 = vmul.f32 %v9231_v33, %v12884_v36  ;;  %vm12951_vm3 = vcmp.eq.f32.partialorder %v2653_v59, 8.507059e+37  ;;  %vm3099_vm0 = vweird.f32 %v12898_v31 }
 0x21b   : > { %18325 = vst [vmem:[#allocation67_spill] sm:$0xff] %v12948_v14  ;;  %v9233_v27 = vpop.eup %9232  ;;  %v2656_v19 = vor.u32 1.1754944e-38, %v2655_v18  ;;  %v3105_v40 = vand.u32 2147483648, %v12898_v31  ;;  %9238 = vpow2.f32 %v7687_v49  ;;  %v12961_v63 = vadd.f32 %v12721_v45, %v941_v5 }
 0x21c   : > { %v2202_v51 = vsel %vm2201_vm4, %v9229_v48, %v2198_v30  ;;  %v2646_v1 = vsub.f32 1.0, %v2645_v0  ;;  %v3095_v8 = vmul.f32 %v9233_v27, %v12898_v31  ;;  %vm12964_vm6 = vcmp.eq.f32.partialorder %v3103_v55, 8.507059e+37 }
 0x21d   : > { %v9235_v24 = vpop.eup %9234  ;;  %v2207_v32 = vsel %vm12930_vm15, %v2206_v47, %v2202_v51  ;;  %vm2650_vm7 = vweird.f32 %v9231_v33  ;;  %v7717_v34 = vmul.f32 -1.442695, %v12961_v63  ;;  %v12972_v56 = vadd.f32 %v12721_v45, %v719_v26  ;;  %v869_v26 = vpop.f32.mrf.mxu2 }
 0x21e   : > { %v12975_v17 = vmul.f32 %v2207_v32, %v12776_v39   ;;  %v2647_v48 = vmul.f32 %v9231_v33, %v2646_v1  ;;  %v3096_v35 = vsub.f32 1.0, %v3095_v8  ;;  %v12977_v61 = vadd.f32 1.0, %v9235_v24  ;;  %vm2651_vm9 = vmor %vm2649_vm2, %vm2650_vm7 }
 0x21f   : > { %v9237_v15 = vpop.eup %9236  ;;  %v3106_v59 = vor.u32 1.1754944e-38, %v3105_v40  ;;  %v1768_v18 = vand.u32 2147483647, %v12938_v2  ;;  %9240 = vpow2.f32 %v7717_v34  ;;  %v7628_v37 = vmul.f32 -1.442695, %v12972_v56 }
 0x220   : > { %18330 = vst [vmem:[#allocation68_spill] sm:$0xff] %v12975_v17  ;;  %v2648_v49 = vadd.f32 %v9231_v33, %v2647_v48  ;;  %v3097_v13 = vmul.f32 %v9233_v27, %v3096_v35  ;;  %vm3100_vm8 = vweird.f32 %v9233_v27  ;;  %v1760_v7 = vmul.f32 %v9237_v15, %v12938_v2 }
 0x221   : > { %v9239_v55 = vpop.eup %9238  ;;  %vm1765_vm10 = vweird.f32 %v9237_v15  ;;  %v1770_v39 = vand.u32 2147483648, %v12938_v2  ;;  %9242 = vrcp.f32 %v12977_v61  ;;  %v12988_v5 = vadd.f32 %v12721_v45, %v794_v57  ;;  %vm3101_vm11 = vmor %vm3099_vm0, %vm3100_vm8 }
 0x222   : > { %v2652_v44 = vsel %vm2651_vm9, %v9231_v33, %v2648_v49  ;;  %v3098_v47 = vadd.f32 %v9233_v27, %v3097_v13  ;;  %v1761_v30 = vsub.f32 1.0, %v1760_v7  ;;  %v12990_v0 = vadd.f32 1.0, %v9239_v55 }
 0x223   : > { %v2657_v40 = vsel %vm12951_vm3, %v2656_v19, %v2652_v44  ;;  %v2218_v36 = vand.u32 2147483647, %v12977_v61  ;;  %v2220_v51 = vand.u32 2147483648, %v12977_v61  ;;  %9244 = vpow2.f32 %v7628_v37 }
 0x224   : > { %v12999_v1 = vmul.f32 %v2657_v40, %v12785_v42   ;;  %v3102_v33 = vsel %vm3101_vm11, %v9233_v27, %v3098_v47  ;;  %v1762_v8 = vmul.f32 %v9237_v15, %v1761_v30  ;;  %9246 = vrcp.f32 %v12990_v0  ;;  %v944_v27 = vpop.f32.mrf.mxu3  ;;  %v721_v40 = vpop.f32.mrf.mxu0 }
 0x225   : > { %v9241_v24 = vpop.eup %9240  ;;  %v3107_v10 = vsel %vm12964_vm6, %v3106_v59, %v3102_v33  ;;  %vm1764_vm12 = vweird.f32 %v12938_v2  ;;  %v13006_v31 = vadd.f32 %v12721_v45, %v869_v26  ;;  %v7658_v42 = vmul.f32 -1.442695, %v12988_v5 }
 0x226   : > { %18331 = vst [vmem:[#allocation69_spill] sm:$0xff] %v12999_v1  ;;  %v13009_v19 = vmul.f32 %v3107_v10, %v12795_v50   ;;  %v1763_v32 = vadd.f32 %v9237_v15, %v1762_v8  ;;  %v13011_v34 = vadd.f32 1.0, %v9241_v24  ;;  %vm1766_vm13 = vmor %vm1764_vm12, %vm1765_vm10  ;;  %vm1769_vm14 = vcmp.eq.f32.partialorder %v1768_v18, 8.507059e+37 }
 0x227   : > { %v9243_v48 = vpop.eup %9242  ;;  %v1771_v62 = vor.u32 1.1754944e-38, %v1770_v39  ;;  %vm2214_vm15 = vweird.f32 %v12977_v61  ;;  %v2668_v2 = vand.u32 2147483647, %v12990_v0  ;;  %vm13018_vm5 = vcmp.eq.f32.partialorder %v2218_v36, 8.507059e+37  ;;  %v796_v36 = vpop.f32.mrf.mxu1 }
 0x228   : > { %v1767_v35 = vsel %vm1766_vm13, %v9237_v15, %v1763_v32  ;;  %v2210_v57 = vmul.f32 %v9243_v48, %v12977_v61  ;;  %v2221_v59 = vor.u32 1.1754944e-38, %v2220_v51  ;;  %9248 = vrcp.f32 %v13011_v34 }
 0x229   : > { %v9245_v37 = vpop.eup %9244  ;;  %v1772_v49 = vsel %vm1769_vm14, %v1771_v62, %v1767_v35  ;;  %v2670_v13 = vand.u32 2147483648, %v12990_v0  ;;  %v7688_v18 = vmul.f32 -1.442695, %v13006_v31  ;;  %v13026_v7 = vadd.f32 %v12721_v45, %v944_v27 }
 0x22a   : > { %v9247_v55 = vpop.eup %9246  ;;  %v13029_v15 = vmul.f32 %v1772_v49, %v12806_v9   ;;  %v2211_v39 = vsub.f32 1.0, %v2210_v57  ;;  %v13031_v44 = vadd.f32 1.0, %v9245_v37  ;;  %9250 = vpow2.f32 %v7658_v42 }
 0x22b   : > { %v2660_v47 = vmul.f32 %v9247_v55, %v12990_v0  ;;  %vm2664_vm1 = vweird.f32 %v12990_v0  ;;  %vm13035_vm2 = vcmp.eq.f32.partialorder %v2668_v2, 8.507059e+37  ;;  %v3118_v26 = vand.u32 2147483647, %v13011_v34 }
 0x22c   : > { %18334 = vst [vmem:[#allocation70_spill] sm:$0xff] %v13029_v15  ;;  %v2212_v51 = vmul.f32 %v9243_v48, %v2211_v39  ;;  %vm2215_vm3 = vweird.f32 %v9243_v48  ;;  %v3120_v9 = vand.u32 2147483648, %v13011_v34  ;;  %9252 = vrcp.f32 %v13031_v44 }
 0x22d   : > { %v2661_v33 = vsub.f32 1.0, %v2660_v47  ;;  %v2671_v8 = vor.u32 1.1754944e-38, %v2670_v13  ;;  %9254 = vpow2.f32 %v7688_v18  ;;  %v7718_v24 = vmul.f32 -1.442695, %v13026_v7  ;;  %vm2216_vm4 = vmor %vm2214_vm15, %vm2215_vm3 }
 0x22e   : > { %v9249_v10 = vpop.eup %9248  ;;  %v2213_v32 = vadd.f32 %v9243_v48, %v2212_v51  ;;  %vm3114_vm0 = vweird.f32 %v13011_v34  ;;  %v13045_v42 = vadd.f32 %v12721_v45, %v721_v40  ;;  %v13048_v27 = vadd.f32 %v12721_v45, %v796_v36 }
 0x22f   : > { %v2662_v62 = vmul.f32 %v9247_v55, %v2661_v33  ;;  %vm2665_vm6 = vweird.f32 %v9247_v55  ;;  %v3110_v2 = vmul.f32 %v9249_v10, %v13011_v34  ;;  %vm13053_vm7 = vcmp.eq.f32.partialorder %v3118_v26, 8.507059e+37  ;;  %v871_v26 = vpop.f32.mrf.mxu2 }
 0x230   : > { %v9251_v57 = vpop.eup %9250  ;;  %v2217_v37 = vsel %vm2216_vm4, %v9243_v48, %v2213_v32  ;;  %v3121_v49 = vor.u32 1.1754944e-38, %v3120_v9  ;;  %9256 = vpow2.f32 %v7718_v24  ;;  %v7629_v13 = vmul.f32 -1.442695, %v13045_v42  ;;  %vm2666_vm8 = vmor %vm2664_vm1, %vm2665_vm6 }
 0x231   : > { %v2222_v18 = vsel %vm13018_vm5, %v2221_v59, %v2217_v37  ;;  %v2663_v39 = vadd.f32 %v9247_v55, %v2662_v62  ;;  %v3111_v61 = vsub.f32 1.0, %v3110_v2  ;;  %v13060_v47 = vadd.f32 1.0, %v9251_v57 }
 0x232   : > { %v9253_v40 = vpop.eup %9252  ;;  %v13063_v36 = vmul.f32 %v2222_v18, %v12829_v23   ;;  %vm3115_vm9 = vweird.f32 %v9249_v10  ;;  %vm1779_vm10 = vweird.f32 %v13031_v44  ;;  %v7659_v48 = vmul.f32 -1.442695, %v13048_v27  ;;  %v946_v18 = vpop.f32.mrf.mxu3 }
 0x233   : > { %v9255_v51 = vpop.eup %9254  ;;  %v2667_v50 = vsel %vm2666_vm8, %v9247_v55, %v2663_v39  ;;  %v3112_v59 = vmul.f32 %v9249_v10, %v3111_v61  ;;  %v1775_v9 = vmul.f32 %v9253_v40, %v13031_v44  ;;  %9258 = vpow2.f32 %v7629_v13  ;;  %vm3116_vm11 = vmor %vm3114_vm0, %vm3115_vm9 }
 0x234   : > { %18339 = vst [vmem:[#allocation71_spill] sm:$0xff] %v13063_v36  ;;  %v2672_v33 = vsel %vm13035_vm2, %v2671_v8, %v2667_v50  ;;  %v1783_v23 = vand.u32 2147483647, %v13031_v44  ;;  %v1785_v0 = vand.u32 2147483648, %v13031_v44  ;;  %9260 = vrcp.f32 %v13060_v47 }
 0x235   : > { %v13076_v24 = vmul.f32 %v2672_v33, %v12832_v60   ;;  %v3113_v32 = vadd.f32 %v9249_v10, %v3112_v59  ;;  %v1776_v62 = vsub.f32 1.0, %v1775_v9  ;;  %v13079_v55 = vadd.f32 %v12721_v45, %v871_v26 }
 0x236   : > { %v9257_v2 = vpop.eup %9256  ;;  %vm1780_vm12 = vweird.f32 %v9253_v40  ;;  %v2233_v30 = vand.u32 2147483647, %v13060_v47  ;;  %v13085_v8 = vadd.f32 1.0, %v9255_v51  ;;  %9262 = vpow2.f32 %v7659_v48 }
 0x237   : > { %18340 = vst [vmem:[#allocation72_spill] sm:$0xff] %v13076_v24  ;;  %v3117_v57 = vsel %vm3116_vm11, %v9249_v10, %v3113_v32  ;;  %v1777_v37 = vmul.f32 %v9253_v40, %v1776_v62  ;;  %v2235_v60 = vand.u32 2147483648, %v13060_v47  ;;  %v13088_v13 = vadd.f32 1.0, %v9257_v2  ;;  %vm1781_vm13 = vmor %vm1779_vm10, %vm1780_vm12  ;;  %v874_v54 = vpop.f32.mrf.mxu2 }
 0x238   : > { %v3122_v39 = vsel %vm13053_vm7, %v3121_v49, %v3117_v57  ;;  %9264 = vrcp.f32 %v13085_v8  ;;  %v7689_v10 = vmul.f32 -1.442695, %v13079_v55  ;;  %vm1784_vm14 = vcmp.eq.f32.partialorder %v1783_v23, 8.507059e+37 }
 0x239   : > { %v9259_v34 = vpop.eup %9258  ;;  %v13094_v61 = vmul.f32 %v3122_v39, %v12961_v63   ;;  %v1778_v26 = vadd.f32 %v9253_v40, %v1777_v37  ;;  %9266 = vrcp.f32 %v13088_v13  ;;  %v1786_v51 = vor.u32 1.1754944e-38, %v1785_v0 }
 0x23a   : > { %v9261_v48 = vpop.eup %9260  ;;  %vm2229_vm15 = vweird.f32 %v13060_v47  ;;  %v13103_v35 = vadd.f32 %v12721_v45, %v946_v18  ;;  %vm13106_vm5 = vcmp.eq.f32.partialorder %v2233_v30, 8.507059e+37  ;;  %v2236_v59 = vor.u32 1.1754944e-38, %v2235_v60 }
 0x23b   : > { %v1782_v49 = vsel %vm1781_vm13, %v9253_v40, %v1778_v26  ;;  %v2225_v63 = vmul.f32 %v9261_v48, %v13060_v47  ;;  %v2683_v9 = vand.u32 2147483647, %v13085_v8  ;;  %v2685_v23 = vand.u32 2147483648, %v13085_v8 }
 0x23c   : > { %v9263_v33 = vpop.eup %9262  ;;  %v1787_v44 = vsel %vm1784_vm14, %v1786_v51, %v1782_v49  ;;  %v3133_v0 = vand.u32 2147483647, %v13088_v13  ;;  %v13113_v32 = vadd.f32 1.0, %v9259_v34  ;;  %9268 = vpow2.f32 %v7689_v10 }
 0x23d   : > { %v13116_v62 = vmul.f32 %v1787_v44, %v12972_v56   ;;  %v2226_v40 = vsub.f32 1.0, %v2225_v63  ;;  %v13118_v2 = vadd.f32 1.0, %v9263_v33  ;;  %vm2230_vm1 = vweird.f32 %v9261_v48  ;;  %v724_v56 = vpop.f32.mrf.mxu0  ;;  %v799_v44 = vpop.f32.mrf.mxu1 }
 0x23e   : > { %v9265_v30 = vpop.eup %9264  ;;  %vm2679_vm2 = vweird.f32 %v13085_v8  ;;  %v3135_v57 = vand.u32 2147483648, %v13088_v13  ;;  %9270 = vrcp.f32 %v13113_v32  ;;  %v1800_v39 = vand.u32 2147483648, %v13113_v32  ;;  %vm2231_vm6 = vmor %vm2229_vm15, %vm2230_vm1 }
 0x23f   : > { %18343 = vst [vmem:[#allocation73_spill] sm:$0xff] %v13116_v62  ;;  %v9267_v37 = vpop.eup %9266  ;;  %v2227_v60 = vmul.f32 %v9261_v48, %v2226_v40  ;;  %v2675_v18 = vmul.f32 %v9265_v30, %v13085_v8  ;;  %9272 = vrcp.f32 %v13118_v2  ;;  %vm13126_vm3 = vcmp.eq.f32.partialorder %v2683_v9, 8.507059e+37 }
 0x240   : > { %v2686_v26 = vor.u32 1.1754944e-38, %v2685_v23  ;;  %v3125_v10 = vmul.f32 %v9267_v37, %v13088_v13  ;;  %vm3129_vm0 = vweird.f32 %v13088_v13  ;;  %vm13132_vm4 = vcmp.eq.f32.partialorder %v3133_v0, 8.507059e+37 }
 0x241   : > { %v2228_v51 = vadd.f32 %v9261_v48, %v2227_v60  ;;  %v2676_v49 = vsub.f32 1.0, %v2675_v18  ;;  %v1798_v33 = vand.u32 2147483647, %v13113_v32  ;;  %vm2680_vm7 = vweird.f32 %v9265_v30 }
 0x242   : > { %v3126_v9 = vsub.f32 1.0, %v3125_v10  ;;  %vm3130_vm8 = vweird.f32 %v9267_v37  ;;  %v3136_v23 = vor.u32 1.1754944e-38, %v3135_v57  ;;  %v9269_v40 = vpop.eup %9268  ;;  %vm1794_vm9 = vweird.f32 %v13113_v32  ;;  %vm2681_vm12 = vmor %vm2679_vm2, %vm2680_vm7 }
 0x243   : > { %v2232_v58 = vsel %vm2231_vm6, %v9261_v48, %v2228_v51  ;;  %v2677_v14 = vmul.f32 %v9265_v30, %v2676_v49  ;;  %v1801_v0 = vor.u32 1.1754944e-38, %v1800_v39  ;;  %v2248_v60 = vand.u32 2147483647, %v13118_v2  ;;  %vm3131_vm13 = vmor %vm3129_vm0, %vm3130_vm8 }
 0x244   : > { %v9271_v18 = vpop.eup %9270  ;;  %v2237_v15 = vsel %vm13106_vm5, %v2236_v59, %v2232_v58  ;;  %v3127_v62 = vmul.f32 %v9267_v37, %v3126_v9  ;;  %vm2244_vm10 = vweird.f32 %v13118_v2  ;;  %v2250_v47 = vand.u32 2147483648, %v13118_v2 }
 0x245   : > { %v13146_v10 = vadd.f32 1.0, %v9269_v40  ;;  %v9273_v57 = vpop.eup %9272  ;;  %v13149_v48 = vmul.f32 %v2237_v15, %v12988_v5   ;;  %v2678_v51 = vadd.f32 %v9265_v30, %v2677_v14  ;;  %v1790_v39 = vmul.f32 %v9271_v18, %v13113_v32  ;;  %v801_v63 = vpop.f32.mrf.mxu1 }
 0x246   : > { %vm13152_vm11 = vcmp.eq.f32.partialorder %v1798_v33, 8.507059e+37  ;;  %v7719_v58 = vmul.f32 -1.442695, %v13103_v35  ;;  %v3128_v50 = vadd.f32 %v9267_v37, %v3127_v62  ;;  %v2240_v59 = vmul.f32 %v9273_v57, %v13118_v2  ;;  %v876_v33 = vpop.f32.mrf.mxu2 }
 0x247   : > { %18348 = vst [vmem:[#allocation74_spill] sm:$0xff] %v13149_v48  ;;  %9274 = vrcp.f32 %v13146_v10  ;;  %v13163_v5 = vadd.f32 %v12721_v45, %v724_v56  ;;  %v2682_v14 = vsel %vm2681_vm12, %v9265_v30, %v2678_v51  ;;  %v1791_v15 = vsub.f32 1.0, %v1790_v39  ;;  %v949_v51 = vpop.f32.mrf.mxu3  ;;  %v726_v39 = vpop.f32.mrf.mxu0 }
 0x248   : > { %vm13168_vm14 = vcmp.eq.f32.partialorder %v2248_v60, 8.507059e+37  ;;  %v13173_v8 = vadd.f32 %v12721_v45, %v799_v44  ;;  %v2687_v62 = vsel %vm13126_vm3, %v2686_v26, %v2682_v14  ;;  %v3132_v9 = vsel %vm3131_vm13, %v9267_v37, %v3128_v50 }
 0x249   : > { %v2241_v40 = vsub.f32 1.0, %v2240_v59  ;;  %v2251_v56 = vor.u32 1.1754944e-38, %v2250_v47  ;;  %v13178_v30 = vmul.f32 %v2687_v62, %v13006_v31   ;;  %v3137_v13 = vsel %vm13132_vm4, %v3136_v23, %v3132_v9 }
 0x24a   : > { %v1792_v60 = vmul.f32 %v9271_v18, %v1791_v15  ;;  %vm1795_vm15 = vweird.f32 %v9271_v18  ;;  %v13183_v44 = vmul.f32 %v3137_v13, %v13026_v7   ;;  %vm2245_vm5 = vweird.f32 %v9273_v57 }
 0x24b   : > { %18353 = vst [vmem:[#allocation75_spill] sm:$0xff] %v13178_v30  ;;  %v2242_v17 = vmul.f32 %v9273_v57, %v2241_v40  ;;  %9276 = vpow2.f32 %v7719_v58  ;;  %v7630_v34 = vmul.f32 -1.442695, %v13163_v5  ;;  %v7660_v26 = vmul.f32 -1.442695, %v13173_v8  ;;  %vm1796_vm1 = vmor %vm1794_vm9, %vm1795_vm15 }
 0x24c   : > { %v1793_v37 = vadd.f32 %v9271_v18, %v1792_v60  ;;  %v13188_v31 = vadd.f32 %v12721_v45, %v874_v54  ;;  %v2698_v7 = vand.u32 2147483647, %v13146_v10  ;;  %v13194_v50 = vadd.f32 %v12721_v45, %v949_v51  ;;  %vm2246_vm2 = vmor %vm2244_vm10, %vm2245_vm5 }
 0x24d   : > { %v9275_v23 = vpop.eup %9274  ;;  %v2243_v47 = vadd.f32 %v9273_v57, %v2242_v17  ;;  %v13197_v58 = vadd.f32 %v12721_v45, %v726_v39  ;;  %v2700_v14 = vand.u32 2147483648, %v13146_v10  ;;  %9278 = vpow2.f32 %v7630_v34 }
 0x24e   : > { %v1797_v59 = vsel %vm1796_vm1, %v9271_v18, %v1793_v37  ;;  %v2690_v54 = vmul.f32 %v9275_v23, %v13146_v10  ;;  %9280 = vpow2.f32 %v7660_v26  ;;  %v7690_v15 = vmul.f32 -1.442695, %v13188_v31 }
 0x24f   : > { %v1802_v17 = vsel %vm13152_vm11, %v1801_v0, %v1797_v59  ;;  %v2247_v32 = vsel %vm2246_vm2, %v9273_v57, %v2243_v47  ;;  %v7720_v9 = vmul.f32 -1.442695, %v13194_v50  ;;  %v7631_v0 = vmul.f32 -1.442695, %v13197_v58  ;;  %v729_v26 = vpop.f32.mrf.mxu0 }
 0x250   : > { %v13207_v62 = vmul.f32 %v1802_v17, %v13045_v42   ;;  %v2252_v18 = vsel %vm13168_vm14, %v2251_v56, %v2247_v32  ;;  %v2691_v2 = vsub.f32 1.0, %v2690_v54  ;;  %9282 = vpow2.f32 %v7690_v15  ;;  %v804_v54 = vpop.f32.mrf.mxu1 }
 0x251   : > { %v9277_v40 = vpop.eup %9276  ;;  %v13213_v13 = vmul.f32 %v2252_v18, %v13048_v27   ;;  %v13217_v57 = vadd.f32 %v12721_v45, %v801_v63  ;;  %vm2695_vm3 = vweird.f32 %v9275_v23  ;;  %9284 = vpow2.f32 %v7720_v9  ;;  %v951_v27 = vpop.f32.mrf.mxu3 }
 0x252   : > { %18354 = vst [vmem:[#allocation76_spill] sm:$0xff] %v13207_v62  ;;  %v2692_v49 = vmul.f32 %v9275_v23, %v2691_v2  ;;  %v13219_v42 = vadd.f32 1.0, %v9277_v40  ;;  %9286 = vpow2.f32 %v7631_v0  ;;  %vm2694_vm0 = vweird.f32 %v13146_v10 }
 0x253   : > { %18355 = vst [vmem:[#allocation77_spill] sm:$0xff] %v13213_v13  ;;  %v9279_v56 = vpop.eup %9278  ;;  %vm2696_vm4 = vmor %vm2694_vm0, %vm2695_vm3  ;;  %v2701_v39 = vor.u32 1.1754944e-38, %v2700_v14  ;;  %v7661_v34 = vmul.f32 -1.442695, %v13217_v57  ;;  %vm2699_vm6 = vcmp.eq.f32.partialorder %v2698_v7, 8.507059e+37  ;;  %v13229_v59 = vadd.f32 %v12721_v45, %v876_v33 }
 0x254   : > { %v2693_v60 = vadd.f32 %v9275_v23, %v2692_v49  ;;  %9288 = vrcp.f32 %v13219_v42  ;;  %v9281_v51 = vpop.eup %9280  ;;  %v13223_v37 = vadd.f32 1.0, %v9279_v56  ;;  %v3148_v32 = vand.u32 2147483647, %v13219_v42  ;;  %v13244_v7 = vld [vmem:[%s18102_s2] ss:$0 sm:$0xff] }
 0x255   : > { %v13226_v47 = vadd.f32 1.0, %v9281_v51  ;;  %v13234_v14 = vadd.f32 %v12721_v45, %v951_v27  ;;  %v13247_v2 = vadd.f32 %v13244_v7, %v729_v26  ;;  %vm3144_vm7 = vweird.f32 %v13219_v42 }
 0x256   : > { %v2697_v63 = vsel %vm2696_vm4, %v9275_v23, %v2693_v60  ;;  %v9283_v10 = vpop.eup %9282  ;;  %9290 = vrcp.f32 %v13223_v37  ;;  %v3150_v23 = vand.u32 2147483648, %v13219_v42  ;;  %v1813_v0 = vand.u32 2147483647, %v13223_v37 }
 0x257   : > { %v2702_v17 = vsel %vm2699_vm6, %v2701_v39, %v2697_v63  ;;  %v9285_v15 = vpop.eup %9284  ;;  %9292 = vrcp.f32 %v13226_v47  ;;  %v13250_v45 = vadd.f32 1.0, %v9283_v10  ;;  %v1815_v49 = vand.u32 2147483648, %v13223_v37 }
 0x258   : > { %v13237_v18 = vmul.f32 %v2702_v17, %v13079_v55   ;;  %v9287_v9 = vpop.eup %9286  ;;  %9294 = vpow2.f32 %v7661_v34  ;;  %v13253_v55 = vadd.f32 %v13244_v7, %v804_v54  ;;  %v13257_v33 = vadd.f32 1.0, %v9285_v15 }
 0x259   : > { %v7691_v56 = vmul.f32 -1.442695, %v13229_v59  ;;  %vm13261_vm8 = vcmp.eq.f32.partialorder %v3148_v32, 8.507059e+37  ;;  %v2263_v51 = vand.u32 2147483647, %v13226_v47  ;;  %v3151_v34 = vor.u32 1.1754944e-38, %v3150_v23 }
 0x25a   : > { %18356 = vst [vmem:[#allocation78_spill] sm:$0xff] %v13237_v18  ;;  %v9289_v40 = vpop.eup %9288  ;;  %v13267_v39 = vmul.f32 -1.442695, %v13234_v14  ;;  %v2265_v26 = vand.u32 2147483648, %v13226_v47  ;;  %9296 = vrcp.f32 %v13250_v45  ;;  %v13271_v63 = vadd.f32 1.0, %v9287_v9 }
 0x25b   : > { %v3140_v60 = vmul.f32 %v9289_v40, %v13219_v42  ;;  %vm1809_vm9 = vweird.f32 %v13223_v37  ;;  %vm2259_vm10 = vweird.f32 %v13226_v47  ;;  %9298 = vrcp.f32 %v13257_v33 }
 0x25c   : > { %v9291_v54 = vpop.eup %9290  ;;  %vm3145_vm11 = vweird.f32 %v9289_v40  ;;  %vm13277_vm12 = vcmp.eq.f32.partialorder %v1813_v0, 8.507059e+37  ;;  %v1816_v23 = vor.u32 1.1754944e-38, %v1815_v49  ;;  %v2715_v9 = vand.u32 2147483648, %v13250_v45 }
 0x25d   : > { %v3141_v10 = vsub.f32 1.0, %v3140_v60  ;;  %v9293_v17 = vpop.eup %9292  ;;  %v1805_v32 = vmul.f32 %v9291_v54, %v13223_v37  ;;  %vm13283_vm13 = vcmp.eq.f32.partialorder %v2263_v51, 8.507059e+37  ;;  %v2713_v13 = vand.u32 2147483647, %v13250_v45  ;;  %vm3146_vm5 = vmor %vm3144_vm7, %vm3145_vm11 }
 0x25e   : > { %v9295_v62 = vpop.eup %9294  ;;  %v2255_v60 = vmul.f32 %v9293_v17, %v13226_v47  ;;  %v2266_v1 = vor.u32 1.1754944e-38, %v2265_v26  ;;  %v3163_v0 = vand.u32 2147483647, %v13257_v33  ;;  %9300 = vrcp.f32 %v13271_v63 }
 0x25f   : > { %v3142_v36 = vmul.f32 %v9289_v40, %v3141_v10  ;;  %v1806_v53 = vsub.f32 1.0, %v1805_v32  ;;  %vm1810_vm14 = vweird.f32 %v9291_v54  ;;  %vm2709_vm15 = vweird.f32 %v13250_v45 }
 0x260   : > { %v2256_v49 = vsub.f32 1.0, %v2255_v60  ;;  %v9297_v10 = vpop.eup %9296  ;;  %v2716_v30 = vor.u32 1.1754944e-38, %v2715_v9  ;;  %vm3159_vm1 = vweird.f32 %v13257_v33  ;;  %v13295_v32 = vadd.f32 1.0, %v9295_v62  ;;  %vm1811_vm4 = vmor %vm1809_vm9, %vm1810_vm14 }
 0x261   : > { %v3143_v24 = vadd.f32 %v9289_v40, %v3142_v36  ;;  %v1807_v51 = vmul.f32 %v9291_v54, %v1806_v53  ;;  %9302 = vpow2.f32 %v7691_v56  ;;  %v9299_v26 = vpop.eup %9298  ;;  %vm2260_vm2 = vweird.f32 %v9293_v17 }
 0x262   : > { %v2257_v12 = vmul.f32 %v9293_v17, %v2256_v49  ;;  %v2705_v36 = vmul.f32 %v9297_v10, %v13250_v45  ;;  %vm13298_vm3 = vcmp.eq.f32.partialorder %v2713_v13, 8.507059e+37  ;;  %v3155_v9 = vmul.f32 %v9299_v26, %v13257_v33  ;;  %vm2261_vm6 = vmor %vm2259_vm10, %vm2260_vm2 }
 0x263   : > { %v3147_v18 = vsel %vm3146_vm5, %v9289_v40, %v3143_v24  ;;  %v1808_v53 = vadd.f32 %v9291_v54, %v1807_v51  ;;  %vm13305_vm0 = vcmp.eq.f32.partialorder %v3163_v0, 8.507059e+37  ;;  %v3165_v56 = vand.u32 2147483648, %v13257_v33 }
 0x264   : > { %v3152_v42 = vsel %vm13261_vm8, %v3151_v34, %v3147_v18  ;;  %v2258_v13 = vadd.f32 %v9293_v17, %v2257_v12  ;;  %v2706_v40 = vsub.f32 1.0, %v2705_v36  ;;  %v9301_v27 = vpop.eup %9300  ;;  %vm2710_vm7 = vweird.f32 %v9297_v10 }
 0x265   : > { %v13310_v24 = vmul.f32 %v3152_v42, %v13103_v35   ;;  %v1812_v18 = vsel %vm1811_vm4, %v9291_v54, %v1808_v53  ;;  %v3156_v34 = vsub.f32 1.0, %v3155_v9  ;;  %9304 = vrcp.f32 %v13295_v32  ;;  %vm2711_vm9 = vmor %vm2709_vm15, %vm2710_vm7 }
 0x266   : > { %v1817_v35 = vsel %vm13277_vm12, %v1816_v23, %v1812_v18  ;;  %v2262_v0 = vsel %vm2261_vm6, %v9293_v17, %v2258_v13  ;;  %v2707_v49 = vmul.f32 %v9297_v10, %v2706_v40  ;;  %v1820_v37 = vmul.f32 %v9301_v27, %v13271_v63 }
 0x267   : > { %v9303_v12 = vpop.eup %9302  ;;  %v13323_v51 = vmul.f32 %v1817_v35, %v13163_v5   ;;  %v2267_v54 = vsel %vm13283_vm13, %v2266_v1, %v2262_v0  ;;  %v3157_v47 = vmul.f32 %v9299_v26, %v3156_v34  ;;  %vm3160_vm8 = vweird.f32 %v9299_v26 }
 0x268   : > { %v13328_v36 = vmul.f32 %v2267_v54, %v13173_v8   ;;  %v2708_v42 = vadd.f32 %v9297_v10, %v2707_v49  ;;  %v1821_v53 = vsub.f32 1.0, %v1820_v37  ;;  %v1828_v15 = vand.u32 2147483647, %v13271_v63  ;;  %vm3161_vm10 = vmor %vm3159_vm1, %vm3160_vm8 }
 0x269   : > { %18367 = vst [vmem:[#allocation79_spill] sm:$0xff] %v13323_v51  ;;  %v3158_v17 = vadd.f32 %v9299_v26, %v3157_v47  ;;  %v3166_v23 = vor.u32 1.1754944e-38, %v3165_v56  ;;  %v1830_v5 = vand.u32 2147483648, %v13271_v63  ;;  %v13335_v9 = vadd.f32 1.0, %v9303_v12  ;;  %v879_v56 = vpop.f32.mrf.mxu2 }
 0x26a   : > { %18368 = vst [vmem:[#allocation80_spill] sm:$0xff] %v13328_v36  ;;  %v2712_v1 = vsel %vm2711_vm9, %v9297_v10, %v2708_v42  ;;  %v1822_v48 = vmul.f32 %v9301_v27, %v1821_v53  ;;  %vm1825_vm11 = vweird.f32 %v9301_v27  ;;  %9306 = vpow2.f32 %v13267_v39  ;;  %v954_v39 = vpop.f32.mrf.mxu3 }
 0x26b   : > { %v9305_v8 = vpop.eup %9304  ;;  %v2717_v13 = vsel %vm13298_vm3, %v2716_v30, %v2712_v1  ;;  %v3162_v45 = vsel %vm3161_vm10, %v9299_v26, %v3158_v17  ;;  %vm1824_vm12 = vweird.f32 %v13271_v63  ;;  %v7632_v40 = vmul.f32 -1.442695, %v13247_v2 }
 0x26c   : > { %v13345_v18 = vmul.f32 %v2717_v13, %v13188_v31   ;;  %v3167_v33 = vsel %vm13305_vm0, %v3166_v23, %v3162_v45  ;;  %v1823_v10 = vadd.f32 %v9301_v27, %v1822_v48  ;;  %v2270_v34 = vmul.f32 %v9305_v8, %v13295_v32  ;;  %vm1826_vm13 = vmor %vm1824_vm12, %vm1825_vm11 }
 0x26d   : > { %v13351_v35 = vmul.f32 %v3167_v33, %v13194_v50   ;;  %vm1829_vm14 = vcmp.eq.f32.partialorder %v1828_v15, 8.507059e+37  ;;  %v1831_v30 = vor.u32 1.1754944e-38, %v1830_v5  ;;  %9308 = vrcp.f32 %v13335_v9  ;;  %v731_v50 = vpop.f32.mrf.mxu0 }
 0x26e   : > { %18369 = vst [vmem:[#allocation81_spill] sm:$0xff] %v13345_v18  ;;  %v1827_v63 = vsel %vm1826_vm13, %v9301_v27, %v1823_v10  ;;  %v2271_v26 = vsub.f32 1.0, %v2270_v34  ;;  %v2278_v31 = vand.u32 2147483647, %v13295_v32  ;;  %v2280_v60 = vand.u32 2147483648, %v13295_v32 }
 0x26f   : > { %v1832_v62 = vsel %vm1829_vm14, %v1831_v30, %v1827_v63  ;;  %9310 = vpow2.f32 %v7632_v40  ;;  %v7662_v0 = vmul.f32 -1.442695, %v13253_v55  ;;  %v13358_v49 = vadd.f32 %v13244_v7, %v879_v56 }
 0x270   : > { %v9307_v37 = vpop.eup %9306  ;;  %v13361_v12 = vmul.f32 %v1832_v62, %v13197_v58   ;;  %v2272_v54 = vmul.f32 %v9305_v8, %v2271_v26  ;;  %vm2275_vm15 = vweird.f32 %v9305_v8  ;;  %v13367_v42 = vadd.f32 %v13244_v7, %v954_v39 }
 0x271   : > { %v13363_v27 = vadd.f32 1.0, %v9307_v37  ;;  %9312 = vpow2.f32 %v7662_v0  ;;  %v7692_v47 = vmul.f32 -1.442695, %v13358_v49  ;;  %vm2274_vm5 = vweird.f32 %v13295_v32  ;;  %v806_v32 = vpop.f32.mrf.mxu1  ;;  %v881_v10 = vpop.f32.mrf.mxu2 }
 0x272   : > { %18370 = vst [vmem:[#allocation82_spill] sm:$0xff] %v13361_v12  ;;  %v2273_v53 = vadd.f32 %v9305_v8, %v2272_v54  ;;  %vm2279_vm1 = vcmp.eq.f32.partialorder %v2278_v31, 8.507059e+37  ;;  %v13371_v15 = vadd.f32 %v13244_v7, %v731_v50  ;;  %vm2276_vm2 = vmor %vm2274_vm5, %vm2275_vm15  ;;  %v2281_v58 = vor.u32 1.1754944e-38, %v2280_v60  ;;  %v956_v63 = vpop.f32.mrf.mxu3 }
 0x273   : > { %v9309_v17 = vpop.eup %9308  ;;  %v2728_v23 = vand.u32 2147483647, %v13335_v9  ;;  %v2730_v5 = vand.u32 2147483648, %v13335_v9  ;;  %9314 = vrcp.f32 %v13363_v27  ;;  %vm2724_vm3 = vweird.f32 %v13335_v9 }
 0x274   : > { %v2277_v1 = vsel %vm2276_vm2, %v9305_v8, %v2273_v53  ;;  %v2720_v48 = vmul.f32 %v9309_v17, %v13335_v9  ;;  %9316 = vpow2.f32 %v7692_v47  ;;  %v3178_v40 = vand.u32 2147483647, %v13363_v27 }
 0x275   : > { %v9311_v13 = vpop.eup %9310  ;;  %v2282_v45 = vsel %vm2279_vm1, %v2281_v58, %v2277_v1  ;;  %v3180_v56 = vand.u32 2147483648, %v13363_v27  ;;  %v7722_v33 = vmul.f32 -1.442695, %v13367_v42  ;;  %v7633_v30 = vmul.f32 -1.442695, %v13371_v15 }
 0x276   : > { %v13382_v34 = vmul.f32 %v2282_v45, %v13217_v57   ;;  %v2721_v39 = vsub.f32 1.0, %v2720_v48  ;;  %v13384_v8 = vadd.f32 1.0, %v9311_v13  ;;  %vm13387_vm0 = vcmp.eq.f32.partialorder %v2728_v23, 8.507059e+37 }
 0x277   : > { %v9313_v26 = vpop.eup %9312  ;;  %v2731_v60 = vor.u32 1.1754944e-38, %v2730_v5  ;;  %9318 = vpow2.f32 %v7722_v33  ;;  %v13392_v62 = vadd.f32 %v13244_v7, %v806_v32  ;;  %vm2725_vm4 = vweird.f32 %v9309_v17 }
 0x278   : > { %18371 = vst [vmem:[#allocation83_spill] sm:$0xff] %v13382_v34  ;;  %v2722_v0 = vmul.f32 %v9309_v17, %v2721_v39  ;;  %9320 = vrcp.f32 %v13384_v8  ;;  %v13396_v57 = vadd.f32 %v13244_v7, %v881_v10  ;;  %vm3174_vm6 = vweird.f32 %v13363_v27  ;;  %vm2726_vm8 = vmor %vm2724_vm3, %vm2725_vm4  ;;  %v734_v39 = vpop.f32.mrf.mxu0 }
 0x279   : > { %v9315_v50 = vpop.eup %9314  ;;  %v13399_v37 = vadd.f32 1.0, %v9313_v26  ;;  %9322 = vpow2.f32 %v7633_v30  ;;  %v13402_v54 = vadd.f32 %v13244_v7, %v956_v63  ;;  %vm13405_vm7 = vcmp.eq.f32.partialorder %v3178_v40, 8.507059e+37  ;;  %v884_v36 = vpop.f32.mrf.mxu2 }
 0x27a   : > { %v9317_v47 = vpop.eup %9316  ;;  %v2723_v53 = vadd.f32 %v9309_v17, %v2722_v0  ;;  %v3170_v58 = vmul.f32 %v9315_v50, %v13363_v27  ;;  %v3181_v5 = vor.u32 1.1754944e-38, %v3180_v56  ;;  %v1843_v1 = vand.u32 2147483647, %v13384_v8 }
 0x27b   : > { %v1845_v48 = vand.u32 2147483648, %v13384_v8  ;;  %9324 = vrcp.f32 %v13399_v37  ;;  %v7663_v32 = vmul.f32 -1.442695, %v13392_v62  ;;  %v13415_v33 = vadd.f32 1.0, %v9317_v47 }
 0x27c   : > { %v2727_v13 = vsel %vm2726_vm8, %v9309_v17, %v2723_v53  ;;  %v3171_v45 = vsub.f32 1.0, %v3170_v58  ;;  %v7693_v40 = vmul.f32 -1.442695, %v13396_v57  ;;  %vm3175_vm9 = vweird.f32 %v9315_v50 }
 0x27d   : > { %v9319_v10 = vpop.eup %9318  ;;  %v2732_v56 = vsel %vm13387_vm0, %v2731_v60, %v2727_v13  ;;  %vm1839_vm10 = vweird.f32 %v13384_v8  ;;  %v13422_v9 = vmul.f32 -1.442695, %v13402_v54  ;;  %v2293_v26 = vand.u32 2147483647, %v13399_v37  ;;  %vm3176_vm13 = vmor %vm3174_vm6, %vm3175_vm9 }
 0x27e   : > { %v9321_v30 = vpop.eup %9320  ;;  %v13425_v63 = vmul.f32 %v2732_v56, %v13229_v59   ;;  %v3172_v17 = vmul.f32 %v9315_v50, %v3171_v45  ;;  %9326 = vrcp.f32 %v13415_v33  ;;  %vm13430_vm11 = vcmp.eq.f32.partialorder %v1843_v1, 8.507059e+37 }
 0x27f   : > { %v9323_v0 = vpop.eup %9322  ;;  %v1835_v31 = vmul.f32 %v9321_v30, %v13384_v8  ;;  %v1846_v47 = vor.u32 1.1754944e-38, %v1845_v48  ;;  %vm2289_vm12 = vweird.f32 %v13399_v37  ;;  %9328 = vpow2.f32 %v7663_v32 }
 0x280   : > { %18376 = vst [vmem:[#allocation84_spill] sm:$0xff] %v13425_v63  ;;  %v3173_v53 = vadd.f32 %v9315_v50, %v3172_v17  ;;  %v2295_v59 = vand.u32 2147483648, %v13399_v37  ;;  %v13436_v58 = vadd.f32 1.0, %v9319_v10  ;;  %v13439_v13 = vadd.f32 %v13244_v7, %v734_v39 }
 0x281   : > { %v9325_v45 = vpop.eup %9324  ;;  %v1836_v1 = vsub.f32 1.0, %v1835_v31  ;;  %v2743_v56 = vand.u32 2147483647, %v13415_v33  ;;  %v13445_v48 = vadd.f32 1.0, %v9323_v0  ;;  %9330 = vpow2.f32 %v7693_v40 }
 0x282   : > { %v3177_v32 = vsel %vm3176_vm13, %v9315_v50, %v3173_v53  ;;  %v2285_v17 = vmul.f32 %v9325_v45, %v13399_v37  ;;  %vm13448_vm14 = vcmp.eq.f32.partialorder %v2293_v26, 8.507059e+37  ;;  %v2745_v39 = vand.u32 2147483648, %v13415_v33 }
 0x283   : > { %v3182_v51 = vsel %vm13405_vm7, %v3181_v5, %v3177_v32  ;;  %v1837_v27 = vmul.f32 %v9321_v30, %v1836_v1  ;;  %vm1840_vm15 = vweird.f32 %v9321_v30  ;;  %9332 = vrcp.f32 %v13436_v58 }
 0x284   : > { %v9327_v31 = vpop.eup %9326  ;;  %v13457_v0 = vmul.f32 %v3182_v51, %v13234_v14   ;;  %v2286_v50 = vsub.f32 1.0, %v2285_v17  ;;  %v2296_v40 = vor.u32 1.1754944e-38, %v2295_v59  ;;  %vm2739_vm5 = vweird.f32 %v13415_v33  ;;  %vm1841_vm2 = vmor %vm1839_vm10, %vm1840_vm15 }
 0x285   : > { %v9329_v26 = vpop.eup %9328  ;;  %v1838_v53 = vadd.f32 %v9321_v30, %v1837_v27  ;;  %v2735_v12 = vmul.f32 %v9327_v31, %v13415_v33  ;;  %vm13461_vm1 = vcmp.eq.f32.partialorder %v2743_v56, 8.507059e+37  ;;  %9334 = vrcp.f32 %v13445_v48 }
 0x286   : > { %v13467_v23 = vmul.f32 -1.442695, %v13439_v13  ;;  %v2287_v14 = vmul.f32 %v9325_v45, %v2286_v50  ;;  %vm2290_vm3 = vweird.f32 %v9325_v45  ;;  %v2746_v51 = vor.u32 1.1754944e-38, %v2745_v39 }
 0x287   : > { %v3193_v5 = vand.u32 2147483647, %v13436_v58  ;;  %v9331_v59 = vpop.eup %9330  ;;  %v1842_v1 = vsel %vm1841_vm2, %v9321_v30, %v1838_v53  ;;  %v2736_v32 = vsub.f32 1.0, %v2735_v12  ;;  %vm2740_vm0 = vweird.f32 %v9327_v31  ;;  %vm2291_vm6 = vmor %vm2289_vm12, %vm2290_vm3 }
 0x288   : > { %v3195_v56 = vand.u32 2147483648, %v13436_v58  ;;  %v1847_v17 = vsel %vm13430_vm11, %v1846_v47, %v1842_v1  ;;  %v2288_v27 = vadd.f32 %v9325_v45, %v2287_v14  ;;  %vm3189_vm4 = vweird.f32 %v13436_v58  ;;  %vm2741_vm9 = vmor %vm2739_vm5, %vm2740_vm0 }
 0x289   : > { %v1858_v8 = vand.u32 2147483647, %v13445_v48  ;;  %v13477_v34 = vadd.f32 1.0, %v9329_v26  ;;  %v9333_v50 = vpop.eup %9332  ;;  %v13480_v39 = vmul.f32 %v1847_v17, %v13247_v2   ;;  %v2737_v12 = vmul.f32 %v9327_v31, %v2736_v32  ;;  %v809_v2 = vpop.f32.mrf.mxu1 }
 0x28a   : > { %v1860_v30 = vand.u32 2147483648, %v13445_v48  ;;  %v13486_v60 = vadd.f32 1.0, %v9331_v59  ;;  %v2292_v47 = vsel %vm2291_vm6, %v9325_v45, %v2288_v27  ;;  %v3185_v53 = vmul.f32 %v9333_v50, %v13436_v58 }
 0x28b   : > { %18383 = vst [vmem:[#allocation85_spill] sm:$0xff] %v13480_v39  ;;  %vm13489_vm7 = vcmp.eq.f32.partialorder %v3193_v5, 8.507059e+37  ;;  %9336 = vrcp.f32 %v13477_v34  ;;  %v9335_v26 = vpop.eup %9334  ;;  %v2297_v37 = vsel %vm13448_vm14, %v2296_v40, %v2292_v47  ;;  %v2738_v1 = vadd.f32 %v9327_v31, %v2737_v12 }
 0x28c   : > { %v3196_v32 = vor.u32 1.1754944e-38, %v3195_v56  ;;  %vm1854_vm8 = vweird.f32 %v13445_v48  ;;  %v13498_v59 = vmul.f32 %v2297_v37, %v13253_v55   ;;  %v3186_v45 = vsub.f32 1.0, %v3185_v53 }
 0x28d   : > { %v1850_v5 = vmul.f32 %v9335_v26, %v13445_v48  ;;  %vm13504_vm10 = vcmp.eq.f32.partialorder %v1858_v8, 8.507059e+37  ;;  %v2742_v10 = vsel %vm2741_vm9, %v9327_v31, %v2738_v1  ;;  %v1861_v40 = vor.u32 1.1754944e-38, %v1860_v30 }
 0x28e   : > { %18386 = vst [vmem:[#allocation86_spill] sm:$0xff] %v13498_v59  ;;  %v2310_v56 = vand.u32 2147483648, %v13477_v34  ;;  %9338 = vrcp.f32 %v13486_v60  ;;  %v2747_v55 = vsel %vm13461_vm1, %v2746_v51, %v2742_v10  ;;  %v3187_v27 = vmul.f32 %v9333_v50, %v3186_v45  ;;  %v959_v51 = vpop.f32.mrf.mxu3 }
 0x28f   : > { %vm3190_vm11 = vweird.f32 %v9333_v50  ;;  %v1851_v33 = vsub.f32 1.0, %v1850_v5  ;;  %v13513_v12 = vmul.f32 %v2747_v55, %v13358_v49   ;;  %vm1855_vm12 = vweird.f32 %v9335_v26 }
 0x290   : > { %vm2304_vm13 = vweird.f32 %v13477_v34  ;;  %v2308_v8 = vand.u32 2147483647, %v13477_v34  ;;  %v3188_v30 = vadd.f32 %v9333_v50, %v3187_v27  ;;  %9340 = vpow2.f32 %v13422_v9  ;;  %vm3191_vm14 = vmor %vm3189_vm4, %vm3190_vm11 }
 0x291   : > { %18389 = vst [vmem:[#allocation87_spill] sm:$0xff] %v13513_v12  ;;  %v9337_v31 = vpop.eup %9336  ;;  %v1852_v47 = vmul.f32 %v9335_v26, %v1851_v33  ;;  %v13519_v53 = vadd.f32 %v13244_v7, %v809_v2  ;;  %v2311_v37 = vor.u32 1.1754944e-38, %v2310_v56  ;;  %v2758_v1 = vand.u32 2147483647, %v13486_v60  ;;  %vm1856_vm15 = vmor %vm1854_vm8, %vm1855_vm12 }
 0x292   : > { %v2300_v49 = vmul.f32 %v9337_v31, %v13477_v34  ;;  %v2760_v45 = vand.u32 2147483648, %v13486_v60  ;;  %v3192_v5 = vsel %vm3191_vm14, %v9333_v50, %v3188_v30  ;;  %9342 = vpow2.f32 %v13467_v23  ;;  %v736_v50 = vpop.f32.mrf.mxu0 }
 0x293   : > { %v1853_v10 = vadd.f32 %v9335_v26, %v1852_v47  ;;  %v7664_v9 = vmul.f32 -1.442695, %v13519_v53  ;;  %v3197_v55 = vsel %vm13489_vm7, %v3196_v32, %v3192_v5  ;;  %v13534_v56 = vadd.f32 %v13244_v7, %v884_v36  ;;  %v811_v32 = vpop.f32.mrf.mxu1 }
 0x294   : > { %v9339_v2 = vpop.eup %9338  ;;  %v2301_v58 = vsub.f32 1.0, %v2300_v49  ;;  %v13537_v27 = vadd.f32 %v13244_v7, %v959_v51  ;;  %v13540_v23 = vmul.f32 %v3197_v55, %v13367_v42   ;;  %vm2305_vm5 = vweird.f32 %v9337_v31 }
 0x295   : > { %v1857_v33 = vsel %vm1856_vm15, %v9335_v26, %v1853_v10  ;;  %v2750_v14 = vmul.f32 %v9339_v2, %v13486_v60  ;;  %9344 = vpow2.f32 %v7664_v9  ;;  %v7694_v47 = vmul.f32 -1.442695, %v13534_v56  ;;  %vm2306_vm1 = vmor %vm2304_vm13, %vm2305_vm5 }
 0x296   : > { %v1862_v48 = vsel %vm13504_vm10, %v1861_v40, %v1857_v33  ;;  %v2302_v30 = vmul.f32 %v9337_v31, %v2301_v58  ;;  %v9341_v36 = vpop.eup %9340  ;;  %v7724_v42 = vmul.f32 -1.442695, %v13537_v27  ;;  %v13551_v26 = vadd.f32 %v13244_v7, %v736_v50 }
 0x297   : > { %v13547_v51 = vmul.f32 %v1862_v48, %v13371_v15   ;;  %v2751_v49 = vsub.f32 1.0, %v2750_v14  ;;  %v13553_v10 = vadd.f32 1.0, %v9341_v36  ;;  %9346 = vpow2.f32 %v7694_v47 }
 0x298   : > { %v2303_v5 = vadd.f32 %v9337_v31, %v2302_v30  ;;  %v13556_v17 = vadd.f32 %v13244_v7, %v811_v32  ;;  %v9343_v40 = vpop.eup %9342  ;;  %vm2755_vm2 = vweird.f32 %v9339_v2  ;;  %9348 = vpow2.f32 %v7724_v42  ;;  %v886_v30 = vpop.f32.mrf.mxu2 }
 0x299   : > { %18390 = vst [vmem:[#allocation88_spill] sm:$0xff] %v13547_v51  ;;  %v2752_v15 = vmul.f32 %v9339_v2, %v2751_v49  ;;  %v7635_v9 = vmul.f32 -1.442695, %v13551_v26  ;;  %vm2309_vm3 = vcmp.eq.f32.partialorder %v2308_v8, 8.507059e+37  ;;  %9350 = vrcp.f32 %v13553_v10 }
 0x29a   : > { %v2307_v55 = vsel %vm2306_vm1, %v9337_v31, %v2303_v5  ;;  %vm2754_vm0 = vweird.f32 %v13486_v60  ;;  %v13564_v33 = vadd.f32 1.0, %v9343_v40  ;;  %v2761_v34 = vor.u32 1.1754944e-38, %v2760_v45 }
 0x29b   : > { %v2312_v58 = vsel %vm2309_vm3, %v2311_v37, %v2307_v55  ;;  %v2753_v50 = vadd.f32 %v9339_v2, %v2752_v15  ;;  %v9345_v14 = vpop.eup %9344  ;;  %vm2756_vm4 = vmor %vm2754_vm0, %vm2755_vm2  ;;  %9352 = vpow2.f32 %v7635_v9  ;;  %v7665_v48 = vmul.f32 -1.442695, %v13556_v17 }
 0x29c   : > { %v13567_v32 = vmul.f32 %v2312_v58, %v13392_v62   ;;  %vm2759_vm6 = vcmp.eq.f32.partialorder %v2758_v1, 8.507059e+37  ;;  %9354 = vrcp.f32 %v13564_v33  ;;  %v3208_v60 = vand.u32 2147483647, %v13553_v10 }
 0x29d   : > { %v2757_v31 = vsel %vm2756_vm4, %v9339_v2, %v2753_v50  ;;  %v9347_v8 = vpop.eup %9346  ;;  %v3210_v47 = vand.u32 2147483648, %v13553_v10  ;;  %v13573_v36 = vadd.f32 1.0, %v9345_v14  ;;  %9356 = vpow2.f32 %v7665_v48 }
 0x29e   : > { %18391 = vst [vmem:[#allocation89_spill] sm:$0xff] %v13567_v32  ;;  %v2762_v37 = vsel %vm2759_vm6, %v2761_v34, %v2757_v31  ;;  %v9349_v62 = vpop.eup %9348  ;;  %v13578_v45 = vadd.f32 1.0, %v9347_v8  ;;  %v13581_v2 = vadd.f32 %v13244_v7, %v886_v30  ;;  %v1873_v42 = vand.u32 2147483647, %v13564_v33 }
 0x29f   : > { %v13576_v49 = vmul.f32 %v2762_v37, %v13396_v57   ;;  %v9351_v1 = vpop.eup %9350  ;;  %v1875_v5 = vand.u32 2147483648, %v13564_v33  ;;  %9358 = vrcp.f32 %v13573_v36  ;;  %vm3204_vm7 = vweird.f32 %v13553_v10 }
 0x2a0   : > { %v3200_v40 = vmul.f32 %v9351_v1, %v13553_v10  ;;  %vm13588_vm8 = vcmp.eq.f32.partialorder %v3208_v60, 8.507059e+37  ;;  %v3211_v9 = vor.u32 1.1754944e-38, %v3210_v47  ;;  %vm1869_vm9 = vweird.f32 %v13564_v33 }
 0x2a1   : > { %18392 = vst [vmem:[#allocation90_spill] sm:$0xff] %v13576_v49  ;;  %v9353_v15 = vpop.eup %9352  ;;  %9360 = vrcp.f32 %v13578_v45  ;;  %v2323_v50 = vand.u32 2147483647, %v13573_v36  ;;  %v13595_v14 = vadd.f32 1.0, %v9349_v62  ;;  %v13598_v34 = vmul.f32 -1.442695, %v13581_v2 }
 0x2a2   : > { %v9355_v55 = vpop.eup %9354  ;;  %v3201_v58 = vsub.f32 1.0, %v3200_v40  ;;  %vm13601_vm10 = vcmp.eq.f32.partialorder %v1873_v42, 8.507059e+37  ;;  %v1876_v31 = vor.u32 1.1754944e-38, %v1875_v5  ;;  %v2325_v8 = vand.u32 2147483648, %v13573_v36 }
 0x2a3   : > { %v1865_v48 = vmul.f32 %v9355_v55, %v13564_v33  ;;  %v9357_v37 = vpop.eup %9356  ;;  %vm3205_vm11 = vweird.f32 %v9351_v1  ;;  %vm2319_vm12 = vweird.f32 %v13573_v36  ;;  %9362 = vrcp.f32 %v13595_v14 }
 0x2a4   : > { %v3202_v60 = vmul.f32 %v9351_v1, %v3201_v58  ;;  %v2773_v40 = vand.u32 2147483647, %v13578_v45  ;;  %v2775_v39 = vand.u32 2147483648, %v13578_v45  ;;  %v13610_v42 = vadd.f32 1.0, %v9353_v15  ;;  %vm3206_vm15 = vmor %vm3204_vm7, %vm3205_vm11 }
 0x2a5   : > { %v9359_v47 = vpop.eup %9358  ;;  %v1866_v62 = vsub.f32 1.0, %v1865_v48  ;;  %vm13613_vm13 = vcmp.eq.f32.partialorder %v2323_v50, 8.507059e+37  ;;  %vm2769_vm14 = vweird.f32 %v13578_v45  ;;  %v13618_v58 = vadd.f32 1.0, %v9357_v37 }
 0x2a6   : > { %v3203_v51 = vadd.f32 %v9351_v1, %v3202_v60  ;;  %v2315_v5 = vmul.f32 %v9359_v47, %v13573_v36  ;;  %vm1870_vm5 = vweird.f32 %v9355_v55  ;;  %v2326_v18 = vor.u32 1.1754944e-38, %v2325_v8 }
 0x2a7   : > { %v9361_v32 = vpop.eup %9360  ;;  %v1867_v48 = vmul.f32 %v9355_v55, %v1866_v62  ;;  %9364 = vrcp.f32 %v13610_v42  ;;  %v3223_v63 = vand.u32 2147483647, %v13595_v14  ;;  %vm2320_vm1 = vweird.f32 %v9359_v47  ;;  %vm1871_vm2 = vmor %vm1869_vm9, %vm1870_vm5 }
 0x2a8   : > { %v3207_v15 = vsel %vm3206_vm15, %v9351_v1, %v3203_v51  ;;  %v2316_v60 = vsub.f32 1.0, %v2315_v5  ;;  %v2765_v50 = vmul.f32 %v9361_v32, %v13578_v45  ;;  %v3225_v49 = vand.u32 2147483648, %v13595_v14  ;;  %vm2321_vm4 = vmor %vm2319_vm12, %vm2320_vm1 }
 0x2a9   : > { %v3212_v12 = vsel %vm13588_vm8, %v3211_v9, %v3207_v15  ;;  %v1868_v37 = vadd.f32 %v9355_v55, %v1867_v48  ;;  %v9363_v10 = vpop.eup %9362  ;;  %9366 = vrcp.f32 %v13618_v58  ;;  %vm13634_vm3 = vcmp.eq.f32.partialorder %v2773_v40, 8.507059e+37 }
 0x2aa   : > { %v13629_v62 = vmul.f32 %v3212_v12, %v13402_v54   ;;  %v2317_v51 = vmul.f32 %v9359_v47, %v2316_v60  ;;  %v2766_v1 = vsub.f32 1.0, %v2765_v50  ;;  %v2776_v57 = vor.u32 1.1754944e-38, %v2775_v39 }
 0x2ab   : > { %v1872_v8 = vsel %vm1871_vm2, %v9355_v55, %v1868_v37  ;;  %v3215_v9 = vmul.f32 %v9363_v10, %v13595_v14  ;;  %vm2770_vm0 = vweird.f32 %v9361_v32  ;;  %vm3219_vm6 = vweird.f32 %v13595_v14  ;;  %v961_v37 = vpop.f32.mrf.mxu3 }
 0x2ac   : > { %v1877_v48 = vsel %vm13601_vm10, %v1876_v31, %v1872_v8  ;;  %v2318_v54 = vadd.f32 %v9359_v47, %v2317_v51  ;;  %v2767_v12 = vmul.f32 %v9361_v32, %v2766_v1  ;;  %vm13648_vm7 = vcmp.eq.f32.partialorder %v3223_v63, 8.507059e+37  ;;  %vm2771_vm8 = vmor %vm2769_vm14, %vm2770_vm0 }
 0x2ad   : > { %v9365_v33 = vpop.eup %9364  ;;  %v13642_v15 = vmul.f32 %v1877_v48, %v13439_v13   ;;  %v3216_v55 = vsub.f32 1.0, %v3215_v9  ;;  %v3226_v40 = vor.u32 1.1754944e-38, %v3225_v49  ;;  %vm3220_vm9 = vweird.f32 %v9363_v10 }
 0x2ae   : > { %v2322_v30 = vsel %vm2321_vm4, %v9359_v47, %v2318_v54  ;;  %v2768_v31 = vadd.f32 %v9361_v32, %v2767_v12  ;;  %v1880_v60 = vmul.f32 %v9365_v33, %v13610_v42  ;;  %v1890_v50 = vand.u32 2147483648, %v13610_v42  ;;  %vm3221_vm10 = vmor %vm3219_vm6, %vm3220_vm9 }
 0x2af   : > { %18401 = vst [vmem:[#allocation91_spill] sm:$0xff] %v13642_v15  ;;  %v2327_v13 = vsel %vm13613_vm13, %v2326_v18, %v2322_v30  ;;  %v3217_v36 = vmul.f32 %v9363_v10, %v3216_v55  ;;  %v9367_v63 = vpop.eup %9366  ;;  %9368 = vpow2.f32 %v13598_v34  ;;  %v1888_v49 = vand.u32 2147483647, %v13610_v42  ;;  %v18443_v15 = vld [vmem:[#allocation89_spill] sm:$0xff] }
 0x2b0   : > { %v13659_v51 = vmul.f32 %v2327_v13, %v13519_v53   ;;  %v2772_v47 = vsel %vm2771_vm8, %v9361_v32, %v2768_v31  ;;  %v1881_v1 = vsub.f32 1.0, %v1880_v60  ;;  %v2330_v45 = vmul.f32 %v9367_v63, %v13618_v58 }
 0x2b1   : > { %v2777_v59 = vsel %vm13634_vm3, %v2776_v57, %v2772_v47  ;;  %v3218_v18 = vadd.f32 %v9363_v10, %v3217_v36  ;;  %vm1885_vm11 = vweird.f32 %v9365_v33  ;;  %v13672_v32 = vadd.f32 %v13244_v7, %v961_v37 }
 0x2b2   : > { %v13667_v8 = vmul.f32 %v2777_v59, %v13534_v56   ;;  %v1882_v53 = vmul.f32 %v9365_v33, %v1881_v1  ;;  %vm1884_vm12 = vweird.f32 %v13610_v42  ;;  %v1891_v5 = vor.u32 1.1754944e-38, %v1890_v50 }
 0x2b3   : > { %v3222_v34 = vsel %vm3221_vm10, %v9363_v10, %v3218_v18  ;;  %v2331_v57 = vsub.f32 1.0, %v2330_v45  ;;  %v2340_v56 = vand.u32 2147483648, %v13618_v58  ;;  %v7725_v54 = vmul.f32 -1.442695, %v13672_v32  ;;  %vm1886_vm13 = vmor %vm1884_vm12, %vm1885_vm11 }
 0x2b4   : > { %v3227_v9 = vsel %vm13648_vm7, %v3226_v40, %v3222_v34  ;;  %v1883_v48 = vadd.f32 %v9365_v33, %v1882_v53  ;;  %vm2335_vm14 = vweird.f32 %v9367_v63  ;;  %v2338_v7 = vand.u32 2147483647, %v13618_v58 }
 0x2b5   : > { %v3362_v14 = vmul.f32 %v3227_v9, %v13537_v27   ;;  %v2332_v12 = vmul.f32 %v9367_v63, %v2331_v57  ;;  %v9369_v10 = vpop.eup %9368  ;;  %vm1889_vm15 = vcmp.eq.f32.partialorder %v1888_v49, 8.507059e+37  ;;  %9370 = vpow2.f32 %v7725_v54 }
 0x2b6   : > { %v1887_v55 = vsel %vm1886_vm13, %v9365_v33, %v1883_v48  ;;  %vm2334_vm5 = vweird.f32 %v13618_v58  ;;  %v1413_v39 = vadd.f32 1.0, %v9369_v10  ;;  %v2341_v40 = vor.u32 1.1754944e-38, %v2340_v56  ;;  %v18407_v10 = vld [vmem:[#allocation10_spill] sm:$0xff] }
 0x2b7   : > { %v1892_v42 = vsel %vm1889_vm15, %v1891_v5, %v1887_v55  ;;  %v2333_v30 = vadd.f32 %v9367_v63, %v2332_v12  ;;  %vm2336_vm1 = vmor %vm2334_vm5, %vm2335_vm14  ;;  %vm2339_vm2 = vcmp.eq.f32.partialorder %v2338_v7, 8.507059e+37  ;;  %v18408_v55 = vld [vmem:[#allocation6_spill] sm:$0xff] }
 0x2b8   : > { %v13683_v31 = vmul.f32 %v1892_v42, %v13551_v26   ;;  %9372 = vrcp.f32 %v1413_v39  ;;  %v2790_v58 = vand.u32 2147483648, %v1413_v39  ;;  %v2788_v26 = vand.u32 2147483647, %v1413_v39  ;;  %v18409_v42 = vld [vmem:[#allocation90_spill] sm:$0xff] }
 0x2b9   : > { %v2337_v27 = vsel %vm2336_vm1, %v9367_v63, %v2333_v30  ;;  %vm2784_vm0 = vweird.f32 %v1413_v39  ;;  %v18410_v30 = vld [vmem:[#allocation87_spill] sm:$0xff] }
 0x2ba   : > { %18404 = vst [vmem:[#allocation92_spill] sm:$0xff] %v13683_v31  ;;  %v2342_v60 = vsel %vm2339_vm2, %v2341_v40, %v2337_v27  ;;  %v2791_v49 = vor.u32 1.1754944e-38, %v2790_v58  ;;  %vm2789_vm6 = vcmp.eq.f32.partialorder %v2788_v26, 8.507059e+37  ;;  %v18412_v40 = vld [vmem:[#allocation81_spill] sm:$0xff]  ;;  %v18413_v27 = vld [vmem:[#allocation78_spill] sm:$0xff]  ;;  %v18422_v26 = vld [vmem:[#allocation51_spill] sm:$0xff] }
 0x2bb   : > { %v13686_v13 = vmul.f32 %v2342_v60, %v13556_v17   ;;  %v9371_v33 = vpop.eup %9370  ;;  %v18414_v60 = vld [vmem:[#allocation75_spill] sm:$0xff]  ;;  %v18420_v58 = vld [vmem:[#allocation57_spill] sm:$0xff]  ;;  %18442 = vst [vmem:[#allocation87_spill] sm:$0xff] %v13659_v51  ;;  %v18445_v31 = vld [vmem:[#allocation86_spill] sm:$0xff] }
 0x2bc   : > { %v1443_v36 = vadd.f32 1.0, %v9371_v33  ;;  %v18415_v33 = vld [vmem:[#allocation72_spill] sm:$0xff]  ;;  %18446 = vst [vmem:[#allocation81_spill] sm:$0xff] %v18445_v31  ;;  %v18461_v31 = vld [vmem:[#allocation62_spill] sm:$0xff] }
 0x2bd   : > { %18441 = vst [vmem:[#allocation90_spill] sm:$0xff] %v13686_v13  ;;  %v18455_v13 = vld [vmem:[#allocation71_spill] sm:$0xff]  ;;  %v18457_v51 = vld [vmem:[#allocation68_spill] sm:$0xff] }
 0x2be   : > { %v9373_v50 = vpop.eup %9372  ;;  %9374 = vrcp.f32 %v1443_v36  ;;  %v3240_v34 = vand.u32 2147483648, %v1443_v36  ;;  %v3238_v9 = vand.u32 2147483647, %v1443_v36  ;;  %vm3234_vm8 = vweird.f32 %v1443_v36  ;;  %18462 = vst [vmem:[#allocation57_spill] sm:$0xff] %v18461_v31  ;;  %v18477_v31 = vld [vmem:[#allocation38_spill] sm:$0xff] }
 0x2bf   : > { %v2780_v37 = vmul.f32 %v9373_v50, %v1413_v39  ;;  %vm2785_vm3 = vweird.f32 %v9373_v50  ;;  %v18411_v39 = vld [vmem:[#allocation84_spill] sm:$0xff] }
 0x2c0   : > { %vm2786_vm4 = vmor %vm2784_vm0, %vm2785_vm3  ;;  %v3241_v56 = vor.u32 1.1754944e-38, %v3240_v34  ;;  %vm3239_vm10 = vcmp.eq.f32.partialorder %v3238_v9, 8.507059e+37  ;;  %v18430_v34 = vld [vmem:[#allocation27_spill] sm:$0xff]  ;;  %v18432_v9 = vld [vmem:[#allocation21_spill] sm:$0xff]  ;;  %18444 = vst [vmem:[#allocation84_spill] sm:$0xff] %v18443_v15 }
 0x2c1   : > { %v2781_v47 = vsub.f32 1.0, %v2780_v37  ;;  %v18418_v37 = vld [vmem:[#allocation63_spill] sm:$0xff]  ;;  %v18459_v15 = vld [vmem:[#allocation65_spill] sm:$0xff] }
 0x2c2   : > { %18458 = vst [vmem:[#allocation63_spill] sm:$0xff] %v18457_v51  ;;  %v18473_v51 = vld [vmem:[#allocation44_spill] sm:$0xff] }
 0x2c3   : > { %v2782_v1 = vmul.f32 %v9373_v50, %v2781_v47  ;;  %v18419_v47 = vld [vmem:[#allocation60_spill] sm:$0xff] }
 0x2c4   : > { %v9375_v59 = vpop.eup %9374  ;;  %18460 = vst [vmem:[#allocation60_spill] sm:$0xff] %v18459_v15  ;;  %v18475_v15 = vld [vmem:[#allocation41_spill] sm:$0xff] }
 0x2c5   : > { %v2783_v18 = vadd.f32 %v9373_v50, %v2782_v1  ;;  %v3230_v63 = vmul.f32 %v9375_v59, %v1443_v36  ;;  %vm3235_vm7 = vweird.f32 %v9375_v59  ;;  %v18416_v36 = vld [vmem:[#allocation69_spill] sm:$0xff]  ;;  %v18421_v1 = vld [vmem:[#allocation54_spill] sm:$0xff] }
 0x2c6   : > { %vm3236_vm9 = vmor %vm3234_vm8, %vm3235_vm7 }
 0x2c7   : > { %v2787_v45 = vsel %vm2786_vm4, %v9373_v50, %v2783_v18  ;;  %v3231_v17 = vsub.f32 1.0, %v3230_v63  ;;  %v18417_v50 = vld [vmem:[#allocation66_spill] sm:$0xff]  ;;  %v18424_v18 = vld [vmem:[#allocation45_spill] sm:$0xff] }
 0x2c8   : > { %v2792_v53 = vsel %vm2789_vm6, %v2791_v49, %v2787_v45  ;;  %v18425_v63 = vld [vmem:[#allocation42_spill] sm:$0xff]  ;;  %v18426_v49 = vld [vmem:[#allocation39_spill] sm:$0xff]  ;;  %v18427_v45 = vld [vmem:[#allocation36_spill] sm:$0xff]  ;;  %18456 = vst [vmem:[#allocation66_spill] sm:$0xff] %v18455_v13 }
 0x2c9   : > { %v3333_v5 = vmul.f32 %v2792_v53, %v13581_v2   ;;  %v3232_v57 = vmul.f32 %v9375_v59, %v3231_v17  ;;  %v18405_v2 = vld [vmem:[#allocation18_spill] sm:$0xff]  ;;  %v18428_v17 = vld [vmem:[#allocation33_spill] sm:$0xff]  ;;  %v18471_v13 = vld [vmem:[#allocation47_spill] sm:$0xff]  ;;  %18474 = vst [vmem:[#allocation39_spill] sm:$0xff] %v18473_v51 }
 0x2ca   : > { %v18429_v53 = vld [vmem:[#allocation30_spill] sm:$0xff]  ;;  %18472 = vst [vmem:[#allocation42_spill] sm:$0xff] %v18471_v13  ;;  %v18487_v13 = vld [vmem:[#allocation23_spill] sm:$0xff]  ;;  %v18489_v51 = vld [vmem:[#allocation20_spill] sm:$0xff] }
 0x2cb   : > { %v3233_v48 = vadd.f32 %v9375_v59, %v3232_v57  ;;  %v18431_v57 = vld [vmem:[#allocation24_spill] sm:$0xff]  ;;  %18476 = vst [vmem:[#allocation36_spill] sm:$0xff] %v18475_v15 }
 0x2cc   : > { %18478 = vst [vmem:[#allocation33_spill] sm:$0xff] %v18477_v31  ;;  %v18491_v15 = vld [vmem:[#allocation16_spill] sm:$0xff] }
 0x2cd   : > { %v3237_v54 = vsel %vm3236_vm9, %v9375_v59, %v3233_v48  ;;  %v18423_v59 = vld [vmem:[#allocation48_spill] sm:$0xff]  ;;  %v18433_v48 = vld [vmem:[#allocation17_spill] sm:$0xff] }
 0x2ce   : > { %v3242_v12 = vsel %vm3239_vm10, %v3241_v56, %v3237_v54  ;;  %18434 = vst [vmem:[#allocation18_spill] sm:$0xff] %v18433_v48  ;;  %v18435_v56 = vld [vmem:[#allocation13_spill] sm:$0xff]  ;;  %v18447_v48 = vld [vmem:[#allocation83_spill] sm:$0xff]  ;;  %v18493_v31 = vld [vmem:[#allocation12_spill] sm:$0xff] }
 0x2cf   : > { %v3363_v7 = vmul.f32 %v3242_v12, %v13672_v32   ;;  %v18406_v32 = vld [vmem:[#allocation14_spill] sm:$0xff]  ;;  %v18437_v54 = vld [vmem:[#allocation9_spill] sm:$0xff]  ;;  %18448 = vst [vmem:[#allocation78_spill] sm:$0xff] %v18447_v48  ;;  %v18463_v48 = vld [vmem:[#allocation59_spill] sm:$0xff] }
 0x2d0   : > { %18436 = vst [vmem:[#allocation14_spill] sm:$0xff] %v18435_v56  ;;  %v18439_v12 = vld [vmem:[#allocation5_spill] sm:$0xff]  ;;  %v18449_v56 = vld [vmem:[#allocation80_spill] sm:$0xff] }
 0x2d1   : > { %18438 = vst [vmem:[#allocation10_spill] sm:$0xff] %v18437_v54  ;;  %v18451_v54 = vld [vmem:[#allocation77_spill] sm:$0xff] }
 0x2d2   : > { %18440 = vst [vmem:[#allocation6_spill] sm:$0xff] %v18439_v12  ;;  %v18453_v12 = vld [vmem:[#allocation74_spill] sm:$0xff] }
 0x2d3   : > { %18450 = vst [vmem:[#allocation75_spill] sm:$0xff] %v18449_v56  ;;  %v18465_v56 = vld [vmem:[#allocation56_spill] sm:$0xff] }
 0x2d4   : > { %18452 = vst [vmem:[#allocation72_spill] sm:$0xff] %v18451_v54  ;;  %v18467_v54 = vld [vmem:[#allocation53_spill] sm:$0xff] }
 0x2d5   : > { %18454 = vst [vmem:[#allocation69_spill] sm:$0xff] %v18453_v12  ;;  %v18469_v12 = vld [vmem:[#allocation50_spill] sm:$0xff] }
 0x2d6   : > { %18464 = vst [vmem:[#allocation54_spill] sm:$0xff] %v18463_v48  ;;  %v18479_v48 = vld [vmem:[#allocation35_spill] sm:$0xff] }
 0x2d7   : > { %18466 = vst [vmem:[#allocation51_spill] sm:$0xff] %v18465_v56  ;;  %v18481_v56 = vld [vmem:[#allocation32_spill] sm:$0xff] }
 0x2d8   : > { %18468 = vst [vmem:[#allocation48_spill] sm:$0xff] %v18467_v54  ;;  %v18483_v54 = vld [vmem:[#allocation29_spill] sm:$0xff] }
 0x2d9   : > { %18470 = vst [vmem:[#allocation45_spill] sm:$0xff] %v18469_v12  ;;  %v18485_v12 = vld [vmem:[#allocation26_spill] sm:$0xff] }
 0x2da   : > { %18480 = vst [vmem:[#allocation30_spill] sm:$0xff] %v18479_v48  ;;  %v18495_v48 = vld [vmem:[#allocation8_spill] sm:$0xff] }
 0x2db   : > { %18482 = vst [vmem:[#allocation27_spill] sm:$0xff] %v18481_v56  ;;  %v18497_v56 = vld [vmem:[#allocation4_spill] sm:$0xff] }
 0x2dc   : > { %18484 = vst [vmem:[#allocation24_spill] sm:$0xff] %v18483_v54  ;;  %v18499_v54 = vld [vmem:[#allocation92_spill] sm:$0xff] }
 0x2dd   : > { %18486 = vst [vmem:[#allocation21_spill] sm:$0xff] %v18485_v12  ;;  %v18501_v12 = vld [vmem:[#allocation91_spill] sm:$0xff] }
 0x2de   : > { %18488 = vst [vmem:[#allocation17_spill] sm:$0xff] %v18487_v13  ;;  %v18503_v13 = vld [vmem:[#allocation88_spill] sm:$0xff] }
 0x2df   : > { %18490 = vst [vmem:[#allocation13_spill] sm:$0xff] %v18489_v51  ;;  %v18505_v51 = vld [vmem:[#allocation85_spill] sm:$0xff] }
 0x2e0   : > { %18492 = vst [vmem:[#allocation9_spill] sm:$0xff] %v18491_v15  ;;  %v18507_v15 = vld [vmem:[#allocation82_spill] sm:$0xff] }
 0x2e1   : > { %18494 = vst [vmem:[#allocation5_spill] sm:$0xff] %v18493_v31  ;;  %v18509_v31 = vld [vmem:[#allocation79_spill] sm:$0xff] }
 0x2e2   : > { %18496 = vst [vmem:[#allocation89_spill] sm:$0xff] %v18495_v48  ;;  %v18511_v48 = vld [vmem:[#allocation76_spill] sm:$0xff] }
 0x2e3   : > { %18498 = vst [vmem:[#allocation86_spill] sm:$0xff] %v18497_v56  ;;  %v18513_v56 = vld [vmem:[#allocation73_spill] sm:$0xff] }
 0x2e4   : > { %18500 = vst [vmem:[#allocation83_spill] sm:$0xff] %v18499_v54  ;;  %v18515_v54 = vld [vmem:[#allocation70_spill] sm:$0xff] }
 0x2e5   : > { %18502 = vst [vmem:[#allocation80_spill] sm:$0xff] %v18501_v12  ;;  %v18517_v12 = vld [vmem:[#allocation67_spill] sm:$0xff] }
 0x2e6   : > { %18504 = vst [vmem:[#allocation77_spill] sm:$0xff] %v18503_v13  ;;  %v18519_v13 = vld [vmem:[#allocation64_spill] sm:$0xff] }
 0x2e7   : > { %18506 = vst [vmem:[#allocation74_spill] sm:$0xff] %v18505_v51  ;;  %v18521_v51 = vld [vmem:[#allocation61_spill] sm:$0xff] }
 0x2e8   : > { %18508 = vst [vmem:[#allocation71_spill] sm:$0xff] %v18507_v15  ;;  %v18523_v15 = vld [vmem:[#allocation58_spill] sm:$0xff] }
 0x2e9   : > { %18510 = vst [vmem:[#allocation68_spill] sm:$0xff] %v18509_v31  ;;  %v18525_v31 = vld [vmem:[#allocation55_spill] sm:$0xff] }
 0x2ea   : > { %18512 = vst [vmem:[#allocation65_spill] sm:$0xff] %v18511_v48  ;;  %v18527_v48 = vld [vmem:[#allocation52_spill] sm:$0xff] }
 0x2eb   : > { %18514 = vst [vmem:[#allocation62_spill] sm:$0xff] %v18513_v56  ;;  %v18529_v56 = vld [vmem:[#allocation49_spill] sm:$0xff] }
 0x2ec   : > { %18516 = vst [vmem:[#allocation59_spill] sm:$0xff] %v18515_v54  ;;  %v18531_v54 = vld [vmem:[#allocation46_spill] sm:$0xff] }
 0x2ed   : > { %18518 = vst [vmem:[#allocation56_spill] sm:$0xff] %v18517_v12  ;;  %v18533_v12 = vld [vmem:[#allocation43_spill] sm:$0xff] }
 0x2ee   : > { %18520 = vst [vmem:[#allocation53_spill] sm:$0xff] %v18519_v13  ;;  %v18535_v13 = vld [vmem:[#allocation40_spill] sm:$0xff] }
 0x2ef   : > { %18522 = vst [vmem:[#allocation50_spill] sm:$0xff] %v18521_v51  ;;  %v18537_v51 = vld [vmem:[#allocation37_spill] sm:$0xff] }
 0x2f0   : > { %18524 = vst [vmem:[#allocation47_spill] sm:$0xff] %v18523_v15  ;;  %v18539_v15 = vld [vmem:[#allocation34_spill] sm:$0xff] }
 0x2f1   : > { %18526 = vst [vmem:[#allocation44_spill] sm:$0xff] %v18525_v31  ;;  %v18541_v31 = vld [vmem:[#allocation31_spill] sm:$0xff] }
 0x2f2   : > { %18528 = vst [vmem:[#allocation41_spill] sm:$0xff] %v18527_v48  ;;  %v18543_v48 = vld [vmem:[#allocation28_spill] sm:$0xff] }
 0x2f3   : > { %18530 = vst [vmem:[#allocation38_spill] sm:$0xff] %v18529_v56  ;;  %v18544_v56 = vld [vmem:[#allocation25_spill] sm:$0xff] }
 0x2f4   : > { %18532 = vst [vmem:[#allocation35_spill] sm:$0xff] %v18531_v54  ;;  %v18545_v54 = vld [vmem:[#allocation22_spill] sm:$0xff] }
 0x2f5   : > { %18534 = vst [vmem:[#allocation32_spill] sm:$0xff] %v18533_v12  ;;  %v18546_v12 = vld [vmem:[#allocation19_spill] sm:$0xff] }
 0x2f6   : > { %18536 = vst [vmem:[#allocation29_spill] sm:$0xff] %v18535_v13  ;;  %v18548_v13 = vld [vmem:[#allocation15_spill] sm:$0xff] }
 0x2f7   : > { %18538 = vst [vmem:[#allocation26_spill] sm:$0xff] %v18537_v51  ;;  %v18549_v51 = vld [vmem:[#allocation11_spill] sm:$0xff] }
 0x2f8   : > { %18540 = vst [vmem:[#allocation23_spill] sm:$0xff] %v18539_v15  ;;  %v18551_v15 = vld [vmem:[#allocation7_spill] sm:$0xff] }
 0x2f9   : > { %18542 = vst [vmem:[#allocation20_spill] sm:$0xff] %v18541_v31  ;;  %v18552_v31 = vld [vmem:[#allocation3_spill] sm:$0xff] }
 0x2fa   : > { %18547 = vst [vmem:[#allocation16_spill] sm:$0xff] %v18546_v12 }
 0x2fb   : > { %18550 = vst [vmem:[#allocation12_spill] sm:$0xff] %v18549_v51 }
 0x2fc   : > { %18553 = vst [vmem:[#allocation8_spill] sm:$0xff] %v18552_v31 }
 0x2fd LB: >> { %18613 = vst [vmem:[#allocation93_spill] sm:$0xff] %v10360_v7  ;;  %v18645_v7 = vld [vmem:[#allocation18_spill] sm:$0xff]  ;;  %s7883_s27 = sshll.u32 %s10840_s25, 6  ;;  %s14409_s6 = scalar_lea.vmem %s18104_s4, %s10840_s25  ;;  %s10840_s25 = sphi %s14047_s25, %s19306_s25   ;;  %v10832_v15 = vphi %v18551_v15, %v19303_v15   ;;  %v10824_v13 = vphi %v18548_v13, %v19300_v13   ;;  %v10816_v54 = vphi %v18545_v54, %v19297_v54   ;;  %v10812_v56 = vphi %v18544_v56, %v19296_v56   ;;  %v10808_v48 = vphi %v18543_v48, %v19295_v48   ;;  %v10580_v9 = vphi %v18432_v9, %v19182_v9   ;;  %v10576_v57 = vphi %v18431_v57, %v19181_v57   ;;  %v10572_v34 = vphi %v18430_v34, %v19180_v34   ;;  %v10568_v53 = vphi %v18429_v53, %v19179_v53   ;;  %v10564_v17 = vphi %v18428_v17, %v19178_v17   ;;  %v10560_v45 = vphi %v18427_v45, %v19177_v45   ;;  %v10556_v49 = vphi %v18426_v49, %v19176_v49   ;;  %v10552_v63 = vphi %v18425_v63, %v19175_v63   ;;  %v10548_v18 = vphi %v18424_v18, %v19174_v18   ;;  %v10544_v59 = vphi %v18423_v59, %v19173_v59   ;;  %v10540_v26 = vphi %v18422_v26, %v19172_v26   ;;  %v10536_v1 = vphi %v18421_v1, %v19171_v1   ;;  %v10532_v58 = vphi %v18420_v58, %v19170_v58   ;;  %v10528_v47 = vphi %v18419_v47, %v19169_v47   ;;  %v10524_v37 = vphi %v18418_v37, %v19168_v37   ;;  %v10520_v50 = vphi %v18417_v50, %v19167_v50   ;;  %v10516_v36 = vphi %v18416_v36, %v19166_v36   ;;  %v10512_v33 = vphi %v18415_v33, %v19165_v33   ;;  %v10508_v60 = vphi %v18414_v60, %v19164_v60   ;;  %v10504_v27 = vphi %v18413_v27, %v19163_v27   ;;  %v10500_v40 = vphi %v18412_v40, %v19162_v40   ;;  %v10496_v39 = vphi %v18411_v39, %v19161_v39   ;;  %v10492_v30 = vphi %v18410_v30, %v19160_v30   ;;  %v10488_v42 = vphi %v18409_v42, %v19159_v42   ;;  %v10484_v8 = vphi %v13667_v8, %v19158_v8   ;;  %v10480_v5 = vphi %v3333_v5, %v19157_v5   ;;  %v10476_v55 = vphi %v18408_v55, %v19155_v55   ;;  %v10472_v10 = vphi %v18407_v10, %v19154_v10   ;;  %v10468_v32 = vphi %v18406_v32, %v19153_v32   ;;  %v10464_v2 = vphi %v18405_v2, %v19152_v2   ;;  %v10460_v28 = vphi %v11567_v28, %v19151_v28   ;;  %v10456_v11 = vphi %v11624_v11, %v19150_v11   ;;  %v10452_v6 = vphi %v11752_v6, %v19149_v6   ;;  %v10448_v3 = vphi %v11827_v3, %v19148_v3   ;;  %v10444_v16 = vphi %v11946_v16, %v19147_v16   ;;  %v10440_v38 = vphi %v12028_v38, %v19146_v38   ;;  %v10436_v22 = vphi %v12143_v22, %v19145_v22   ;;  %v10432_v41 = vphi %v12223_v41, %v19144_v41   ;;  %v10428_v20 = vphi %v12316_v20, %v19143_v20   ;;  %v10424_v43 = vphi %v12390_v43, %v19142_v43   ;;  %v10420_v52 = vphi %v12509_v52, %v19141_v52   ;;  %v10416_v21 = vphi %v12553_v21, %v19140_v21   ;;  %v10412_v4 = vphi %v12654_v4, %v19139_v4   ;;  %v10408_v46 = vphi %v12744_v46, %v19138_v46   ;;  %v10404_v29 = vphi %v12875_v29, %v19137_v29   ;;  %v10400_v25 = vphi %v12924_v25, %v19136_v25   ;;  %v10396_v19 = vphi %v13009_v19, %v19135_v19   ;;  %v10392_v61 = vphi %v13094_v61, %v19134_v61   ;;  %v10388_v44 = vphi %v13183_v44, %v19133_v44   ;;  %v10384_v24 = vphi %v13310_v24, %v19132_v24   ;;  %v10380_v35 = vphi %v13351_v35, %v19131_v35   ;;  %v10376_v0 = vphi %v13457_v0, %v19130_v0   ;;  %v10372_v23 = vphi %v13540_v23, %v19129_v23   ;;  %v10368_v62 = vphi %v13629_v62, %v19128_v62   ;;  %v10364_v14 = vphi %v3362_v14, %v19127_v14   ;;  %v10360_v7 = vphi %v3363_v7, %v19125_v7  }
 0x2fe   : >> { %18614 = vst [vmem:[#allocation94_spill] sm:$0xff] %v10364_v14  ;;  %v18646_v14 = vld [vmem:[#allocation14_spill] sm:$0xff]  ;;  %s14414_s9 = scalar_lea.vmem %s18103_s3, %s7883_s27  ;;  %s3369_s11 = sadd.s32 1, %s10840_s25  }
 0x2ff   : >> { %18615 = vst [vmem:[#allocation95_spill] sm:$0xff] %v10368_v62  ;;  %v18649_v62 = vld [vmem:[#allocation90_spill] sm:$0xff]  ;;  %p17117_p5 = scmp.ge.s32.totalorder %s3369_s11, 7   ;;  %s19306_s25 = smov %s3369_s11 }
 0x300   : >> { %18616 = vst [vmem:[#allocation96_spill] sm:$0xff] %v10372_v23  ;;  %v18651_v23 = vld [vmem:[#allocation87_spill] sm:$0xff] }
 0x301   : >> { %18617 = vst [vmem:[#allocation97_spill] sm:$0xff] %v10376_v0  ;;  %v18657_v0 = vld [vmem:[#allocation78_spill] sm:$0xff]  ;;  %v18732_v12 = vld [vmem:[#allocation16_spill] sm:$0xff] }
 0x302   : >> { %18618 = vst [vmem:[#allocation98_spill] sm:$0xff] %v10380_v35  ;;  %v18659_v35 = vld [vmem:[#allocation75_spill] sm:$0xff]  ;;  %v18733_v51 = vld [vmem:[#allocation12_spill] sm:$0xff] }
 0x303   : >> { %18619 = vst [vmem:[#allocation99_spill] sm:$0xff] %v10384_v24  ;;  %v18677_v24 = vld [vmem:[#allocation48_spill] sm:$0xff] }
 0x304   : >> { %18620 = vst [vmem:[#allocation100_spill] sm:$0xff] %v10388_v44  ;;  %v18679_v44 = vld [vmem:[#allocation45_spill] sm:$0xff]  ;;  %v18734_v31 = vld [vmem:[#allocation8_spill] sm:$0xff] }
 0x305   : >> { %18621 = vst [vmem:[#allocation101_spill] sm:$0xff] %v10392_v61  ;;  %v18685_v61 = vld [vmem:[#allocation30_spill] sm:$0xff] }
 0x306   : >> { %18622 = vst [vmem:[#allocation102_spill] sm:$0xff] %v10396_v19  ;;  %v18686_v19 = vld [vmem:[#allocation27_spill] sm:$0xff] }
 0x307   : >> { %18623 = vst [vmem:[#allocation103_spill] sm:$0xff] %v10400_v25  ;;  %v18691_v25 = vld [vmem:[#allocation9_spill] sm:$0xff] }
 0x308   : >> { %18624 = vst [vmem:[#allocation104_spill] sm:$0xff] %v10404_v29  ;;  %v18692_v29 = vld [vmem:[#allocation5_spill] sm:$0xff] }
 0x309   : >> { %18625 = vst [vmem:[#allocation105_spill] sm:$0xff] %v10408_v46  ;;  %v18699_v46 = vld [vmem:[#allocation77_spill] sm:$0xff] }
 0x30a   : >> { %18626 = vst [vmem:[#allocation106_spill] sm:$0xff] %v10412_v4  ;;  %v18701_v4 = vld [vmem:[#allocation74_spill] sm:$0xff] }
 0x30b   : >> { %18627 = vst [vmem:[#allocation107_spill] sm:$0xff] %v10416_v21  ;;  %v7891_v21 = vld [vmem:[%s14414_s9 + $0x38] sm:$0xff] }
 0x30c   : >> { %18628 = vst [vmem:[#allocation108_spill] sm:$0xff] %v10420_v52  ;;  %3622 = vmatpush.bf16.msra.mxu0 %v7891_v21  ;;  %7895 = vmatpush.bf16.msra.mxu1 %v7891_v21  ;;  %v7890_v52 = vld [vmem:[%s14414_s9 + $0x30] sm:$0xff] }
 0x30d   : >> { %18629 = vst [vmem:[#allocation109_spill] sm:$0xff] %v10480_v5  ;;  %v18647_v5 = vld [vmem:[#allocation10_spill] sm:$0xff]  ;;  %7896 = vmatpush.bf16.msra.mxu2 %v7891_v21  ;;  %7897 = vmatpush.bf16.msra.mxu3 %v7891_v21  ;;  %v7886_v21 = vld [vmem:[%s14414_s9 + $0x10] sm:$0xff] }
 0x30e   : >> { %18630 = vst [vmem:[#allocation110_spill] sm:$0xff] %v10484_v8  ;;  %v18648_v8 = vld [vmem:[#allocation6_spill] sm:$0xff] }
 0x30f   : >> { %18631 = vst [vmem:[#allocation111_spill] sm:$0xff] %v10488_v42  ;;  %v18653_v42 = vld [vmem:[#allocation84_spill] sm:$0xff] }
 0x310   : >> { %18632 = vst [vmem:[#allocation112_spill] sm:$0xff] %v10492_v30  ;;  %v18655_v30 = vld [vmem:[#allocation81_spill] sm:$0xff]  ;;  %3623 = vmatpush.bf16.msra.mxu0 %v7890_v52  ;;  %7898 = vmatpush.bf16.msra.mxu1 %v7890_v52 }
 0x311   : >> { %18633 = vst [vmem:[#allocation113_spill] sm:$0xff] %v10496_v39  ;;  %v18661_v39 = vld [vmem:[#allocation72_spill] sm:$0xff]  ;;  %7899 = vmatpush.bf16.msra.mxu2 %v7890_v52  ;;  %7900 = vmatpush.bf16.msra.mxu3 %v7890_v52 }
 0x312   : >> { %18634 = vst [vmem:[#allocation114_spill] sm:$0xff] %v10500_v40  ;;  %v18663_v40 = vld [vmem:[#allocation69_spill] sm:$0xff]  ;;  %v7885_v52 = vld [vmem:[%s14414_s9 + $0x8] sm:$0xff] }
 0x313   : >> { %18635 = vst [vmem:[#allocation115_spill] sm:$0xff] %v10504_v27  ;;  %v18681_v27 = vld [vmem:[#allocation42_spill] sm:$0xff] }
 0x314   : >> { %18636 = vst [vmem:[#allocation116_spill] sm:$0xff] %v10508_v60  ;;  %v18682_v60 = vld [vmem:[#allocation39_spill] sm:$0xff] }
 0x315   : >> { %18637 = vst [vmem:[#allocation117_spill] sm:$0xff] %v10512_v33  ;;  %v18687_v33 = vld [vmem:[#allocation24_spill] sm:$0xff] }
 0x316   : >> { %18638 = vst [vmem:[#allocation118_spill] sm:$0xff] %v10516_v36  ;;  %v18688_v36 = vld [vmem:[#allocation21_spill] sm:$0xff] }
 0x317   : >> { %18639 = vst [vmem:[#allocation119_spill] sm:$0xff] %v10520_v50  ;;  %v18693_v50 = vld [vmem:[#allocation89_spill] sm:$0xff] }
 0x318   : >> { %18640 = vst [vmem:[#allocation120_spill] sm:$0xff] %v10524_v37  ;;  %v18694_v37 = vld [vmem:[#allocation86_spill] sm:$0xff] }
 0x319   : >> { %18641 = vst [vmem:[#allocation121_spill] sm:$0xff] %v10528_v47  ;;  %v18703_v47 = vld [vmem:[#allocation71_spill] sm:$0xff] }
 0x31a   : >> { %18642 = vst [vmem:[#allocation122_spill] sm:$0xff] %v10532_v58  ;;  %v18705_v58 = vld [vmem:[#allocation68_spill] sm:$0xff] }
 0x31b   : >> { %18643 = vst [vmem:[#allocation123_spill] sm:$0xff] %v10536_v1  ;;  %v7889_v1 = vld [vmem:[%s14414_s9 + $0x28] sm:$0xff] }
 0x31c   : >> { %18644 = vst [vmem:[#allocation124_spill] sm:$0xff] %v10540_v26  ;;  %3624 = vmatpush.bf16.msra.mxu0 %v7889_v1  ;;  %7901 = vmatpush.bf16.msra.mxu1 %v7889_v1  ;;  %v7888_v26 = vld [vmem:[%s14414_s9 + $0x20] sm:$0xff] }
 0x31d   : >> { %18650 = vst [vmem:[#allocation18_spill] sm:$0xff] %v18649_v62  ;;  %v18665_v62 = vld [vmem:[#allocation66_spill] sm:$0xff]  ;;  %7902 = vmatpush.bf16.msra.mxu2 %v7889_v1  ;;  %7903 = vmatpush.bf16.msra.mxu3 %v7889_v1  ;;  %v3490_v1 = vpack.c.bf16 %v10832_v15, %v18734_v31  ;;  %v3506_v15 = vpack.c.bf16 %v18691_v25, %v18692_v29 }
 0x31e   : >> { %18652 = vst [vmem:[#allocation14_spill] sm:$0xff] %v18651_v23  ;;  %v18667_v23 = vld [vmem:[#allocation63_spill] sm:$0xff]  ;;  %v3521_v31 = vpack.c.bf16 %v18645_v7, %v18646_v14  ;;  %v3537_v29 = vpack.c.bf16 %v10456_v11, %v10460_v28  ;;  %v3493_v25 = vpack.c.bf16 %v10808_v48, %v10812_v56  ;;  %v3523_v14 = vpack.c.bf16 %v10568_v53, %v10572_v34 }
 0x31f   : >> { %18654 = vst [vmem:[#allocation10_spill] sm:$0xff] %v18653_v42  ;;  %v18669_v42 = vld [vmem:[#allocation60_spill] sm:$0xff]  ;;  %v3509_v11 = vpack.c.bf16 %v18685_v61, %v18686_v19  ;;  %v3540_v19 = vpack.c.bf16 %v10432_v41, %v10436_v22 }
 0x320   : >> { %18656 = vst [vmem:[#allocation6_spill] sm:$0xff] %v18655_v30  ;;  %v18671_v30 = vld [vmem:[#allocation57_spill] sm:$0xff]  ;;  %3625 = vmatpush.bf16.msra.mxu0 %v7888_v26  ;;  %7904 = vmatpush.bf16.msra.mxu1 %v7888_v26 }
 0x321   : >> { %18658 = vst [vmem:[#allocation90_spill] sm:$0xff] %v18657_v0  ;;  %v18673_v0 = vld [vmem:[#allocation54_spill] sm:$0xff]  ;;  %7905 = vmatpush.bf16.msra.mxu2 %v7888_v26  ;;  %7906 = vmatpush.bf16.msra.mxu3 %v7888_v26  ;;  %v3520_v26 = vpack.c.bf16 %v18647_v5, %v18648_v8  ;;  %v3508_v8 = vpack.c.bf16 %v18687_v33, %v18688_v36 }
 0x322   : >> { %18660 = vst [vmem:[#allocation87_spill] sm:$0xff] %v18659_v35  ;;  %v18675_v35 = vld [vmem:[#allocation51_spill] sm:$0xff]  ;;  %v3525_v5 = vpack.c.bf16 %v10552_v63, %v10556_v49  ;;  %v18749_v63 = vld [vmem:[#allocation105_spill] sm:$0xff] }
 0x323   : >> { %18662 = vst [vmem:[#allocation84_spill] sm:$0xff] %v18661_v39  ;;  %v18683_v39 = vld [vmem:[#allocation36_spill] sm:$0xff] }
 0x324   : >> { %18664 = vst [vmem:[#allocation81_spill] sm:$0xff] %v18663_v40  ;;  %v18684_v40 = vld [vmem:[#allocation33_spill] sm:$0xff] }
 0x325   : >> { %18666 = vst [vmem:[#allocation78_spill] sm:$0xff] %v18665_v62  ;;  %v18689_v62 = vld [vmem:[#allocation17_spill] sm:$0xff] }
 0x326   : >> { %18668 = vst [vmem:[#allocation75_spill] sm:$0xff] %v18667_v23  ;;  %v18690_v23 = vld [vmem:[#allocation13_spill] sm:$0xff] }
 0x327   : >> { %18670 = vst [vmem:[#allocation72_spill] sm:$0xff] %v18669_v42  ;;  %v18695_v42 = vld [vmem:[#allocation83_spill] sm:$0xff] }
 0x328   : >> { %18672 = vst [vmem:[#allocation69_spill] sm:$0xff] %v18671_v30  ;;  %v18697_v30 = vld [vmem:[#allocation80_spill] sm:$0xff] }
 0x329   : >> { %18674 = vst [vmem:[#allocation66_spill] sm:$0xff] %v18673_v0  ;;  %v18707_v0 = vld [vmem:[#allocation65_spill] sm:$0xff] }
 0x32a   : >> { %18676 = vst [vmem:[#allocation63_spill] sm:$0xff] %v18675_v35  ;;  %v18709_v35 = vld [vmem:[#allocation62_spill] sm:$0xff] }
 0x32b   : >> { %18678 = vst [vmem:[#allocation60_spill] sm:$0xff] %v18677_v24  ;;  %v7887_v24 = vld [vmem:[%s14414_s9 + $0x18] sm:$0xff] }
 0x32c   : >> { %18680 = vst [vmem:[#allocation57_spill] sm:$0xff] %v18679_v44  ;;  %3626 = vmatpush.bf16.msra.mxu0 %v7887_v24  ;;  %7907 = vmatpush.bf16.msra.mxu1 %v7887_v24  ;;  %v7884_v44 = vld [vmem:[%s14414_s9] sm:$0xff] }
 0x32d   : >> { %18696 = vst [vmem:[#allocation54_spill] sm:$0xff] %v18695_v42  ;;  %v18711_v42 = vld [vmem:[#allocation59_spill] sm:$0xff]  ;;  %7908 = vmatpush.bf16.msra.mxu2 %v7887_v24  ;;  %7909 = vmatpush.bf16.msra.mxu3 %v7887_v24  ;;  %v3535_v24 = vpack.c.bf16 %v10472_v10, %v10476_v55  ;;  %v18739_v10 = vld [vmem:[#allocation123_spill] sm:$0xff] }
 0x32e   : >> { %18698 = vst [vmem:[#allocation51_spill] sm:$0xff] %v18697_v30  ;;  %v18713_v30 = vld [vmem:[#allocation56_spill] sm:$0xff] }
 0x32f   : >> { %18700 = vst [vmem:[#allocation48_spill] sm:$0xff] %v18699_v46  ;;  %v18715_v46 = vld [vmem:[#allocation53_spill] sm:$0xff] }
 0x330   : >> { %18702 = vst [vmem:[#allocation45_spill] sm:$0xff] %v18701_v4  ;;  %v18717_v4 = vld [vmem:[#allocation50_spill] sm:$0xff]  ;;  %3627 = vmatpush.bf16.msra.mxu0 %v7886_v21  ;;  %7910 = vmatpush.bf16.msra.mxu1 %v7886_v21 }
 0x331   : >> { %18704 = vst [vmem:[#allocation42_spill] sm:$0xff] %v18703_v47  ;;  %v18719_v47 = vld [vmem:[#allocation47_spill] sm:$0xff]  ;;  %7911 = vmatpush.bf16.msra.mxu2 %v7886_v21  ;;  %7912 = vmatpush.bf16.msra.mxu3 %v7886_v21  ;;  %v3491_v21 = vpack.c.bf16 %v10824_v13, %v18733_v51  ;;  %v3522_v51 = vpack.c.bf16 %v10576_v57, %v10580_v9 }
 0x332   : >> { %18706 = vst [vmem:[#allocation39_spill] sm:$0xff] %v18705_v58  ;;  %v18721_v58 = vld [vmem:[#allocation44_spill] sm:$0xff]  ;;  %v3539_v13 = vpack.c.bf16 %v10440_v38, %v10444_v16  ;;  %v3511_v38 = vpack.c.bf16 %v18681_v27, %v18682_v60  ;;  %v18744_v60 = vld [vmem:[#allocation63_spill] sm:$0xff] }
 0x333   : >> { %18708 = vst [vmem:[#allocation36_spill] sm:$0xff] %v18707_v0  ;;  %v18723_v0 = vld [vmem:[#allocation41_spill] sm:$0xff]  ;;  %v18737_v7 = vld [vmem:[#allocation60_spill] sm:$0xff] }
 0x334   : >> { %18710 = vst [vmem:[#allocation33_spill] sm:$0xff] %v18709_v35  ;;  %v18725_v35 = vld [vmem:[#allocation38_spill] sm:$0xff]  ;;  %3628 = vmatpush.bf16.msra.mxu0 %v7885_v52  ;;  %7913 = vmatpush.bf16.msra.mxu1 %v7885_v52  ;;  %v18736_v61 = vld [vmem:[#allocation57_spill] sm:$0xff] }
 0x335   : >> { %18712 = vst [vmem:[#allocation30_spill] sm:$0xff] %v18711_v42  ;;  %v18726_v42 = vld [vmem:[#allocation35_spill] sm:$0xff]  ;;  %7914 = vmatpush.bf16.msra.mxu2 %v7885_v52  ;;  %7915 = vmatpush.bf16.msra.mxu3 %v7885_v52 }
 0x336   : >> { %18714 = vst [vmem:[#allocation27_spill] sm:$0xff] %v18713_v30  ;;  %v18727_v30 = vld [vmem:[#allocation32_spill] sm:$0xff] }
 0x337   : >> { %18716 = vst [vmem:[#allocation24_spill] sm:$0xff] %v18715_v46  ;;  %v18728_v46 = vld [vmem:[#allocation29_spill] sm:$0xff]  ;;  %v3496_v16 = vpack.c.bf16 %v18726_v42, %v18727_v30  ;;  %v18741_v30 = vld [vmem:[#allocation107_spill] sm:$0xff] }
 0x338   : >> { %18718 = vst [vmem:[#allocation21_spill] sm:$0xff] %v18717_v4  ;;  %v18729_v4 = vld [vmem:[#allocation26_spill] sm:$0xff]  ;;  %3629 = vmatpush.bf16.msra.mxu0 %v7884_v44  ;;  %7916 = vmatpush.bf16.msra.mxu1 %v7884_v44  ;;  %v18740_v42 = vld [vmem:[#allocation108_spill] sm:$0xff] }
 0x339   : >> { %18720 = vst [vmem:[#allocation17_spill] sm:$0xff] %v18719_v47  ;;  %v18730_v47 = vld [vmem:[#allocation23_spill] sm:$0xff]  ;;  %7917 = vmatpush.bf16.msra.mxu2 %v7884_v44  ;;  %7918 = vmatpush.bf16.msra.mxu3 %v7884_v44  ;;  %v3492_v44 = vpack.c.bf16 %v10816_v54, %v18732_v12 }
 0x33a   : >> { %18722 = vst [vmem:[#allocation13_spill] sm:$0xff] %v18721_v58  ;;  %v18731_v58 = vld [vmem:[#allocation20_spill] sm:$0xff] }
 0x33b   : >> { %18724 = vst [vmem:[#allocation9_spill] sm:$0xff] %v18723_v0  ;;  %v3505_v0 = vpack.c.bf16 %v18693_v50, %v18694_v37  ;;  %3630 = vmatmul.bf16.vlgmr.msra.gmra.mxu0 %v3490_v1  ;;  %v3536_v50 = vpack.c.bf16 %v10464_v2, %v10468_v32  ;;  %v3494_v28 = vpack.c.bf16 %v18730_v47, %v18731_v58  ;;  %v18738_v32 = vld [vmem:[#allocation124_spill] sm:$0xff]  ;;  %v18746_v47 = vld [vmem:[#allocation122_spill] sm:$0xff]  ;;  %v18747_v58 = vld [vmem:[#allocation121_spill] sm:$0xff] }
 0x33c   : >> { %3780 = vmatmul.bf16.vlgmr.msra.gmra.mxu2 %v3520_v26  ;;  %3855 = vmatmul.bf16.vlgmr.msra.gmra.mxu3 %v3535_v24  ;;  %v3512_v2 = vpack.c.bf16 %v18737_v7, %v18736_v61  ;;  %v3527_v55 = vpack.c.bf16 %v18739_v10, %v18738_v32 }
 0x33d   : >> { %3705 = vmatmul.bf16.vlgmr.msra.gmra.mxu1 %v3505_v0  ;;  %v3507_v0 = vpack.c.bf16 %v18689_v62, %v18690_v23  ;;  %v3538_v23 = vpack.c.bf16 %v10448_v3, %v10452_v6  ;;  %v3524_v62 = vpack.c.bf16 %v10560_v45, %v10564_v17  ;;  %v3495_v6 = vpack.c.bf16 %v18728_v46, %v18729_v4 }
 0x33e   : >> { %v3510_v3 = vpack.c.bf16 %v18683_v39, %v18684_v40  ;;  %v3526_v4 = vpack.c.bf16 %v10544_v59, %v10548_v18  ;;  %v3541_v46 = vpack.c.bf16 %v10424_v43, %v10428_v20  ;;  %v3542_v39 = vpack.c.bf16 %v18741_v30, %v18740_v42  ;;  %v14485_v20 = vld [vmem:[%s14409_s6] ss:$0 sm:$0xff]  ;;  %v18748_v18 = vld [vmem:[#allocation106_spill] sm:$0xff] }
 0x33f   : >> { %v3528_v59 = vpack.c.bf16 %v18747_v58, %v18746_v47  ;;  %v3543_v49 = vpack.c.bf16 %v18749_v63, %v18748_v18 }
 0x340   : >> { %v18743_v40 = vld [vmem:[#allocation17_spill] sm:$0xff] }
 0x341   : >> { %v18742_v43 = vld [vmem:[#allocation13_spill] sm:$0xff] }
 0x342   : >> { %v18735_v22 = vld [vmem:[#allocation9_spill] sm:$0xff]  ;;  %v3498_v27 = vpack.c.bf16 %v18743_v40, %v18742_v43 }
 0x343   : >> { %v3497_v41 = vpack.c.bf16 %v18735_v22, %v18725_v35  ;;  %v18745_v35 = vld [vmem:[#allocation66_spill] sm:$0xff] }
 0x344   : >> { %v3513_v33 = vpack.c.bf16 %v18745_v35, %v18744_v60 }
 0x34b   : >> { %3635 = vmatmul.bf16.gmra.mxu0 %v3491_v21 }
 0x34c   : >> { %3785 = vmatmul.bf16.gmra.mxu2 %v3521_v31  ;;  %3860 = vmatmul.bf16.gmra.mxu3 %v3536_v50 }
 0x34d   : >> { %3710 = vmatmul.bf16.gmra.mxu1 %v3506_v15 }
 0x35b   : >> { %3640 = vmatmul.bf16.gmra.mxu0 %v3492_v44 }
 0x35c   : >> { %3790 = vmatmul.bf16.gmra.mxu2 %v3522_v51  ;;  %3865 = vmatmul.bf16.gmra.mxu3 %v3537_v29 }
 0x35d   : >> { %3715 = vmatmul.bf16.gmra.mxu1 %v3507_v0 }
 0x36b   : >> { %3645 = vmatmul.bf16.gmra.mxu0 %v3493_v25  ;;  %v18750_v25 = vld [vmem:[#allocation21_spill] sm:$0xff] }
 0x36c   : >> { %3795 = vmatmul.bf16.gmra.mxu2 %v3523_v14  ;;  %3870 = vmatmul.bf16.gmra.mxu3 %v3538_v23  ;;  %v18752_v23 = vld [vmem:[#allocation69_spill] sm:$0xff] }
 0x36d   : >> { %3720 = vmatmul.bf16.gmra.mxu1 %v3508_v8  ;;  %v18751_v8 = vld [vmem:[#allocation24_spill] sm:$0xff] }
 0x36e   : >> { %v3499_v14 = vpack.c.bf16 %v18751_v8, %v18750_v25 }
 0x37b   : >> { %3650 = vmatmul.bf16.gmra.mxu0 %v3494_v28  ;;  %v18753_v28 = vld [vmem:[#allocation72_spill] sm:$0xff] }
 0x37c   : >> { %3800 = vmatmul.bf16.gmra.mxu2 %v3524_v62  ;;  %3875 = vmatmul.bf16.gmra.mxu3 %v3539_v13 }
 0x37d   : >> { %3725 = vmatmul.bf16.gmra.mxu1 %v3509_v11  ;;  %v3514_v11 = vpack.c.bf16 %v18753_v28, %v18752_v23 }
 0x38b   : >> { %3655 = vmatmul.bf16.gmra.mxu0 %v3495_v6 }
 0x38c   : >> { %3805 = vmatmul.bf16.gmra.mxu2 %v3525_v5  ;;  %3880 = vmatmul.bf16.gmra.mxu3 %v3540_v19  ;;  %v18755_v5 = vld [vmem:[#allocation119_spill] sm:$0xff] }
 0x38d   : >> { %3730 = vmatmul.bf16.gmra.mxu1 %v3510_v3  ;;  %v18754_v3 = vld [vmem:[#allocation120_spill] sm:$0xff] }
 0x38e   : >> { %v3529_v19 = vpack.c.bf16 %v18755_v5, %v18754_v3 }
 0x39b   : >> { %3660 = vmatmul.bf16.gmra.mxu0 %v3496_v16  ;;  %v18756_v16 = vld [vmem:[#allocation104_spill] sm:$0xff] }
 0x39c   : >> { %3810 = vmatmul.bf16.gmra.mxu2 %v3526_v4  ;;  %3885 = vmatmul.bf16.gmra.mxu3 %v3541_v46 }
 0x39d   : >> { %3735 = vmatmul.bf16.gmra.mxu1 %v3511_v38  ;;  %v18757_v38 = vld [vmem:[#allocation103_spill] sm:$0xff] }
 0x39e   : >> { %v3544_v4 = vpack.c.bf16 %v18757_v38, %v18756_v16 }
 0x3ab   : >> { %3665 = vmatmul.bf16.gmra.mxu0 %v3497_v41 }
 0x3ac   : >> { %3815 = vmatmul.bf16.gmra.mxu2 %v3527_v55  ;;  %3890 = vmatmul.bf16.gmra.mxu3 %v3542_v39 }
 0x3ad   : >> { %3740 = vmatmul.bf16.gmra.mxu1 %v3512_v2 }
 0x3b8   : >> { %v3631_v36 = vpop.f32.mrf.mxu0 }
 0x3b9   : >> { %v14496_v45 = vadd.f32 %v14485_v20, %v3631_v36 }
 0x3ba   : >> { %v3706_v37 = vpop.f32.mrf.mxu1 }
 0x3bb   : >> { %v14499_v17 = vadd.f32 %v14485_v20, %v3706_v37  ;;  %v7760_v53 = vmul.f32 -1.442695, %v14496_v45  ;;  %3670 = vmatmul.bf16.gmra.mxu0 %v3498_v27 }
 0x3bc   : >> { %3820 = vmatmul.bf16.gmra.mxu2 %v3528_v59  ;;  %3895 = vmatmul.bf16.gmra.mxu3 %v3543_v49 }
 0x3bd   : >> { %v7790_v34 = vmul.f32 -1.442695, %v14499_v17  ;;  %3745 = vmatmul.bf16.gmra.mxu1 %v3513_v33  ;;  %9381 = vpow2.f32 %v7760_v53 }
 0x3bf   : >> { %9383 = vpow2.f32 %v7790_v34  ;;  %v3781_v57 = vpop.f32.mrf.mxu2  ;;  %v3856_v9 = vpop.f32.mrf.mxu3 }
 0x3c0   : >> { %v14504_v48 = vadd.f32 %v14485_v20, %v3781_v57  ;;  %v14507_v56 = vadd.f32 %v14485_v20, %v3856_v9  ;;  %v3633_v54 = vpop.f32.mrf.mxu0 }
 0x3c1   : >> { %v14510_v52 = vadd.f32 %v14485_v20, %v3633_v54 }
 0x3c2   : >> { %v3708_v12 = vpop.f32.mrf.mxu1  ;;  %v7820_v26 = vmul.f32 -1.442695, %v14504_v48  ;;  %v7850_v24 = vmul.f32 -1.442695, %v14507_v56 }
 0x3c3   : >> { %v14513_v1 = vadd.f32 %v14485_v20, %v3708_v12  ;;  %v9382_v21 = vpop.eup %9381  ;;  %v7761_v50 = vmul.f32 -1.442695, %v14510_v52 }
 0x3c4   : >> { %v14517_v31 = vadd.f32 1.0, %v9382_v21  ;;  %9385 = vpow2.f32 %v7820_v26 }
 0x3c5   : >> { %v9384_v15 = vpop.eup %9383  ;;  %9387 = vpow2.f32 %v7850_v24  ;;  %v7791_v0 = vmul.f32 -1.442695, %v14513_v1 }
 0x3c6   : >> { %v14520_v44 = vadd.f32 1.0, %v9384_v15  ;;  %9389 = vrcp.f32 %v14517_v31  ;;  %v4420_v46 = vand.u32 2147483647, %v14517_v31  ;;  %v4422_v22 = vand.u32 2147483648, %v14517_v31 }
 0x3c7   : >> { %v3783_v51 = vpop.f32.mrf.mxu2  ;;  %v3858_v29 = vpop.f32.mrf.mxu3  ;;  %vm4416_vm11 = vweird.f32 %v14517_v31 }
 0x3c8   : >> { %9391 = vrcp.f32 %v14520_v44  ;;  %v14530_v62 = vadd.f32 %v14485_v20, %v3783_v51  ;;  %v3636_v13 = vpop.f32.mrf.mxu0  ;;  %v4870_v41 = vand.u32 2147483647, %v14520_v44  ;;  %v14541_v2 = vadd.f32 %v14485_v20, %v3858_v29 }
 0x3c9   : >> { %9393 = vpow2.f32 %v7761_v50  ;;  %v14544_v32 = vadd.f32 %v14485_v20, %v3636_v13  ;;  %v4872_v42 = vand.u32 2147483648, %v14520_v44  ;;  %vm4866_vm12 = vweird.f32 %v14520_v44 }
 0x3ca   : >> { %v3711_v6 = vpop.f32.mrf.mxu1  ;;  %9395 = vpow2.f32 %v7791_v0  ;;  %v9386_v61 = vpop.eup %9385  ;;  %v7821_v7 = vmul.f32 -1.442695, %v14530_v62  ;;  %vm14557_vm13 = vcmp.eq.f32.partialorder %v4420_v46, 8.507059e+37  ;;  %v4423_v35 = vor.u32 1.1754944e-38, %v4422_v22 }
 0x3cb   : >> { %v14547_v10 = vadd.f32 %v14485_v20, %v3711_v6  ;;  %v9388_v55 = vpop.eup %9387  ;;  %v14550_v30 = vadd.f32 1.0, %v9386_v61  ;;  %3675 = vmatmul.bf16.gmra.mxu0 %v3499_v14  ;;  %vm14563_vm14 = vcmp.eq.f32.partialorder %v4870_v41, 8.507059e+37  ;;  %v7851_v47 = vmul.f32 -1.442695, %v14541_v2 }
 0x3cc   : >> { %v9390_v39 = vpop.eup %9389  ;;  %v14554_v43 = vadd.f32 1.0, %v9388_v55  ;;  %3825 = vmatmul.bf16.gmra.mxu2 %v3529_v19  ;;  %3900 = vmatmul.bf16.gmra.mxu3 %v3544_v4  ;;  %v4873_v18 = vor.u32 1.1754944e-38, %v4872_v42  ;;  %v7762_v63 = vmul.f32 -1.442695, %v14544_v32 }
 0x3cd   : >> { %3750 = vmatmul.bf16.gmra.mxu1 %v3514_v11  ;;  %v4412_v27 = vmul.f32 %v9390_v39, %v14517_v31  ;;  %9397 = vrcp.f32 %v14550_v30  ;;  %vm4417_vm15 = vweird.f32 %v9390_v39  ;;  %v5320_v34 = vand.u32 2147483647, %v14550_v30 }
 0x3ce   : >> { %v9392_v40 = vpop.eup %9391  ;;  %9399 = vpow2.f32 %v7821_v7  ;;  %v5322_v9 = vand.u32 2147483648, %v14550_v30  ;;  %v5770_v24 = vand.u32 2147483647, %v14554_v43  ;;  %v5772_v0 = vand.u32 2147483648, %v14554_v43  ;;  %vm4418_vm1 = vmor %vm4416_vm11, %vm4417_vm15 }
 0x3cf   : >> { %v9394_v33 = vpop.eup %9393  ;;  %v4862_v36 = vmul.f32 %v9392_v40, %v14520_v44  ;;  %v4413_v59 = vsub.f32 1.0, %v4412_v27  ;;  %9401 = vrcp.f32 %v14554_v43  ;;  %v3786_v49 = vpop.f32.mrf.mxu2  ;;  %vm4867_vm5 = vweird.f32 %v9392_v40 }
 0x3d0   : >> { %v9396_v58 = vpop.eup %9395  ;;  %v14572_v54 = vadd.f32 1.0, %v9394_v33  ;;  %9403 = vpow2.f32 %v7851_v47  ;;  %v14578_v21 = vadd.f32 %v14485_v20, %v3786_v49  ;;  %v14583_v51 = vmul.f32 -1.442695, %v14547_v10  ;;  %vm4868_vm0 = vmor %vm4866_vm12, %vm4867_vm5  ;;  %v3638_v28 = vpop.f32.mrf.mxu0 }
 0x3d1   : >> { %v4863_v53 = vsub.f32 1.0, %v4862_v36  ;;  %v4414_v57 = vmul.f32 %v9390_v39, %v4413_v59  ;;  %v14574_v12 = vadd.f32 1.0, %v9396_v58  ;;  %vm5316_vm2 = vweird.f32 %v14550_v30 }
 0x3d2   : >> { %9405 = vrcp.f32 %v14572_v54  ;;  %18763 = vst [vmem:[#allocation69_spill] sm:$0xff] %v14583_v51  ;;  %vm5766_vm3 = vweird.f32 %v14554_v43  ;;  %vm14594_vm4 = vcmp.eq.f32.partialorder %v5320_v34, 8.507059e+37  ;;  %v5323_v11 = vor.u32 1.1754944e-38, %v5322_v9  ;;  %v3861_v34 = vpop.f32.mrf.mxu3 }
 0x3d3   : >> { %18762 = vst [vmem:[#allocation72_spill] sm:$0xff] %v14574_v12  ;;  %v4864_v26 = vmul.f32 %v9392_v40, %v4863_v53  ;;  %v9398_v15 = vpop.eup %9397  ;;  %v4415_v50 = vadd.f32 %v9390_v39, %v4414_v57  ;;  %9407 = vrcp.f32 %v14574_v12  ;;  %vm14602_vm6 = vcmp.eq.f32.partialorder %v5770_v24, 8.507059e+37 }
 0x3d4   : >> { %v9400_v29 = vpop.eup %9399  ;;  %v5312_v8 = vmul.f32 %v9398_v15, %v14550_v30  ;;  %v5773_v19 = vor.u32 1.1754944e-38, %v5772_v0  ;;  %v4435_v16 = vand.u32 2147483647, %v14572_v54  ;;  %vm5317_vm7 = vweird.f32 %v9398_v15 }
 0x3d5   : >> { %v4865_v25 = vadd.f32 %v9392_v40, %v4864_v26  ;;  %v9402_v14 = vpop.eup %9401  ;;  %v4419_v23 = vsel %vm4418_vm1, %v9390_v39, %v4415_v50  ;;  %vm4431_vm8 = vweird.f32 %v14572_v54  ;;  %v4437_v41 = vand.u32 2147483648, %v14572_v54  ;;  %vm5318_vm10 = vmor %vm5316_vm2, %vm5317_vm7 }
 0x3d6   : >> { %v4424_v31 = vsel %vm14557_vm13, %v4423_v35, %v4419_v23  ;;  %v5313_v6 = vsub.f32 1.0, %v5312_v8  ;;  %v5762_v3 = vmul.f32 %v9402_v14, %v14554_v43  ;;  %v9404_v38 = vpop.eup %9403  ;;  %9409 = vpow2.f32 %v7762_v63 }
 0x3d7   : >> { %v4869_v13 = vsel %vm4868_vm0, %v9392_v40, %v4865_v25  ;;  %v14607_v31 = vmul.f32 %v4424_v31, %v14496_v45   ;;  %v14617_v45 = vadd.f32 1.0, %v9400_v29  ;;  %vm5767_vm9 = vweird.f32 %v9402_v14 }
 0x3d8   : >> { %v4874_v44 = vsel %vm14563_vm14, %v4873_v18, %v4869_v13  ;;  %v5314_v4 = vmul.f32 %v9398_v15, %v5313_v6  ;;  %v5763_v46 = vsub.f32 1.0, %v5762_v3  ;;  %v9406_v22 = vpop.eup %9405  ;;  %vm14622_vm11 = vcmp.eq.f32.partialorder %v4435_v16, 8.507059e+37  ;;  %vm5768_vm12 = vmor %vm5766_vm3, %vm5767_vm9  ;;  %v3641_v53 = vpop.f32.mrf.mxu0 }
 0x3d9   : >> { %18768 = vst [vmem:[#allocation4_spill] sm:$0xff] %v14607_v31  ;;  %v14613_v37 = vmul.f32 %v4874_v44, %v14499_v17   ;;  %v4427_v55 = vmul.f32 %v9406_v22, %v14572_v54  ;;  %v9408_v42 = vpop.eup %9407  ;;  %v18772_v39 = vmov %v14574_v12  ;;  %9411 = vrcp.f32 %v14617_v45  ;;  %v3713_v44 = vpop.f32.mrf.mxu1 }
 0x3da   : >> { %v5315_v61 = vadd.f32 %v9398_v15, %v5314_v4  ;;  %v5764_v7 = vmul.f32 %v9402_v14, %v5763_v46  ;;  %v4885_v40 = vand.u32 2147483647, %v18772_v39  ;;  %v14628_v27 = vadd.f32 1.0, %v9404_v38 }
 0x3db   : >> { %18769 = vst [vmem:[#allocation92_spill] sm:$0xff] %v14613_v37  ;;  %v4428_v33 = vsub.f32 1.0, %v4427_v55  ;;  %v4877_v36 = vmul.f32 %v9408_v42, %v18772_v39  ;;  %vm4432_vm13 = vweird.f32 %v9406_v22  ;;  %vm4881_vm14 = vweird.f32 %v18772_v39 }
 0x3dc   : >> { %v5319_v60 = vsel %vm5318_vm10, %v9398_v15, %v5315_v61  ;;  %v5765_v35 = vadd.f32 %v9402_v14, %v5764_v7  ;;  %v4887_v30 = vand.u32 2147483648, %v18772_v39  ;;  %v9410_v18 = vpop.eup %9409  ;;  %v4438_v49 = vor.u32 1.1754944e-38, %v4437_v41  ;;  %vm4433_vm1 = vmor %vm4431_vm8, %vm4432_vm13  ;;  %v3788_v41 = vpop.f32.mrf.mxu2 }
 0x3dd   : >> { %v5324_v37 = vsel %vm14594_vm4, %v5323_v11, %v5319_v60  ;;  %v4429_v58 = vmul.f32 %v9406_v22, %v4428_v33  ;;  %v4878_v59 = vsub.f32 1.0, %v4877_v36  ;;  %vm14642_vm15 = vcmp.eq.f32.partialorder %v4885_v40, 8.507059e+37  ;;  %v3863_v60 = vpop.f32.mrf.mxu3 }
 0x3de   : >> { %v14638_v8 = vmul.f32 %v5324_v37, %v14504_v48   ;;  %v5769_v47 = vsel %vm5768_vm12, %v9402_v14, %v5765_v35  ;;  %9413 = vrcp.f32 %v14628_v27  ;;  %vm4882_vm5 = vweird.f32 %v9408_v42 }
 0x3df   : >> { %v5774_v63 = vsel %vm14602_vm6, %v5773_v19, %v5769_v47  ;;  %v4430_v43 = vadd.f32 %v9406_v22, %v4429_v58  ;;  %v4879_v48 = vmul.f32 %v9408_v42, %v4878_v59  ;;  %v9412_v57 = vpop.eup %9411  ;;  %v5335_v9 = vand.u32 2147483647, %v14617_v45  ;;  %vm4883_vm2 = vmor %vm4881_vm14, %vm4882_vm5 }
 0x3e0   : >> { %18773 = vst [vmem:[#allocation91_spill] sm:$0xff] %v14638_v8  ;;  %v14648_v55 = vmul.f32 %v5774_v63, %v14507_v56   ;;  %v5337_v26 = vand.u32 2147483648, %v14617_v45  ;;  %v14655_v24 = vadd.f32 1.0, %v9410_v18  ;;  %v18777_v15 = vmov %v14583_v51 }
 0x3e1   : >> { %9415 = vpow2.f32 %v18777_v15  ;;  %v4434_v50 = vsel %vm4433_vm1, %v9406_v22, %v4430_v43  ;;  %v4880_v56 = vadd.f32 %v9408_v42, %v4879_v48  ;;  %v4888_v0 = vor.u32 1.1754944e-38, %v4887_v30 }
 0x3e2   : >> { %18776 = vst [vmem:[#allocation88_spill] sm:$0xff] %v14648_v55  ;;  %v5327_v29 = vmul.f32 %v9412_v57, %v14617_v45  ;;  %v4439_v25 = vsel %vm14622_vm11, %v4438_v49, %v4434_v50  ;;  %vm5331_vm3 = vweird.f32 %v14617_v45  ;;  %v5785_v54 = vand.u32 2147483647, %v14628_v27 }
 0x3e3   : >> { %9417 = vrcp.f32 %v14655_v24  ;;  %v14667_v15 = vmul.f32 %v4439_v25, %v14510_v52   ;;  %v4884_v8 = vsel %vm4883_vm2, %v9408_v42, %v4880_v56  ;;  %v5787_v23 = vand.u32 2147483648, %v14628_v27 }
 0x3e4   : >> { %v5328_v14 = vsub.f32 1.0, %v5327_v29  ;;  %v9414_v11 = vpop.eup %9413  ;;  %v4889_v31 = vsel %vm14642_vm15, %v4888_v0, %v4884_v8  ;;  %vm14672_vm0 = vcmp.eq.f32.partialorder %v5335_v9, 8.507059e+37  ;;  %v5338_v6 = vor.u32 1.1754944e-38, %v5337_v26  ;;  %v3716_v29 = vpop.f32.mrf.mxu1 }
 0x3e5   : >> { %18778 = vst [vmem:[#allocation85_spill] sm:$0xff] %v14667_v15  ;;  %v7822_v3 = vmul.f32 -1.442695, %v14578_v21  ;;  %v14678_v50 = vmul.f32 %v4889_v31, %v14513_v1   ;;  %vm5332_vm4 = vweird.f32 %v9412_v57  ;;  %v5777_v5 = vmul.f32 %v9414_v11, %v14628_v27 }
 0x3e6   : >> { %v5329_v52 = vmul.f32 %v9412_v57, %v5328_v14  ;;  %vm5781_vm6 = vweird.f32 %v14628_v27  ;;  %vm14682_vm7 = vcmp.eq.f32.partialorder %v5785_v54, 8.507059e+37  ;;  %v14687_v38 = vadd.f32 %v14485_v20, %v3861_v34  ;;  %vm5333_vm8 = vmor %vm5331_vm3, %vm5332_vm4 }
 0x3e7   : >> { %18781 = vst [vmem:[#allocation82_spill] sm:$0xff] %v14678_v50  ;;  %v9416_v19 = vpop.eup %9415  ;;  %9419 = vpow2.f32 %v7822_v3  ;;  %v5778_v46 = vsub.f32 1.0, %v5777_v5  ;;  %v5788_v1 = vor.u32 1.1754944e-38, %v5787_v23  ;;  %vm4446_vm9 = vweird.f32 %v14655_v24 }
 0x3e8   : >> { %v5330_v4 = vadd.f32 %v9412_v57, %v5329_v52  ;;  %v14689_v22 = vadd.f32 1.0, %v9416_v19  ;;  %v7852_v7 = vmul.f32 -1.442695, %v14687_v38  ;;  %v14696_v55 = vadd.f32 %v14485_v20, %v3638_v28 }
 0x3e9   : >> { %v9418_v61 = vpop.eup %9417  ;;  %v14699_v42 = vadd.f32 %v14485_v20, %v3713_v44  ;;  %v5779_v39 = vmul.f32 %v9414_v11, %v5778_v46  ;;  %vm5782_vm10 = vweird.f32 %v9414_v11  ;;  %v4450_v35 = vand.u32 2147483647, %v14655_v24 }
 0x3ea   : >> { %v5334_v17 = vsel %vm5333_vm8, %v9412_v57, %v5330_v4  ;;  %v4442_v40 = vmul.f32 %v9418_v61, %v14655_v24  ;;  %9421 = vrcp.f32 %v14689_v22  ;;  %v14707_v33 = vadd.f32 %v14485_v20, %v3788_v41  ;;  %vm5783_vm11 = vmor %vm5781_vm6, %vm5782_vm10 }
 0x3eb   : >> { %v5339_v45 = vsel %vm14672_vm0, %v5338_v6, %v5334_v17  ;;  %v5780_v36 = vadd.f32 %v9414_v11, %v5779_v39  ;;  %v4452_v30 = vand.u32 2147483648, %v14655_v24  ;;  %9423 = vpow2.f32 %v7852_v7 }
 0x3ec   : >> { %v14710_v5 = vmul.f32 %v5339_v45, %v14530_v62   ;;  %v4443_v37 = vsub.f32 1.0, %v4442_v40  ;;  %v7763_v58 = vmul.f32 -1.442695, %v14696_v55  ;;  %v7793_v59 = vmul.f32 -1.442695, %v14699_v42 }
 0x3ed   : >> { %v9420_v47 = vpop.eup %9419  ;;  %v14718_v18 = vadd.f32 %v14485_v20, %v3863_v60  ;;  %v5784_v63 = vsel %vm5783_vm11, %v9414_v11, %v5780_v36  ;;  %vm4447_vm12 = vweird.f32 %v9418_v61  ;;  %v7823_v27 = vmul.f32 -1.442695, %v14707_v33 }
 0x3ee   : >> { %18784 = vst [vmem:[#allocation79_spill] sm:$0xff] %v14710_v5  ;;  %v4444_v49 = vmul.f32 %v9418_v61, %v4443_v37  ;;  %v14720_v62 = vadd.f32 1.0, %v9420_v47  ;;  %v5789_v43 = vsel %vm14682_vm7, %v5788_v1, %v5784_v63  ;;  %9425 = vpow2.f32 %v7763_v58  ;;  %vm4448_vm13 = vmor %vm4446_vm9, %vm4447_vm12 }
 0x3ef   : >> { %v14726_v48 = vmul.f32 %v5789_v43, %v14541_v2   ;;  %v4453_v57 = vor.u32 1.1754944e-38, %v4452_v30  ;;  %v4900_v26 = vand.u32 2147483647, %v14689_v22  ;;  %v7853_v15 = vmul.f32 -1.442695, %v14718_v18 }
 0x3f0   : >> { %v4445_v34 = vadd.f32 %v9418_v61, %v4444_v49  ;;  %9427 = vrcp.f32 %v14720_v62  ;;  %v9422_v9 = vpop.eup %9421  ;;  %v14734_v50 = vadd.f32 %v14485_v20, %v3641_v53  ;;  %vm4451_vm14 = vcmp.eq.f32.partialorder %v4450_v35, 8.507059e+37 }
 0x3f1   : >> { %18785 = vst [vmem:[#allocation76_spill] sm:$0xff] %v14726_v48  ;;  %9429 = vpow2.f32 %v7793_v59  ;;  %v4892_v2 = vmul.f32 %v9422_v9, %v14689_v22  ;;  %v4902_v0 = vand.u32 2147483648, %v14689_v22  ;;  %v9424_v25 = vpop.eup %9423  ;;  %v5350_v24 = vand.u32 2147483647, %v14720_v62 }
 0x3f2   : >> { %v4449_v56 = vsel %vm4448_vm13, %v9418_v61, %v4445_v34  ;;  %v5352_v8 = vand.u32 2147483648, %v14720_v62  ;;  %9431 = vpow2.f32 %v7823_v27  ;;  %v14743_v28 = vadd.f32 1.0, %v9424_v25 }
 0x3f3   : >> { %v4454_v54 = vsel %vm4451_vm14, %v4453_v57, %v4449_v56  ;;  %v4893_v23 = vsub.f32 1.0, %v4892_v2  ;;  %v7764_v11 = vmul.f32 -1.442695, %v14734_v50  ;;  %vm4896_vm15 = vweird.f32 %v14689_v22 }
 0x3f4   : >> { %v14741_v14 = vmul.f32 %v4454_v54, %v14544_v32   ;;  %v9426_v31 = vpop.eup %9425  ;;  %vm14747_vm5 = vcmp.eq.f32.partialorder %v4900_v26, 8.507059e+37  ;;  %9433 = vpow2.f32 %v7853_v15  ;;  %v14752_v6 = vadd.f32 %v14485_v20, %v3716_v29 }
 0x3f5   : >> { %v4894_v52 = vmul.f32 %v9422_v9, %v4893_v23  ;;  %vm4897_vm1 = vweird.f32 %v9422_v9  ;;  %v4903_v32 = vor.u32 1.1754944e-38, %v4902_v0  ;;  %9435 = vrcp.f32 %v14743_v28 }
 0x3f6   : >> { %18786 = vst [vmem:[#allocation73_spill] sm:$0xff] %v14741_v14  ;;  %v9428_v3 = vpop.eup %9427  ;;  %vm5346_vm2 = vweird.f32 %v14720_v62  ;;  %vm14757_vm3 = vcmp.eq.f32.partialorder %v5350_v24, 8.507059e+37  ;;  %v14761_v16 = vadd.f32 1.0, %v9426_v31  ;;  %v5353_v46 = vor.u32 1.1754944e-38, %v5352_v8  ;;  %vm4898_vm0 = vmor %vm4896_vm15, %vm4897_vm1 }
 0x3f7   : >> { %v9430_v5 = vpop.eup %9429  ;;  %v5342_v44 = vmul.f32 %v9428_v3, %v14720_v62  ;;  %v4895_v4 = vadd.f32 %v9422_v9, %v4894_v52  ;;  %9437 = vpow2.f32 %v7764_v11  ;;  %v5800_v7 = vand.u32 2147483647, %v14743_v28 }
 0x3f8   : >> { %v14763_v1 = vadd.f32 1.0, %v9430_v5  ;;  %v9432_v41 = vpop.eup %9431  ;;  %9439 = vrcp.f32 %v14761_v16  ;;  %v5802_v39 = vand.u32 2147483648, %v14743_v28  ;;  %vm5347_vm4 = vweird.f32 %v9428_v3 }
 0x3f9   : >> { %v5343_v61 = vsub.f32 1.0, %v5342_v44  ;;  %v4899_v17 = vsel %vm4898_vm0, %v9422_v9, %v4895_v4  ;;  %v4467_v35 = vand.u32 2147483648, %v14761_v16  ;;  %vm5796_vm6 = vweird.f32 %v14743_v28  ;;  %vm5348_vm8 = vmor %vm5346_vm2, %vm5347_vm4 }
 0x3fa   : >> { %9441 = vrcp.f32 %v14763_v1  ;;  %v9434_v40 = vpop.eup %9433  ;;  %v4904_v60 = vsel %vm14747_vm5, %v4903_v32, %v4899_v17  ;;  %v4465_v36 = vand.u32 2147483647, %v14761_v16  ;;  %vm14780_vm7 = vcmp.eq.f32.partialorder %v5800_v7, 8.507059e+37 }
 0x3fb   : >> { %v5344_v45 = vmul.f32 %v9428_v3, %v5343_v61  ;;  %v9436_v22 = vpop.eup %9435  ;;  %v14775_v29 = vmul.f32 %v4904_v60, %v14547_v10   ;;  %v4915_v58 = vand.u32 2147483647, %v14763_v1  ;;  %v5803_v63 = vor.u32 1.1754944e-38, %v5802_v39  ;;  %v3791_v39 = vpop.f32.mrf.mxu2 }
 0x3fc   : >> { %v5792_v30 = vmul.f32 %v9436_v22, %v14743_v28  ;;  %vm4461_vm9 = vweird.f32 %v14761_v16  ;;  %v4917_v10 = vand.u32 2147483648, %v14763_v1  ;;  %v14789_v49 = vadd.f32 1.0, %v9432_v41 }
 0x3fd   : >> { %18791 = vst [vmem:[#allocation70_spill] sm:$0xff] %v14775_v29  ;;  %v5345_v37 = vadd.f32 %v9428_v3, %v5344_v45  ;;  %v9438_v59 = vpop.eup %9437  ;;  %v4468_v48 = vor.u32 1.1754944e-38, %v4467_v35  ;;  %vm4911_vm10 = vweird.f32 %v14763_v1  ;;  %v14792_v34 = vadd.f32 1.0, %v9434_v40  ;;  %v3866_v45 = vpop.f32.mrf.mxu3 }
 0x3fe   : >> { %v9440_v53 = vpop.eup %9439  ;;  %v5793_v27 = vsub.f32 1.0, %v5792_v30  ;;  %vm5797_vm11 = vweird.f32 %v9436_v22  ;;  %vm14797_vm12 = vcmp.eq.f32.partialorder %v4465_v36, 8.507059e+37  ;;  %9443 = vrcp.f32 %v14789_v49  ;;  %v3643_v35 = vpop.f32.mrf.mxu0 }
 0x3ff   : >> { %v5349_v43 = vsel %vm5348_vm8, %v9428_v3, %v5345_v37  ;;  %v4457_v9 = vmul.f32 %v9440_v53, %v14761_v16  ;;  %vm14806_vm13 = vcmp.eq.f32.partialorder %v4915_v58, 8.507059e+37  ;;  %v14810_v0 = vadd.f32 1.0, %v9438_v59  ;;  %vm5798_vm14 = vmor %vm5796_vm6, %vm5797_vm11  ;;  %v3718_v30 = vpop.f32.mrf.mxu1  ;;  %v18804_v59 = vld [vmem:[#allocation27_spill] sm:$0xff] }
 0x400   : >> { %v9442_v57 = vpop.eup %9441  ;;  %v5354_v62 = vsel %vm14757_vm3, %v5353_v46, %v5349_v43  ;;  %v5794_v15 = vmul.f32 %v9436_v22, %v5793_v27  ;;  %v4918_v25 = vor.u32 1.1754944e-38, %v4917_v10  ;;  %v5367_v54 = vand.u32 2147483648, %v14789_v49 }
 0x401   : >> { %v14803_v14 = vmul.f32 %v5354_v62, %v14578_v21   ;;  %v4907_v56 = vmul.f32 %v9442_v57, %v14763_v1  ;;  %v4458_v29 = vsub.f32 1.0, %v4457_v9  ;;  %v7794_v24 = vmul.f32 -1.442695, %v14752_v6 }
 0x402   : >> { %v5795_v8 = vadd.f32 %v9436_v22, %v5794_v15  ;;  %v5365_v21 = vand.u32 2147483647, %v14789_v49  ;;  %9445 = vrcp.f32 %v14792_v34  ;;  %vm4462_vm15 = vweird.f32 %v9440_v53 }
 0x403   : >> { %18796 = vst [vmem:[#allocation67_spill] sm:$0xff] %v14803_v14  ;;  %v4908_v23 = vsub.f32 1.0, %v4907_v56  ;;  %v4459_v14 = vmul.f32 %v9440_v53, %v4458_v29  ;;  %vm4912_vm5 = vweird.f32 %v9442_v57  ;;  %v5817_v13 = vand.u32 2147483648, %v14792_v34  ;;  %vm4463_vm2 = vmor %vm4461_vm9, %vm4462_vm15 }
 0x404   : >> { %v5799_v11 = vsel %vm5798_vm14, %v9436_v22, %v5795_v8  ;;  %9447 = vrcp.f32 %v14810_v0  ;;  %v9444_v3 = vpop.eup %9443  ;;  %vm5361_vm1 = vweird.f32 %v14789_v49  ;;  %v5368_v5 = vor.u32 1.1754944e-38, %v5367_v54  ;;  %vm4913_vm0 = vmor %vm4911_vm10, %vm4912_vm5  ;;  %v18809_v54 = vld [vmem:[#allocation118_spill] sm:$0xff]  ;;  %v3793_v8 = vpop.f32.mrf.mxu2 }
 0x405   : >> { %v4909_v31 = vmul.f32 %v9442_v57, %v4908_v23  ;;  %v5804_v52 = vsel %vm14780_vm7, %v5803_v63, %v5799_v11  ;;  %v4460_v32 = vadd.f32 %v9440_v53, %v4459_v14  ;;  %v5357_v19 = vmul.f32 %v9444_v3, %v14789_v49  ;;  %v18805_v63 = vld [vmem:[#allocation30_spill] sm:$0xff] }
 0x406   : >> { %v14825_v28 = vmul.f32 %v5804_v52, %v14687_v38   ;;  %vm14830_vm3 = vcmp.eq.f32.partialorder %v5365_v21, 8.507059e+37  ;;  %v5815_v46 = vand.u32 2147483647, %v14792_v34  ;;  %vm5362_vm4 = vweird.f32 %v9444_v3  ;;  %v3868_v21 = vpop.f32.mrf.mxu3  ;;  %v3646_v14 = vpop.f32.mrf.mxu0 }
 0x407   : >> { %v4910_v44 = vadd.f32 %v9442_v57, %v4909_v31  ;;  %v4464_v41 = vsel %vm4463_vm2, %v9440_v53, %v4460_v32  ;;  %vm5811_vm6 = vweird.f32 %v14792_v34  ;;  %v5818_v38 = vor.u32 1.1754944e-38, %v5817_v13  ;;  %vm5363_vm10 = vmor %vm5361_vm1, %vm5362_vm4  ;;  %v18812_v31 = vld [vmem:[#allocation102_spill] sm:$0xff] }
 0x408   : >> { %18799 = vst [vmem:[#allocation64_spill] sm:$0xff] %v14825_v28  ;;  %vm4476_vm7 = vweird.f32 %v14810_v0  ;;  %v9446_v16 = vpop.eup %9445  ;;  %v4469_v61 = vsel %vm14797_vm12, %v4468_v48, %v4464_v41  ;;  %v5358_v17 = vsub.f32 1.0, %v5357_v19  ;;  %9449 = vpow2.f32 %v7794_v24  ;;  %v18806_v48 = vld [vmem:[#allocation75_spill] sm:$0xff]  ;;  %v18810_v24 = vld [vmem:[#allocation117_spill] sm:$0xff] }
 0x409   : >> { %v4914_v7 = vsel %vm4913_vm0, %v9442_v57, %v4910_v44  ;;  %v14843_v13 = vmul.f32 %v4469_v61, %v14696_v55   ;;  %v5807_v40 = vmul.f32 %v9446_v16, %v14792_v34  ;;  %v4480_v60 = vand.u32 2147483647, %v14810_v0  ;;  %v18807_v57 = vld [vmem:[#allocation78_spill] sm:$0xff] }
 0x40a   : >> { %v4919_v1 = vsel %vm14806_vm13, %v4918_v25, %v4914_v7  ;;  %v9448_v22 = vpop.eup %9447  ;;  %v5359_v36 = vmul.f32 %v9444_v3, %v5358_v17  ;;  %vm5812_vm8 = vweird.f32 %v9446_v16  ;;  %v4482_v37 = vand.u32 2147483648, %v14810_v0 }
 0x40b   : >> { %18802 = vst [vmem:[#allocation61_spill] sm:$0xff] %v14843_v13  ;;  %v14850_v25 = vmul.f32 %v4919_v1, %v14699_v42   ;;  %v5808_v55 = vsub.f32 1.0, %v5807_v40  ;;  %v4472_v47 = vmul.f32 %v9448_v22, %v14810_v0  ;;  %vm4477_vm9 = vweird.f32 %v9448_v22  ;;  %vm5813_vm11 = vmor %vm5811_vm6, %vm5812_vm8  ;;  %v18813_v13 = vld [vmem:[#allocation101_spill] sm:$0xff]  ;;  %v3721_v0 = vpop.f32.mrf.mxu1 }
 0x40c   : >> { %v5360_v58 = vadd.f32 %v9444_v3, %v5359_v36  ;;  %v3500_v10 = vpack.c.bf16 %v18805_v63, %v18804_v59  ;;  %v3515_v62 = vpack.c.bf16 %v18807_v57, %v18806_v48  ;;  %vm5816_vm12 = vcmp.eq.f32.partialorder %v5815_v46, 8.507059e+37  ;;  %vm4478_vm13 = vmor %vm4476_vm7, %vm4477_vm9 }
 0x40d   : >> { %18803 = vst [vmem:[#allocation58_spill] sm:$0xff] %v14850_v25  ;;  %v5809_v53 = vmul.f32 %v9446_v16, %v5808_v55  ;;  %v4473_v42 = vsub.f32 1.0, %v4472_v47  ;;  %vm4481_vm14 = vcmp.eq.f32.partialorder %v4480_v60, 8.507059e+37  ;;  %v4483_v25 = vor.u32 1.1754944e-38, %v4482_v37  ;;  %v18817_v37 = vld [vmem:[#allocation81_spill] sm:$0xff] }
 0x40e   : >> { %v9450_v43 = vpop.eup %9449  ;;  %v5364_v27 = vsel %vm5363_vm10, %v9444_v3, %v5360_v58  ;;  %3680 = vmatmul.bf16.gmra.mxu0 %v3500_v10  ;;  %3755 = vmatmul.bf16.gmra.mxu1 %v3515_v62  ;;  %v3545_v3 = vpack.c.bf16 %v18813_v13, %v18812_v31  ;;  %v14883_v32 = vadd.f32 %v14485_v20, %v3791_v39 }
 0x40f   : >> { %v5369_v9 = vsel %vm14830_vm3, %v5368_v5, %v5364_v27  ;;  %v5810_v26 = vadd.f32 %v9446_v16, %v5809_v53  ;;  %v4474_v15 = vmul.f32 %v9448_v22, %v4473_v42  ;;  %v4325_v56 = vadd.f32 1.0, %v9450_v43  ;;  %v18819_v42 = vld [vmem:[#allocation116_spill] sm:$0xff]  ;;  %v18820_v43 = vld [vmem:[#allocation115_spill] sm:$0xff] }
 0x410   : >> { %v14864_v7 = vmul.f32 %v5369_v9, %v14707_v33   ;;  %v3530_v33 = vpack.c.bf16 %v18810_v24, %v18809_v54  ;;  %v14886_v5 = vadd.f32 %v14485_v20, %v3866_v45  ;;  %3905 = vmatmul.bf16.gmra.mxu3 %v3545_v3  ;;  %v14892_v28 = vadd.f32 %v14485_v20, %v3718_v30  ;;  %v18818_v30 = vld [vmem:[#allocation84_spill] sm:$0xff] }
 0x411   : >> { %v5814_v49 = vsel %vm5813_vm11, %v9446_v16, %v5810_v26  ;;  %v4475_v2 = vadd.f32 %v9448_v22, %v4474_v15  ;;  %9451 = vrcp.f32 %v4325_v56  ;;  %vm4926_vm15 = vweird.f32 %v4325_v56 }
 0x412   : >> { %18808 = vst [vmem:[#allocation55_spill] sm:$0xff] %v14864_v7  ;;  %v5819_v29 = vsel %vm5816_vm12, %v5818_v38, %v5814_v49  ;;  %3830 = vmatmul.bf16.gmra.mxu2 %v3530_v33  ;;  %v14895_v44 = vadd.f32 %v14485_v20, %v3793_v8  ;;  %v14898_v19 = vadd.f32 %v14485_v20, %v3868_v21  ;;  %v7824_v46 = vmul.f32 -1.442695, %v14883_v32 }
 0x413   : >> { %v14875_v23 = vmul.f32 %v5819_v29, %v14718_v18   ;;  %v4479_v34 = vsel %vm4478_vm13, %v9448_v22, %v4475_v2  ;;  %v14889_v18 = vadd.f32 %v14485_v20, %v3643_v35  ;;  %v7854_v41 = vmul.f32 -1.442695, %v14886_v5  ;;  %v18815_v35 = vld [vmem:[#allocation33_spill] sm:$0xff]  ;;  %v18816_v22 = vld [vmem:[#allocation36_spill] sm:$0xff] }
 0x414   : >> { %v4484_v11 = vsel %vm4481_vm14, %v4483_v25, %v4479_v34  ;;  %v14907_v16 = vadd.f32 %v14485_v20, %v3721_v0  ;;  %v4930_v7 = vand.u32 2147483647, %v4325_v56  ;;  %v4932_v17 = vand.u32 2147483648, %v4325_v56 }
 0x415   : >> { %18811 = vst [vmem:[#allocation52_spill] sm:$0xff] %v14875_v23  ;;  %v14880_v52 = vmul.f32 %v4484_v11, %v14734_v50   ;;  %v14901_v50 = vadd.f32 %v14485_v20, %v3646_v14  ;;  %v7765_v38 = vmul.f32 -1.442695, %v14889_v18  ;;  %v7795_v39 = vmul.f32 -1.442695, %v14892_v28 }
 0x416   : >> { %9453 = vpow2.f32 %v7824_v46  ;;  %v7825_v1 = vmul.f32 -1.442695, %v14895_v44  ;;  %v7855_v40 = vmul.f32 -1.442695, %v14898_v19  ;;  %v3501_v20 = vpack.c.bf16 %v18816_v22, %v18815_v35 }
 0x417   : >> { %18814 = vst [vmem:[#allocation49_spill] sm:$0xff] %v14880_v52  ;;  %v9452_v4 = vpop.eup %9451  ;;  %9455 = vpow2.f32 %v7854_v41  ;;  %v3516_v55 = vpack.c.bf16 %v18818_v30, %v18817_v37  ;;  %vm4931_vm2 = vcmp.eq.f32.partialorder %v4930_v7, 8.507059e+37  ;;  %v4933_v58 = vor.u32 1.1754944e-38, %v4932_v17 }
 0x418   : >> { %v4922_v61 = vmul.f32 %v9452_v4, %v4325_v56  ;;  %vm4927_vm5 = vweird.f32 %v9452_v4  ;;  %9457 = vpow2.f32 %v7765_v38  ;;  %v7766_v53 = vmul.f32 -1.442695, %v14901_v50 }
 0x419   : >> { %9459 = vpow2.f32 %v7795_v39  ;;  %vm4928_vm1 = vmor %vm4926_vm15, %vm4927_vm5  ;;  %v3531_v27 = vpack.c.bf16 %v18820_v43, %v18819_v42  ;;  %v7796_v9 = vmul.f32 -1.442695, %v14907_v16 }
 0x41a   : >> { %v4923_v60 = vsub.f32 1.0, %v4922_v61  ;;  %9461 = vpow2.f32 %v7825_v1 }
 0x41b   : >> { %9463 = vpow2.f32 %v7855_v40 }
 0x41c   : >> { %v4924_v45 = vmul.f32 %v9452_v4, %v4923_v60  ;;  %v9454_v47 = vpop.eup %9453 }
 0x41d   : >> { %v9456_v59 = vpop.eup %9455  ;;  %v14918_v10 = vadd.f32 1.0, %v9454_v47 }
 0x41e   : >> { %v4925_v36 = vadd.f32 %v9452_v4, %v4924_v45  ;;  %3685 = vmatmul.bf16.gmra.mxu0 %v3501_v20  ;;  %3760 = vmatmul.bf16.gmra.mxu1 %v3516_v55  ;;  %v9458_v48 = vpop.eup %9457  ;;  %v14923_v62 = vadd.f32 1.0, %v9456_v59 }
 0x41f   : >> { %v9460_v26 = vpop.eup %9459  ;;  %9465 = vrcp.f32 %v14918_v10  ;;  %v14931_v49 = vadd.f32 1.0, %v9458_v48  ;;  %v5380_v29 = vand.u32 2147483647, %v14918_v10  ;;  %v5382_v25 = vand.u32 2147483648, %v14918_v10 }
 0x420   : >> { %v4929_v63 = vsel %vm4928_vm1, %v9452_v4, %v4925_v36  ;;  %v9462_v15 = vpop.eup %9461  ;;  %9467 = vrcp.f32 %v14923_v62  ;;  %v14933_v2 = vadd.f32 1.0, %v9460_v26  ;;  %v5832_v24 = vand.u32 2147483648, %v14923_v62 }
 0x421   : >> { %v4934_v57 = vsel %vm4931_vm2, %v4933_v58, %v4929_v63  ;;  %v9464_v56 = vpop.eup %9463  ;;  %9469 = vpow2.f32 %v7766_v53  ;;  %v14937_v54 = vadd.f32 1.0, %v9462_v15  ;;  %vm5376_vm3 = vweird.f32 %v14918_v10  ;;  %v3871_v15 = vpop.f32.mrf.mxu3 }
 0x422   : >> { %v14927_v23 = vmul.f32 %v4934_v57, %v14752_v6   ;;  %3835 = vmatmul.bf16.gmra.mxu2 %v3531_v27  ;;  %9471 = vpow2.f32 %v7796_v9  ;;  %v5830_v6 = vand.u32 2147483647, %v14923_v62  ;;  %v14943_v33 = vadd.f32 1.0, %v9464_v56 }
 0x423   : >> { %9473 = vrcp.f32 %v14931_v49  ;;  %vm5826_vm0 = vweird.f32 %v14923_v62  ;;  %vm14952_vm4 = vcmp.eq.f32.partialorder %v5380_v29, 8.507059e+37  ;;  %v5383_v11 = vor.u32 1.1754944e-38, %v5382_v25 }
 0x424   : >> { %18821 = vst [vmem:[#allocation46_spill] sm:$0xff] %v14927_v23  ;;  %9475 = vrcp.f32 %v14933_v2  ;;  %v4497_v23 = vand.u32 2147483648, %v14931_v49  ;;  %v4495_v31 = vand.u32 2147483647, %v14931_v49  ;;  %v4947_v13 = vand.u32 2147483648, %v14933_v2 }
 0x425   : >> { %v9466_v8 = vpop.eup %9465  ;;  %9477 = vrcp.f32 %v14937_v54  ;;  %vm14960_vm6 = vcmp.eq.f32.partialorder %v5830_v6, 8.507059e+37  ;;  %v5833_v4 = vor.u32 1.1754944e-38, %v5832_v24  ;;  %v4945_v46 = vand.u32 2147483647, %v14933_v2  ;;  %v3648_v24 = vpop.f32.mrf.mxu0 }
 0x426   : >> { %v14949_v34 = vpop.eup %9467  ;;  %v5372_v21 = vmul.f32 %v9466_v8, %v14918_v10  ;;  %vm4491_vm7 = vweird.f32 %v14931_v49  ;;  %v5395_v61 = vand.u32 2147483647, %v14937_v54  ;;  %9479 = vrcp.f32 %v14943_v33  ;;  %v3796_v10 = vpop.f32.mrf.mxu2 }
 0x427   : >> { %v9470_v3 = vpop.eup %9469  ;;  %v5822_v0 = vmul.f32 %v14949_v34, %v14923_v62  ;;  %vm5377_vm8 = vweird.f32 %v9466_v8  ;;  %vm5827_vm9 = vweird.f32 %v14949_v34  ;;  %v4498_v39 = vor.u32 1.1754944e-38, %v4497_v23 }
 0x428   : >> { %v9472_v41 = vpop.eup %9471  ;;  %v5373_v38 = vsub.f32 1.0, %v5372_v21  ;;  %vm14971_vm11 = vcmp.eq.f32.partialorder %v4495_v31, 8.507059e+37  ;;  %v4948_v35 = vor.u32 1.1754944e-38, %v4947_v13  ;;  %v5397_v22 = vand.u32 2147483648, %v14937_v54  ;;  %vm5378_vm5 = vmor %vm5376_vm3, %vm5377_vm8 }
 0x429   : >> { %v9474_v7 = vpop.eup %9473  ;;  %v5823_v17 = vsub.f32 1.0, %v5822_v0  ;;  %vm14979_vm13 = vcmp.eq.f32.partialorder %v4945_v46, 8.507059e+37  ;;  %v5845_v55 = vand.u32 2147483647, %v14943_v33  ;;  %v5847_v47 = vand.u32 2147483648, %v14943_v33  ;;  %vm5828_vm10 = vmor %vm5826_vm0, %vm5827_vm9  ;;  %v3873_v45 = vpop.f32.mrf.mxu3 }
 0x42a   : >> { %v9476_v1 = vpop.eup %9475  ;;  %v5374_v40 = vmul.f32 %v9466_v8, %v5373_v38  ;;  %v4487_v60 = vmul.f32 %v9474_v7, %v14931_v49  ;;  %vm4492_vm14 = vweird.f32 %v9474_v7  ;;  %vm14986_vm15 = vcmp.eq.f32.partialorder %v5395_v61, 8.507059e+37 }
 0x42b   : >> { %v9478_v20 = vpop.eup %9477  ;;  %v5824_v36 = vmul.f32 %v14949_v34, %v5823_v17  ;;  %v4937_v37 = vmul.f32 %v9476_v1, %v14933_v2  ;;  %vm4942_vm1 = vweird.f32 %v9476_v1  ;;  %vm5841_vm12 = vweird.f32 %v14943_v33  ;;  %vm4493_vm3 = vmor %vm4491_vm7, %vm4492_vm14  ;;  %v18839_v17 = vld [vmem:[#allocation100_spill] sm:$0xff] }
 0x42c   : >> { %v5375_v58 = vadd.f32 %v9466_v8, %v5374_v40  ;;  %v4488_v59 = vsub.f32 1.0, %v4487_v60  ;;  %v5387_v63 = vmul.f32 %v9478_v20, %v14937_v54  ;;  %vm5392_vm2 = vweird.f32 %v9478_v20  ;;  %v9480_v27 = vpop.eup %9479  ;;  %v15049_v40 = vld [vmem:[%s14409_s6] ss:$0 sm:$0xff] }
 0x42d   : >> { %v5825_v42 = vadd.f32 %v14949_v34, %v5824_v36  ;;  %v4938_v43 = vsub.f32 1.0, %v4937_v37  ;;  %v14999_v26 = vadd.f32 1.0, %v9470_v3  ;;  %v5837_v6 = vmul.f32 %v9480_v27, %v14943_v33  ;;  %v3651_v36 = vpop.f32.mrf.mxu0 }
 0x42e   : >> { %v5379_v48 = vsel %vm5378_vm5, %v9466_v8, %v5375_v58  ;;  %v4489_v57 = vmul.f32 %v9474_v7, %v4488_v59  ;;  %v5388_v9 = vsub.f32 1.0, %v5387_v63  ;;  %v3723_v8 = vpop.f32.mrf.mxu1  ;;  %v5398_v14 = vor.u32 1.1754944e-38, %v5397_v22  ;;  %v3798_v60 = vpop.f32.mrf.mxu2 }
 0x42f   : >> { %v5384_v56 = vsel %vm14952_vm4, %v5383_v11, %v5379_v48  ;;  %v5829_v29 = vsel %vm5828_vm10, %v14949_v34, %v5825_v42  ;;  %v4939_v25 = vmul.f32 %v9476_v1, %v4938_v43  ;;  %v5838_v11 = vsub.f32 1.0, %v5837_v6 }
 0x430   : >> { %v15006_v23 = vmul.f32 %v5384_v56, %v14883_v32   ;;  %v5834_v62 = vsel %vm14960_vm6, %v5833_v4, %v5829_v29  ;;  %v4490_v21 = vadd.f32 %v9474_v7, %v4489_v57  ;;  %v5389_v31 = vmul.f32 %v9478_v20, %v5388_v9 }
 0x431   : >> { %v15011_v13 = vmul.f32 %v5834_v62, %v14886_v5   ;;  %v4940_v34 = vadd.f32 %v9476_v1, %v4939_v25  ;;  %vm18834_vm0 = vweird.f32 %v14933_v2  ;;  %9481 = vrcp.f32 %v14999_v26 }
 0x432   : >> { %18832 = vst [vmem:[#allocation43_spill] sm:$0xff] %v15006_v23  ;;  %v4494_v3 = vsel %vm4493_vm3, %v9474_v7, %v4490_v21  ;;  %vm4943_vm4 = vmor %vm18834_vm0, %vm4942_vm1  ;;  %v5390_v32 = vadd.f32 %v9478_v20, %v5389_v31  ;;  %v15020_v0 = vadd.f32 1.0, %v9472_v41  ;;  %vm18835_vm6 = vweird.f32 %v14937_v54 }
 0x433   : >> { %18833 = vst [vmem:[#allocation40_spill] sm:$0xff] %v15011_v13  ;;  %v4499_v5 = vsel %vm14971_vm11, %v4498_v39, %v4494_v3  ;;  %v4944_v52 = vsel %vm4943_vm4, %v9476_v1, %v4940_v34  ;;  %vm5393_vm7 = vmor %vm18835_vm6, %vm5392_vm2  ;;  %v5839_v49 = vmul.f32 %v9480_v27, %v5838_v11  ;;  %vm5842_vm8 = vweird.f32 %v9480_v27  ;;  %v18840_v39 = vld [vmem:[#allocation99_spill] sm:$0xff]  ;;  %v18845_v3 = vld [vmem:[#allocation39_spill] sm:$0xff] }
 0x434   : >> { %v15028_v54 = vmul.f32 %v4499_v5, %v14889_v18   ;;  %v4949_v2 = vsel %vm14979_vm13, %v4948_v35, %v4944_v52  ;;  %v5394_v4 = vsel %vm5393_vm7, %v9478_v20, %v5390_v32  ;;  %v4510_v46 = vand.u32 2147483647, %v14999_v26  ;;  %vm5843_vm9 = vmor %vm5841_vm12, %vm5842_vm8  ;;  %v18846_v32 = vld [vmem:[#allocation42_spill] sm:$0xff] }
 0x435   : >> { %v15034_v62 = vmul.f32 %v4949_v2, %v14892_v28   ;;  %v5399_v41 = vsel %vm14986_vm15, %v5398_v14, %v5394_v4  ;;  %v5840_v38 = vadd.f32 %v9480_v27, %v5839_v49  ;;  %v4512_v61 = vand.u32 2147483648, %v14999_v26 }
 0x436   : >> { %18836 = vst [vmem:[#allocation37_spill] sm:$0xff] %v15028_v54  ;;  %v15040_v57 = vmul.f32 %v5399_v41, %v14895_v44   ;;  %v5848_v18 = vor.u32 1.1754944e-38, %v5847_v47  ;;  %9483 = vrcp.f32 %v15020_v0  ;;  %vm5846_vm10 = vcmp.eq.f32.partialorder %v5845_v55, 8.507059e+37  ;;  %v3726_v37 = vpop.f32.mrf.mxu1 }
 0x437   : >> { %18837 = vst [vmem:[#allocation34_spill] sm:$0xff] %v15034_v62  ;;  %v5844_v54 = vsel %vm5843_vm9, %v9480_v27, %v5840_v38  ;;  %vm4506_vm11 = vweird.f32 %v14999_v26  ;;  %v9482_v28 = vpop.eup %9481  ;;  %v3546_v1 = vpack.c.bf16 %v18840_v39, %v18839_v17  ;;  %v15052_v44 = vadd.f32 %v15049_v40, %v3796_v10 }
 0x438   : >> { %18838 = vst [vmem:[#allocation31_spill] sm:$0xff] %v15040_v57  ;;  %v5849_v7 = vsel %vm5846_vm10, %v5848_v18, %v5844_v54  ;;  %v15055_v33 = vadd.f32 %v15049_v40, %v3871_v15  ;;  %v4502_v35 = vmul.f32 %v9482_v28, %v14999_v26  ;;  %vm15061_vm12 = vcmp.eq.f32.partialorder %v4510_v46, 8.507059e+37 }
 0x439   : >> { %v15058_v11 = vmul.f32 %v5849_v7, %v14898_v19   ;;  %v4513_v20 = vor.u32 1.1754944e-38, %v4512_v61  ;;  %v4960_v30 = vand.u32 2147483647, %v15020_v0  ;;  %3910 = vmatmul.bf16.gmra.mxu3 %v3546_v1  ;;  %v7826_v55 = vmul.f32 -1.442695, %v15052_v44 }
 0x43a   : >> { %v7856_v47 = vmul.f32 -1.442695, %v15055_v33  ;;  %v15069_v58 = vadd.f32 %v15049_v40, %v3648_v24  ;;  %v4503_v19 = vsub.f32 1.0, %v4502_v35  ;;  %v15072_v59 = vadd.f32 %v15049_v40, %v3723_v8 }
 0x43b   : >> { %18841 = vst [vmem:[#allocation28_spill] sm:$0xff] %v15058_v11  ;;  %v15075_v63 = vadd.f32 %v15049_v40, %v3798_v60  ;;  %v15078_v53 = vadd.f32 %v15049_v40, %v3873_v45  ;;  %9485 = vpow2.f32 %v7826_v55  ;;  %v15082_v27 = vadd.f32 %v15049_v40, %v3651_v36 }
 0x43c   : >> { %v9484_v42 = vpop.eup %9483  ;;  %v7767_v43 = vmul.f32 -1.442695, %v15069_v58  ;;  %v15085_v48 = vadd.f32 %v15049_v40, %v3726_v37  ;;  %v4504_v57 = vmul.f32 %v9482_v28, %v4503_v19  ;;  %vm4507_vm13 = vweird.f32 %v9482_v28 }
 0x43d   : >> { %v4952_v9 = vmul.f32 %v9484_v42, %v15020_v0  ;;  %9487 = vpow2.f32 %v7856_v47  ;;  %vm4956_vm14 = vweird.f32 %v15020_v0  ;;  %v7797_v10 = vmul.f32 -1.442695, %v15072_v59  ;;  %vm4508_vm15 = vmor %vm4506_vm11, %vm4507_vm13 }
 0x43e   : >> { %v7827_v15 = vmul.f32 -1.442695, %v15075_v63  ;;  %v7857_v56 = vmul.f32 -1.442695, %v15078_v53  ;;  %v4505_v29 = vadd.f32 %v9482_v28, %v4504_v57  ;;  %v4962_v6 = vand.u32 2147483648, %v15020_v0 }
 0x43f   : >> { %v4953_v25 = vsub.f32 1.0, %v4952_v9  ;;  %9489 = vpow2.f32 %v7767_v43  ;;  %vm4957_vm5 = vweird.f32 %v9484_v42  ;;  %v7768_v26 = vmul.f32 -1.442695, %v15082_v27 }
 0x440   : >> { %9491 = vpow2.f32 %v7797_v10  ;;  %v4509_v24 = vsel %vm4508_vm15, %v9482_v28, %v4505_v29  ;;  %vm4958_vm1 = vmor %vm4956_vm14, %vm4957_vm5  ;;  %v4963_v14 = vor.u32 1.1754944e-38, %v4962_v6  ;;  %v3502_v5 = vpack.c.bf16 %v18846_v32, %v18845_v3 }
 0x441   : >> { %v4954_v8 = vmul.f32 %v9484_v42, %v4953_v25  ;;  %9493 = vpow2.f32 %v7827_v15  ;;  %v9486_v23 = vpop.eup %9485  ;;  %v4514_v62 = vsel %vm15061_vm12, %v4513_v20, %v4509_v24  ;;  %vm4961_vm2 = vcmp.eq.f32.partialorder %v4960_v30, 8.507059e+37 }
 0x442   : >> { %9495 = vpow2.f32 %v7857_v56  ;;  %v15098_v56 = vmul.f32 %v4514_v62, %v14901_v50   ;;  %v15100_v34 = vadd.f32 1.0, %v9486_v23  ;;  %v7798_v50 = vmul.f32 -1.442695, %v15085_v48  ;;  %3690 = vmatmul.bf16.gmra.mxu0 %v3502_v5 }
 0x443   : >> { %v9488_v21 = vpop.eup %9487  ;;  %v4955_v13 = vadd.f32 %v9484_v42, %v4954_v8 }
 0x444   : >> { %18844 = vst [vmem:[#allocation25_spill] sm:$0xff] %v15098_v56  ;;  %v15105_v11 = vadd.f32 1.0, %v9488_v21  ;;  %9497 = vrcp.f32 %v15100_v34  ;;  %v5410_v41 = vand.u32 2147483647, %v15100_v34  ;;  %v5412_v38 = vand.u32 2147483648, %v15100_v34 }
 0x445   : >> { %v9490_v52 = vpop.eup %9489  ;;  %v4959_v49 = vsel %vm4958_vm1, %v9484_v42, %v4955_v13  ;;  %vm5406_vm3 = vweird.f32 %v15100_v34 }
 0x446   : >> { %v9492_v2 = vpop.eup %9491  ;;  %v4964_v4 = vsel %vm4961_vm2, %v4963_v14, %v4959_v49  ;;  %9499 = vrcp.f32 %v15105_v11  ;;  %v15117_v61 = vadd.f32 1.0, %v9490_v52  ;;  %v5860_v54 = vand.u32 2147483647, %v15105_v11 }
 0x447   : >> { %v9494_v0 = vpop.eup %9493  ;;  %v15113_v36 = vmul.f32 %v4964_v4, %v14907_v16   ;;  %9501 = vpow2.f32 %v7768_v26  ;;  %v15119_v18 = vadd.f32 1.0, %v9492_v2  ;;  %v5862_v28 = vand.u32 2147483648, %v15105_v11  ;;  %v18856_v2 = vld [vmem:[#allocation87_spill] sm:$0xff]  ;;  %v18857_v4 = vld [vmem:[#allocation90_spill] sm:$0xff] }
 0x448   : >> { %v9496_v46 = vpop.eup %9495  ;;  %9503 = vpow2.f32 %v7798_v50  ;;  %v15124_v7 = vadd.f32 1.0, %v9494_v0  ;;  %vm5856_vm0 = vweird.f32 %v15105_v11  ;;  %vm15132_vm4 = vcmp.eq.f32.partialorder %v5410_v41, 8.507059e+37 }
 0x449   : >> { %18847 = vst [vmem:[#allocation22_spill] sm:$0xff] %v15113_v36  ;;  %9505 = vrcp.f32 %v15117_v61  ;;  %v15129_v17 = vadd.f32 1.0, %v9496_v46  ;;  %v5413_v45 = vor.u32 1.1754944e-38, %v5412_v38  ;;  %v4527_v35 = vand.u32 2147483648, %v15117_v61 }
 0x44a   : >> { %v9498_v16 = vpop.eup %9497  ;;  %9507 = vrcp.f32 %v15119_v18  ;;  %v4977_v22 = vand.u32 2147483648, %v15119_v18  ;;  %vm15139_vm6 = vcmp.eq.f32.partialorder %v5860_v54, 8.507059e+37  ;;  %v5863_v30 = vor.u32 1.1754944e-38, %v5862_v28 }
 0x44b   : >> { %v5402_v1 = vmul.f32 %v9498_v16, %v15100_v34  ;;  %v4525_v55 = vand.u32 2147483647, %v15117_v61  ;;  %v4975_v19 = vand.u32 2147483647, %v15119_v18  ;;  %9509 = vrcp.f32 %v15124_v7 }
 0x44c   : >> { %v9500_v39 = vpop.eup %9499  ;;  %vm5407_vm7 = vweird.f32 %v9498_v16  ;;  %vm4521_vm8 = vweird.f32 %v15117_v61  ;;  %v5427_v57 = vand.u32 2147483648, %v15124_v7  ;;  %9511 = vrcp.f32 %v15129_v17 }
 0x44d   : >> { %v9502_v20 = vpop.eup %9501  ;;  %v5852_v36 = vmul.f32 %v9500_v39, %v15105_v11  ;;  %v5403_v47 = vsub.f32 1.0, %v5402_v1  ;;  %vm5857_vm9 = vweird.f32 %v9500_v39  ;;  %v4528_v15 = vor.u32 1.1754944e-38, %v4527_v35  ;;  %vm5408_vm14 = vmor %vm5406_vm3, %vm5407_vm7 }
 0x44e   : >> { %v9504_v42 = vpop.eup %9503  ;;  %vm4971_vm10 = vweird.f32 %v15119_v18  ;;  %v4978_v56 = vor.u32 1.1754944e-38, %v4977_v22  ;;  %vm15151_vm11 = vcmp.eq.f32.partialorder %v4525_v55, 8.507059e+37  ;;  %v5425_v8 = vand.u32 2147483647, %v15124_v7  ;;  %vm5858_vm1 = vmor %vm5856_vm0, %vm5857_vm9  ;;  %v3876_v55 = vpop.f32.mrf.mxu3 }
 0x44f   : >> { %v5853_v43 = vsub.f32 1.0, %v5852_v36  ;;  %v9506_v9 = vpop.eup %9505  ;;  %v5404_v10 = vmul.f32 %v9498_v16, %v5403_v47  ;;  %v5875_v23 = vand.u32 2147483647, %v15129_v17  ;;  %vm15158_vm13 = vcmp.eq.f32.partialorder %v4975_v19, 8.507059e+37 }
 0x450   : >> { %v9508_v29 = vpop.eup %9507  ;;  %v4517_v6 = vmul.f32 %v9506_v9, %v15117_v61  ;;  %vm4522_vm12 = vweird.f32 %v9506_v9  ;;  %v5877_v26 = vand.u32 2147483648, %v15129_v17  ;;  %vm5421_vm5 = vweird.f32 %v15124_v7 }
 0x451   : >> { %v5854_v25 = vmul.f32 %v9500_v39, %v5853_v43  ;;  %v5405_v62 = vadd.f32 %v9498_v16, %v5404_v10  ;;  %v4967_v21 = vmul.f32 %v9508_v29, %v15119_v18  ;;  %vm4972_vm15 = vweird.f32 %v9508_v29  ;;  %v9510_v5 = vpop.eup %9509 }
 0x452   : >> { %v4518_v3 = vsub.f32 1.0, %v4517_v6  ;;  %v5428_v32 = vor.u32 1.1754944e-38, %v5427_v57  ;;  %v15170_v50 = vadd.f32 1.0, %v9502_v20  ;;  %v3517_v0 = vpack.c.bf16 %v18857_v4, %v18856_v2  ;;  %v9512_v34 = vpop.eup %9511  ;;  %v3801_v20 = vpop.f32.mrf.mxu2  ;;  %vm4973_vm9 = vmor %vm4971_vm10, %vm4972_vm15  ;;  %v18872_v2 = vld [vmem:[#allocation114_spill] sm:$0xff]  ;;  %v18873_v4 = vld [vmem:[#allocation113_spill] sm:$0xff] }
 0x453   : >> { %v5855_v14 = vadd.f32 %v9500_v39, %v5854_v25  ;;  %v5409_v52 = vsel %vm5408_vm14, %v9498_v16, %v5405_v62  ;;  %v4968_v49 = vsub.f32 1.0, %v4967_v21  ;;  %v5417_v54 = vmul.f32 %v9510_v5, %v15124_v7 }
 0x454   : >> { %v5414_v46 = vsel %vm15132_vm4, %v5413_v45, %v5409_v52  ;;  %v4519_v38 = vmul.f32 %v9506_v9, %v4518_v3  ;;  %vm15177_vm2 = vcmp.eq.f32.partialorder %v5425_v8, 8.507059e+37  ;;  %vm5871_vm3 = vweird.f32 %v15129_v17  ;;  %3765 = vmatmul.bf16.gmra.mxu1 %v3517_v0  ;;  %vm4523_vm4 = vmor %vm4521_vm8, %vm4522_vm12 }
 0x455   : >> { %v5859_v41 = vsel %vm5858_vm1, %v9500_v39, %v5855_v14  ;;  %v15183_v11 = vmul.f32 %v5414_v46, %v15052_v44   ;;  %v4969_v1 = vmul.f32 %v9508_v29, %v4968_v49  ;;  %v15187_v35 = vadd.f32 1.0, %v9504_v42 }
 0x456   : >> { %v5864_v16 = vsel %vm15139_vm6, %v5863_v30, %v5859_v41  ;;  %v4520_v39 = vadd.f32 %v9506_v9, %v4519_v38  ;;  %v5418_v60 = vsub.f32 1.0, %v5417_v54  ;;  %v5867_v45 = vmul.f32 %v9512_v34, %v15129_v17 }
 0x457   : >> { %18860 = vst [vmem:[#allocation19_spill] sm:$0xff] %v15183_v11  ;;  %v15190_v6 = vmul.f32 %v5864_v16, %v15055_v33   ;;  %vm15193_vm0 = vcmp.eq.f32.partialorder %v5875_v23, 8.507059e+37  ;;  %v4970_v44 = vadd.f32 %v9508_v29, %v4969_v1  ;;  %vm5422_vm6 = vweird.f32 %v9510_v5 }
 0x458   : >> { %vm5872_vm7 = vweird.f32 %v9512_v34  ;;  %9513 = vrcp.f32 %v15170_v50  ;;  %v4524_v33 = vsel %vm4523_vm4, %v9506_v9, %v4520_v39  ;;  %v5419_v36 = vmul.f32 %v9510_v5, %v5418_v60  ;;  %v3653_v9 = vpop.f32.mrf.mxu0  ;;  %vm5423_vm8 = vmor %vm5421_vm5, %vm5422_vm6 }
 0x459   : >> { %18861 = vst [vmem:[#allocation15_spill] sm:$0xff] %v15190_v6  ;;  %v5868_v37 = vsub.f32 1.0, %v5867_v45  ;;  %v4540_v30 = vand.u32 2147483647, %v15170_v50  ;;  %v4529_v61 = vsel %vm15151_vm11, %v4528_v15, %v4524_v33  ;;  %v4974_v47 = vsel %vm4973_vm9, %v9508_v29, %v4970_v44  ;;  %v3728_v29 = vpop.f32.mrf.mxu1  ;;  %vm5873_vm11 = vmor %vm5871_vm3, %vm5872_vm7 }
 0x45a   : >> { %v4542_v19 = vand.u32 2147483648, %v15170_v50  ;;  %9515 = vrcp.f32 %v15187_v35  ;;  %v15210_v42 = vmul.f32 %v4529_v61, %v15069_v58   ;;  %v4979_v18 = vsel %vm15158_vm13, %v4978_v56, %v4974_v47 }
 0x45b   : >> { %v5420_v43 = vadd.f32 %v9510_v5, %v5419_v36  ;;  %v5869_v57 = vmul.f32 %v9512_v34, %v5868_v37  ;;  %v15215_v33 = vmul.f32 %v4979_v18, %v15072_v59   ;;  %v5878_v10 = vor.u32 1.1754944e-38, %v5877_v26 }
 0x45c   : >> { %18864 = vst [vmem:[#allocation11_spill] sm:$0xff] %v15210_v42  ;;  %vm4536_vm10 = vweird.f32 %v15170_v50  ;;  %v4543_v15 = vor.u32 1.1754944e-38, %v4542_v19  ;;  %v4990_v6 = vand.u32 2147483647, %v15187_v35  ;;  %v4992_v56 = vand.u32 2147483648, %v15187_v35 }
 0x45d   : >> { %18865 = vst [vmem:[#allocation7_spill] sm:$0xff] %v15215_v33  ;;  %v5424_v58 = vsel %vm5423_vm8, %v9510_v5, %v5420_v43  ;;  %v5870_v25 = vadd.f32 %v9512_v34, %v5869_v57  ;;  %vm4986_vm12 = vweird.f32 %v15187_v35  ;;  %vm15233_vm13 = vcmp.eq.f32.partialorder %v4540_v30, 8.507059e+37  ;;  %v3803_v5 = vpop.f32.mrf.mxu2  ;;  %v18878_v43 = vld [vmem:[#allocation45_spill] sm:$0xff]  ;;  %v18879_v57 = vld [vmem:[#allocation48_spill] sm:$0xff] }
 0x45e   : >> { %v9514_v24 = vpop.eup %9513  ;;  %v5429_v59 = vsel %vm15177_vm2, %v5428_v32, %v5424_v58  ;;  %v4993_v26 = vor.u32 1.1754944e-38, %v4992_v56  ;;  %vm15243_vm5 = vcmp.eq.f32.partialorder %v4990_v6, 8.507059e+37  ;;  %v15248_v32 = vadd.f32 %v15049_v40, %v3801_v20  ;;  %v18881_v6 = vld [vmem:[#allocation10_spill] sm:$0xff] }
 0x45f   : >> { %v15230_v7 = vmul.f32 %v5429_v59, %v15075_v63   ;;  %v5874_v8 = vsel %vm5873_vm11, %v9512_v34, %v5870_v25  ;;  %v4532_v23 = vmul.f32 %v9514_v24, %v15170_v50  ;;  %vm4537_vm14 = vweird.f32 %v9514_v24  ;;  %v3878_v34 = vpop.f32.mrf.mxu3  ;;  %v18880_v25 = vld [vmem:[#allocation6_spill] sm:$0xff] }
 0x460   : >> { %v9516_v21 = vpop.eup %9515  ;;  %v5879_v13 = vsel %vm15193_vm0, %v5878_v10, %v5874_v8  ;;  %v3532_v0 = vpack.c.bf16 %v18873_v4, %v18872_v2  ;;  %v7828_v41 = vmul.f32 -1.442695, %v15248_v32  ;;  %v15256_v38 = vadd.f32 %v15049_v40, %v3876_v55  ;;  %v3656_v39 = vpop.f32.mrf.mxu0  ;;  %vm4538_vm1 = vmor %vm4536_vm10, %vm4537_vm14 }
 0x461   : >> { %18866 = vst [vmem:[#allocation3_spill] sm:$0xff] %v15230_v7  ;;  %v15240_v3 = vmul.f32 %v5879_v13, %v15078_v53   ;;  %v4533_v17 = vsub.f32 1.0, %v4532_v23  ;;  %v4982_v63 = vmul.f32 %v9516_v21, %v15187_v35  ;;  %vm4987_vm15 = vweird.f32 %v9516_v21  ;;  %v18874_v53 = vld [vmem:[#allocation98_spill] sm:$0xff]  ;;  %v3731_v44 = vpop.f32.mrf.mxu1 }
 0x462   : >> { %v15259_v54 = vadd.f32 %v15049_v40, %v3653_v9  ;;  %3840 = vmatmul.bf16.gmra.mxu2 %v3532_v0  ;;  %v15262_v16 = vadd.f32 %v15049_v40, %v3728_v29  ;;  %v15265_v1 = vadd.f32 %v15049_v40, %v3803_v5  ;;  %9517 = vpow2.f32 %v7828_v41  ;;  %vm4988_vm2 = vmor %vm4986_vm12, %vm4987_vm15 }
 0x463   : >> { %18869 = vst [vmem:[#allocation125_spill] sm:$0xff] %v15240_v3  ;;  %v4534_v52 = vmul.f32 %v9514_v24, %v4533_v17  ;;  %v4983_v49 = vsub.f32 1.0, %v4982_v63  ;;  %v18875_v3 = vld [vmem:[#allocation97_spill] sm:$0xff]  ;;  %v7858_v60 = vmul.f32 -1.442695, %v15256_v38  ;;  %v15273_v22 = vadd.f32 %v15049_v40, %v3878_v34 }
 0x464   : >> { %v3547_v46 = vpack.c.bf16 %v18875_v3, %v18874_v53  ;;  %v7769_v45 = vmul.f32 -1.442695, %v15259_v54  ;;  %v7799_v36 = vmul.f32 -1.442695, %v15262_v16  ;;  %v7829_v37 = vmul.f32 -1.442695, %v15265_v1 }
 0x465   : >> { %v4535_v28 = vadd.f32 %v9514_v24, %v4534_v52  ;;  %v4984_v11 = vmul.f32 %v9516_v21, %v4983_v49  ;;  %9519 = vpow2.f32 %v7858_v60  ;;  %v7859_v30 = vmul.f32 -1.442695, %v15273_v22 }
 0x466   : >> { %3915 = vmatmul.bf16.gmra.mxu3 %v3547_v46  ;;  %v15284_v55 = vadd.f32 %v15049_v40, %v3656_v39  ;;  %9521 = vpow2.f32 %v7769_v45  ;;  %v15290_v47 = vadd.f32 %v15049_v40, %v3731_v44  ;;  %v3503_v9 = vpack.c.bf16 %v18879_v57, %v18878_v43  ;;  %v18913_v39 = vld [vmem:[#allocation18_spill] sm:$0xff] }
 0x467   : >> { %v4539_v20 = vsel %vm4538_vm1, %v9514_v24, %v4535_v28  ;;  %v4985_v33 = vadd.f32 %v9516_v21, %v4984_v11  ;;  %9523 = vpow2.f32 %v7799_v36  ;;  %v3518_v56 = vpack.c.bf16 %v18881_v6, %v18880_v25 }
 0x468   : >> { %v4544_v50 = vsel %vm15233_vm13, %v4543_v15, %v4539_v20  ;;  %9525 = vpow2.f32 %v7829_v37  ;;  %v7770_v35 = vmul.f32 -1.442695, %v15284_v55  ;;  %v9518_v42 = vpop.eup %9517  ;;  %v7800_v18 = vmul.f32 -1.442695, %v15290_v47  ;;  %3695 = vmatmul.bf16.gmra.mxu0 %v3503_v9 }
 0x469   : >> { %v15287_v58 = vmul.f32 %v4544_v50, %v15082_v27   ;;  %v4989_v61 = vsel %vm4988_vm2, %v9516_v21, %v4985_v33  ;;  %v15299_v27 = vadd.f32 1.0, %v9518_v42  ;;  %9527 = vpow2.f32 %v7859_v30  ;;  %3770 = vmatmul.bf16.gmra.mxu1 %v3518_v56 }
 0x46a   : >> { %v4994_v19 = vsel %vm15243_vm5, %v4993_v26, %v4989_v61 }
 0x46b   : >> { %18876 = vst [vmem:[#allocation126_spill] sm:$0xff] %v15287_v58  ;;  %v15295_v19 = vmul.f32 %v4994_v19, %v15085_v48   ;;  %v9520_v10 = vpop.eup %9519  ;;  %9529 = vrcp.f32 %v15299_v27  ;;  %v5442_v59 = vand.u32 2147483648, %v15299_v27  ;;  %v5440_v8 = vand.u32 2147483647, %v15299_v27 }
 0x46c   : >> { %v9522_v15 = vpop.eup %9521  ;;  %v15304_v48 = vadd.f32 1.0, %v9520_v10  ;;  %9531 = vpow2.f32 %v7770_v35  ;;  %vm5436_vm3 = vweird.f32 %v15299_v27 }
 0x46d   : >> { %18877 = vst [vmem:[#allocation127_spill] sm:$0xff] %v15295_v19  ;;  %v9524_v29 = vpop.eup %9523  ;;  %v15306_v58 = vadd.f32 1.0, %v9522_v15  ;;  %9533 = vpow2.f32 %v7800_v18  ;;  %v5443_v26 = vor.u32 1.1754944e-38, %v5442_v59  ;;  %vm15323_vm0 = vcmp.eq.f32.partialorder %v5440_v8, 8.507059e+37 }
 0x46e   : >> { %v9526_v24 = vpop.eup %9525  ;;  %v15311_v7 = vadd.f32 1.0, %v9524_v29  ;;  %9535 = vrcp.f32 %v15304_v48  ;;  %v5892_v62 = vand.u32 2147483648, %v15304_v48  ;;  %v5890_v17 = vand.u32 2147483647, %v15304_v48 }
 0x46f   : >> { %v9528_v23 = vpop.eup %9527  ;;  %9537 = vrcp.f32 %v15306_v58  ;;  %v4557_v21 = vand.u32 2147483648, %v15306_v58  ;;  %v4555_v63 = vand.u32 2147483647, %v15306_v58  ;;  %v15328_v2 = vadd.f32 1.0, %v9526_v24 }
 0x470   : >> { %9539 = vrcp.f32 %v15311_v7  ;;  %v5007_v49 = vand.u32 2147483648, %v15311_v7  ;;  %v15330_v4 = vadd.f32 1.0, %v9528_v23  ;;  %vm5886_vm4 = vweird.f32 %v15304_v48 }
 0x471   : >> { %v9530_v13 = vpop.eup %9529  ;;  %v5893_v34 = vor.u32 1.1754944e-38, %v5892_v62  ;;  %v5005_v53 = vand.u32 2147483647, %v15311_v7  ;;  %vm4551_vm7 = vweird.f32 %v15306_v58  ;;  %v4558_v41 = vor.u32 1.1754944e-38, %v4557_v21 }
 0x472   : >> { %v9532_v14 = vpop.eup %9531  ;;  %v5432_v5 = vmul.f32 %v9530_v13, %v15299_v27  ;;  %vm5437_vm6 = vweird.f32 %v9530_v13  ;;  %9541 = vrcp.f32 %v15328_v2  ;;  %vm15337_vm9 = vcmp.eq.f32.partialorder %v5890_v17, 8.507059e+37 }
 0x473   : >> { %v9534_v0 = vpop.eup %9533  ;;  %vm5001_vm8 = vweird.f32 %v15311_v7  ;;  %v5457_v60 = vand.u32 2147483648, %v15328_v2  ;;  %9543 = vrcp.f32 %v15330_v4  ;;  %v15344_v45 = vadd.f32 1.0, %v9532_v14  ;;  %vm5438_vm15 = vmor %vm5436_vm3, %vm5437_vm6  ;;  %v3806_v14 = vpop.f32.mrf.mxu2 }
 0x474   : >> { %v9536_v3 = vpop.eup %9535  ;;  %v5433_v46 = vsub.f32 1.0, %v5432_v5  ;;  %vm15347_vm10 = vcmp.eq.f32.partialorder %v4555_v63, 8.507059e+37  ;;  %v5008_v37 = vor.u32 1.1754944e-38, %v5007_v49  ;;  %v15351_v50 = vadd.f32 1.0, %v9534_v0  ;;  %v3881_v5 = vpop.f32.mrf.mxu3 }
 0x475   : >> { %v9538_v28 = vpop.eup %9537  ;;  %v5882_v11 = vmul.f32 %v9536_v3, %v15304_v48  ;;  %vm5887_vm11 = vweird.f32 %v9536_v3  ;;  %vm15354_vm12 = vcmp.eq.f32.partialorder %v5005_v53, 8.507059e+37  ;;  %v5455_v35 = vand.u32 2147483647, %v15328_v2 }
 0x476   : >> { %v9540_v44 = vpop.eup %9539  ;;  %v5434_v20 = vmul.f32 %v9530_v13, %v5433_v46  ;;  %v4547_v33 = vmul.f32 %v9538_v28, %v15306_v58  ;;  %vm4552_vm13 = vweird.f32 %v9538_v28  ;;  %vm5451_vm5 = vweird.f32 %v15328_v2  ;;  %vm5888_vm3 = vmor %vm5886_vm4, %vm5887_vm11 }
 0x477   : >> { %v5883_v30 = vsub.f32 1.0, %v5882_v11  ;;  %v4997_v61 = vmul.f32 %v9540_v44, %v15311_v7  ;;  %vm5002_vm14 = vweird.f32 %v9540_v44  ;;  %v5458_v9 = vor.u32 1.1754944e-38, %v5457_v60 }
 0x478   : >> { %v5435_v42 = vadd.f32 %v9530_v13, %v5434_v20  ;;  %v4548_v18 = vsub.f32 1.0, %v4547_v33  ;;  %9545 = vrcp.f32 %v15344_v45  ;;  %v9542_v10 = vpop.eup %9541  ;;  %vm5901_vm1 = vweird.f32 %v15330_v4  ;;  %vm5003_vm4 = vmor %vm5001_vm8, %vm5002_vm14 }
 0x479   : >> { %v5884_v43 = vmul.f32 %v9536_v3, %v5883_v30  ;;  %v4998_v57 = vsub.f32 1.0, %v4997_v61  ;;  %v5905_v25 = vand.u32 2147483647, %v15330_v4  ;;  %v9544_v6 = vpop.eup %9543  ;;  %v5447_v59 = vmul.f32 %v9542_v10, %v15328_v2 }
 0x47a   : >> { %v5439_v15 = vsel %vm5438_vm15, %v9530_v13, %v5435_v42  ;;  %v4549_v29 = vmul.f32 %v9538_v28, %v4548_v18  ;;  %vm15369_vm2 = vcmp.eq.f32.partialorder %v5455_v35, 8.507059e+37  ;;  %v5897_v62 = vmul.f32 %v9544_v6, %v15330_v4  ;;  %v18902_v42 = vld [vmem:[#allocation112_spill] sm:$0xff]  ;;  %v18903_v18 = vld [vmem:[#allocation111_spill] sm:$0xff] }
 0x47b   : >> { %v5444_v56 = vsel %vm15323_vm0, %v5443_v26, %v5439_v15  ;;  %v5885_v27 = vadd.f32 %v9536_v3, %v5884_v43  ;;  %v4999_v24 = vmul.f32 %v9540_v44, %v4998_v57  ;;  %v5907_v21 = vand.u32 2147483648, %v15330_v4  ;;  %vm4553_vm0 = vmor %vm4551_vm7, %vm4552_vm13 }
 0x47c   : >> { %v15374_v17 = vmul.f32 %v5444_v56, %v15248_v32   ;;  %v4550_v23 = vadd.f32 %v9538_v28, %v4549_v29  ;;  %v5448_v63 = vsub.f32 1.0, %v5447_v59  ;;  %vm5452_vm6 = vweird.f32 %v9542_v10  ;;  %v3883_v15 = vpop.f32.mrf.mxu3  ;;  %v18907_v56 = vld [vmem:[#allocation95_spill] sm:$0xff] }
 0x47d   : >> { %v5889_v13 = vsel %vm5888_vm3, %v9536_v3, %v5885_v27  ;;  %v5000_v26 = vadd.f32 %v9540_v44, %v4999_v24  ;;  %v5898_v48 = vsub.f32 1.0, %v5897_v62  ;;  %vm5902_vm11 = vweird.f32 %v9544_v6  ;;  %v3658_v3 = vpop.f32.mrf.mxu0 }
 0x47e   : >> { %18892 = vst [vmem:[#allocation128_spill] sm:$0xff] %v15374_v17  ;;  %v5894_v32 = vsel %vm15337_vm9, %v5893_v34, %v5889_v13  ;;  %v4554_v17 = vsel %vm4553_vm0, %v9538_v28, %v4550_v23  ;;  %v9546_v52 = vpop.eup %9545  ;;  %v5449_v53 = vmul.f32 %v9542_v10, %v5448_v63  ;;  %v3733_v34 = vpop.f32.mrf.mxu1  ;;  %vm15403_vm7 = vcmp.eq.f32.partialorder %v5905_v25, 8.507059e+37  ;;  %vm5453_vm9 = vmor %vm5451_vm5, %vm5452_vm6 }
 0x47f   : >> { %v15390_v49 = vmul.f32 %v5894_v32, %v15256_v38   ;;  %v4559_v58 = vsel %vm15347_vm10, %v4558_v41, %v4554_v17  ;;  %v5004_v0 = vsel %vm5003_vm4, %v9540_v44, %v5000_v26  ;;  %v5899_v28 = vmul.f32 %v9544_v6, %v5898_v48  ;;  %vm5903_vm8 = vmor %vm5901_vm1, %vm5902_vm11 }
 0x480   : >> { %v15395_v46 = vmul.f32 %v4559_v58, %v15259_v54   ;;  %v5009_v7 = vsel %vm15354_vm12, %v5008_v37, %v5004_v0  ;;  %v4562_v11 = vmul.f32 %v9546_v52, %v15344_v45  ;;  %v5450_v38 = vadd.f32 %v9542_v10, %v5449_v53  ;;  %v18909_v53 = vld [vmem:[#allocation51_spill] sm:$0xff] }
 0x481   : >> { %18893 = vst [vmem:[#allocation129_spill] sm:$0xff] %v15390_v49  ;;  %v15401_v61 = vmul.f32 %v5009_v7, %v15262_v16   ;;  %v4570_v41 = vand.u32 2147483647, %v15344_v45  ;;  %v5900_v54 = vadd.f32 %v9544_v6, %v5899_v28  ;;  %v4572_v44 = vand.u32 2147483648, %v15344_v45 }
 0x482   : >> { %18894 = vst [vmem:[#allocation130_spill] sm:$0xff] %v15395_v46  ;;  %v4563_v60 = vsub.f32 1.0, %v4562_v11  ;;  %9547 = vrcp.f32 %v15351_v50  ;;  %v5454_v20 = vsel %vm5453_vm9, %v9542_v10, %v5450_v38  ;;  %v5908_v16 = vor.u32 1.1754944e-38, %v5907_v21  ;;  %v3808_v10 = vpop.f32.mrf.mxu2 }
 0x483   : >> { %18895 = vst [vmem:[#allocation131_spill] sm:$0xff] %v15401_v61  ;;  %vm4566_vm10 = vweird.f32 %v15344_v45  ;;  %vm4567_vm12 = vweird.f32 %v9546_v52  ;;  %v5459_v33 = vsel %vm15369_vm2, %v5458_v9, %v5454_v20  ;;  %v5904_v2 = vsel %vm5903_vm8, %v9544_v6, %v5900_v54  ;;  %v18906_v6 = vld [vmem:[#allocation96_spill] sm:$0xff] }
 0x484   : >> { %v4564_v36 = vmul.f32 %v9546_v52, %v4563_v60  ;;  %vm15419_vm13 = vcmp.eq.f32.partialorder %v4570_v41, 8.507059e+37  ;;  %v15424_v45 = vmul.f32 %v5459_v33, %v15265_v1   ;;  %v5909_v4 = vsel %vm15403_vm7, %v5908_v16, %v5904_v2  ;;  %vm4568_vm15 = vmor %vm4566_vm10, %vm4567_vm12 }
 0x485   : >> { %v4573_v30 = vor.u32 1.1754944e-38, %v4572_v44  ;;  %vm5016_vm14 = vweird.f32 %v15351_v50  ;;  %v5020_v61 = vand.u32 2147483647, %v15351_v50  ;;  %v15431_v38 = vmul.f32 %v5909_v4, %v15273_v22   ;;  %v3661_v24 = vpop.f32.mrf.mxu0 }
 0x486   : >> { %18900 = vst [vmem:[#allocation132_spill] sm:$0xff] %v15424_v45  ;;  %v4565_v19 = vadd.f32 %v9546_v52, %v4564_v36  ;;  %v5022_v35 = vand.u32 2147483648, %v15351_v50  ;;  %v3533_v43 = vpack.c.bf16 %v18903_v18, %v18902_v42  ;;  %v15437_v57 = vadd.f32 %v15049_v40, %v3806_v14  ;;  %v3736_v59 = vpop.f32.mrf.mxu1 }
 0x487   : >> { %18901 = vst [vmem:[#allocation133_spill] sm:$0xff] %v15431_v38  ;;  %v15440_v9 = vadd.f32 %v15049_v40, %v3881_v5  ;;  %vm15445_vm1 = vcmp.eq.f32.partialorder %v5020_v61, 8.507059e+37  ;;  %v3548_v27 = vpack.c.bf16 %v18907_v56, %v18906_v6  ;;  %v15457_v62 = vadd.f32 %v15049_v40, %v3658_v3  ;;  %v18910_v3 = vld [vmem:[#allocation54_spill] sm:$0xff] }
 0x488   : >> { %v9548_v1 = vpop.eup %9547  ;;  %v4569_v45 = vsel %vm4568_vm15, %v9546_v52, %v4565_v19  ;;  %3845 = vmatmul.bf16.gmra.mxu2 %v3533_v43  ;;  %v7830_v8 = vmul.f32 -1.442695, %v15437_v57  ;;  %v15460_v13 = vadd.f32 %v15049_v40, %v3733_v34  ;;  %v15463_v26 = vadd.f32 %v15049_v40, %v3808_v10 }
 0x489   : >> { %v4574_v22 = vsel %vm15419_vm13, %v4573_v30, %v4569_v45  ;;  %v5012_v29 = vmul.f32 %v9548_v1, %v15351_v50  ;;  %vm5017_vm5 = vweird.f32 %v9548_v1  ;;  %v7860_v23 = vmul.f32 -1.442695, %v15440_v9  ;;  %3920 = vmatmul.bf16.gmra.mxu3 %v3548_v27  ;;  %v18912_v50 = vld [vmem:[#allocation14_spill] sm:$0xff] }
 0x48a   : >> { %v15452_v4 = vmul.f32 %v4574_v22, %v15284_v55   ;;  %v15466_v63 = vadd.f32 %v15049_v40, %v3883_v15  ;;  %9549 = vpow2.f32 %v7830_v8  ;;  %v7771_v55 = vmul.f32 -1.442695, %v15457_v62  ;;  %vm5018_vm2 = vmor %vm5016_vm14, %vm5017_vm5 }
 0x48b   : >> { %v5013_v21 = vsub.f32 1.0, %v5012_v29  ;;  %v15470_v32 = vadd.f32 %v15049_v40, %v3661_v24  ;;  %v15473_v17 = vadd.f32 %v15049_v40, %v3736_v59  ;;  %9551 = vpow2.f32 %v7860_v23 }
 0x48c   : >> { %18908 = vst [vmem:[#allocation134_spill] sm:$0xff] %v15452_v4  ;;  %v7801_v14 = vmul.f32 -1.442695, %v15460_v13  ;;  %v7831_v5 = vmul.f32 -1.442695, %v15463_v26  ;;  %v5023_v52 = vor.u32 1.1754944e-38, %v5022_v35  ;;  %9553 = vpow2.f32 %v7771_v55 }
 0x48d   : >> { %v5014_v48 = vmul.f32 %v9548_v1, %v5013_v21  ;;  %v7861_v49 = vmul.f32 -1.442695, %v15466_v63  ;;  %v7772_v58 = vmul.f32 -1.442695, %v15470_v32  ;;  %v3504_v34 = vpack.c.bf16 %v18910_v3, %v18909_v53 }
 0x48e   : >> { %9555 = vpow2.f32 %v7801_v14  ;;  %v7802_v38 = vmul.f32 -1.442695, %v15473_v17  ;;  %v3519_v41 = vpack.c.bf16 %v18913_v39, %v18912_v50  ;;  %v15536_v14 = vpop.f32.mrf.mxu3 }
 0x48f   : >> { %v5015_v0 = vadd.f32 %v9548_v1, %v5014_v48  ;;  %9557 = vpow2.f32 %v7831_v5  ;;  %3700 = vmatmul.bf16.gmra.mxu0 %v3504_v34  ;;  %v15534_v48 = vpop.f32.mrf.mxu2 }
 0x490   : >> { %9559 = vpow2.f32 %v7861_v49  ;;  %v9550_v46 = vpop.eup %9549  ;;  %3775 = vmatmul.bf16.gmra.mxu1 %v3519_v41 }
 0x491   : >> { %v5019_v40 = vsel %vm5018_vm2, %v9548_v1, %v5015_v0  ;;  %v9552_v28 = vpop.eup %9551  ;;  %v15489_v11 = vadd.f32 1.0, %v9550_v46  ;;  %9561 = vpow2.f32 %v7772_v58 }
 0x492   : >> { %v5024_v7 = vsel %vm15445_vm1, %v5023_v52, %v5019_v40  ;;  %v9554_v54 = vpop.eup %9553  ;;  %v15494_v60 = vadd.f32 1.0, %v9552_v28 }
 0x493   : >> { %v15487_v40 = vmul.f32 %v5024_v7, %v15290_v47   ;;  %9563 = vrcp.f32 %v15489_v11  ;;  %v15498_v16 = vadd.f32 1.0, %v9554_v54  ;;  %v5470_v2 = vand.u32 2147483647, %v15489_v11 }
 0x494   : >> { %v9556_v44 = vpop.eup %9555  ;;  %9565 = vrcp.f32 %v15494_v60  ;;  %v5472_v36 = vand.u32 2147483648, %v15489_v11  ;;  %v5920_v4 = vand.u32 2147483647, %v15494_v60  ;;  %v5922_v30 = vand.u32 2147483648, %v15494_v60 }
 0x495   : >> { %18911 = vst [vmem:[#allocation135_spill] sm:$0xff] %v15487_v40  ;;  %v9558_v20 = vpop.eup %9557  ;;  %v15500_v33 = vadd.f32 1.0, %v9556_v44  ;;  %9567 = vpow2.f32 %v7802_v38  ;;  %vm5466_vm3 = vweird.f32 %v15489_v11  ;;  %vm5916_vm0 = vweird.f32 %v15494_v60  ;;  %v15560_v44 = vpop.f32.mrf.mxu0 }
 0x496   : >> { %v9560_v47 = vpop.eup %9559  ;;  %v15504_v37 = vadd.f32 1.0, %v9558_v20  ;;  %9569 = vrcp.f32 %v15498_v16  ;;  %v4587_v42 = vand.u32 2147483648, %v15498_v16  ;;  %vm15518_vm6 = vcmp.eq.f32.partialorder %v5470_v2, 8.507059e+37  ;;  %v15562_v20 = vpop.f32.mrf.mxu1 }
 0x497   : >> { %v9562_v61 = vpop.eup %9561  ;;  %9571 = vrcp.f32 %v15500_v33  ;;  %v15511_v19 = vadd.f32 1.0, %v9560_v47  ;;  %v5037_v18 = vand.u32 2147483648, %v15500_v33  ;;  %v5473_v10 = vor.u32 1.1754944e-38, %v5472_v36 }
 0x498   : >> { %9573 = vrcp.f32 %v15504_v37  ;;  %v4585_v15 = vand.u32 2147483647, %v15498_v16  ;;  %vm15524_vm4 = vcmp.eq.f32.partialorder %v5920_v4, 8.507059e+37  ;;  %v5923_v6 = vor.u32 1.1754944e-38, %v5922_v30 }
 0x499   : >> { %v9564_v35 = vpop.eup %9563  ;;  %v5035_v56 = vand.u32 2147483647, %v15500_v33  ;;  %v5487_v27 = vand.u32 2147483648, %v15504_v37  ;;  %vm4581_vm11 = vweird.f32 %v15498_v16  ;;  %v5485_v59 = vand.u32 2147483647, %v15504_v37 }
 0x49a   : >> { %v9566_v43 = vpop.eup %9565  ;;  %v5462_v1 = vmul.f32 %v9564_v35, %v15489_v11  ;;  %9575 = vrcp.f32 %v15511_v19  ;;  %vm5467_vm7 = vweird.f32 %v9564_v35  ;;  %v4588_v21 = vor.u32 1.1754944e-38, %v4587_v42 }
 0x49b   : >> { %v9568_v22 = vpop.eup %9567  ;;  %v5912_v29 = vmul.f32 %v9566_v43, %v15494_v60  ;;  %v5038_v55 = vor.u32 1.1754944e-38, %v5037_v18  ;;  %vm5917_vm8 = vweird.f32 %v9566_v43  ;;  %vm15539_vm10 = vcmp.eq.f32.partialorder %v4585_v15, 8.507059e+37  ;;  %vm5468_vm5 = vmor %vm5466_vm3, %vm5467_vm7 }
 0x49c   : >> { %v5463_v24 = vsub.f32 1.0, %v5462_v1  ;;  %v9570_v8 = vpop.eup %9569  ;;  %v5935_v0 = vand.u32 2147483647, %v15511_v19  ;;  %vm15546_vm13 = vcmp.eq.f32.partialorder %v5035_v56, 8.507059e+37  ;;  %v5488_v46 = vor.u32 1.1754944e-38, %v5487_v27  ;;  %vm5918_vm9 = vmor %vm5916_vm0, %vm5917_vm8 }
 0x49d   : >> { %v5913_v23 = vsub.f32 1.0, %v5912_v29  ;;  %v9572_v5 = vpop.eup %9571  ;;  %v4577_v49 = vmul.f32 %v9570_v8, %v15498_v16  ;;  %v5937_v7 = vand.u32 2147483648, %v15511_v19  ;;  %vm4582_vm14 = vweird.f32 %v9570_v8 }
 0x49e   : >> { %v5464_v52 = vmul.f32 %v9564_v35, %v5463_v24  ;;  %v9574_v40 = vpop.eup %9573  ;;  %v5027_v3 = vmul.f32 %v9572_v5, %v15500_v33  ;;  %vm15552_vm15 = vcmp.eq.f32.partialorder %v5485_v59, 8.507059e+37  ;;  %vm5032_vm1 = vweird.f32 %v9572_v5  ;;  %vm4583_vm3 = vmor %vm4581_vm11, %vm4582_vm14 }
 0x49f   : >> { %v5914_v53 = vmul.f32 %v9566_v43, %v5913_v23  ;;  %v4578_v38 = vsub.f32 1.0, %v4577_v49  ;;  %v5477_v50 = vmul.f32 %v9574_v40, %v15504_v37  ;;  %vm5482_vm2 = vweird.f32 %v9574_v40 }
 0x4a0   : >> { %v5465_v28 = vadd.f32 %v9564_v35, %v5464_v52  ;;  %v5028_v54 = vsub.f32 1.0, %v5027_v3  ;;  %vm5931_vm12 = vweird.f32 %v15511_v19  ;;  %v9576_v47 = vpop.eup %9575  ;;  %v15567_v11 = vadd.f32 1.0, %v9562_v61  ;;  %v3741_v52 = vpop.f32.mrf.mxu1 }
 0x4a1   : >> { %v5915_v41 = vadd.f32 %v9566_v43, %v5914_v53  ;;  %v4579_v36 = vmul.f32 %v9570_v8, %v4578_v38  ;;  %v5478_v4 = vsub.f32 1.0, %v5477_v50  ;;  %v5927_v1 = vmul.f32 %v9576_v47, %v15511_v19  ;;  %v18932_v53 = vld [vmem:[#allocation109_spill] sm:$0xff]  ;;  %v18936_v38 = vld [vmem:[#allocation94_spill] sm:$0xff] }
 0x4a2   : >> { %v5469_v2 = vsel %vm5468_vm5, %v9564_v35, %v5465_v28  ;;  %v5029_v18 = vmul.f32 %v9572_v5, %v5028_v54  ;;  %v15583_v45 = vadd.f32 1.0, %v9568_v22  ;;  %vm18926_vm0 = vweird.f32 %v15500_v33  ;;  %v3813_v22 = vpop.f32.mrf.mxu2  ;;  %v18937_v50 = vld [vmem:[#allocation93_spill] sm:$0xff] }
 0x4a3   : >> { %v5474_v30 = vsel %vm15518_vm6, %v5473_v10, %v5469_v2  ;;  %v5919_v42 = vsel %vm5918_vm9, %v9566_v43, %v5915_v41  ;;  %v4580_v15 = vadd.f32 %v9570_v8, %v4579_v36  ;;  %v5479_v60 = vmul.f32 %v9574_v40, %v5478_v4  ;;  %vm5033_vm6 = vmor %vm18926_vm0, %vm5032_vm1 }
 0x4a4   : >> { %v15573_v49 = vmul.f32 %v5474_v30, %v15437_v57   ;;  %v5924_v35 = vsel %vm15524_vm4, %v5923_v6, %v5919_v42  ;;  %v5030_v61 = vadd.f32 %v9572_v5, %v5029_v18  ;;  %v5928_v43 = vsub.f32 1.0, %v5927_v1  ;;  %v3888_v6 = vpop.f32.mrf.mxu3 }
 0x4a5   : >> { %v15578_v29 = vmul.f32 %v5924_v35, %v15440_v9   ;;  %v4584_v10 = vsel %vm4583_vm3, %v9570_v8, %v4580_v15  ;;  %v5480_v57 = vadd.f32 %v9574_v40, %v5479_v60  ;;  %9577 = vrcp.f32 %v15567_v11 }
 0x4a6   : >> { %18924 = vst [vmem:[#allocation136_spill] sm:$0xff] %v15573_v49  ;;  %v4589_v9 = vsel %vm15539_vm10, %v4588_v21, %v4584_v10  ;;  %v5034_v25 = vsel %vm5033_vm6, %v9572_v5, %v5030_v61  ;;  %vm18927_vm4 = vweird.f32 %v15504_v37  ;;  %v5929_v16 = vmul.f32 %v9576_v47, %v5928_v43  ;;  %v3666_v5 = vpop.f32.mrf.mxu0 }
 0x4a7   : >> { %18925 = vst [vmem:[#allocation137_spill] sm:$0xff] %v15578_v29  ;;  %vm5483_vm11 = vmor %vm18927_vm4, %vm5482_vm2  ;;  %vm5932_vm7 = vweird.f32 %v9576_v47  ;;  %v15595_v56 = vmul.f32 %v4589_v9, %v15457_v62   ;;  %v5039_v33 = vsel %vm15546_vm13, %v5038_v55, %v5034_v25  ;;  %v4602_v24 = vand.u32 2147483648, %v15567_v11 }
 0x4a8   : >> { %v5484_v27 = vsel %vm5483_vm11, %v9574_v40, %v5480_v57  ;;  %v15601_v59 = vmul.f32 %v5039_v33, %v15460_v13   ;;  %v5930_v8 = vadd.f32 %v9576_v47, %v5929_v16  ;;  %v4600_v23 = vand.u32 2147483647, %v15567_v11  ;;  %vm5933_vm9 = vmor %vm5931_vm12, %vm5932_vm7  ;;  %v18931_v40 = vld [vmem:[#allocation110_spill] sm:$0xff]  ;;  %v3743_v16 = vpop.f32.mrf.mxu1 }
 0x4a9   : >> { %18928 = vst [vmem:[#allocation138_spill] sm:$0xff] %v15595_v56  ;;  %v5489_v37 = vsel %vm15552_vm15, %v5488_v46, %v5484_v27  ;;  %vm5936_vm8 = vcmp.eq.f32.partialorder %v5935_v0, 8.507059e+37  ;;  %v5938_v62 = vor.u32 1.1754944e-38, %v5937_v7  ;;  %9579 = vrcp.f32 %v15583_v45  ;;  %v15627_v46 = vld [vmem:[%s14409_s6] ss:$0 sm:$0xff] }
 0x4aa   : >> { %18929 = vst [vmem:[#allocation139_spill] sm:$0xff] %v15601_v59  ;;  %v15607_v21 = vmul.f32 %v5489_v37, %v15463_v26   ;;  %v5934_v55 = vsel %vm5933_vm9, %v9576_v47, %v5930_v8  ;;  %vm4596_vm10 = vweird.f32 %v15567_v11  ;;  %v4603_v13 = vor.u32 1.1754944e-38, %v4602_v24 }
 0x4ab   : >> { %v9578_v49 = vpop.eup %9577  ;;  %v5939_v58 = vsel %vm5936_vm8, %v5938_v62, %v5934_v55  ;;  %v3534_v26 = vpack.c.bf16 %v18932_v53, %v18931_v40  ;;  %vm15619_vm12 = vcmp.eq.f32.partialorder %v4600_v23, 8.507059e+37  ;;  %vm5046_vm13 = vweird.f32 %v15583_v45 }
 0x4ac   : >> { %18930 = vst [vmem:[#allocation140_spill] sm:$0xff] %v15607_v21  ;;  %v15616_v41 = vmul.f32 %v5939_v58, %v15466_v63   ;;  %v4592_v19 = vmul.f32 %v9578_v49, %v15567_v11  ;;  %v5050_v3 = vand.u32 2147483647, %v15583_v45  ;;  %v5052_v34 = vand.u32 2147483648, %v15583_v45  ;;  %v3891_v42 = vpop.f32.mrf.mxu3 }
 0x4ad   : >> { %3850 = vmatmul.bf16.gmra.mxu2 %v3534_v26  ;;  %v15631_v7 = vadd.f32 %v15627_v46, %v15534_v48  ;;  %v15635_v63 = vadd.f32 %v15627_v46, %v15536_v14  ;;  %v3549_v39 = vpack.c.bf16 %v18937_v50, %v18936_v38  ;;  %v15645_v54 = vadd.f32 %v15627_v46, %v15562_v20  ;;  %v3816_v20 = vpop.f32.mrf.mxu2 }
 0x4ae   : >> { %18933 = vst [vmem:[#allocation141_spill] sm:$0xff] %v15616_v41  ;;  %v4593_v28 = vsub.f32 1.0, %v4592_v19  ;;  %v15641_v41 = vadd.f32 %v15627_v46, %v15560_v44  ;;  %v15650_v14 = vadd.f32 %v15627_v46, %v3813_v22  ;;  %v15653_v36 = vadd.f32 %v15627_v46, %v3888_v6  ;;  %v3668_v25 = vpop.f32.mrf.mxu0 }
 0x4af   : >> { %v9580_v47 = vpop.eup %9579  ;;  %v7832_v48 = vmul.f32 -1.442695, %v15631_v7  ;;  %v7862_v2 = vmul.f32 -1.442695, %v15635_v63  ;;  %vm4597_vm14 = vweird.f32 %v9578_v49  ;;  %3925 = vmatmul.bf16.gmra.mxu3 %v3549_v39  ;;  %v7803_v18 = vmul.f32 -1.442695, %v15645_v54 }
 0x4b0   : >> { %v4594_v4 = vmul.f32 %v9578_v49, %v4593_v28  ;;  %v5042_v44 = vmul.f32 %v9580_v47, %v15583_v45  ;;  %v7773_v30 = vmul.f32 -1.442695, %v15641_v41  ;;  %v7833_v1 = vmul.f32 -1.442695, %v15650_v14  ;;  %vm4598_vm15 = vmor %vm4596_vm10, %vm4597_vm14 }
 0x4b1   : >> { %9581 = vpow2.f32 %v7832_v48  ;;  %v7863_v35 = vmul.f32 -1.442695, %v15653_v36  ;;  %v15661_v29 = vadd.f32 %v15627_v46, %v3666_v5  ;;  %v15666_v61 = vadd.f32 %v15627_v46, %v3741_v52 }
 0x4b2   : >> { %v4595_v15 = vadd.f32 %v9578_v49, %v4594_v4  ;;  %v5043_v60 = vsub.f32 1.0, %v5042_v44  ;;  %9583 = vpow2.f32 %v7862_v2  ;;  %v15669_v43 = vadd.f32 %v15627_v46, %v3816_v20 }
 0x4b3   : >> { %9585 = vpow2.f32 %v7773_v30  ;;  %v15672_v10 = vadd.f32 %v15627_v46, %v3891_v42  ;;  %vm5047_vm5 = vweird.f32 %v9580_v47  ;;  %v7774_v22 = vmul.f32 -1.442695, %v15661_v29 }
 0x4b4   : >> { %v4599_v57 = vsel %vm4598_vm15, %v9578_v49, %v4595_v15  ;;  %v5044_v9 = vmul.f32 %v9580_v47, %v5043_v60  ;;  %9587 = vpow2.f32 %v7803_v18  ;;  %vm5048_vm1 = vmor %vm5046_vm13, %vm5047_vm5  ;;  %v5053_v33 = vor.u32 1.1754944e-38, %v5052_v34 }
 0x4b5   : >> { %v4604_v11 = vsel %vm15619_vm12, %v4603_v13, %v4599_v57  ;;  %9589 = vpow2.f32 %v7833_v1  ;;  %v15683_v27 = vadd.f32 %v15627_v46, %v3668_v25  ;;  %v15686_v24 = vadd.f32 %v15627_v46, %v3743_v16 }
 0x4b6   : >> { %v15678_v30 = vmul.f32 %v4604_v11, %v15470_v32   ;;  %v5045_v6 = vadd.f32 %v9580_v47, %v5044_v9  ;;  %9591 = vpow2.f32 %v7863_v35  ;;  %vm5051_vm2 = vcmp.eq.f32.partialorder %v5050_v3, 8.507059e+37 }
 0x4b7   : >> { %v9582_v56 = vpop.eup %9581  ;;  %v7804_v32 = vmul.f32 -1.442695, %v15666_v61  ;;  %9593 = vpow2.f32 %v7774_v22  ;;  %v7834_v45 = vmul.f32 -1.442695, %v15669_v43  ;;  %v15711_v19 = vmul.f32 -1.442695, %v15672_v10 }
 0x4b8   : >> { %18938 = vst [vmem:[#allocation142_spill] sm:$0xff] %v15678_v30  ;;  %v9584_v59 = vpop.eup %9583  ;;  %v5049_v37 = vsel %vm5048_vm1, %v9580_v47, %v5045_v6  ;;  %v15688_v8 = vadd.f32 1.0, %v9582_v56  ;;  %v15718_v34 = vmul.f32 -1.442695, %v15683_v27 }
 0x4b9   : >> { %v9586_v23 = vpop.eup %9585  ;;  %v5054_v21 = vsel %vm5051_vm2, %v5053_v33, %v5049_v37  ;;  %v15691_v62 = vadd.f32 1.0, %v9584_v59 }
 0x4ba   : >> { %v9588_v55 = vpop.eup %9587  ;;  %v15695_v60 = vmul.f32 %v5054_v21, %v15473_v17   ;;  %9595 = vrcp.f32 %v15688_v8  ;;  %v15699_v52 = vadd.f32 1.0, %v9586_v23  ;;  %v5500_v58 = vand.u32 2147483647, %v15688_v8 }
 0x4bb   : >> { %v9590_v13 = vpop.eup %9589  ;;  %9597 = vrcp.f32 %v15691_v62  ;;  %v15701_v49 = vadd.f32 1.0, %v9588_v55  ;;  %v5502_v40 = vand.u32 2147483648, %v15688_v8  ;;  %v5950_v17 = vand.u32 2147483647, %v15691_v62 }
 0x4bc   : >> { %18939 = vst [vmem:[#allocation143_spill] sm:$0xff] %v15695_v60  ;;  %v9592_v5 = vpop.eup %9591  ;;  %9599 = vpow2.f32 %v7804_v32  ;;  %v15705_v53 = vadd.f32 1.0, %v9590_v13  ;;  %v5952_v26 = vand.u32 2147483648, %v15691_v62  ;;  %vm5496_vm3 = vweird.f32 %v15688_v8 }
 0x4bd   : >> { %9601 = vpow2.f32 %v7834_v45  ;;  %v9594_v0 = vpop.eup %9593  ;;  %v15715_v3 = vadd.f32 1.0, %v9592_v5  ;;  %vm5946_vm0 = vweird.f32 %v15691_v62  ;;  %v4617_v38 = vand.u32 2147483648, %v15699_v52 }
 0x4be   : >> { %9603 = vrcp.f32 %v15699_v52  ;;  %v5067_v50 = vand.u32 2147483648, %v15701_v49  ;;  %vm15725_vm6 = vcmp.eq.f32.partialorder %v5500_v58, 8.507059e+37  ;;  %v5503_v2 = vor.u32 1.1754944e-38, %v5502_v40 }
 0x4bf   : >> { %9605 = vrcp.f32 %v15701_v49  ;;  %v4615_v4 = vand.u32 2147483647, %v15699_v52  ;;  %vm15731_vm4 = vcmp.eq.f32.partialorder %v5950_v17, 8.507059e+37  ;;  %v5953_v42 = vor.u32 1.1754944e-38, %v5952_v26 }
 0x4c0   : >> { %v9596_v28 = vpop.eup %9595  ;;  %9607 = vrcp.f32 %v15705_v53  ;;  %v5065_v18 = vand.u32 2147483647, %v15701_v49  ;;  %vm4611_vm7 = vweird.f32 %v15699_v52  ;;  %v4618_v57 = vor.u32 1.1754944e-38, %v4617_v38 }
 0x4c1   : >> { %v9598_v39 = vpop.eup %9597  ;;  %v5492_v47 = vmul.f32 %v9596_v28, %v15688_v8  ;;  %vm5497_vm11 = vweird.f32 %v9596_v28  ;;  %9609 = vrcp.f32 %v15715_v3  ;;  %vm5061_vm8 = vweird.f32 %v15701_v49 }
 0x4c2   : >> { %v9600_v44 = vpop.eup %9599  ;;  %v5942_v30 = vmul.f32 %v9598_v39, %v15691_v62  ;;  %vm5947_vm9 = vweird.f32 %v9598_v39  ;;  %v5068_v9 = vor.u32 1.1754944e-38, %v5067_v50  ;;  %vm15742_vm10 = vcmp.eq.f32.partialorder %v4615_v4, 8.507059e+37  ;;  %vm5498_vm15 = vmor %vm5496_vm3, %vm5497_vm11 }
 0x4c3   : >> { %v15736_v1 = vpop.eup %9601  ;;  %v5493_v35 = vsub.f32 1.0, %v5492_v47  ;;  %vm5511_vm12 = vweird.f32 %v15705_v53  ;;  %v5515_v6 = vand.u32 2147483647, %v15705_v53  ;;  %v5517_v56 = vand.u32 2147483648, %v15705_v53  ;;  %vm5948_vm2 = vmor %vm5946_vm0, %vm5947_vm9 }
 0x4c4   : >> { %v9604_v15 = vpop.eup %9603  ;;  %v5943_v60 = vsub.f32 1.0, %v5942_v30  ;;  %vm15750_vm13 = vcmp.eq.f32.partialorder %v5065_v18, 8.507059e+37  ;;  %v5965_v23 = vand.u32 2147483647, %v15715_v3  ;;  %v5967_v21 = vand.u32 2147483648, %v15715_v3 }
 0x4c5   : >> { %v9606_v25 = vpop.eup %9605  ;;  %v5494_v16 = vmul.f32 %v9596_v28, %v5493_v35  ;;  %v4607_v11 = vmul.f32 %v9604_v15, %v15699_v52  ;;  %vm4612_vm14 = vweird.f32 %v9604_v15  ;;  %v15763_v50 = vadd.f32 1.0, %v9594_v0 }
 0x4c6   : >> { %v9608_v33 = vpop.eup %9607  ;;  %v5944_v59 = vmul.f32 %v9598_v39, %v5943_v60  ;;  %v5057_v37 = vmul.f32 %v9606_v25, %v15701_v49  ;;  %vm5062_vm5 = vweird.f32 %v9606_v25  ;;  %vm4613_vm3 = vmor %vm4611_vm7, %vm4612_vm14  ;;  %v3671_v60 = vpop.f32.mrf.mxu0  ;;  %vm5516_vm11 = vcmp.eq.f32.partialorder %v5515_v6, 8.507059e+37 }
 0x4c7   : >> { %v5495_v45 = vadd.f32 %v9596_v28, %v5494_v16  ;;  %v4608_v55 = vsub.f32 1.0, %v4607_v11  ;;  %v5507_v13 = vmul.f32 %v9608_v33, %v15705_v53  ;;  %vm5512_vm1 = vweird.f32 %v9608_v33  ;;  %v9610_v40 = vpop.eup %9609  ;;  %vm5063_vm0 = vmor %vm5061_vm8, %vm5062_vm5 }
 0x4c8   : >> { %v5945_v5 = vadd.f32 %v9598_v39, %v5944_v59  ;;  %v5058_v58 = vsub.f32 1.0, %v5057_v37  ;;  %v5957_v30 = vmul.f32 %v9610_v40, %v15715_v3  ;;  %9611 = vrcp.f32 %v15763_v50 }
 0x4c9   : >> { %v5499_v17 = vsel %vm5498_vm15, %v9596_v28, %v5495_v45  ;;  %v4609_v26 = vmul.f32 %v9604_v15, %v4608_v55  ;;  %v5508_v38 = vsub.f32 1.0, %v5507_v13  ;;  %vm5961_vm7 = vweird.f32 %v15715_v3 }
 0x4ca   : >> { %v5504_v47 = vsel %vm15725_vm6, %v5503_v2, %v5499_v17  ;;  %v5949_v4 = vsel %vm5948_vm2, %v9598_v39, %v5945_v5  ;;  %v5059_v8 = vmul.f32 %v9606_v25, %v5058_v58  ;;  %v5518_v39 = vor.u32 1.1754944e-38, %v5517_v56  ;;  %vm5513_vm6 = vmor %vm5511_vm12, %vm5512_vm1 }
 0x4cb   : >> { %v15769_v18 = vmul.f32 %v5504_v47, %v15631_v7   ;;  %v5954_v28 = vsel %vm15731_vm4, %v5953_v42, %v5949_v4  ;;  %v4610_v35 = vadd.f32 %v9604_v15, %v4609_v26  ;;  %v5509_v62 = vmul.f32 %v9608_v33, %v5508_v38 }
 0x4cc   : >> { %v15774_v20 = vmul.f32 %v5954_v28, %v15635_v63   ;;  %v5060_v0 = vadd.f32 %v9606_v25, %v5059_v8  ;;  %v5958_v48 = vsub.f32 1.0, %v5957_v30  ;;  %v15783_v42 = vadd.f32 1.0, %v9600_v44 }
 0x4cd   : >> { %18948 = vst [vmem:[#allocation144_spill] sm:$0xff] %v15769_v18  ;;  %v4614_v2 = vsel %vm4613_vm3, %v9604_v15, %v4610_v35  ;;  %v5510_v7 = vadd.f32 %v9608_v33, %v5509_v62  ;;  %v3818_v18 = vpop.f32.mrf.mxu2  ;;  %vm5962_vm4 = vweird.f32 %v9610_v40  ;;  %v3893_v15 = vpop.f32.mrf.mxu3  ;;  %v5968_v53 = vor.u32 1.1754944e-38, %v5967_v21 }
 0x4ce   : >> { %18949 = vst [vmem:[#allocation145_spill] sm:$0xff] %v15774_v20  ;;  %v4619_v63 = vsel %vm15742_vm10, %v4618_v57, %v4614_v2  ;;  %v5064_v20 = vsel %vm5063_vm0, %v9606_v25, %v5060_v0  ;;  %v5959_v52 = vmul.f32 %v9610_v40, %v5958_v48  ;;  %vm5963_vm9 = vmor %vm5961_vm7, %vm5962_vm4  ;;  %9613 = vrcp.f32 %v15783_v42  ;;  %v9612_v6 = vpop.eup %9611 }
 0x4cf   : >> { %v15791_v49 = vmul.f32 %v4619_v63, %v15641_v41   ;;  %v5069_v44 = vsel %vm15750_vm13, %v5068_v9, %v5064_v20  ;;  %v5514_v16 = vsel %vm5513_vm6, %v9608_v33, %v5510_v7  ;;  %v4630_v41 = vand.u32 2147483647, %v15763_v50 }
 0x4d0   : >> { %v15796_v11 = vmul.f32 %v5069_v44, %v15645_v54   ;;  %v5519_v57 = vsel %vm5516_vm11, %v5518_v39, %v5514_v16  ;;  %v5960_v25 = vadd.f32 %v9610_v40, %v5959_v52  ;;  %vm5966_vm8 = vcmp.eq.f32.partialorder %v5965_v23, 8.507059e+37  ;;  %v3746_v23 = vpop.f32.mrf.mxu1 }
 0x4d1   : >> { %18950 = vst [vmem:[#allocation146_spill] sm:$0xff] %v15791_v49  ;;  %v15800_v59 = vmul.f32 %v5519_v57, %v15650_v14   ;;  %v4632_v9 = vand.u32 2147483648, %v15763_v50  ;;  %v15806_v54 = vadd.f32 1.0, %v15736_v1  ;;  %9615 = vpow2.f32 %v15711_v19 }
 0x4d2   : >> { %18951 = vst [vmem:[#allocation147_spill] sm:$0xff] %v15796_v11  ;;  %v5964_v22 = vsel %vm5963_vm9, %v9610_v40, %v5960_v25  ;;  %v7805_v14 = vmul.f32 -1.442695, %v15686_v24  ;;  %v15811_v3 = vadd.f32 %v15627_v46, %v3818_v18  ;;  %vm4626_vm10 = vweird.f32 %v15763_v50  ;;  %v3673_v40 = vpop.f32.mrf.mxu0 }
 0x4d3   : >> { %18952 = vst [vmem:[#allocation148_spill] sm:$0xff] %v15800_v59  ;;  %v5969_v56 = vsel %vm5966_vm8, %v5968_v53, %v5964_v22  ;;  %v4622_v59 = vmul.f32 %v9612_v6, %v15763_v50  ;;  %vm15818_vm12 = vcmp.eq.f32.partialorder %v4630_v41, 8.507059e+37  ;;  %9617 = vrcp.f32 %v15806_v54 }
 0x4d4   : >> { %v15814_v33 = vmul.f32 %v5969_v56, %v15653_v36   ;;  %v4633_v19 = vor.u32 1.1754944e-38, %v4632_v9  ;;  %9619 = vpow2.f32 %v15718_v34  ;;  %v7835_v32 = vmul.f32 -1.442695, %v15811_v3  ;;  %v9614_v21 = vpop.eup %9613 }
 0x4d5   : >> { %v4623_v1 = vsub.f32 1.0, %v4622_v59  ;;  %v5080_v36 = vand.u32 2147483647, %v15783_v42  ;;  %9621 = vpow2.f32 %v7805_v14  ;;  %v15827_v45 = vadd.f32 %v15627_v46, %v3893_v15  ;;  %v3821_v13 = vpop.f32.mrf.mxu2  ;;  %v3896_v34 = vpop.f32.mrf.mxu3 }
 0x4d6   : >> { %18953 = vst [vmem:[#allocation149_spill] sm:$0xff] %v15814_v33  ;;  %v15830_v55 = vadd.f32 %v15627_v46, %v3671_v60  ;;  %vm4627_vm13 = vweird.f32 %v9612_v6  ;;  %v5072_v58 = vmul.f32 %v9614_v21, %v15783_v42  ;;  %vm5076_vm14 = vweird.f32 %v15783_v42 }
 0x4d7   : >> { %v4624_v5 = vmul.f32 %v9612_v6, %v4623_v1  ;;  %v9616_v17 = vpop.eup %9615  ;;  %v5082_v26 = vand.u32 2147483648, %v15783_v42  ;;  %9623 = vpow2.f32 %v7835_v32  ;;  %v7865_v38 = vmul.f32 -1.442695, %v15827_v45  ;;  %vm4628_vm15 = vmor %vm4626_vm10, %vm4627_vm13 }
 0x4d8   : >> { %v15837_v47 = vadd.f32 %v15627_v46, %v3746_v23  ;;  %v5073_v8 = vsub.f32 1.0, %v5072_v58  ;;  %v15839_v30 = vadd.f32 1.0, %v9616_v17  ;;  %v15842_v28 = vadd.f32 %v15627_v46, %v3821_v13 }
 0x4d9   : >> { %v4625_v4 = vadd.f32 %v9612_v6, %v4624_v5  ;;  %v9618_v35 = vpop.eup %9617  ;;  %vm15847_vm5 = vcmp.eq.f32.partialorder %v5080_v36, 8.507059e+37  ;;  %v7776_v0 = vmul.f32 -1.442695, %v15830_v55  ;;  %v15853_v39 = vadd.f32 %v15627_v46, %v3896_v34 }
 0x4da   : >> { %v15856_v48 = vadd.f32 %v15627_v46, %v3673_v40  ;;  %v9620_v2 = vpop.eup %9619  ;;  %v5074_v18 = vmul.f32 %v9614_v21, %v5073_v8  ;;  %vm5077_vm1 = vweird.f32 %v9614_v21  ;;  %v5522_v63 = vmul.f32 %v9618_v35, %v15806_v54 }
 0x4db   : >> { %v4629_v7 = vsel %vm4628_vm15, %v9612_v6, %v4625_v4  ;;  %v9622_v50 = vpop.eup %9621  ;;  %v5083_v52 = vor.u32 1.1754944e-38, %v5082_v26  ;;  %v5530_v15 = vand.u32 2147483647, %v15806_v54  ;;  %9625 = vrcp.f32 %v15839_v30  ;;  %vm5078_vm2 = vmor %vm5076_vm14, %vm5077_vm1 }
 0x4dc   : >> { %v4634_v20 = vsel %vm15818_vm12, %v4633_v19, %v4629_v7  ;;  %v5075_v49 = vadd.f32 %v9614_v21, %v5074_v18  ;;  %v5523_v44 = vsub.f32 1.0, %v5522_v63  ;;  %9627 = vpow2.f32 %v7865_v38 }
 0x4dd   : >> { %v15864_v60 = vmul.f32 %v4634_v20, %v15661_v29   ;;  %v9624_v16 = vpop.eup %9623  ;;  %v5532_v11 = vand.u32 2147483648, %v15806_v54  ;;  %v15869_v57 = vadd.f32 1.0, %v9620_v2  ;;  %v15871_v25 = vadd.f32 1.0, %v9622_v50 }
 0x4de   : >> { %9629 = vpow2.f32 %v7776_v0  ;;  %v5079_v53 = vsel %vm5078_vm2, %v9614_v21, %v5075_v49  ;;  %v5524_v41 = vmul.f32 %v9618_v35, %v5523_v44  ;;  %vm5527_vm3 = vweird.f32 %v9618_v35 }
 0x4df   : >> { %18958 = vst [vmem:[#allocation150_spill] sm:$0xff] %v15864_v60  ;;  %v5980_v29 = vand.u32 2147483647, %v15839_v30  ;;  %v5084_v22 = vsel %vm15847_vm5, %v5083_v52, %v5079_v53  ;;  %v5982_v9 = vand.u32 2147483648, %v15839_v30  ;;  %9631 = vrcp.f32 %v15869_v57 }
 0x4e0   : >> { %v15878_v42 = vadd.f32 1.0, %v9624_v16  ;;  %v15881_v44 = vmul.f32 %v5084_v22, %v15666_v61   ;;  %v5525_v6 = vadd.f32 %v9618_v35, %v5524_v41  ;;  %vm5526_vm0 = vweird.f32 %v15806_v54 }
 0x4e1   : >> { %9633 = vrcp.f32 %v15871_v25  ;;  %v9626_v56 = vpop.eup %9625  ;;  %vm5528_vm6 = vmor %vm5526_vm0, %vm5527_vm3  ;;  %vm5531_vm4 = vcmp.eq.f32.partialorder %v5530_v15, 8.507059e+37  ;;  %v5533_v14 = vor.u32 1.1754944e-38, %v5532_v11  ;;  %vm5976_vm11 = vweird.f32 %v15839_v30 }
 0x4e2   : >> { %18959 = vst [vmem:[#allocation151_spill] sm:$0xff] %v15881_v44  ;;  %v7806_v33 = vmul.f32 -1.442695, %v15837_v47  ;;  %v9628_v59 = vpop.eup %9627  ;;  %v5529_v37 = vsel %vm5528_vm6, %v9618_v35, %v5525_v6  ;;  %v5972_v1 = vmul.f32 %v9626_v56, %v15839_v30  ;;  %vm15888_vm7 = vcmp.eq.f32.partialorder %v5980_v29, 8.507059e+37 }
 0x4e3   : >> { %v4645_v54 = vand.u32 2147483647, %v15869_v57  ;;  %v5534_v32 = vsel %vm5531_vm4, %v5533_v14, %v5529_v37  ;;  %v5983_v23 = vor.u32 1.1754944e-38, %v5982_v9  ;;  %v4647_v21 = vand.u32 2147483648, %v15869_v57 }
 0x4e4   : >> { %v9630_v19 = vpop.eup %9629  ;;  %9635 = vrcp.f32 %v15878_v42  ;;  %v15896_v26 = vmul.f32 %v5534_v32, %v15669_v43   ;;  %v5973_v36 = vsub.f32 1.0, %v5972_v1  ;;  %vm4641_vm9 = vweird.f32 %v15869_v57 }
 0x4e5   : >> { %v5095_v13 = vand.u32 2147483647, %v15871_v25  ;;  %v5097_v5 = vand.u32 2147483648, %v15871_v25  ;;  %v9632_v58 = vpop.eup %9631  ;;  %vm5091_vm8 = vweird.f32 %v15871_v25  ;;  %v15902_v34 = vadd.f32 1.0, %v9628_v59  ;;  %v3748_v59 = vpop.f32.mrf.mxu1 }
 0x4e6   : >> { %18962 = vst [vmem:[#allocation152_spill] sm:$0xff] %v15896_v26  ;;  %v15904_v40 = vadd.f32 1.0, %v9630_v19  ;;  %9637 = vpow2.f32 %v7806_v33  ;;  %v5974_v38 = vmul.f32 %v9626_v56, %v5973_v36  ;;  %vm5977_vm10 = vweird.f32 %v9626_v56 }
 0x4e7   : >> { %v9634_v17 = vpop.eup %9633  ;;  %v4637_v43 = vmul.f32 %v9632_v58, %v15869_v57  ;;  %vm15907_vm12 = vcmp.eq.f32.partialorder %v4645_v54, 8.507059e+37  ;;  %v5545_v4 = vand.u32 2147483647, %v15878_v42  ;;  %v4648_v8 = vor.u32 1.1754944e-38, %v4647_v21  ;;  %vm5978_vm14 = vmor %vm5976_vm11, %vm5977_vm10 }
 0x4e8   : >> { %v5087_v35 = vmul.f32 %v9634_v17, %v15871_v25  ;;  %v5547_v62 = vand.u32 2147483648, %v15878_v42  ;;  %9639 = vrcp.f32 %v15902_v34  ;;  %v5975_v0 = vadd.f32 %v9626_v56, %v5974_v38 }
 0x4e9   : >> { %v4638_v2 = vsub.f32 1.0, %v4637_v43  ;;  %vm15915_vm13 = vcmp.eq.f32.partialorder %v5095_v13, 8.507059e+37  ;;  %v5098_v18 = vor.u32 1.1754944e-38, %v5097_v5  ;;  %vm4642_vm15 = vweird.f32 %v9632_v58 }
 0x4ea   : >> { %v9636_v63 = vpop.eup %9635  ;;  %v5088_v50 = vsub.f32 1.0, %v5087_v35  ;;  %vm5541_vm5 = vweird.f32 %v15878_v42  ;;  %9641 = vrcp.f32 %v15904_v40  ;;  %v5979_v20 = vsel %vm5978_vm14, %v9626_v56, %v5975_v0  ;;  %vm4643_vm0 = vmor %vm4641_vm9, %vm4642_vm15 }
 0x4eb   : >> { %v4639_v52 = vmul.f32 %v9632_v58, %v4638_v2  ;;  %v5537_v15 = vmul.f32 %v9636_v63, %v15878_v42  ;;  %vm15924_vm1 = vcmp.eq.f32.partialorder %v5545_v4, 8.507059e+37  ;;  %v5984_v44 = vsel %vm15888_vm7, %v5983_v23, %v5979_v20  ;;  %v3676_v2 = vpop.f32.mrf.mxu0 }
 0x4ec   : >> { %v9638_v49 = vpop.eup %9637  ;;  %v5089_v30 = vmul.f32 %v9634_v17, %v5088_v50  ;;  %vm5092_vm2 = vweird.f32 %v9634_v17  ;;  %v5548_v16 = vor.u32 1.1754944e-38, %v5547_v62  ;;  %v15931_v11 = vmul.f32 %v5984_v44, %v15672_v10  }
 0x4ed   : >> { %v4640_v53 = vadd.f32 %v9632_v58, %v4639_v52  ;;  %v5538_v41 = vsub.f32 1.0, %v5537_v15  ;;  %vm5991_vm3 = vweird.f32 %v15902_v34  ;;  %v5995_v29 = vand.u32 2147483647, %v15902_v34  ;;  %vm5093_vm4 = vmor %vm5091_vm8, %vm5092_vm2  ;;  %v3751_v15 = vpop.f32.mrf.mxu1 }
 0x4ee   : >> { %18969 = vst [vmem:[#allocation153_spill] sm:$0xff] %v15931_v11  ;;  %v9640_v22 = vpop.eup %9639  ;;  %v5090_v9 = vadd.f32 %v9634_v17, %v5089_v30  ;;  %v5997_v6 = vand.u32 2147483648, %v15902_v34  ;;  %vm4656_vm6 = vweird.f32 %v15904_v40  ;;  %v15940_v56 = vadd.f32 1.0, %v9638_v49 }
 0x4ef   : >> { %v4644_v10 = vsel %vm4643_vm0, %v9632_v58, %v4640_v53  ;;  %v5539_v14 = vmul.f32 %v9636_v63, %v5538_v41  ;;  %vm5542_vm11 = vweird.f32 %v9636_v63  ;;  %v5987_v33 = vmul.f32 %v9640_v22, %v15902_v34 }
 0x4f0   : >> { %v9642_v37 = vpop.eup %9641  ;;  %v4649_v57 = vsel %vm15907_vm12, %v4648_v8, %v4644_v10  ;;  %v5094_v1 = vsel %vm5093_vm4, %v9634_v17, %v5090_v9  ;;  %v4660_v61 = vand.u32 2147483647, %v15904_v40  ;;  %v7836_v54 = vmul.f32 -1.442695, %v15842_v28  ;;  %vm5543_vm7 = vmor %vm5541_vm5, %vm5542_vm11  ;;  %v3898_v17 = vpop.f32.mrf.mxu3 }
 0x4f1   : >> { %v15950_v0 = vmul.f32 %v4649_v57, %v15683_v27   ;;  %v5099_v25 = vsel %vm15915_vm13, %v5098_v18, %v5094_v1  ;;  %v5540_v19 = vadd.f32 %v9636_v63, %v5539_v14  ;;  %v5988_v32 = vsub.f32 1.0, %v5987_v33  ;;  %v3823_v27 = vpop.f32.mrf.mxu2 }
 0x4f2   : >> { %v15955_v24 = vmul.f32 %v5099_v25, %v15686_v24   ;;  %vm15959_vm9 = vcmp.eq.f32.partialorder %v5995_v29, 8.507059e+37  ;;  %v4652_v21 = vmul.f32 %v9642_v37, %v15904_v40  ;;  %9643 = vrcp.f32 %v15940_v56 }
 0x4f3   : >> { %18970 = vst [vmem:[#allocation154_spill] sm:$0xff] %v15950_v0  ;;  %v5544_v36 = vsel %vm5543_vm7, %v9636_v63, %v5540_v19  ;;  %v5989_v13 = vmul.f32 %v9640_v22, %v5988_v32  ;;  %vm5992_vm8 = vweird.f32 %v9640_v22  ;;  %v5998_v5 = vor.u32 1.1754944e-38, %v5997_v6 }
 0x4f4   : >> { %18971 = vst [vmem:[#allocation155_spill] sm:$0xff] %v15955_v24  ;;  %v5549_v58 = vsel %vm15924_vm1, %v5548_v16, %v5544_v36  ;;  %v4653_v24 = vsub.f32 1.0, %v4652_v21  ;;  %v4662_v42 = vand.u32 2147483648, %v15904_v40  ;;  %9645 = vpow2.f32 %v7836_v54  ;;  %vm5993_vm12 = vmor %vm5991_vm3, %vm5992_vm8 }
 0x4f5   : >> { %v15969_v1 = vmul.f32 %v5549_v58, %v15811_v3   ;;  %v5990_v38 = vadd.f32 %v9640_v22, %v5989_v13  ;;  %vm15971_vm10 = vcmp.eq.f32.partialorder %v4660_v61, 8.507059e+37  ;;  %v7866_v26 = vmul.f32 -1.442695, %v15853_v39 }
 0x4f6   : >> { %v4654_v4 = vmul.f32 %v9642_v37, %v4653_v24  ;;  %vm4657_vm13 = vweird.f32 %v9642_v37  ;;  %v7777_v8 = vmul.f32 -1.442695, %v15856_v48  ;;  %v15980_v35 = vadd.f32 %v15627_v46, %v3748_v59 }
 0x4f7   : >> { %18974 = vst [vmem:[#allocation156_spill] sm:$0xff] %v15969_v1  ;;  %v5994_v62 = vsel %vm5993_vm12, %v9640_v22, %v5990_v38  ;;  %9647 = vpow2.f32 %v7866_v26  ;;  %v15983_v3 = vadd.f32 %v15627_v46, %v3823_v27  ;;  %v15986_v0 = vadd.f32 %v15627_v46, %v3898_v17  ;;  %vm4658_vm14 = vmor %vm4656_vm6, %vm4657_vm13 }
 0x4f8   : >> { %v9644_v7 = vpop.eup %9643  ;;  %v5999_v34 = vsel %vm15959_vm9, %v5998_v5, %v5994_v62  ;;  %v4655_v18 = vadd.f32 %v9642_v37, %v4654_v4  ;;  %9649 = vpow2.f32 %v7777_v8  ;;  %v7807_v63 = vmul.f32 -1.442695, %v15980_v35 }
 0x4f9   : >> { %v15992_v21 = vmul.f32 %v5999_v34, %v15827_v45   ;;  %v4663_v50 = vor.u32 1.1754944e-38, %v4662_v42  ;;  %v5102_v20 = vmul.f32 %v9644_v7, %v15940_v56  ;;  %v7837_v52 = vmul.f32 -1.442695, %v15983_v3  ;;  %v3826_v29 = vpop.f32.mrf.mxu2 }
 0x4fa   : >> { %v9646_v60 = vpop.eup %9645  ;;  %v4659_v49 = vsel %vm4658_vm14, %v9642_v37, %v4655_v18  ;;  %9651 = vpow2.f32 %v7807_v63  ;;  %v7867_v44 = vmul.f32 -1.442695, %v15986_v0  ;;  %v16000_v30 = vadd.f32 %v15627_v46, %v3676_v2 }
 0x4fb   : >> { %18977 = vst [vmem:[#allocation157_spill] sm:$0xff] %v15992_v21  ;;  %v4664_v45 = vsel %vm15971_vm10, %v4663_v50, %v4659_v49  ;;  %v5103_v16 = vsub.f32 1.0, %v5102_v20  ;;  %v16004_v40 = vadd.f32 1.0, %v9646_v60  ;;  %9653 = vpow2.f32 %v7837_v52 }
 0x4fc   : >> { %v16007_v58 = vmul.f32 %v4664_v45, %v15830_v55   ;;  %v5110_v11 = vand.u32 2147483647, %v15940_v56  ;;  %v5112_v53 = vand.u32 2147483648, %v15940_v56  ;;  %v16012_v41 = vadd.f32 %v15627_v46, %v3751_v15 }
 0x4fd   : >> { %v9648_v22 = vpop.eup %9647  ;;  %v5104_v9 = vmul.f32 %v9644_v7, %v5103_v16  ;;  %vm5106_vm15 = vweird.f32 %v15940_v56  ;;  %vm5107_vm5 = vweird.f32 %v9644_v7  ;;  %9655 = vrcp.f32 %v16004_v40 }
 0x4fe   : >> { %18978 = vst [vmem:[#allocation158_spill] sm:$0xff] %v16007_v58  ;;  %v9650_v6 = vpop.eup %9649  ;;  %v16016_v10 = vadd.f32 1.0, %v9648_v22  ;;  %v7778_v55 = vmul.f32 -1.442695, %v16000_v30  ;;  %9657 = vpow2.f32 %v7867_v44  ;;  %v16022_v59 = vadd.f32 %v15627_v46, %v3826_v29  ;;  %vm5108_vm1 = vmor %vm5106_vm15, %vm5107_vm5  ;;  %v16079_v29 = vpop.f32.mrf.mxu0 }
 0x4ff   : >> { %v5105_v14 = vadd.f32 %v9644_v7, %v5104_v9  ;;  %v16019_v33 = vadd.f32 1.0, %v9650_v6  ;;  %vm5111_vm2 = vcmp.eq.f32.partialorder %v5110_v11, 8.507059e+37  ;;  %v5113_v57 = vor.u32 1.1754944e-38, %v5112_v53  ;;  %v16077_v53 = vpop.f32.mrf.mxu3 }
 0x500   : >> { %v9652_v37 = vpop.eup %9651  ;;  %9659 = vrcp.f32 %v16016_v10  ;;  %v5560_v61 = vand.u32 2147483647, %v16004_v40  ;;  %v5562_v54 = vand.u32 2147483648, %v16004_v40  ;;  %v6010_v19 = vand.u32 2147483647, %v16016_v10 }
 0x501   : >> { %v9654_v56 = vpop.eup %9653  ;;  %v5109_v1 = vsel %vm5108_vm1, %v9644_v7, %v5105_v14  ;;  %9661 = vrcp.f32 %v16019_v33  ;;  %v6012_v23 = vand.u32 2147483648, %v16016_v10  ;;  %v16033_v21 = vadd.f32 1.0, %v9652_v37  ;;  %v16088_v14 = vpop.f32.mrf.mxu1 }
 0x502   : >> { %v5114_v25 = vsel %vm5111_vm2, %v5113_v57, %v5109_v1  ;;  %9663 = vpow2.f32 %v7778_v55  ;;  %v16035_v27 = vadd.f32 1.0, %v9654_v56  ;;  %vm5556_vm3 = vweird.f32 %v16004_v40 }
 0x503   : >> { %v9656_v46 = vpop.eup %9655  ;;  %v16030_v32 = vmul.f32 %v5114_v25, %v15837_v47   ;;  %v4675_v13 = vand.u32 2147483647, %v16019_v33  ;;  %v7808_v5 = vmul.f32 -1.442695, %v16012_v41  ;;  %vm16041_vm0 = vcmp.eq.f32.partialorder %v5560_v61, 8.507059e+37 }
 0x504   : >> { %v5552_v36 = vmul.f32 %v9656_v46, %v16004_v40  ;;  %v9658_v58 = vpop.eup %9657  ;;  %v5563_v47 = vor.u32 1.1754944e-38, %v5562_v54  ;;  %v4677_v42 = vand.u32 2147483648, %v16019_v33  ;;  %9665 = vrcp.f32 %v16033_v21 }
 0x505   : >> { %18979 = vst [vmem:[#allocation159_spill] sm:$0xff] %v16030_v32  ;;  %vm6006_vm6 = vweird.f32 %v16016_v10  ;;  %vm4671_vm4 = vweird.f32 %v16019_v33  ;;  %9667 = vrcp.f32 %v16035_v27  ;;  %vm5557_vm11 = vweird.f32 %v9656_v46 }
 0x506   : >> { %v9660_v17 = vpop.eup %9659  ;;  %v5553_v38 = vsub.f32 1.0, %v5552_v36  ;;  %vm16051_vm7 = vcmp.eq.f32.partialorder %v6010_v19, 8.507059e+37  ;;  %v6013_v8 = vor.u32 1.1754944e-38, %v6012_v23  ;;  %vm16056_vm9 = vcmp.eq.f32.partialorder %v4675_v13, 8.507059e+37  ;;  %vm16069_vm10 = vmor %vm5556_vm3, %vm5557_vm11 }
 0x507   : >> { %v9662_v43 = vpop.eup %9661  ;;  %v6002_v26 = vmul.f32 %v9660_v17, %v16016_v10  ;;  %v5125_v18 = vand.u32 2147483647, %v16033_v21  ;;  %v4678_v50 = vor.u32 1.1754944e-38, %v4677_v42  ;;  %v5127_v20 = vand.u32 2147483648, %v16033_v21 }
 0x508   : >> { %v9664_v62 = vpop.eup %9663  ;;  %v5554_v2 = vmul.f32 %v9656_v46, %v5553_v38  ;;  %v4667_v7 = vmul.f32 %v9662_v43, %v16019_v33  ;;  %v16062_v52 = vadd.f32 1.0, %v9658_v58  ;;  %vm5121_vm8 = vweird.f32 %v16033_v21 }
 0x509   : >> { %v6003_v63 = vsub.f32 1.0, %v6002_v26  ;;  %v5575_v49 = vand.u32 2147483647, %v16035_v27  ;;  %9669 = vpow2.f32 %v7808_v5  ;;  %vm6007_vm12 = vweird.f32 %v9660_v17 }
 0x50a   : >> { %v5555_v15 = vadd.f32 %v9656_v46, %v5554_v2  ;;  %v4668_v60 = vsub.f32 1.0, %v4667_v7  ;;  %v9666_v44 = vpop.eup %9665  ;;  %vm5571_vm13 = vweird.f32 %v16035_v27  ;;  %9671 = vrcp.f32 %v16062_v52  ;;  %vm6008_vm5 = vmor %vm6006_vm6, %vm6007_vm12  ;;  %v3903_v2 = vpop.f32.mrf.mxu3 }
 0x50b   : >> { %v6004_v16 = vmul.f32 %v9660_v17, %v6003_v63  ;;  %v16075_v11 = vadd.f32 1.0, %v9664_v62  ;;  %v9668_v22 = vpop.eup %9667  ;;  %vm4672_vm14 = vweird.f32 %v9662_v43  ;;  %v5117_v6 = vmul.f32 %v9666_v44, %v16033_v21  ;;  %v3681_v7 = vpop.f32.mrf.mxu0 }
 0x50c   : >> { %v5559_v40 = vsel %vm16069_vm10, %v9656_v46, %v5555_v15  ;;  %v4669_v9 = vmul.f32 %v9662_v43, %v4668_v60  ;;  %vm16084_vm15 = vcmp.eq.f32.partialorder %v5125_v18, 8.507059e+37  ;;  %v5128_v56 = vor.u32 1.1754944e-38, %v5127_v20  ;;  %vm4673_vm1 = vmor %vm4671_vm4, %vm4672_vm14 }
 0x50d   : >> { %v5564_v37 = vsel %vm16041_vm0, %v5563_v47, %v5559_v40  ;;  %v6005_v57 = vadd.f32 %v9660_v17, %v6004_v16  ;;  %v5567_v1 = vmul.f32 %v9668_v22, %v16035_v27  ;;  %v5118_v54 = vsub.f32 1.0, %v5117_v6  ;;  %v16150_v16 = vld [vmem:[%s14409_s6] ss:$0 sm:$0xff] }
 0x50e   : >> { %v16094_v58 = vmul.f32 %v5564_v37, %v15842_v28   ;;  %v4670_v61 = vadd.f32 %v9662_v43, %v4669_v9  ;;  %v5577_v25 = vand.u32 2147483648, %v16035_v27  ;;  %9673 = vrcp.f32 %v16075_v11 }
 0x50f   : >> { %v6009_v19 = vsel %vm6008_vm5, %v9660_v17, %v6005_v57  ;;  %v5568_v46 = vsub.f32 1.0, %v5567_v1  ;;  %v7838_v32 = vmul.f32 -1.442695, %v16022_v59  ;;  %v9670_v23 = vpop.eup %9669  ;;  %v5119_v10 = vmul.f32 %v9666_v44, %v5118_v54 }
 0x510   : >> { %18990 = vst [vmem:[#allocation160_spill] sm:$0xff] %v16094_v58  ;;  %v6014_v28 = vsel %vm16051_vm7, %v6013_v8, %v6009_v19  ;;  %v4674_v36 = vsel %vm4673_vm1, %v9662_v43, %v4670_v61  ;;  %vm5122_vm2 = vweird.f32 %v9666_v44  ;;  %v9672_v13 = vpop.eup %9671  ;;  %vm5572_vm3 = vweird.f32 %v9668_v22 }
 0x511   : >> { %v16107_v4 = vmul.f32 %v6014_v28, %v15853_v39   ;;  %v4679_v33 = vsel %vm16056_vm9, %v4678_v50, %v4674_v36  ;;  %v5569_v5 = vmul.f32 %v9668_v22, %v5568_v46  ;;  %v5120_v58 = vadd.f32 %v9666_v44, %v5119_v10  ;;  %vm5123_vm6 = vmor %vm5121_vm8, %vm5122_vm2  ;;  %v3756_v50 = vpop.f32.mrf.mxu1 }
 0x512   : >> { %v16112_v47 = vmul.f32 %v4679_v33, %v15856_v48   ;;  %vm16114_vm0 = vcmp.eq.f32.partialorder %v5575_v49, 8.507059e+37  ;;  %v6017_v42 = vmul.f32 %v9672_v13, %v16062_v52  ;;  %v5578_v17 = vor.u32 1.1754944e-38, %v5577_v25  ;;  %vm5573_vm4 = vmor %vm5571_vm13, %vm5572_vm3 }
 0x513   : >> { %18991 = vst [vmem:[#allocation161_spill] sm:$0xff] %v16107_v4  ;;  %v5570_v39 = vadd.f32 %v9668_v22, %v5569_v5  ;;  %v6025_v38 = vand.u32 2147483647, %v16062_v52  ;;  %v6027_v43 = vand.u32 2147483648, %v16062_v52  ;;  %v5124_v26 = vsel %vm5123_vm6, %v9666_v44, %v5120_v58  ;;  %v3828_v4 = vpop.f32.mrf.mxu2  ;;  %v3683_v28 = vpop.f32.mrf.mxu0 }
 0x514   : >> { %18992 = vst [vmem:[#allocation162_spill] sm:$0xff] %v16112_v47  ;;  %v6018_v48 = vsub.f32 1.0, %v6017_v42  ;;  %v16125_v47 = vadd.f32 1.0, %v9670_v23  ;;  %9675 = vpow2.f32 %v7838_v32  ;;  %v9674_v8 = vpop.eup %9673  ;;  %v5129_v21 = vsel %vm16084_vm15, %v5128_v56, %v5124_v26  ;;  %v3906_v23 = vpop.f32.mrf.mxu3 }
 0x515   : >> { %v5574_v62 = vsel %vm5573_vm4, %v9668_v22, %v5570_v39  ;;  %vm6021_vm11 = vweird.f32 %v16062_v52  ;;  %vm6022_vm7 = vweird.f32 %v9672_v13  ;;  %v16131_v34 = vmul.f32 %v5129_v21, %v15980_v35  }
 0x516   : >> { %v5579_v27 = vsel %vm16114_vm0, %v5578_v17, %v5574_v62  ;;  %v6019_v18 = vmul.f32 %v9672_v13, %v6018_v48  ;;  %v4682_v63 = vmul.f32 %v9674_v8, %v16075_v11  ;;  %vm16139_vm9 = vcmp.eq.f32.partialorder %v6025_v38, 8.507059e+37  ;;  %vm6023_vm8 = vmor %vm6021_vm11, %vm6022_vm7 }
 0x517   : >> { %18995 = vst [vmem:[#allocation163_spill] sm:$0xff] %v16131_v34  ;;  %v16137_v20 = vmul.f32 %v5579_v27, %v15983_v3   ;;  %v6028_v60 = vor.u32 1.1754944e-38, %v6027_v43  ;;  %9677 = vrcp.f32 %v16125_v47  ;;  %v4690_v44 = vand.u32 2147483647, %v16075_v11 }
 0x518   : >> { %v6020_v49 = vadd.f32 %v9672_v13, %v6019_v18  ;;  %v4683_v35 = vsub.f32 1.0, %v4682_v63  ;;  %v4692_v45 = vand.u32 2147483648, %v16075_v11  ;;  %v16154_v3 = vadd.f32 %v16150_v16, %v16077_v53 }
 0x519   : >> { %18996 = vst [vmem:[#allocation164_spill] sm:$0xff] %v16137_v20  ;;  %v16158_v22 = vadd.f32 %v16150_v16, %v16079_v29  ;;  %v16162_v40 = vadd.f32 %v16150_v16, %v16088_v14  ;;  %v16165_v9 = vadd.f32 %v16150_v16, %v3828_v4  ;;  %vm4686_vm10 = vweird.f32 %v16075_v11 }
 0x51a   : >> { %v9676_v6 = vpop.eup %9675  ;;  %v6024_v52 = vsel %vm6023_vm8, %v9672_v13, %v6020_v49  ;;  %v4684_v55 = vmul.f32 %v9674_v8, %v4683_v35  ;;  %vm4687_vm12 = vweird.f32 %v9674_v8  ;;  %v7868_v29 = vmul.f32 -1.442695, %v16154_v3  ;;  %v3758_v13 = vpop.f32.mrf.mxu1 }
 0x51b   : >> { %v6029_v53 = vsel %vm16139_vm9, %v6028_v60, %v6024_v52  ;;  %v16170_v37 = vadd.f32 1.0, %v9676_v6  ;;  %v7779_v57 = vmul.f32 -1.442695, %v16158_v22  ;;  %vm4691_vm13 = vcmp.eq.f32.partialorder %v4690_v44, 8.507059e+37  ;;  %vm4688_vm14 = vmor %vm4686_vm10, %vm4687_vm12 }
 0x51c   : >> { %v16175_v46 = vmul.f32 %v6029_v53, %v15986_v0   ;;  %v4685_v14 = vadd.f32 %v9674_v8, %v4684_v55  ;;  %v7809_v56 = vmul.f32 -1.442695, %v16162_v40  ;;  %v4693_v11 = vor.u32 1.1754944e-38, %v4692_v45  ;;  %v3831_v0 = vpop.f32.mrf.mxu2 }
 0x51d   : >> { %v9678_v1 = vpop.eup %9677  ;;  %vm5136_vm15 = vweird.f32 %v16125_v47  ;;  %9679 = vrcp.f32 %v16170_v37  ;;  %v7839_v61 = vmul.f32 -1.442695, %v16165_v9  ;;  %v5140_v19 = vand.u32 2147483647, %v16125_v47 }
 0x51e   : >> { %18999 = vst [vmem:[#allocation165_spill] sm:$0xff] %v16175_v46  ;;  %v4689_v54 = vsel %vm4688_vm14, %v9674_v8, %v4685_v14  ;;  %v5132_v25 = vmul.f32 %v9678_v1, %v16125_v47  ;;  %9681 = vpow2.f32 %v7868_v29  ;;  %vm5137_vm5 = vweird.f32 %v9678_v1 }
 0x51f   : >> { %v4694_v46 = vsel %vm4691_vm13, %v4693_v11, %v4689_v54  ;;  %v5142_v32 = vand.u32 2147483648, %v16125_v47  ;;  %9683 = vpow2.f32 %v7779_v57  ;;  %v16188_v10 = vadd.f32 %v16150_v16, %v3903_v2  ;;  %vm5138_vm1 = vmor %vm5136_vm15, %vm5137_vm5 }
 0x520   : >> { %v16185_v4 = vmul.f32 %v4694_v46, %v16000_v30   ;;  %v5133_v36 = vsub.f32 1.0, %v5132_v25  ;;  %9685 = vpow2.f32 %v7809_v56  ;;  %v16191_v33 = vadd.f32 %v16150_v16, %v3681_v7 }
 0x521   : >> { %9687 = vpow2.f32 %v7839_v61  ;;  %v16194_v5 = vadd.f32 %v16150_v16, %v3756_v50  ;;  %v16197_v58 = vadd.f32 %v16150_v16, %v3831_v0  ;;  %v7869_v30 = vmul.f32 -1.442695, %v16188_v10 }
 0x522   : >> { %19000 = vst [vmem:[#allocation166_spill] sm:$0xff] %v16185_v4  ;;  %v5134_v24 = vmul.f32 %v9678_v1, %v5133_v36  ;;  %v16201_v42 = vadd.f32 %v16150_v16, %v3906_v23  ;;  %v16204_v39 = vadd.f32 %v16150_v16, %v3683_v28  ;;  %v16207_v38 = vadd.f32 %v16150_v16, %v3758_v13 }
 0x523   : >> { %v9680_v17 = vpop.eup %9679  ;;  %v5143_v48 = vor.u32 1.1754944e-38, %v5142_v32  ;;  %9689 = vpow2.f32 %v7869_v30  ;;  %v5590_v21 = vand.u32 2147483647, %v16170_v37  ;;  %v5592_v62 = vand.u32 2147483648, %v16170_v37 }
 0x524   : >> { %v9682_v43 = vpop.eup %9681  ;;  %v5135_v26 = vadd.f32 %v9678_v1, %v5134_v24  ;;  %v5582_v4 = vmul.f32 %v9680_v17, %v16170_v37  ;;  %v7780_v7 = vmul.f32 -1.442695, %v16191_v33  ;;  %vm5141_vm2 = vcmp.eq.f32.partialorder %v5140_v19, 8.507059e+37 }
 0x525   : >> { %v9684_v8 = vpop.eup %9683  ;;  %v16215_v2 = vadd.f32 1.0, %v9682_v43  ;;  %v7810_v47 = vmul.f32 -1.442695, %v16194_v5  ;;  %vm5587_vm3 = vweird.f32 %v9680_v17  ;;  %vm5586_vm0 = vweird.f32 %v16170_v37 }
 0x526   : >> { %v9686_v34 = vpop.eup %9685  ;;  %v5139_v27 = vsel %vm5138_vm1, %v9678_v1, %v5135_v26  ;;  %v5583_v18 = vsub.f32 1.0, %v5582_v4  ;;  %v16218_v63 = vadd.f32 1.0, %v9684_v8  ;;  %vm16227_vm6 = vcmp.eq.f32.partialorder %v5590_v21, 8.507059e+37  ;;  %vm5588_vm4 = vmor %vm5586_vm0, %vm5587_vm3 }
 0x527   : >> { %v9688_v50 = vpop.eup %9687  ;;  %v5144_v20 = vsel %vm5141_vm2, %v5143_v48, %v5139_v27  ;;  %9691 = vrcp.f32 %v16215_v2  ;;  %v5593_v49 = vor.u32 1.1754944e-38, %v5592_v62  ;;  %v6040_v45 = vand.u32 2147483647, %v16215_v2 }
 0x528   : >> { %v16223_v30 = vmul.f32 %v5144_v20, %v16012_v41   ;;  %v5584_v15 = vmul.f32 %v9680_v17, %v5583_v18  ;;  %9693 = vrcp.f32 %v16218_v63  ;;  %v16232_v6 = vadd.f32 1.0, %v9686_v34 }
 0x529   : >> { %9695 = vpow2.f32 %v7780_v7  ;;  %v9690_v35 = vpop.eup %9689  ;;  %v16234_v41 = vadd.f32 1.0, %v9688_v50  ;;  %v6042_v52 = vand.u32 2147483648, %v16215_v2  ;;  %v7840_v55 = vmul.f32 -1.442695, %v16197_v58 }
 0x52a   : >> { %19001 = vst [vmem:[#allocation167_spill] sm:$0xff] %v16223_v30  ;;  %v5585_v44 = vadd.f32 %v9680_v17, %v5584_v15  ;;  %9697 = vpow2.f32 %v7810_v47  ;;  %v16239_v53 = vmul.f32 -1.442695, %v16201_v42  ;;  %v4705_v29 = vand.u32 2147483647, %v16218_v63 }
 0x52b   : >> { %9699 = vrcp.f32 %v16232_v6  ;;  %v16243_v57 = vadd.f32 1.0, %v9690_v35  ;;  %v4707_v1 = vand.u32 2147483648, %v16218_v63  ;;  %v16250_v11 = vmul.f32 -1.442695, %v16204_v39 }
 0x52c   : >> { %v5589_v37 = vsel %vm5588_vm4, %v9680_v17, %v5585_v44  ;;  %9701 = vrcp.f32 %v16234_v41  ;;  %vm6036_vm11 = vweird.f32 %v16215_v2  ;;  %vm16257_vm7 = vcmp.eq.f32.partialorder %v6040_v45, 8.507059e+37 }
 0x52d   : >> { %v9692_v14 = vpop.eup %9691  ;;  %v5594_v56 = vsel %vm16227_vm6, %v5593_v49, %v5589_v37  ;;  %vm4701_vm9 = vweird.f32 %v16218_v63  ;;  %v5155_v46 = vand.u32 2147483647, %v16232_v6  ;;  %v5157_v32 = vand.u32 2147483648, %v16232_v6 }
 0x52e   : >> { %v9694_v61 = vpop.eup %9693  ;;  %v16253_v37 = vmul.f32 %v5594_v56, %v16022_v59   ;;  %v6032_v54 = vmul.f32 %v9692_v14, %v16215_v2  ;;  %v6043_v59 = vor.u32 1.1754944e-38, %v6042_v52  ;;  %vm16265_vm8 = vcmp.eq.f32.partialorder %v4705_v29, 8.507059e+37 }
 0x52f   : >> { %v9696_v19 = vpop.eup %9695  ;;  %v4697_v0 = vmul.f32 %v9694_v61, %v16218_v63  ;;  %9703 = vrcp.f32 %v16243_v57  ;;  %v4708_v24 = vor.u32 1.1754944e-38, %v4707_v1  ;;  %vm5151_vm10 = vweird.f32 %v16232_v6 }
 0x530   : >> { %19004 = vst [vmem:[#allocation168_spill] sm:$0xff] %v16253_v37  ;;  %v6033_v23 = vsub.f32 1.0, %v6032_v54  ;;  %v9698_v36 = vpop.eup %9697  ;;  %9705 = vpow2.f32 %v7840_v55  ;;  %vm6037_vm12 = vweird.f32 %v9692_v14  ;;  %vm4702_vm13 = vweird.f32 %v9694_v61 }
 0x531   : >> { %v4698_v13 = vsub.f32 1.0, %v4697_v0  ;;  %v9700_v30 = vpop.eup %9699  ;;  %vm5601_vm14 = vweird.f32 %v16234_v41  ;;  %v16272_v43 = vadd.f32 1.0, %v9696_v19  ;;  %vm16275_vm15 = vcmp.eq.f32.partialorder %v5155_v46, 8.507059e+37  ;;  %vm6038_vm5 = vmor %vm6036_vm11, %vm6037_vm12 }
 0x532   : >> { %v6034_v17 = vmul.f32 %v9692_v14, %v6033_v23  ;;  %v9702_v26 = vpop.eup %9701  ;;  %v5147_v4 = vmul.f32 %v9700_v30, %v16232_v6  ;;  %v5158_v21 = vor.u32 1.1754944e-38, %v5157_v32  ;;  %v5605_v62 = vand.u32 2147483647, %v16234_v41  ;;  %vm4703_vm2 = vmor %vm4701_vm9, %vm4702_vm13  ;;  %v3833_v23 = vpop.f32.mrf.mxu2 }
 0x533   : >> { %v4699_v48 = vmul.f32 %v9694_v61, %v4698_v13  ;;  %v5597_v34 = vmul.f32 %v9702_v26, %v16234_v41  ;;  %v5607_v27 = vand.u32 2147483648, %v16234_v41  ;;  %v6055_v18 = vand.u32 2147483647, %v16243_v57 }
 0x534   : >> { %v6035_v7 = vadd.f32 %v9692_v14, %v6034_v17  ;;  %v5148_v20 = vsub.f32 1.0, %v5147_v4  ;;  %vm6051_vm1 = vweird.f32 %v16243_v57  ;;  %v6057_v47 = vand.u32 2147483648, %v16243_v57 }
 0x535   : >> { %v4700_v50 = vadd.f32 %v9694_v61, %v4699_v48  ;;  %9707 = vrcp.f32 %v16272_v43  ;;  %v9704_v15 = vpop.eup %9703  ;;  %vm5152_vm3 = vweird.f32 %v9700_v30  ;;  %v5598_v49 = vsub.f32 1.0, %v5597_v34 }
 0x536   : >> { %v6039_v60 = vsel %vm6038_vm5, %v9692_v14, %v6035_v7  ;;  %v16291_v35 = vadd.f32 1.0, %v9698_v36  ;;  %v9706_v2 = vpop.eup %9705  ;;  %v5149_v52 = vmul.f32 %v9700_v30, %v5148_v20  ;;  %v6047_v55 = vmul.f32 %v9704_v15, %v16243_v57  ;;  %vm5153_vm4 = vmor %vm5151_vm10, %vm5152_vm3  ;;  %v3908_v57 = vpop.f32.mrf.mxu3 }
 0x537   : >> { %v6044_v44 = vsel %vm16257_vm7, %v6043_v59, %v6039_v60  ;;  %v4704_v45 = vsel %vm4703_vm2, %v9694_v61, %v4700_v50  ;;  %v5599_v63 = vmul.f32 %v9702_v26, %v5598_v49  ;;  %vm5602_vm0 = vweird.f32 %v9702_v26 }
 0x538   : >> { %v16297_v29 = vmul.f32 %v6044_v44, %v16154_v3   ;;  %v4709_v37 = vsel %vm16265_vm8, %v4708_v24, %v4704_v45  ;;  %v5150_v14 = vadd.f32 %v9700_v30, %v5149_v52  ;;  %vm16304_vm6 = vcmp.eq.f32.partialorder %v5605_v62, 8.507059e+37  ;;  %vm5603_vm7 = vmor %vm5601_vm14, %vm5602_vm0 }
 0x539   : >> { %v16302_v46 = vmul.f32 %v4709_v37, %v16158_v22   ;;  %v6048_v1 = vsub.f32 1.0, %v6047_v55  ;;  %v5600_v3 = vadd.f32 %v9702_v26, %v5599_v63  ;;  %vm16311_vm11 = vcmp.eq.f32.partialorder %v6055_v18, 8.507059e+37 }
 0x53a   : >> { %19011 = vst [vmem:[#allocation169_spill] sm:$0xff] %v16297_v29  ;;  %v5608_v29 = vor.u32 1.1754944e-38, %v5607_v27  ;;  %9709 = vrcp.f32 %v16291_v35  ;;  %v5154_v54 = vsel %vm5153_vm4, %v9700_v30, %v5150_v14  ;;  %vm6052_vm9 = vweird.f32 %v9704_v15 }
 0x53b   : >> { %19012 = vst [vmem:[#allocation170_spill] sm:$0xff] %v16302_v46  ;;  %v9708_v22 = vpop.eup %9707  ;;  %v6049_v25 = vmul.f32 %v9704_v15, %v6048_v1  ;;  %v6058_v19 = vor.u32 1.1754944e-38, %v6057_v47  ;;  %v5159_v6 = vsel %vm16275_vm15, %v5158_v21, %v5154_v54  ;;  %v5604_v0 = vsel %vm5603_vm7, %v9702_v26, %v5600_v3  ;;  %vm6053_vm8 = vmor %vm6051_vm1, %vm6052_vm9  ;;  %v3686_v21 = vpop.f32.mrf.mxu0 }
 0x53c   : >> { %v4712_v46 = vmul.f32 %v9708_v22, %v16272_v43  ;;  %v4720_v32 = vand.u32 2147483647, %v16272_v43  ;;  %v16323_v59 = vmul.f32 %v5159_v6, %v16162_v40   ;;  %v5609_v28 = vsel %vm16304_vm6, %v5608_v29, %v5604_v0  ;;  %v3836_v54 = vpop.f32.mrf.mxu2 }
 0x53d   : >> { %v6050_v41 = vadd.f32 %v9704_v15, %v6049_v25  ;;  %v4722_v36 = vand.u32 2147483648, %v16272_v43  ;;  %v16329_v50 = vmul.f32 %v5609_v28, %v16165_v9   ;;  %vm4716_vm10 = vweird.f32 %v16272_v43 }
 0x53e   : >> { %19017 = vst [vmem:[#allocation171_spill] sm:$0xff] %v16323_v59  ;;  %v4713_v13 = vsub.f32 1.0, %v4712_v46  ;;  %v16334_v24 = vadd.f32 1.0, %v9706_v2  ;;  %9711 = vpow2.f32 %v16239_v53  ;;  %v7811_v40 = vmul.f32 -1.442695, %v16207_v38 }
 0x53f   : >> { %19018 = vst [vmem:[#allocation172_spill] sm:$0xff] %v16329_v50  ;;  %v6054_v30 = vsel %vm6053_vm8, %v9704_v15, %v6050_v41  ;;  %v16339_v17 = vadd.f32 %v16150_v16, %v3833_v23  ;;  %vm4717_vm12 = vweird.f32 %v9708_v22  ;;  %vm16347_vm13 = vcmp.eq.f32.partialorder %v4720_v32, 8.507059e+37 }
 0x540   : >> { %v9710_v26 = vpop.eup %9709  ;;  %v6059_v9 = vsel %vm16311_vm11, %v6058_v19, %v6054_v30  ;;  %v4714_v48 = vmul.f32 %v9708_v22, %v4713_v13  ;;  %9713 = vrcp.f32 %v16334_v24  ;;  %v4723_v53 = vor.u32 1.1754944e-38, %v4722_v36  ;;  %vm4718_vm15 = vmor %vm4716_vm10, %vm4717_vm12 }
 0x541   : >> { %v16345_v25 = vmul.f32 %v6059_v9, %v16188_v10   ;;  %v5162_v8 = vmul.f32 %v9710_v26, %v16291_v35  ;;  %vm5166_vm14 = vweird.f32 %v16291_v35  ;;  %9715 = vpow2.f32 %v16250_v11 }
 0x542   : >> { %v4715_v62 = vadd.f32 %v9708_v22, %v4714_v48  ;;  %v7841_v7 = vmul.f32 -1.442695, %v16339_v17  ;;  %v5170_v34 = vand.u32 2147483647, %v16291_v35  ;;  %9717 = vpow2.f32 %v7811_v40 }
 0x543   : >> { %19019 = vst [vmem:[#allocation173_spill] sm:$0xff] %v16345_v25  ;;  %v5163_v10 = vsub.f32 1.0, %v5162_v8  ;;  %v16359_v27 = vadd.f32 %v16150_v16, %v3908_v57  ;;  %v5172_v50 = vand.u32 2147483648, %v16291_v35  ;;  %v16363_v20 = vadd.f32 %v16150_v16, %v3686_v21  ;;  %v3761_v35 = vpop.f32.mrf.mxu1 }
 0x544   : >> { %v4719_v18 = vsel %vm4718_vm15, %v9708_v22, %v4715_v62  ;;  %9719 = vpow2.f32 %v7841_v7  ;;  %v9712_v11 = vpop.eup %9711  ;;  %vm5167_vm5 = vweird.f32 %v9710_v26  ;;  %vm5171_vm1 = vcmp.eq.f32.partialorder %v5170_v34, 8.507059e+37 }
 0x545   : >> { %v4724_v47 = vsel %vm16347_vm13, %v4723_v53, %v4719_v18  ;;  %v5164_v43 = vmul.f32 %v9710_v26, %v5163_v10  ;;  %v7871_v15 = vmul.f32 -1.442695, %v16359_v27  ;;  %v16371_v49 = vadd.f32 1.0, %v9712_v11  ;;  %vm5168_vm2 = vmor %vm5166_vm14, %vm5167_vm5 }
 0x546   : >> { %v9714_v60 = vpop.eup %9713  ;;  %v16369_v30 = vmul.f32 %v4724_v47, %v16191_v33   ;;  %v7782_v2 = vmul.f32 -1.442695, %v16363_v20  ;;  %v5173_v55 = vor.u32 1.1754944e-38, %v5172_v50  ;;  %v5620_v37 = vand.u32 2147483647, %v16334_v24 }
 0x547   : >> { %v5165_v44 = vadd.f32 %v9710_v26, %v5164_v43  ;;  %v5612_v45 = vmul.f32 %v9714_v60, %v16334_v24  ;;  %9721 = vpow2.f32 %v7871_v15  ;;  %v9716_v52 = vpop.eup %9715  ;;  %v5622_v63 = vand.u32 2147483648, %v16334_v24 }
 0x548   : >> { %19022 = vst [vmem:[#allocation174_spill] sm:$0xff] %v16369_v30  ;;  %9723 = vrcp.f32 %v16371_v49  ;;  %v9718_v33 = vpop.eup %9717  ;;  %vm5617_vm3 = vweird.f32 %v9714_v60  ;;  %v16380_v1 = vadd.f32 1.0, %v9716_v52  ;;  %v6070_v61 = vand.u32 2147483647, %v16371_v49 }
 0x549   : >> { %v5169_v14 = vsel %vm5168_vm2, %v9710_v26, %v5165_v44  ;;  %v5613_v56 = vsub.f32 1.0, %v5612_v45  ;;  %v16383_v22 = vadd.f32 1.0, %v9718_v33  ;;  %9725 = vpow2.f32 %v7782_v2 }
 0x54a   : >> { %v9720_v3 = vpop.eup %9719  ;;  %v5174_v29 = vsel %vm5171_vm1, %v5173_v55, %v5169_v14  ;;  %v6072_v19 = vand.u32 2147483648, %v16371_v49  ;;  %9727 = vrcp.f32 %v16380_v1  ;;  %vm5616_vm0 = vweird.f32 %v16334_v24 }
 0x54b   : >> { %v16386_v23 = vmul.f32 %v5174_v29, %v16194_v5   ;;  %v5614_v25 = vmul.f32 %v9714_v60, %v5613_v56  ;;  %vm16391_vm6 = vcmp.eq.f32.partialorder %v5620_v37, 8.507059e+37  ;;  %v5623_v0 = vor.u32 1.1754944e-38, %v5622_v63  ;;  %vm5618_vm4 = vmor %vm5616_vm0, %vm5617_vm3  ;;  %v3911_v56 = vpop.f32.mrf.mxu3 }
 0x54c   : >> { %9729 = vrcp.f32 %v16383_v22  ;;  %v16396_v59 = vadd.f32 1.0, %v9720_v3  ;;  %v16399_v5 = vadd.f32 %v16150_v16, %v3761_v35  ;;  %vm6066_vm11 = vweird.f32 %v16371_v49  ;;  %v3688_v3 = vpop.f32.mrf.mxu0 }
 0x54d   : >> { %19023 = vst [vmem:[#allocation175_spill] sm:$0xff] %v16386_v23  ;;  %v9722_v46 = vpop.eup %9721  ;;  %v5615_v32 = vadd.f32 %v9714_v60, %v5614_v25  ;;  %v16402_v23 = vadd.f32 %v16150_v16, %v3836_v54  ;;  %v4735_v41 = vand.u32 2147483647, %v16380_v1  ;;  %v4737_v36 = vand.u32 2147483648, %v16380_v1 }
 0x54e   : >> { %v9724_v28 = vpop.eup %9723  ;;  %v16408_v13 = vadd.f32 1.0, %v9722_v46  ;;  %vm16411_vm7 = vcmp.eq.f32.partialorder %v6070_v61, 8.507059e+37  ;;  %v6073_v26 = vor.u32 1.1754944e-38, %v6072_v19  ;;  %vm4731_vm9 = vweird.f32 %v16380_v1 }
 0x54f   : >> { %v5619_v24 = vsel %vm5618_vm4, %v9714_v60, %v5615_v32  ;;  %v6062_v30 = vmul.f32 %v9724_v28, %v16371_v49  ;;  %v9726_v9 = vpop.eup %9725  ;;  %v5185_v57 = vand.u32 2147483647, %v16383_v22  ;;  %v5187_v4 = vand.u32 2147483648, %v16383_v22 }
 0x550   : >> { %v5624_v48 = vsel %vm16391_vm6, %v5623_v0, %v5619_v24  ;;  %9731 = vrcp.f32 %v16396_v59  ;;  %v9728_v53 = vpop.eup %9727  ;;  %vm5181_vm8 = vweird.f32 %v16383_v22  ;;  %v7812_v62 = vmul.f32 -1.442695, %v16399_v5 }
 0x551   : >> { %v16422_v8 = vmul.f32 %v5624_v48, %v16197_v58   ;;  %v6063_v21 = vsub.f32 1.0, %v6062_v30  ;;  %v4727_v10 = vmul.f32 %v9728_v53, %v16380_v1  ;;  %vm16427_vm10 = vcmp.eq.f32.partialorder %v4735_v41, 8.507059e+37 }
 0x552   : >> { %v9730_v7 = vpop.eup %9729  ;;  %v4738_v18 = vor.u32 1.1754944e-38, %v4737_v36  ;;  %9733 = vrcp.f32 %v16408_v13  ;;  %vm6067_vm12 = vweird.f32 %v9724_v28  ;;  %v5635_v11 = vand.u32 2147483647, %v16396_v59 }
 0x553   : >> { %19028 = vst [vmem:[#allocation176_spill] sm:$0xff] %v16422_v8  ;;  %v6064_v50 = vmul.f32 %v9724_v28, %v6063_v21  ;;  %v5177_v58 = vmul.f32 %v9730_v7, %v16383_v22  ;;  %v4728_v47 = vsub.f32 1.0, %v4727_v10  ;;  %vm16434_vm13 = vcmp.eq.f32.partialorder %v5185_v57, 8.507059e+37  ;;  %vm6068_vm14 = vmor %vm6066_vm11, %vm6067_vm12 }
 0x554   : >> { %v5188_v15 = vor.u32 1.1754944e-38, %v5187_v4  ;;  %v5637_v60 = vand.u32 2147483648, %v16396_v59  ;;  %v16439_v45 = vadd.f32 1.0, %v9726_v9  ;;  %9735 = vpow2.f32 %v7812_v62 }
 0x555   : >> { %v6065_v2 = vadd.f32 %v9724_v28, %v6064_v50  ;;  %v5178_v44 = vsub.f32 1.0, %v5177_v58  ;;  %v4729_v55 = vmul.f32 %v9728_v53, %v4728_v47  ;;  %vm4732_vm15 = vweird.f32 %v9728_v53  ;;  %v3913_v50 = vpop.f32.mrf.mxu3  ;;  %v3691_v58 = vpop.f32.mrf.mxu0 }
 0x556   : >> { %v9732_v52 = vpop.eup %9731  ;;  %vm5182_vm5 = vweird.f32 %v9730_v7  ;;  %vm5631_vm1 = vweird.f32 %v16396_v59  ;;  %vm16445_vm2 = vcmp.eq.f32.partialorder %v5635_v11, 8.507059e+37  ;;  %vm6081_vm3 = vweird.f32 %v16408_v13  ;;  %vm4733_vm0 = vmor %vm4731_vm9, %vm4732_vm15 }
 0x557   : >> { %v6069_v37 = vsel %vm6068_vm14, %v9724_v28, %v6065_v2  ;;  %v5179_v63 = vmul.f32 %v9730_v7, %v5178_v44  ;;  %v5627_v33 = vmul.f32 %v9732_v52, %v16396_v59  ;;  %v4730_v61 = vadd.f32 %v9728_v53, %v4729_v55  ;;  %vm5183_vm6 = vmor %vm5181_vm8, %vm5182_vm5 }
 0x558   : >> { %v9734_v29 = vpop.eup %9733  ;;  %v6074_v49 = vsel %vm16411_vm7, %v6073_v26, %v6069_v37  ;;  %v5638_v35 = vor.u32 1.1754944e-38, %v5637_v60  ;;  %9737 = vrcp.f32 %v16439_v45  ;;  %vm5632_vm4 = vweird.f32 %v9732_v52 }
 0x559   : >> { %v16454_v19 = vmul.f32 %v6074_v49, %v16201_v42   ;;  %v5180_v54 = vadd.f32 %v9730_v7, %v5179_v63  ;;  %v5628_v25 = vsub.f32 1.0, %v5627_v33  ;;  %v6077_v6 = vmul.f32 %v9734_v29, %v16408_v13  ;;  %v3763_v42 = vpop.f32.mrf.mxu1  ;;  %vm5633_vm7 = vmor %vm5631_vm1, %vm5632_vm4 }
 0x55a   : >> { %v4734_v0 = vsel %vm4733_vm0, %v9728_v53, %v4730_v61  ;;  %v6085_v46 = vand.u32 2147483647, %v16408_v13  ;;  %v7842_v32 = vmul.f32 -1.442695, %v16402_v23  ;;  %vm6082_vm11 = vweird.f32 %v9734_v29 }
 0x55b   : >> { %19035 = vst [vmem:[#allocation177_spill] sm:$0xff] %v16454_v19  ;;  %v9736_v19 = vpop.eup %9735  ;;  %v4739_v1 = vsel %vm16427_vm10, %v4738_v18, %v4734_v0  ;;  %v5184_v28 = vsel %vm5183_vm6, %v9730_v7, %v5180_v54  ;;  %v5629_v41 = vmul.f32 %v9732_v52, %v5628_v25  ;;  %v6078_v36 = vsub.f32 1.0, %v6077_v6  ;;  %vm6083_vm8 = vmor %vm6081_vm3, %vm6082_vm11  ;;  %v3838_v7 = vpop.f32.mrf.mxu2 }
 0x55c   : >> { %v16468_v24 = vmul.f32 %v4739_v1, %v16204_v39   ;;  %v5189_v22 = vsel %vm16434_vm13, %v5188_v15, %v5184_v28  ;;  %v6087_v30 = vand.u32 2147483648, %v16408_v13  ;;  %v16476_v9 = vadd.f32 1.0, %v9736_v19 }
 0x55d   : >> { %v16474_v62 = vmul.f32 %v5189_v22, %v16207_v38   ;;  %v5630_v40 = vadd.f32 %v9732_v52, %v5629_v41  ;;  %v6079_v26 = vmul.f32 %v9734_v29, %v6078_v36  ;;  %vm16481_vm9 = vcmp.eq.f32.partialorder %v6085_v46, 8.507059e+37 }
 0x55e   : >> { %19036 = vst [vmem:[#allocation178_spill] sm:$0xff] %v16468_v24  ;;  %v9738_v48 = vpop.eup %9737  ;;  %9739 = vpow2.f32 %v7842_v32  ;;  %v16486_v57 = vadd.f32 %v16150_v16, %v3911_v56  ;;  %v16489_v38 = vadd.f32 %v16150_v16, %v3688_v3  ;;  %v16493_v21 = vadd.f32 %v16150_v16, %v3763_v42  ;;  %v3916_v24 = vpop.f32.mrf.mxu3 }
 0x55f   : >> { %19037 = vst [vmem:[#allocation179_spill] sm:$0xff] %v16474_v62  ;;  %v5634_v4 = vsel %vm5633_vm7, %v9732_v52, %v5630_v40  ;;  %v6080_v53 = vadd.f32 %v9734_v29, %v6079_v26  ;;  %v4742_v8 = vmul.f32 %v9738_v48, %v16439_v45  ;;  %v6088_v62 = vor.u32 1.1754944e-38, %v6087_v30 }
 0x560   : >> { %v5639_v59 = vsel %vm16445_vm2, %v5638_v35, %v5634_v4  ;;  %vm4746_vm10 = vweird.f32 %v16439_v45  ;;  %9741 = vrcp.f32 %v16476_v9  ;;  %v4750_v18 = vand.u32 2147483647, %v16439_v45 }
 0x561   : >> { %v16503_v33 = vmul.f32 %v5639_v59, %v16339_v17   ;;  %v6084_v10 = vsel %vm6083_vm8, %v9734_v29, %v6080_v53  ;;  %v4743_v34 = vsub.f32 1.0, %v4742_v8  ;;  %v4752_v13 = vand.u32 2147483648, %v16439_v45  ;;  %v3766_v55 = vpop.f32.mrf.mxu1 }
 0x562   : >> { %v6089_v11 = vsel %vm16481_vm9, %v6088_v62, %v6084_v10  ;;  %v7872_v47 = vmul.f32 -1.442695, %v16486_v57  ;;  %v7783_v43 = vmul.f32 -1.442695, %v16489_v38  ;;  %vm4747_vm12 = vweird.f32 %v9738_v48 }
 0x563   : >> { %19040 = vst [vmem:[#allocation180_spill] sm:$0xff] %v16503_v33  ;;  %v16512_v61 = vmul.f32 %v6089_v11, %v16359_v27   ;;  %v4744_v17 = vmul.f32 %v9738_v48, %v4743_v34  ;;  %v7813_v15 = vmul.f32 -1.442695, %v16493_v21  ;;  %v16516_v2 = vadd.f32 %v16150_v16, %v3838_v7  ;;  %vm4748_vm13 = vmor %vm4746_vm10, %vm4747_vm12  ;;  %v3841_v28 = vpop.f32.mrf.mxu2  ;;  %v3693_v7 = vpop.f32.mrf.mxu0 }
 0x564   : >> { %v9740_v60 = vpop.eup %9739  ;;  %9743 = vpow2.f32 %v7872_v47  ;;  %v16519_v44 = vadd.f32 %v16150_v16, %v3913_v50  ;;  %v16522_v52 = vadd.f32 %v16150_v16, %v3691_v58  ;;  %vm4751_vm14 = vcmp.eq.f32.partialorder %v4750_v18, 8.507059e+37 }
 0x565   : >> { %19041 = vst [vmem:[#allocation181_spill] sm:$0xff] %v16512_v61  ;;  %v4745_v37 = vadd.f32 %v9738_v48, %v4744_v17  ;;  %v16524_v63 = vadd.f32 1.0, %v9740_v60  ;;  %9745 = vpow2.f32 %v7783_v43  ;;  %v4753_v33 = vor.u32 1.1754944e-38, %v4752_v13 }
 0x566   : >> { %v9742_v27 = vpop.eup %9741  ;;  %v7843_v14 = vmul.f32 -1.442695, %v16516_v2  ;;  %v7873_v56 = vmul.f32 -1.442695, %v16519_v44  ;;  %v16533_v49 = vadd.f32 %v16150_v16, %v3766_v55  ;;  %v5200_v35 = vand.u32 2147483647, %v16476_v9 }
 0x567   : >> { %v4749_v3 = vsel %vm4748_vm13, %v9738_v48, %v4745_v37  ;;  %v5192_v29 = vmul.f32 %v9742_v27, %v16476_v9  ;;  %9747 = vrcp.f32 %v16524_v63  ;;  %v7784_v45 = vmul.f32 -1.442695, %v16522_v52 }
 0x568   : >> { %v4754_v61 = vsel %vm4751_vm14, %v4753_v33, %v4749_v3  ;;  %9749 = vpow2.f32 %v7813_v15  ;;  %v5202_v6 = vand.u32 2147483648, %v16476_v9  ;;  %vm5196_vm15 = vweird.f32 %v16476_v9 }
 0x569   : >> { %v16538_v54 = vmul.f32 %v4754_v61, %v16363_v20   ;;  %v5193_v25 = vsub.f32 1.0, %v5192_v29  ;;  %9751 = vpow2.f32 %v7843_v14  ;;  %v5650_v46 = vand.u32 2147483647, %v16524_v63 }
 0x56a   : >> { %v9744_v0 = vpop.eup %9743  ;;  %v5652_v32 = vand.u32 2147483648, %v16524_v63  ;;  %9753 = vpow2.f32 %v7873_v56  ;;  %vm5197_vm5 = vweird.f32 %v9742_v27  ;;  %v7814_v20 = vmul.f32 -1.442695, %v16533_v49 }
 0x56b   : >> { %19042 = vst [vmem:[#allocation182_spill] sm:$0xff] %v16538_v54  ;;  %v9746_v42 = vpop.eup %9745  ;;  %v5194_v19 = vmul.f32 %v9742_v27, %v5193_v25  ;;  %v16544_v1 = vadd.f32 1.0, %v9744_v0  ;;  %vm16547_vm1 = vcmp.eq.f32.partialorder %v5200_v35, 8.507059e+37  ;;  %9755 = vpow2.f32 %v7784_v45  ;;  %vm5198_vm3 = vmor %vm5196_vm15, %vm5197_vm5 }
 0x56c   : >> { %v16551_v36 = vadd.f32 1.0, %v9746_v42  ;;  %v5203_v40 = vor.u32 1.1754944e-38, %v5202_v6  ;;  %vm5646_vm2 = vweird.f32 %v16524_v63  ;;  %vm16558_vm0 = vcmp.eq.f32.partialorder %v5650_v46, 8.507059e+37 }
 0x56d   : >> { %v9748_v22 = vpop.eup %9747  ;;  %v5195_v30 = vadd.f32 %v9742_v27, %v5194_v19  ;;  %9757 = vrcp.f32 %v16544_v1  ;;  %v5653_v4 = vor.u32 1.1754944e-38, %v5652_v32  ;;  %v16564_v53 = vadd.f32 %v16150_v16, %v3841_v28 }
 0x56e   : >> { %v9750_v26 = vpop.eup %9749  ;;  %v5642_v48 = vmul.f32 %v9748_v22, %v16524_v63  ;;  %9759 = vrcp.f32 %v16551_v36  ;;  %v6100_v62 = vand.u32 2147483647, %v16544_v1  ;;  %v16568_v9 = vadd.f32 %v16150_v16, %v3916_v24 }
 0x56f   : >> { %v9752_v8 = vpop.eup %9751  ;;  %v5199_v59 = vsel %vm5198_vm3, %v9742_v27, %v5195_v30  ;;  %9761 = vpow2.f32 %v7814_v20  ;;  %v6102_v50 = vand.u32 2147483648, %v16544_v1  ;;  %v4765_v58 = vand.u32 2147483647, %v16551_v36 }
 0x570   : >> { %v9754_v10 = vpop.eup %9753  ;;  %v5204_v34 = vsel %vm16547_vm1, %v5203_v40, %v5199_v59  ;;  %v5643_v18 = vsub.f32 1.0, %v5642_v48  ;;  %v4767_v11 = vand.u32 2147483648, %v16551_v36  ;;  %v16578_v13 = vadd.f32 1.0, %v9750_v26  ;;  %v3918_v48 = vpop.f32.mrf.mxu3 }
 0x571   : >> { %v16575_v40 = vmul.f32 %v5204_v34, %v16399_v5   ;;  %v16580_v47 = vadd.f32 1.0, %v9752_v8  ;;  %v9756_v43 = vpop.eup %9755  ;;  %vm5647_vm6 = vweird.f32 %v9748_v22  ;;  %v16583_v15 = vmul.f32 -1.442695, %v16564_v53 }
 0x572   : >> { %v5644_v17 = vmul.f32 %v9748_v22, %v5643_v18  ;;  %v16586_v60 = vadd.f32 %v16150_v16, %v3693_v7  ;;  %vm6096_vm4 = vweird.f32 %v16544_v1  ;;  %vm4761_vm11 = vweird.f32 %v16551_v36  ;;  %vm5648_vm9 = vmor %vm5646_vm2, %vm5647_vm6 }
 0x573   : >> { %19047 = vst [vmem:[#allocation183_spill] sm:$0xff] %v16575_v40  ;;  %v9758_v55 = vpop.eup %9757  ;;  %9763 = vrcp.f32 %v16578_v13  ;;  %v16591_v5 = vadd.f32 1.0, %v9754_v10  ;;  %vm16594_vm7 = vcmp.eq.f32.partialorder %v6100_v62, 8.507059e+37  ;;  %v6103_v56 = vor.u32 1.1754944e-38, %v6102_v50 }
 0x574   : >> { %v9760_v37 = vpop.eup %9759  ;;  %v5645_v27 = vadd.f32 %v9748_v22, %v5644_v17  ;;  %v6092_v33 = vmul.f32 %v9758_v55, %v16544_v1  ;;  %9765 = vrcp.f32 %v16580_v47  ;;  %vm16603_vm8 = vcmp.eq.f32.partialorder %v4765_v58, 8.507059e+37 }
 0x575   : >> { %v9762_v16 = vpop.eup %9761  ;;  %v4757_v3 = vmul.f32 %v9760_v37, %v16551_v36  ;;  %v4768_v61 = vor.u32 1.1754944e-38, %v4767_v11  ;;  %v5217_v35 = vand.u32 2147483648, %v16578_v13  ;;  %v5215_v25 = vand.u32 2147483647, %v16578_v13 }
 0x576   : >> { %v5649_v45 = vsel %vm5648_vm9, %v9748_v22, %v5645_v27  ;;  %v6093_v54 = vsub.f32 1.0, %v6092_v33  ;;  %v16609_v6 = vadd.f32 1.0, %v9756_v43  ;;  %v5665_v46 = vand.u32 2147483647, %v16580_v47 }
 0x577   : >> { %v5654_v0 = vsel %vm16558_vm0, %v5653_v4, %v5649_v45  ;;  %v4758_v63 = vsub.f32 1.0, %v4757_v3  ;;  %9767 = vrcp.f32 %v16591_v5  ;;  %vm6097_vm10 = vweird.f32 %v9758_v55  ;;  %v3843_v45 = vpop.f32.mrf.mxu2 }
 0x578   : >> { %v16616_v32 = vmul.f32 %v5654_v0, %v16402_v23   ;;  %v6094_v42 = vmul.f32 %v9758_v55, %v6093_v54  ;;  %v5667_v19 = vand.u32 2147483648, %v16580_v47  ;;  %vm4762_vm12 = vweird.f32 %v9760_v37  ;;  %vm6098_vm5 = vmor %vm6096_vm4, %vm6097_vm10 }
 0x579   : >> { %v9764_v20 = vpop.eup %9763  ;;  %v4759_v28 = vmul.f32 %v9760_v37, %v4758_v63  ;;  %vm5211_vm13 = vweird.f32 %v16578_v13  ;;  %v5218_v41 = vor.u32 1.1754944e-38, %v5217_v35  ;;  %vm16621_vm14 = vcmp.eq.f32.partialorder %v5215_v25, 8.507059e+37  ;;  %vm4763_vm2 = vmor %vm4761_vm11, %vm4762_vm12  ;;  %v3768_v35 = vpop.f32.mrf.mxu1 }
 0x57a   : >> { %19052 = vst [vmem:[#allocation184_spill] sm:$0xff] %v16616_v32  ;;  %v9766_v24 = vpop.eup %9765  ;;  %v6095_v22 = vadd.f32 %v9758_v55, %v6094_v42  ;;  %v5207_v30 = vmul.f32 %v9764_v20, %v16578_v13  ;;  %vm5661_vm15 = vweird.f32 %v16580_v47  ;;  %9769 = vrcp.f32 %v16609_v6  ;;  %v16687_v32 = vld [vmem:[%s14409_s6] ss:$0 sm:$0xff] }
 0x57b   : >> { %v4760_v23 = vadd.f32 %v9760_v37, %v4759_v28  ;;  %v5657_v26 = vmul.f32 %v9766_v24, %v16580_v47  ;;  %vm16630_vm1 = vcmp.eq.f32.partialorder %v5665_v46, 8.507059e+37  ;;  %v6115_v39 = vand.u32 2147483647, %v16591_v5 }
 0x57c   : >> { %v6099_v4 = vsel %vm6098_vm5, %v9758_v55, %v6095_v22  ;;  %v5208_v8 = vsub.f32 1.0, %v5207_v30  ;;  %v5668_v59 = vor.u32 1.1754944e-38, %v5667_v19  ;;  %vm6111_vm3 = vweird.f32 %v16591_v5 }
 0x57d   : >> { %v6117_v1 = vand.u32 2147483648, %v16591_v5  ;;  %v9768_v62 = vpop.eup %9767  ;;  %v6104_v7 = vsel %vm16594_vm7, %v6103_v56, %v6099_v4  ;;  %v4764_v10 = vsel %vm4763_vm2, %v9760_v37, %v4760_v23  ;;  %vm5212_vm0 = vweird.f32 %v9764_v20 }
 0x57e   : >> { %v5658_v34 = vsub.f32 1.0, %v5657_v26  ;;  %v16643_v18 = vmul.f32 %v6104_v7, %v16486_v57   ;;  %v4769_v36 = vsel %vm16603_vm8, %v4768_v61, %v4764_v10  ;;  %v5209_v50 = vmul.f32 %v9764_v20, %v5208_v8  ;;  %vm5213_vm11 = vmor %vm5211_vm13, %vm5212_vm0 }
 0x57f   : >> { %v6107_v58 = vmul.f32 %v9768_v62, %v16591_v5  ;;  %v16649_v0 = vmul.f32 %v4769_v36, %v16489_v38   ;;  %vm5662_vm6 = vweird.f32 %v9766_v24  ;;  %vm16651_vm4 = vcmp.eq.f32.partialorder %v6115_v39, 8.507059e+37  ;;  %v3846_v36 = vpop.f32.mrf.mxu2 }
 0x580   : >> { %19057 = vst [vmem:[#allocation185_spill] sm:$0xff] %v16643_v18  ;;  %v5659_v11 = vmul.f32 %v9766_v24, %v5658_v34  ;;  %v9770_v17 = vpop.eup %9769  ;;  %v5210_v55 = vadd.f32 %v9764_v20, %v5209_v50  ;;  %v6118_v57 = vor.u32 1.1754944e-38, %v6117_v1  ;;  %v16655_v27 = vadd.f32 1.0, %v9762_v16  ;;  %vm5663_vm7 = vmor %vm5661_vm15, %vm5662_vm6 }
 0x581   : >> { %19058 = vst [vmem:[#allocation186_spill] sm:$0xff] %v16649_v0  ;;  %v6108_v37 = vsub.f32 1.0, %v6107_v58  ;;  %v4772_v38 = vmul.f32 %v9770_v17, %v16609_v6  ;;  %v4780_v14 = vand.u32 2147483647, %v16609_v6  ;;  %9771 = vpow2.f32 %v16583_v15 }
 0x582   : >> { %v5660_v33 = vadd.f32 %v9766_v24, %v5659_v11  ;;  %v5214_v56 = vsel %vm5213_vm11, %v9764_v20, %v5210_v55  ;;  %vm6112_vm9 = vweird.f32 %v9768_v62  ;;  %9773 = vrcp.f32 %v16655_v27 }
 0x583   : >> { %v6109_v3 = vmul.f32 %v9768_v62, %v6108_v37  ;;  %v5219_v16 = vsel %vm16621_vm14, %v5218_v41, %v5214_v56  ;;  %v4773_v29 = vsub.f32 1.0, %v4772_v38  ;;  %v4782_v61 = vand.u32 2147483648, %v16609_v6  ;;  %vm6113_vm10 = vmor %vm6111_vm3, %vm6112_vm9 }
 0x584   : >> { %v5664_v13 = vsel %vm5663_vm7, %v9766_v24, %v5660_v33  ;;  %v16670_v39 = vmul.f32 %v5219_v16, %v16493_v21   ;;  %vm4776_vm8 = vweird.f32 %v16609_v6  ;;  %vm4777_vm12 = vweird.f32 %v9770_v17 }
 0x585   : >> { %v5669_v47 = vsel %vm16630_vm1, %v5668_v59, %v5664_v13  ;;  %v6110_v15 = vadd.f32 %v9768_v62, %v6109_v3  ;;  %v4774_v25 = vmul.f32 %v9770_v17, %v4773_v29  ;;  %v7874_v0 = vmul.f32 -1.442695, %v16568_v9  ;;  %vm4778_vm14 = vmor %vm4776_vm8, %vm4777_vm12 }
 0x586   : >> { %19061 = vst [vmem:[#allocation187_spill] sm:$0xff] %v16670_v39  ;;  %v16676_v54 = vmul.f32 %v5669_v47, %v16516_v2   ;;  %vm16681_vm13 = vcmp.eq.f32.partialorder %v4780_v14, 8.507059e+37  ;;  %v7785_v46 = vmul.f32 -1.442695, %v16586_v60  ;;  %v16690_v42 = vadd.f32 %v16687_v32, %v3768_v35  ;;  %v3696_v39 = vpop.f32.mrf.mxu0 }
 0x587   : >> { %v6114_v63 = vsel %vm6113_vm10, %v9768_v62, %v6110_v15  ;;  %v9772_v2 = vpop.eup %9771  ;;  %v4775_v19 = vadd.f32 %v9770_v17, %v4774_v25  ;;  %v4783_v20 = vor.u32 1.1754944e-38, %v4782_v61  ;;  %9775 = vpow2.f32 %v7874_v0 }
 0x588   : >> { %19062 = vst [vmem:[#allocation188_spill] sm:$0xff] %v16676_v54  ;;  %v6119_v5 = vsel %vm16651_vm4, %v6118_v57, %v6114_v63  ;;  %v9774_v28 = vpop.eup %9773  ;;  %v16699_v41 = vadd.f32 1.0, %v9772_v2  ;;  %9777 = vpow2.f32 %v7785_v46  ;;  %v7815_v22 = vmul.f32 -1.442695, %v16690_v42 }
 0x589   : >> { %v16695_v24 = vmul.f32 %v6119_v5, %v16519_v44   ;;  %v4779_v30 = vsel %vm4778_vm14, %v9770_v17, %v4775_v19  ;;  %v5222_v40 = vmul.f32 %v9774_v28, %v16655_v27  ;;  %v5230_v23 = vand.u32 2147483647, %v16655_v27 }
 0x58a   : >> { %v16705_v26 = vadd.f32 %v16687_v32, %v3843_v45  ;;  %v4784_v44 = vsel %vm16681_vm13, %v4783_v20, %v4779_v30  ;;  %9779 = vrcp.f32 %v16699_v41  ;;  %v16716_v8 = vadd.f32 %v16687_v32, %v3918_v48 }
 0x58b   : >> { %19065 = vst [vmem:[#allocation189_spill] sm:$0xff] %v16695_v24  ;;  %v16711_v58 = vmul.f32 %v4784_v44, %v16522_v52   ;;  %v5223_v6 = vsub.f32 1.0, %v5222_v40  ;;  %v5232_v24 = vand.u32 2147483648, %v16655_v27  ;;  %9781 = vpow2.f32 %v7815_v22  ;;  %v3771_v52 = vpop.f32.mrf.mxu1 }
 0x58c   : >> { %v7845_v4 = vmul.f32 -1.442695, %v16705_v26  ;;  %vm5226_vm15 = vweird.f32 %v16655_v27  ;;  %vm5227_vm5 = vweird.f32 %v9774_v28  ;;  %vm16719_vm1 = vcmp.eq.f32.partialorder %v5230_v23, 8.507059e+37 }
 0x58d   : >> { %19066 = vst [vmem:[#allocation190_spill] sm:$0xff] %v16711_v58  ;;  %v9776_v59 = vpop.eup %9775  ;;  %v5224_v1 = vmul.f32 %v9774_v28, %v5223_v6  ;;  %v5680_v10 = vand.u32 2147483647, %v16699_v41  ;;  %v5682_v34 = vand.u32 2147483648, %v16699_v41  ;;  %v5233_v58 = vor.u32 1.1754944e-38, %v5232_v24  ;;  %vm5228_vm2 = vmor %vm5226_vm15, %vm5227_vm5 }
 0x58e   : >> { %v9778_v7 = vpop.eup %9777  ;;  %v16725_v18 = vadd.f32 1.0, %v9776_v59  ;;  %9783 = vpow2.f32 %v7845_v4  ;;  %v16730_v43 = vadd.f32 %v16687_v32, %v3696_v39  ;;  %vm5676_vm3 = vweird.f32 %v16699_v41  ;;  %v3698_v63 = vpop.f32.mrf.mxu0 }
 0x58f   : >> { %v5225_v50 = vadd.f32 %v9774_v28, %v5224_v1  ;;  %v16727_v11 = vadd.f32 1.0, %v9778_v7  ;;  %v7875_v55 = vmul.f32 -1.442695, %v16716_v8  ;;  %v16738_v37 = vadd.f32 %v16687_v32, %v3771_v52 }
 0x590   : >> { %v9780_v17 = vpop.eup %9779  ;;  %9785 = vrcp.f32 %v16725_v18  ;;  %v16743_v14 = vadd.f32 %v16687_v32, %v3846_v36  ;;  %vm16747_vm0 = vcmp.eq.f32.partialorder %v5680_v10, 8.507059e+37  ;;  %v5683_v3 = vor.u32 1.1754944e-38, %v5682_v34 }
 0x591   : >> { %v9782_v57 = vpop.eup %9781  ;;  %v5229_v33 = vsel %vm5228_vm2, %v9774_v28, %v5225_v50  ;;  %v5672_v38 = vmul.f32 %v9780_v17, %v16699_v41  ;;  %9787 = vrcp.f32 %v16727_v11  ;;  %v6132_v16 = vand.u32 2147483648, %v16725_v18 }
 0x592   : >> { %v5234_v27 = vsel %vm16719_vm1, %v5233_v58, %v5229_v33  ;;  %v6130_v29 = vand.u32 2147483647, %v16725_v18  ;;  %v7786_v61 = vmul.f32 -1.442695, %v16730_v43  ;;  %v4795_v15 = vand.u32 2147483647, %v16727_v11 }
 0x593   : >> { %v16753_v35 = vmul.f32 %v5234_v27, %v16533_v49   ;;  %v5673_v13 = vsub.f32 1.0, %v5672_v38  ;;  %v16758_v45 = vadd.f32 1.0, %v9782_v57  ;;  %9789 = vpow2.f32 %v7875_v55 }
 0x594   : >> { %v9784_v47 = vpop.eup %9783  ;;  %v7816_v54 = vmul.f32 -1.442695, %v16738_v37  ;;  %vm5677_vm6 = vweird.f32 %v9780_v17  ;;  %v7846_v49 = vmul.f32 -1.442695, %v16743_v14  ;;  %vm6126_vm4 = vweird.f32 %v16725_v18 }
 0x595   : >> { %19071 = vst [vmem:[#allocation191_spill] sm:$0xff] %v16753_v35  ;;  %v5674_v25 = vmul.f32 %v9780_v17, %v5673_v13  ;;  %v16761_v0 = vadd.f32 1.0, %v9784_v47  ;;  %v3921_v35 = vpop.f32.mrf.mxu3  ;;  %v6133_v46 = vor.u32 1.1754944e-38, %v6132_v16  ;;  %v4797_v2 = vand.u32 2147483648, %v16727_v11  ;;  %vm5678_vm9 = vmor %vm5676_vm3, %vm5677_vm6 }
 0x596   : >> { %v9786_v21 = vpop.eup %9785  ;;  %9791 = vrcp.f32 %v16758_v45  ;;  %vm16768_vm11 = vcmp.eq.f32.partialorder %v6130_v29, 8.507059e+37  ;;  %vm4791_vm7 = vweird.f32 %v16727_v11  ;;  %vm16778_vm8 = vcmp.eq.f32.partialorder %v4795_v15, 8.507059e+37 }
 0x597   : >> { %v9788_v5 = vpop.eup %9787  ;;  %v5675_v19 = vadd.f32 %v9780_v17, %v5674_v25  ;;  %v6122_v20 = vmul.f32 %v9786_v21, %v16725_v18  ;;  %9793 = vrcp.f32 %v16761_v0  ;;  %v16783_v40 = vadd.f32 %v16687_v32, %v3921_v35 }
 0x598   : >> { %v4787_v22 = vmul.f32 %v9788_v5, %v16727_v11  ;;  %v16786_v23 = vadd.f32 %v16687_v32, %v3698_v63  ;;  %v5245_v6 = vand.u32 2147483647, %v16758_v45  ;;  %v5247_v24 = vand.u32 2147483648, %v16758_v45 }
 0x599   : >> { %v5679_v48 = vsel %vm5678_vm9, %v9780_v17, %v5675_v19  ;;  %v6123_v44 = vsub.f32 1.0, %v6122_v20  ;;  %v9790_v41 = vpop.eup %9789  ;;  %v4798_v59 = vor.u32 1.1754944e-38, %v4797_v2  ;;  %9795 = vpow2.f32 %v7786_v61 }
 0x59a   : >> { %v5684_v39 = vsel %vm16747_vm0, %v5683_v3, %v5679_v48  ;;  %v4788_v4 = vsub.f32 1.0, %v4787_v22  ;;  %vm6127_vm10 = vweird.f32 %v9786_v21  ;;  %v16795_v52 = vadd.f32 1.0, %v9790_v41  ;;  %v3773_v41 = vpop.f32.mrf.mxu1 }
 0x59b   : >> { %v16793_v1 = vmul.f32 %v5684_v39, %v16564_v53   ;;  %v6124_v62 = vmul.f32 %v9786_v21, %v6123_v44  ;;  %vm4792_vm12 = vweird.f32 %v9788_v5  ;;  %vm5241_vm13 = vweird.f32 %v16758_v45  ;;  %vm6128_vm15 = vmor %vm6126_vm4, %vm6127_vm10 }
 0x59c   : >> { %v9792_v7 = vpop.eup %9791  ;;  %v4789_v10 = vmul.f32 %v9788_v5, %v4788_v4  ;;  %9797 = vpow2.f32 %v7816_v54  ;;  %vm16799_vm14 = vcmp.eq.f32.partialorder %v5245_v6, 8.507059e+37  ;;  %v5248_v53 = vor.u32 1.1754944e-38, %v5247_v24  ;;  %vm4793_vm1 = vmor %vm4791_vm7, %vm4792_vm12 }
 0x59d   : >> { %19076 = vst [vmem:[#allocation192_spill] sm:$0xff] %v16793_v1  ;;  %v9794_v34 = vpop.eup %9793  ;;  %v6125_v36 = vadd.f32 %v9786_v21, %v6124_v62  ;;  %v5237_v50 = vmul.f32 %v9792_v7, %v16758_v45  ;;  %9799 = vrcp.f32 %v16795_v52  ;;  %vm5691_vm5 = vweird.f32 %v16761_v0 }
 0x59e   : >> { %v4790_v17 = vadd.f32 %v9788_v5, %v4789_v10  ;;  %v5687_v55 = vmul.f32 %v9794_v34, %v16761_v0  ;;  %v5695_v57 = vand.u32 2147483647, %v16761_v0  ;;  %v5697_v27 = vand.u32 2147483648, %v16761_v0 }
 0x59f   : >> { %v6129_v33 = vsel %vm6128_vm15, %v9786_v21, %v6125_v36  ;;  %v5238_v38 = vsub.f32 1.0, %v5237_v50  ;;  %v7876_v56 = vmul.f32 -1.442695, %v16783_v40  ;;  %v9796_v3 = vpop.eup %9795  ;;  %9801 = vpow2.f32 %v7846_v49  ;;  %v3848_v50 = vpop.f32.mrf.mxu2 }
 0x5a0   : >> { %v6134_v18 = vsel %vm16768_vm11, %v6133_v46, %v6129_v33  ;;  %v4794_v16 = vsel %vm4793_vm1, %v9788_v5, %v4790_v17  ;;  %v5688_v13 = vsub.f32 1.0, %v5687_v55  ;;  %vm5242_vm2 = vweird.f32 %v9792_v7 }
 0x5a1   : >> { %v16817_v35 = vmul.f32 %v6134_v18, %v16568_v9   ;;  %v4799_v29 = vsel %vm16778_vm8, %v4798_v59, %v4794_v16  ;;  %v5239_v11 = vmul.f32 %v9792_v7, %v5238_v38  ;;  %vm5692_vm3 = vweird.f32 %v9794_v34  ;;  %vm5243_vm6 = vmor %vm5241_vm13, %vm5242_vm2 }
 0x5a2   : >> { %v9798_v61 = vpop.eup %9797  ;;  %v16822_v47 = vmul.f32 %v4799_v29, %v16586_v60   ;;  %v5689_v15 = vmul.f32 %v9794_v34, %v5688_v13  ;;  %v16824_v54 = vadd.f32 1.0, %v9796_v3  ;;  %vm16826_vm0 = vcmp.eq.f32.partialorder %v5695_v57, 8.507059e+37  ;;  %vm5693_vm4 = vmor %vm5691_vm5, %vm5692_vm3  ;;  %v3923_v29 = vpop.f32.mrf.mxu3 }
 0x5a3   : >> { %19079 = vst [vmem:[#allocation193_spill] sm:$0xff] %v16817_v35  ;;  %v9800_v25 = vpop.eup %9799  ;;  %v5240_v63 = vadd.f32 %v9792_v7, %v5239_v11  ;;  %v16830_v9 = vadd.f32 1.0, %v9798_v61  ;;  %9803 = vpow2.f32 %v7876_v56  ;;  %v5698_v21 = vor.u32 1.1754944e-38, %v5697_v27 }
 0x5a4   : >> { %19080 = vst [vmem:[#allocation194_spill] sm:$0xff] %v16822_v47  ;;  %v5690_v35 = vadd.f32 %v9794_v34, %v5689_v15  ;;  %v6137_v60 = vmul.f32 %v9800_v25, %v16795_v52  ;;  %9805 = vrcp.f32 %v16824_v54  ;;  %v6145_v46 = vand.u32 2147483647, %v16795_v52 }
 0x5a5   : >> { %v5244_v47 = vsel %vm5243_vm6, %v9792_v7, %v5240_v63  ;;  %v6147_v2 = vand.u32 2147483648, %v16795_v52  ;;  %v7787_v5 = vmul.f32 -1.442695, %v16786_v23  ;;  %v9802_v19 = vpop.eup %9801  ;;  %9807 = vrcp.f32 %v16830_v9 }
 0x5a6   : >> { %v5249_v45 = vsel %vm16799_vm14, %v5248_v53, %v5244_v47  ;;  %v5694_v20 = vsel %vm5693_vm4, %v9794_v34, %v5690_v35  ;;  %v6138_v28 = vsub.f32 1.0, %v6137_v60  ;;  %v4810_v30 = vand.u32 2147483647, %v16824_v54 }
 0x5a7   : >> { %v16845_v0 = vmul.f32 %v5249_v45, %v16690_v42   ;;  %v5699_v22 = vsel %vm16826_vm0, %v5698_v21, %v5694_v20  ;;  %v4812_v48 = vand.u32 2147483648, %v16824_v54  ;;  %vm6141_vm11 = vweird.f32 %v16795_v52 }
 0x5a8   : >> { %v16852_v39 = vmul.f32 %v5699_v22, %v16705_v26   ;;  %v6139_v44 = vmul.f32 %v9800_v25, %v6138_v28  ;;  %vm6142_vm7 = vweird.f32 %v9800_v25  ;;  %vm16855_vm9 = vcmp.eq.f32.partialorder %v6145_v46, 8.507059e+37 }
 0x5a9   : >> { %19083 = vst [vmem:[#allocation195_spill] sm:$0xff] %v16845_v0  ;;  %v9804_v6 = vpop.eup %9803  ;;  %v5260_v42 = vand.u32 2147483647, %v16830_v9  ;;  %v16860_v0 = vadd.f32 1.0, %v9802_v19  ;;  %9809 = vpow2.f32 %v7787_v5  ;;  %v6148_v1 = vor.u32 1.1754944e-38, %v6147_v2  ;;  %vm6143_vm10 = vmor %vm6141_vm11, %vm6142_vm7 }
 0x5aa   : >> { %19084 = vst [vmem:[#allocation196_spill] sm:$0xff] %v16852_v39  ;;  %v9806_v4 = vpop.eup %9805  ;;  %v6140_v59 = vadd.f32 %v9800_v25, %v6139_v44  ;;  %vm4806_vm8 = vweird.f32 %v16824_v54  ;;  %v16863_v26 = vadd.f32 1.0, %v9804_v6  ;;  %vm16866_vm12 = vcmp.eq.f32.partialorder %v4810_v30, 8.507059e+37  ;;  %v3776_v30 = vpop.f32.mrf.mxu1 }
 0x5ab   : >> { %v4802_v39 = vmul.f32 %v9806_v4, %v16824_v54  ;;  %v4813_v52 = vor.u32 1.1754944e-38, %v4812_v48  ;;  %9811 = vrcp.f32 %v16860_v0  ;;  %v9808_v7 = vpop.eup %9807  ;;  %vm5256_vm13 = vweird.f32 %v16830_v9  ;;  %v3701_v54 = vpop.f32.mrf.mxu0 }
 0x5ac   : >> { %v6144_v10 = vsel %vm6143_vm10, %v9800_v25, %v6140_v59  ;;  %v5262_v34 = vand.u32 2147483648, %v16830_v9  ;;  %v16874_v36 = vadd.f32 %v16687_v32, %v3773_v41  ;;  %v5252_v17 = vmul.f32 %v9808_v7, %v16830_v9 }
 0x5ad   : >> { %v6149_v58 = vsel %vm16855_vm9, %v6148_v1, %v6144_v10  ;;  %v4803_v53 = vsub.f32 1.0, %v4802_v39  ;;  %vm16879_vm14 = vcmp.eq.f32.partialorder %v5260_v42, 8.507059e+37  ;;  %v5710_v33 = vand.u32 2147483647, %v16860_v0  ;;  %v3851_v42 = vpop.f32.mrf.mxu2 }
 0x5ae   : >> { %v16884_v57 = vmul.f32 %v6149_v58, %v16716_v8   ;;  %v5712_v38 = vand.u32 2147483648, %v16860_v0  ;;  %9813 = vrcp.f32 %v16863_v26  ;;  %vm4807_vm15 = vweird.f32 %v9806_v4  ;;  %v3926_v58 = vpop.f32.mrf.mxu3 }
 0x5af   : >> { %v9810_v27 = vpop.eup %9809  ;;  %v4804_v56 = vmul.f32 %v9806_v4, %v4803_v53  ;;  %v5253_v3 = vsub.f32 1.0, %v5252_v17  ;;  %v16890_v18 = vadd.f32 %v16687_v32, %v3848_v50  ;;  %v5263_v16 = vor.u32 1.1754944e-38, %v5262_v34  ;;  %vm4808_vm2 = vmor %vm4806_vm8, %vm4807_vm15 }
 0x5b0   : >> { %19091 = vst [vmem:[#allocation197_spill] sm:$0xff] %v16884_v57  ;;  %vm5706_vm5 = vweird.f32 %v16860_v0  ;;  %v16893_v13 = vadd.f32 1.0, %v9810_v27  ;;  %v7817_v8 = vmul.f32 -1.442695, %v16874_v36  ;;  %vm5257_vm1 = vweird.f32 %v9808_v7 }
 0x5b1   : >> { %v9812_v11 = vpop.eup %9811  ;;  %v4805_v61 = vadd.f32 %v9806_v4, %v4804_v56  ;;  %v5254_v15 = vmul.f32 %v9808_v7, %v5253_v3  ;;  %v6160_v25 = vand.u32 2147483647, %v16863_v26  ;;  %vm16900_vm3 = vcmp.eq.f32.partialorder %v5710_v33, 8.507059e+37  ;;  %vm5258_vm0 = vmor %vm5256_vm13, %vm5257_vm1 }
 0x5b2   : >> { %v5702_v63 = vmul.f32 %v9812_v11, %v16860_v0  ;;  %v5713_v35 = vor.u32 1.1754944e-38, %v5712_v38  ;;  %v6162_v21 = vand.u32 2147483648, %v16863_v26  ;;  %9815 = vrcp.f32 %v16893_v13 }
 0x5b3   : >> { %v4809_v60 = vsel %vm4808_vm2, %v9806_v4, %v4805_v61  ;;  %v5255_v47 = vadd.f32 %v9808_v7, %v5254_v15  ;;  %v7847_v46 = vmul.f32 -1.442695, %v16890_v18  ;;  %v16908_v2 = vadd.f32 %v16687_v32, %v3923_v29  ;;  %v3703_v3 = vpop.f32.mrf.mxu0 }
 0x5b4   : >> { %v9814_v5 = vpop.eup %9813  ;;  %v4814_v19 = vsel %vm16866_vm12, %v4813_v52, %v4809_v60  ;;  %v5703_v45 = vsub.f32 1.0, %v5702_v63  ;;  %vm6156_vm6 = vweird.f32 %v16863_v26  ;;  %9817 = vpow2.f32 %v7817_v8 }
 0x5b5   : >> { %v16917_v4 = vmul.f32 %v4814_v19, %v16730_v43   ;;  %v5259_v20 = vsel %vm5258_vm0, %v9808_v7, %v5255_v47  ;;  %v6152_v28 = vmul.f32 %v9814_v5, %v16863_v26  ;;  %vm16920_vm4 = vcmp.eq.f32.partialorder %v6160_v25, 8.507059e+37 }
 0x5b6   : >> { %v5264_v48 = vsel %vm16879_vm14, %v5263_v16, %v5259_v20  ;;  %v5704_v9 = vmul.f32 %v9812_v11, %v5703_v45  ;;  %vm5707_vm11 = vweird.f32 %v9812_v11  ;;  %v6163_v44 = vor.u32 1.1754944e-38, %v6162_v21 }
 0x5b7   : >> { %19094 = vst [vmem:[#allocation198_spill] sm:$0xff] %v16917_v4  ;;  %v16927_v6 = vmul.f32 %v5264_v48, %v16738_v37   ;;  %v6153_v24 = vsub.f32 1.0, %v6152_v28  ;;  %9819 = vpow2.f32 %v7847_v46  ;;  %v7877_v43 = vmul.f32 -1.442695, %v16908_v2  ;;  %vm5708_vm7 = vmor %vm5706_vm5, %vm5707_vm11 }
 0x5b8   : >> { %v9816_v41 = vpop.eup %9815  ;;  %v5705_v4 = vadd.f32 %v9812_v11, %v5704_v9  ;;  %v4825_v59 = vand.u32 2147483647, %v16893_v13  ;;  %v16932_v1 = vadd.f32 %v16687_v32, %v3701_v54  ;;  %v16935_v39 = vadd.f32 %v16687_v32, %v3776_v30 }
 0x5b9   : >> { %19097 = vst [vmem:[#allocation199_spill] sm:$0xff] %v16927_v6  ;;  %v6154_v37 = vmul.f32 %v9814_v5, %v6153_v24  ;;  %vm6157_vm9 = vweird.f32 %v9814_v5  ;;  %v4817_v62 = vmul.f32 %v9816_v41, %v16893_v13  ;;  %9821 = vpow2.f32 %v7877_v43 }
 0x5ba   : >> { %v9818_v52 = vpop.eup %9817  ;;  %v5709_v7 = vsel %vm5708_vm7, %v9812_v11, %v5705_v4  ;;  %v7788_v10 = vmul.f32 -1.442695, %v16932_v1  ;;  %v7818_v34 = vmul.f32 -1.442695, %v16935_v39  ;;  %v16943_v50 = vadd.f32 %v16687_v32, %v3851_v42  ;;  %vm6158_vm8 = vmor %vm6156_vm6, %vm6157_vm9 }
 0x5bb   : >> { %v5714_v53 = vsel %vm16900_vm3, %v5713_v35, %v5709_v7  ;;  %v6155_v0 = vadd.f32 %v9814_v5, %v6154_v37  ;;  %v4818_v17 = vsub.f32 1.0, %v4817_v62  ;;  %v16947_v55 = vadd.f32 1.0, %v9818_v52 }
 0x5bc   : >> { %v16950_v30 = vmul.f32 %v5714_v53, %v16743_v14   ;;  %vm4822_vm10 = vweird.f32 %v9816_v41  ;;  %v4827_v57 = vand.u32 2147483648, %v16893_v13  ;;  %9823 = vpow2.f32 %v7788_v10 }
 0x5bd   : >> { %v9820_v33 = vpop.eup %9819  ;;  %v6159_v38 = vsel %vm6158_vm8, %v9814_v5, %v6155_v0  ;;  %v4819_v27 = vmul.f32 %v9816_v41, %v4818_v17  ;;  %9825 = vrcp.f32 %v16947_v55  ;;  %v16957_v56 = vadd.f32 %v16687_v32, %v3926_v58 }
 0x5be   : >> { %19098 = vst [vmem:[#allocation200_spill] sm:$0xff] %v16950_v30  ;;  %v6164_v14 = vsel %vm16920_vm4, %v6163_v44, %v6159_v38  ;;  %v16961_v16 = vadd.f32 1.0, %v9820_v33  ;;  %v7848_v26 = vmul.f32 -1.442695, %v16943_v50  ;;  %vm4821_vm12 = vweird.f32 %v16893_v13  ;;  %v3778_v30 = vpop.f32.mrf.mxu1 }
 0x5bf   : >> { %v9822_v8 = vpop.eup %9821  ;;  %v16965_v29 = vmul.f32 %v6164_v14, %v16783_v40   ;;  %v4820_v11 = vadd.f32 %v9816_v41, %v4819_v27  ;;  %9827 = vpow2.f32 %v7818_v34  ;;  %vm4823_vm13 = vmor %vm4821_vm12, %vm4822_vm10  ;;  %vm4826_vm14 = vcmp.eq.f32.partialorder %v4825_v59, 8.507059e+37 }
 0x5c0   : >> { %v4828_v61 = vor.u32 1.1754944e-38, %v4827_v57  ;;  %9829 = vrcp.f32 %v16961_v16  ;;  %v16971_v15 = vadd.f32 %v16687_v32, %v3703_v3  ;;  %v5275_v63 = vand.u32 2147483647, %v16947_v55 }
 0x5c1   : >> { %19099 = vst [vmem:[#allocation201_spill] sm:$0xff] %v16965_v29  ;;  %v4824_v25 = vsel %vm4823_vm13, %v9816_v41, %v4820_v11  ;;  %v16974_v49 = vadd.f32 1.0, %v9822_v8  ;;  %v7878_v40 = vmul.f32 -1.442695, %v16957_v56  ;;  %9831 = vpow2.f32 %v7848_v26 }
 0x5c2   : >> { %v9824_v35 = vpop.eup %9823  ;;  %v4829_v21 = vsel %vm4826_vm14, %v4828_v61, %v4824_v25  ;;  %v5277_v60 = vand.u32 2147483648, %v16947_v55  ;;  %v7789_v54 = vmul.f32 -1.442695, %v16971_v15  ;;  %vm5271_vm15 = vweird.f32 %v16947_v55 }
 0x5c3   : >> { %v9826_v13 = vpop.eup %9825  ;;  %v16978_v46 = vmul.f32 %v4829_v21, %v16786_v23   ;;  %9833 = vrcp.f32 %v16974_v49  ;;  %vm16985_vm5 = vcmp.eq.f32.partialorder %v5275_v63, 8.507059e+37  ;;  %v16989_v45 = vadd.f32 1.0, %v9824_v35 }
 0x5c4   : >> { %v5267_v47 = vmul.f32 %v9826_v13, %v16947_v55  ;;  %9835 = vpow2.f32 %v7878_v40  ;;  %v5725_v20 = vand.u32 2147483647, %v16961_v16  ;;  %v5727_v28 = vand.u32 2147483648, %v16961_v16 }
 0x5c5   : >> { %19100 = vst [vmem:[#allocation202_spill] sm:$0xff] %v16978_v46  ;;  %v9828_v5 = vpop.eup %9827  ;;  %v5278_v48 = vor.u32 1.1754944e-38, %v5277_v60  ;;  %v6175_v44 = vand.u32 2147483647, %v16974_v49  ;;  %9837 = vrcp.f32 %v16989_v45  ;;  %vm5272_vm1 = vweird.f32 %v9826_v13 }
 0x5c6   : >> { %v9830_v23 = vpop.eup %9829  ;;  %v5268_v46 = vsub.f32 1.0, %v5267_v47  ;;  %v16993_v22 = vadd.f32 1.0, %v9828_v5  ;;  %v6177_v43 = vand.u32 2147483648, %v16974_v49  ;;  %9839 = vpow2.f32 %v7789_v54  ;;  %vm5273_vm0 = vmor %vm5271_vm15, %vm5272_vm1 }
 0x5c7   : >> { %v5717_v9 = vmul.f32 %v9830_v23, %v16961_v16  ;;  %v9832_v6 = vpop.eup %9831  ;;  %vm5721_vm2 = vweird.f32 %v16961_v16  ;;  %v17002_v4 = vadd.f32 %v16687_v32, %v3778_v30  ;;  %vm17004_vm3 = vcmp.eq.f32.partialorder %v5725_v20, 8.507059e+37 }
 0x5c8   : >> { %v5269_v24 = vmul.f32 %v9826_v13, %v5268_v46  ;;  %9841 = vrcp.f32 %v16993_v22  ;;  %v5728_v62 = vor.u32 1.1754944e-38, %v5727_v28  ;;  %vm5722_vm6 = vweird.f32 %v9830_v23 }
 0x5c9   : >> { %v9834_v42 = vpop.eup %9833  ;;  %v5718_v41 = vsub.f32 1.0, %v5717_v9  ;;  %vm6171_vm4 = vweird.f32 %v16974_v49  ;;  %vm17012_vm11 = vcmp.eq.f32.partialorder %v6175_v44, 8.507059e+37  ;;  %v6178_v0 = vor.u32 1.1754944e-38, %v6177_v43  ;;  %vm5723_vm8 = vmor %vm5721_vm2, %vm5722_vm6  ;;  %v3853_v44 = vpop.f32.mrf.mxu2 }
 0x5ca   : >> { %v5270_v59 = vadd.f32 %v9826_v13, %v5269_v24  ;;  %v6167_v52 = vmul.f32 %v9834_v42, %v16974_v49  ;;  %v9836_v7 = vpop.eup %9835  ;;  %v17016_v17 = vadd.f32 1.0, %v9832_v6  ;;  %vm6172_vm7 = vweird.f32 %v9834_v42  ;;  %v3928_v6 = vpop.f32.mrf.mxu3 }
 0x5cb   : >> { %v5719_v10 = vmul.f32 %v9830_v23, %v5718_v41  ;;  %v9838_v57 = vpop.eup %9837  ;;  %vm4836_vm9 = vweird.f32 %v16989_v45  ;;  %v17027_v26 = vadd.f32 1.0, %v9836_v7  ;;  %v4840_v11 = vand.u32 2147483647, %v16989_v45  ;;  %vm6173_vm10 = vmor %vm6171_vm4, %vm6172_vm7 }
 0x5cc   : >> { %v5274_v58 = vsel %vm5273_vm0, %v9826_v13, %v5270_v59  ;;  %v6168_v53 = vsub.f32 1.0, %v6167_v52  ;;  %v9840_v55 = vpop.eup %9839  ;;  %v4832_v14 = vmul.f32 %v9838_v57, %v16989_v45  ;;  %v4842_v61 = vand.u32 2147483648, %v16989_v45 }
 0x5cd   : >> { %v5279_v33 = vsel %vm16985_vm5, %v5278_v48, %v5274_v58  ;;  %v5720_v38 = vadd.f32 %v9830_v23, %v5719_v10  ;;  %9843 = vrcp.f32 %v17016_v17  ;;  %vm4837_vm12 = vweird.f32 %v9838_v57 }
 0x5ce   : >> { %v17022_v27 = vmul.f32 %v5279_v33, %v16874_v36   ;;  %v6169_v3 = vmul.f32 %v9834_v42, %v6168_v53  ;;  %v9842_v8 = vpop.eup %9841  ;;  %v4833_v63 = vsub.f32 1.0, %v4832_v14  ;;  %v5290_v35 = vand.u32 2147483647, %v16993_v22  ;;  %vm4838_vm15 = vmor %vm4836_vm9, %vm4837_vm12 }
 0x5cf   : >> { %v5724_v29 = vsel %vm5723_vm8, %v9830_v23, %v5720_v38  ;;  %v5282_v16 = vmul.f32 %v9842_v8, %v16993_v22  ;;  %v17042_v21 = vadd.f32 1.0, %v9840_v55  ;;  %9845 = vrcp.f32 %v17027_v26 }
 0x5d0   : >> { %19107 = vst [vmem:[#allocation203_spill] sm:$0xff] %v17022_v27  ;;  %v5729_v36 = vsel %vm17004_vm3, %v5728_v62, %v5724_v29  ;;  %v6170_v25 = vadd.f32 %v9834_v42, %v6169_v3  ;;  %v4834_v60 = vmul.f32 %v9838_v57, %v4833_v63  ;;  %vm5286_vm13 = vweird.f32 %v16993_v22 }
 0x5d1   : >> { %v17036_v40 = vmul.f32 %v5729_v36, %v16890_v18   ;;  %v5283_v47 = vsub.f32 1.0, %v5282_v16  ;;  %v5292_v18 = vand.u32 2147483648, %v16993_v22  ;;  %v7819_v49 = vmul.f32 -1.442695, %v17002_v4 }
 0x5d2   : >> { %v6174_v13 = vsel %vm6173_vm10, %v9834_v42, %v6170_v25  ;;  %v4835_v5 = vadd.f32 %v9838_v57, %v4834_v60  ;;  %vm5287_vm14 = vweird.f32 %v9842_v8  ;;  %vm4841_vm5 = vcmp.eq.f32.partialorder %v4840_v11, 8.507059e+37 }
 0x5d3   : >> { %19108 = vst [vmem:[#allocation204_spill] sm:$0xff] %v17036_v40  ;;  %v6179_v54 = vsel %vm17012_vm11, %v6178_v0, %v6174_v13  ;;  %v5284_v19 = vmul.f32 %v9842_v8, %v5283_v47  ;;  %v9844_v23 = vpop.eup %9843  ;;  %v4843_v46 = vor.u32 1.1754944e-38, %v4842_v61  ;;  %v5740_v20 = vand.u32 2147483647, %v17016_v17  ;;  %vm5288_vm2 = vmor %vm5286_vm13, %vm5287_vm14 }
 0x5d4   : >> { %v17051_v62 = vmul.f32 %v6179_v54, %v16908_v2   ;;  %9847 = vrcp.f32 %v17042_v21  ;;  %v4839_v28 = vsel %vm4838_vm15, %v9838_v57, %v4835_v5  ;;  %vm5291_vm1 = vcmp.eq.f32.partialorder %v5290_v35, 8.507059e+37 }
 0x5d5   : >> { %v5285_v30 = vadd.f32 %v9842_v8, %v5284_v19  ;;  %v5732_v2 = vmul.f32 %v9844_v23, %v17016_v17  ;;  %v4844_v48 = vsel %vm4841_vm5, %v4843_v46, %v4839_v28  ;;  %v5293_v9 = vor.u32 1.1754944e-38, %v5292_v18  ;;  %v9846_v24 = vpop.eup %9845 }
 0x5d6   : >> { %19109 = vst [vmem:[#allocation205_spill] sm:$0xff] %v17051_v62  ;;  %vm5736_vm3 = vweird.f32 %v17016_v17  ;;  %v5742_v45 = vand.u32 2147483648, %v17016_v17  ;;  %v17064_v43 = vmul.f32 %v4844_v48, %v16932_v1   ;;  %9849 = vpow2.f32 %v7819_v49 }
 0x5d7   : >> { %v5289_v42 = vsel %vm5288_vm2, %v9842_v8, %v5285_v30  ;;  %v5733_v41 = vsub.f32 1.0, %v5732_v2  ;;  %vm5737_vm0 = vweird.f32 %v9844_v23  ;;  %vm17066_vm6 = vcmp.eq.f32.partialorder %v5740_v20, 8.507059e+37 }
 0x5d8   : >> { %19110 = vst [vmem:[#allocation206_spill] sm:$0xff] %v17064_v43  ;;  %v5294_v59 = vsel %vm5291_vm1, %v5293_v9, %v5289_v42  ;;  %v6182_v22 = vmul.f32 %v9846_v24, %v17027_v26  ;;  %v17075_v7 = vadd.f32 %v16687_v32, %v3853_v44  ;;  %v17078_v1 = vadd.f32 %v16687_v32, %v3928_v6  ;;  %vm5738_vm11 = vmor %vm5736_vm3, %vm5737_vm0 }
 0x5d9   : >> { %v17072_v62 = vmul.f32 %v5294_v59, %v16935_v39   ;;  %v5734_v52 = vmul.f32 %v9844_v23, %v5733_v41  ;;  %v5743_v34 = vor.u32 1.1754944e-38, %v5742_v45  ;;  %vm6186_vm4 = vweird.f32 %v17027_v26 }
 0x5da   : >> { %v9848_v10 = vpop.eup %9847  ;;  %v6183_v58 = vsub.f32 1.0, %v6182_v22  ;;  %v6190_v53 = vand.u32 2147483647, %v17027_v26  ;;  %v6192_v57 = vand.u32 2147483648, %v17027_v26  ;;  %v7849_v33 = vmul.f32 -1.442695, %v17075_v7 }
 0x5db   : >> { %19113 = vst [vmem:[#allocation207_spill] sm:$0xff] %v17072_v62  ;;  %v5735_v0 = vadd.f32 %v9844_v23, %v5734_v52  ;;  %v4847_v39 = vmul.f32 %v9848_v10, %v17042_v21  ;;  %vm6187_vm7 = vweird.f32 %v9846_v24  ;;  %v4855_v38 = vand.u32 2147483647, %v17042_v21 }
 0x5dc   : >> { %v6184_v32 = vmul.f32 %v9846_v24, %v6183_v58  ;;  %v7879_v55 = vmul.f32 -1.442695, %v17078_v1  ;;  %v9850_v27 = vpop.eup %9849  ;;  %v4857_v8 = vand.u32 2147483648, %v17042_v21  ;;  %9851 = vpow2.f32 %v7849_v33  ;;  %vm6188_vm9 = vmor %vm6186_vm4, %vm6187_vm7  ;;  %v19165_v33 = vld [vmem:[#allocation180_spill] sm:$0xff] }
 0x5dd   : >> { %v5739_v3 = vsel %vm5738_vm11, %v9844_v23, %v5735_v0  ;;  %v4848_v14 = vsub.f32 1.0, %v4847_v39  ;;  %v4350_v61 = vadd.f32 1.0, %v9850_v27  ;;  %v6193_v36 = vor.u32 1.1754944e-38, %v6192_v57  ;;  %v19130_v0 = vld [vmem:[#allocation197_spill] sm:$0xff]  ;;  %v19161_v39 = vld [vmem:[#allocation196_spill] sm:$0xff]  ;;  %v19181_v57 = vld [vmem:[#allocation31_spill] sm:$0xff] }
 0x5de   : >> { %v5744_v29 = vsel %vm17066_vm6, %v5743_v34, %v5739_v3  ;;  %v6185_v11 = vadd.f32 %v9846_v24, %v6184_v32  ;;  %9853 = vpow2.f32 %v7879_v55  ;;  %vm4852_vm8 = vweird.f32 %v9848_v10  ;;  %v19148_v3 = vld [vmem:[#allocation125_spill] sm:$0xff]  ;;  %v19153_v32 = vld [vmem:[#allocation64_spill] sm:$0xff] }
 0x5df   : >> { %v17094_v17 = vmul.f32 %v5744_v29, %v16943_v50   ;;  %v4849_v25 = vmul.f32 %v9848_v10, %v4848_v14  ;;  %vm6191_vm10 = vcmp.eq.f32.partialorder %v6190_v53, 8.507059e+37  ;;  %9855 = vrcp.f32 %v4350_v61  ;;  %v19137_v29 = vld [vmem:[#allocation169_spill] sm:$0xff]  ;;  %v19155_v55 = vld [vmem:[#allocation88_spill] sm:$0xff]  ;;  %v19179_v53 = vld [vmem:[#allocation3_spill] sm:$0xff] }
 0x5e0   : >> { %v6189_v63 = vsel %vm6188_vm9, %v9846_v24, %v6185_v11  ;;  %vm4851_vm12 = vweird.f32 %v17042_v21  ;;  %v4858_v35 = vor.u32 1.1754944e-38, %v4857_v8  ;;  %vm4856_vm14 = vcmp.eq.f32.partialorder %v4855_v38, 8.507059e+37  ;;  %v19146_v38 = vld [vmem:[#allocation133_spill] sm:$0xff]  ;;  %v19150_v11 = vld [vmem:[#allocation28_spill] sm:$0xff] }
 0x5e1   : >> { %19114 = vst [vmem:[#allocation208_spill] sm:$0xff] %v17094_v17  ;;  %v6194_v16 = vsel %vm6191_vm10, %v6193_v36, %v6189_v63  ;;  %v4850_v40 = vadd.f32 %v9848_v10, %v4849_v25  ;;  %vm4853_vm13 = vmor %vm4851_vm12, %vm4852_vm8  ;;  %v5307_v5 = vand.u32 2147483648, %v4350_v61  ;;  %v5305_v19 = vand.u32 2147483647, %v4350_v61  ;;  %v19136_v25 = vld [vmem:[#allocation173_spill] sm:$0xff]  ;;  %v19163_v27 = vld [vmem:[#allocation188_spill] sm:$0xff] }
 0x5e2   : >> { %v17100_v14 = vmul.f32 %v6194_v16, %v16957_v56   ;;  %v9852_v50 = vpop.eup %9851  ;;  %vm5301_vm5 = vweird.f32 %v4350_v61  ;;  %v19147_v16 = vld [vmem:[#allocation129_spill] sm:$0xff]  ;;  %v19158_v8 = vmov %v17094_v17  ;;  %v19166_v36 = vld [vmem:[#allocation176_spill] sm:$0xff]  ;;  %vm6831_vm10 = vcmask (%p17117_p5), 130112  }
 0x5e3   : >> { %v4854_v13 = vsel %vm4853_vm13, %v9848_v10, %v4850_v40  ;;  %v4380_v47 = vadd.f32 1.0, %v9852_v50  ;;  %v5308_v30 = vor.u32 1.1754944e-38, %v5307_v5  ;;  %vm5306_vm2 = vcmp.eq.f32.partialorder %v5305_v19, 8.507059e+37  ;;  %v19135_v19 = vld [vmem:[#allocation177_spill] sm:$0xff]  ;;  %v19162_v40 = vld [vmem:[#allocation192_spill] sm:$0xff]  ;;  %v17532_v8 = vld [vmem:[%s18105_s5 + $0x40] sm:$0xff] (%p17117_p5) }
 0x5e4   : >> { %19115 = vst [vmem:[#allocation209_spill] sm:$0xff] %v17100_v14  ;;  %v9854_v26 = vpop.eup %9853  ;;  %v4859_v60 = vsel %vm4856_vm14, %v4858_v35, %v4854_v13  ;;  %v19126_v51 = vmov %v17100_v14  ;;  %v19131_v35 = vld [vmem:[#allocation193_spill] sm:$0xff]  ;;  %v19167_v50 = vld [vmem:[#allocation172_spill] sm:$0xff]  ;;  %v19183_v13 = vld [vmem:[#allocation55_spill] sm:$0xff]  ;;  %vm6835_vm12 = vcmask (%p17117_p5), 195712   ;;  %vm6839_vm13 = vcmask (%p17117_p5), 261312  }
 0x5e5   : >> { %v17103_v42 = vmul.f32 %v4859_v60, %v16971_v15   ;;  %v4410_v54 = vadd.f32 1.0, %v9854_v26  ;;  %v9856_v18 = vpop.eup %9855  ;;  %9857 = vrcp.f32 %v4380_v47  ;;  %v5755_v45 = vand.u32 2147483647, %v4380_v47  ;;  %v19164_v60 = vld [vmem:[#allocation184_spill] sm:$0xff]  ;;  %19184 = vst [vmem:[#allocation18_spill] sm:$0xff] %v19183_v13  ;;  %v19199_v13 = vld [vmem:[#allocation195_spill] sm:$0xff] }
 0x5e6   : >> { %v5297_v49 = vmul.f32 %v9856_v18, %v4350_v61  ;;  %vm5302_vm15 = vweird.f32 %v9856_v18  ;;  %v5757_v44 = vand.u32 2147483648, %v4380_v47  ;;  %vm5751_vm6 = vweird.f32 %v4380_v47  ;;  %v19134_v61 = vld [vmem:[#allocation181_spill] sm:$0xff]  ;;  %v19172_v26 = vld [vmem:[#allocation152_spill] sm:$0xff]  ;;  %19200 = vst [vmem:[#allocation78_spill] sm:$0xff] %v19199_v13  ;;  %v19215_v13 = vld [vmem:[#allocation163_spill] sm:$0xff] }
 0x5e7   : >> { %19117 = vst [vmem:[#allocation210_spill] sm:$0xff] %v17103_v42  ;;  %9859 = vrcp.f32 %v4410_v54  ;;  %vm5303_vm1 = vmor %vm5301_vm5, %vm5302_vm15  ;;  %v6207_v43 = vand.u32 2147483648, %v4410_v54  ;;  %v6205_v41 = vand.u32 2147483647, %v4410_v54  ;;  %vm6201_vm11 = vweird.f32 %v4410_v54  ;;  %v19175_v63 = vld [vmem:[#allocation140_spill] sm:$0xff]  ;;  %v19307_v0 = vld [vmem:[#allocation49_spill] sm:$0xff] (%p17117_p5) }
 0x5e8   : >> { %v5298_v21 = vsub.f32 1.0, %v5297_v49  ;;  %v5758_v37 = vor.u32 1.1754944e-38, %v5757_v44  ;;  %vm5756_vm7 = vcmp.eq.f32.partialorder %v5755_v45, 8.507059e+37  ;;  %v19127_v14 = vmov %v19126_v51  ;;  %v19133_v44 = vld [vmem:[#allocation185_spill] sm:$0xff]  ;;  %v19176_v49 = vld [vmem:[#allocation136_spill] sm:$0xff]  ;;  %v19195_v51 = vld [vmem:[#allocation203_spill] sm:$0xff] }
 0x5e9   : >> { %v6208_v10 = vor.u32 1.1754944e-38, %v6207_v43  ;;  %vm6206_vm8 = vcmp.eq.f32.partialorder %v6205_v41, 8.507059e+37  ;;  %v19142_v43 = vld [vmem:[#allocation149_spill] sm:$0xff]  ;;  %v19177_v45 = vld [vmem:[#allocation132_spill] sm:$0xff]  ;;  %19196 = vst [vmem:[#allocation84_spill] sm:$0xff] %v19195_v51  ;;  %v19211_v51 = vld [vmem:[#allocation171_spill] sm:$0xff] }
 0x5ea   : >> { %v5299_v56 = vmul.f32 %v9856_v18, %v5298_v21  ;;  %v19140_v21 = vld [vmem:[#allocation157_spill] sm:$0xff]  ;;  %v19178_v17 = vld [vmem:[#allocation128_spill] sm:$0xff]  ;;  %19212 = vst [vmem:[#allocation60_spill] sm:$0xff] %v19211_v51  ;;  %v19227_v51 = vld [vmem:[#allocation139_spill] sm:$0xff]  ;;  %vm6843_vm14 = vcmask (%p17117_p5), 326912   ;;  %vm6847_vm15 = vcmask (%p17117_p5), 392512  }
 0x5eb   : >> { %v9858_v23 = vpop.eup %9857  ;;  %v19144_v41 = vld [vmem:[#allocation141_spill] sm:$0xff]  ;;  %19216 = vst [vmem:[#allocation54_spill] sm:$0xff] %v19215_v13  ;;  %v19231_v13 = vld [vmem:[#allocation131_spill] sm:$0xff]  ;;  %v19313_v61 = vld [vmem:[#allocation126_spill] sm:$0xff] (%p17117_p5)  ;;  %vm6851_vm5 = vcmask (%p17117_p5), 458112  }
 0x5ec   : >> { %v5300_v20 = vadd.f32 %v9856_v18, %v5299_v56  ;;  %v5747_v28 = vmul.f32 %v9858_v23, %v4380_v47  ;;  %vm5752_vm3 = vweird.f32 %v9858_v23  ;;  %v19169_v47 = vld [vmem:[#allocation164_spill] sm:$0xff]  ;;  %v19187_v56 = vld [vmem:[#allocation79_spill] sm:$0xff]  ;;  %19228 = vst [vmem:[#allocation36_spill] sm:$0xff] %v19227_v51  ;;  %v19243_v51 = vld [vmem:[#allocation58_spill] sm:$0xff]  ;;  %v6354_v17 = vmul.f32 (%p17117_p5), %v17532_v8, %v19313_v61 }
 0x5ed   : >> { %v9860_v46 = vpop.eup %9859  ;;  %vm5753_vm4 = vmor %vm5751_vm6, %vm5752_vm3  ;;  %19188 = vst [vmem:[#allocation10_spill] sm:$0xff] %v19187_v56  ;;  %v19203_v56 = vld [vmem:[#allocation187_spill] sm:$0xff]  ;;  %v17516_v39 = vld [vmem:[%s18105_s5 + $0x18] sm:$0xff] (%p17117_p5)  ;;  %vm6863_vm3 = vcmask (%p17117_p5), 654912   ;;  %vm6871_vm6 = vcmask (%p17117_p5), 786112  }
 0x5ee   : >> { %v6197_v2 = vmul.f32 %v9860_v46, %v4410_v54  ;;  %v5304_v15 = vsel %vm5303_vm1, %v9856_v18, %v5300_v20  ;;  %v5748_v48 = vsub.f32 1.0, %v5747_v28  ;;  %vm6202_vm0 = vweird.f32 %v9860_v46  ;;  %v19143_v20 = vld [vmem:[#allocation145_spill] sm:$0xff]  ;;  %v19151_v28 = vld [vmem:[#allocation40_spill] sm:$0xff]  ;;  %v19185_v54 = vld [vmem:[#allocation67_spill] sm:$0xff]  ;;  %19204 = vst [vmem:[#allocation72_spill] sm:$0xff] %v19203_v56 }
 0x5ef   : >> { %v5309_v9 = vsel %vm5306_vm2, %v5308_v30, %v5304_v15  ;;  %vm6203_vm9 = vmor %vm6201_vm11, %vm6202_vm0  ;;  %v19160_v30 = vld [vmem:[#allocation200_spill] sm:$0xff]  ;;  %19186 = vst [vmem:[#allocation14_spill] sm:$0xff] %v19185_v54  ;;  %v19189_v15 = vld [vmem:[#allocation91_spill] sm:$0xff]  ;;  %vm6855_vm1 = vcmask (%p17117_p5), 523712   ;;  %vm6859_vm2 = vcmask (%p17117_p5), 589312   ;;  %vm6867_vm0 = vcmask (%p17117_p5), 720512  }
 0x5f0   : >> { %v6198_v6 = vsub.f32 1.0, %v6197_v2  ;;  %v17106_v62 = vmul.f32 %v5309_v9, %v17002_v4   ;;  %v5749_v24 = vmul.f32 %v9858_v23, %v5748_v48  ;;  %v19152_v2 = vld [vmem:[#allocation52_spill] sm:$0xff]  ;;  %v19182_v9 = vld [vmem:[#allocation43_spill] sm:$0xff]  ;;  %19190 = vst [vmem:[#allocation6_spill] sm:$0xff] %v19189_v15  ;;  %v19310_v32 = vld [vmem:[#allocation37_spill] sm:$0xff] (%p17117_p5)  ;;  %vm6879_vm11 = vcmask (%p17117_p5), 917312  }
 0x5f1   : >> { %v19174_v18 = vld [vmem:[#allocation144_spill] sm:$0xff]  ;;  %v19201_v54 = vld [vmem:[#allocation191_spill] sm:$0xff]  ;;  %19232 = vst [vmem:[#allocation30_spill] sm:$0xff] %v19231_v13  ;;  %v19247_v13 = vld [vmem:[#allocation82_spill] sm:$0xff] }
 0x5f2   : >> { %19118 = vst [vmem:[#allocation211_spill] sm:$0xff] %v17106_v62  ;;  %v6199_v42 = vmul.f32 %v9860_v46, %v6198_v6  ;;  %v5750_v59 = vadd.f32 %v9858_v23, %v5749_v24  ;;  %v19128_v62 = vld [vmem:[#allocation205_spill] sm:$0xff]  ;;  %v19149_v6 = vld [vmem:[#allocation15_spill] sm:$0xff]  ;;  %v19316_v26 = vld [vmem:[#allocation138_spill] sm:$0xff] (%p17117_p5) }
 0x5f3   : >> { %v19132_v24 = vld [vmem:[#allocation189_spill] sm:$0xff]  ;;  %19202 = vst [vmem:[#allocation75_spill] sm:$0xff] %v19201_v54  ;;  %v19205_v15 = vld [vmem:[#allocation183_spill] sm:$0xff]  ;;  %v19317_v47 = vld [vmem:[#allocation134_spill] sm:$0xff] (%p17117_p5) }
 0x5f4   : >> { %v6200_v22 = vadd.f32 %v9860_v46, %v6199_v42  ;;  %v5754_v52 = vsel %vm5753_vm4, %v9858_v23, %v5750_v59  ;;  %v19129_v23 = vld [vmem:[#allocation201_spill] sm:$0xff]  ;;  %v19159_v42 = vld [vmem:[#allocation204_spill] sm:$0xff]  ;;  %19206 = vst [vmem:[#allocation69_spill] sm:$0xff] %v19205_v15  ;;  %v19217_v54 = vld [vmem:[#allocation159_spill] sm:$0xff]  ;;  %vm6875_vm4 = vcmask (%p17117_p5), 851712  }
 0x5f5   : >> { %v5759_v34 = vsel %vm5756_vm7, %v5758_v37, %v5754_v52  ;;  %v19141_v52 = vld [vmem:[#allocation153_spill] sm:$0xff]  ;;  %v19168_v37 = vld [vmem:[#allocation168_spill] sm:$0xff]  ;;  %19218 = vst [vmem:[#allocation51_spill] sm:$0xff] %v19217_v54  ;;  %v19219_v56 = vld [vmem:[#allocation155_spill] sm:$0xff]  ;;  %vm6883_vm7 = vcmask (%p17117_p5), 982912  }
 0x5f6   : >> { %v6204_v58 = vsel %vm6203_vm9, %v9860_v46, %v6200_v22  ;;  %v17109_v5 = vmul.f32 %v5759_v34, %v17075_v7   ;;  %v19138_v46 = vld [vmem:[#allocation165_spill] sm:$0xff]  ;;  %v19173_v59 = vld [vmem:[#allocation148_spill] sm:$0xff]  ;;  %v19180_v34 = vld [vmem:[#allocation19_spill] sm:$0xff]  ;;  %19220 = vst [vmem:[#allocation48_spill] sm:$0xff] %v19219_v56  ;;  %vm7088_vm9 = vcmask (%p17117_p5), 1041409  }
 0x5f7   : >> { %v6209_v4 = vsel %vm6206_vm8, %v6208_v10, %v6204_v58  ;;  %v19145_v22 = vld [vmem:[#allocation137_spill] sm:$0xff]  ;;  %v19154_v10 = vld [vmem:[#allocation76_spill] sm:$0xff]  ;;  %v19221_v15 = vld [vmem:[#allocation151_spill] sm:$0xff]  ;;  %19244 = vst [vmem:[#allocation9_spill] sm:$0xff] %v19243_v51  ;;  %vm7090_vm8 = vcmask (%p17117_p5), 1042434  }
 0x5f8   : >> { %19119 = vst [vmem:[#allocation212_spill] sm:$0xff] %v17109_v5  ;;  %v17112_v7 = vmul.f32 %v6209_v4, %v17078_v1   ;;  %v19139_v4 = vld [vmem:[#allocation161_spill] sm:$0xff]  ;;  %v19156_v12 = vmov %v17109_v5  ;;  %v19170_v58 = vld [vmem:[#allocation160_spill] sm:$0xff]  ;;  %v19233_v54 = vld [vmem:[#allocation127_spill] sm:$0xff] }
 0x5f9   : >> { %v19157_v5 = vmov %v19156_v12  ;;  %v19171_v1 = vld [vmem:[#allocation156_spill] sm:$0xff]  ;;  %v19191_v48 = vld [vmem:[#allocation211_spill] sm:$0xff]  ;;  %19222 = vst [vmem:[#allocation45_spill] sm:$0xff] %v19221_v15  ;;  %v19237_v15 = vld [vmem:[#allocation22_spill] sm:$0xff] }
 0x5fa   : >> { %19121 = vst [vmem:[#allocation213_spill] sm:$0xff] %v17112_v7  ;;  %v19124_v31 = vmov %v17112_v7  ;;  %v19197_v12 = vld [vmem:[#allocation199_spill] sm:$0xff]  ;;  %v19259_v51 = vld [vmem:[#allocation194_spill] sm:$0xff]  ;;  %v19308_v2 = vld [vmem:[#allocation73_spill] sm:$0xff] (%p17117_p5) }
 0x5fb   : >> { %v19125_v7 = vmov %v19124_v31  ;;  %19192 = vst [vmem:[#allocation90_spill] sm:$0xff] %v19191_v48  ;;  %v19193_v31 = vld [vmem:[#allocation207_spill] sm:$0xff]  ;;  %v19311_v55 = vld [vmem:[#allocation61_spill] sm:$0xff] (%p17117_p5)  ;;  %v19318_v49 = vld [vmem:[#allocation130_spill] sm:$0xff] (%p17117_p5) }
 0x5fc   : >> { %19194 = vst [vmem:[#allocation87_spill] sm:$0xff] %v19193_v31  ;;  %v19207_v48 = vld [vmem:[#allocation179_spill] sm:$0xff]  ;;  %v19309_v7 = vld [vmem:[#allocation4_spill] sm:$0xff] (%p17117_p5)  ;;  %v6349_v27 = vmul.f32 (%p17117_p5), %v17516_v39, %v19311_v55  ;;  %v19312_v3 = vld [vmem:[#allocation85_spill] sm:$0xff] (%p17117_p5) }
 0x5fd   : >> { %19198 = vst [vmem:[#allocation81_spill] sm:$0xff] %v19197_v12  ;;  %v19209_v31 = vld [vmem:[#allocation175_spill] sm:$0xff]  ;;  %v17537_v29 = vld [vmem:[%s18105_s5 + $0x38] sm:$0xff] (%p17117_p5)  ;;  %v17542_v11 = vld [vmem:[%s18105_s5 + $0x30] sm:$0xff] (%p17117_p5) }
 0x5fe   : >> { %19208 = vst [vmem:[#allocation66_spill] sm:$0xff] %v19207_v48  ;;  %v19213_v12 = vld [vmem:[#allocation167_spill] sm:$0xff]  ;;  %v19315_v63 = vld [vmem:[#allocation25_spill] sm:$0xff] (%p17117_p5)  ;;  %v19319_v46 = vld [vmem:[#allocation150_spill] sm:$0xff] (%p17117_p5) }
 0x5ff   : >> { %19210 = vst [vmem:[#allocation63_spill] sm:$0xff] %v19209_v31  ;;  %v19223_v48 = vld [vmem:[#allocation147_spill] sm:$0xff]  ;;  %v6352_v16 = vmul.f32 (%p17117_p5), %v17542_v11, %v19315_v63  ;;  %v17553_v40 = vld [vmem:[%s18105_s5 + $0x58] sm:$0xff] (%p17117_p5)  ;;  %v17558_v35 = vld [vmem:[%s18105_s5 + $0x50] sm:$0xff] (%p17117_p5) }
 0x600   : >> { %19214 = vst [vmem:[#allocation57_spill] sm:$0xff] %v19213_v12  ;;  %v19225_v31 = vld [vmem:[#allocation143_spill] sm:$0xff]  ;;  %v6357_v60 = vmul.f32 (%p17117_p5), %v17553_v40, %v19316_v26  ;;  %v6356_v18 = vmul.f32 (%p17117_p5), %v17558_v35, %v19317_v47  ;;  %v17574_v5 = vld [vmem:[%s18105_s5 + $0x70] sm:$0xff] (%p17117_p5)  ;;  %v19320_v28 = vld [vmem:[#allocation146_spill] sm:$0xff] (%p17117_p5) }
 0x601   : >> { %19224 = vst [vmem:[#allocation42_spill] sm:$0xff] %v19223_v48  ;;  %v19229_v12 = vld [vmem:[#allocation135_spill] sm:$0xff]  ;;  %v19239_v48 = vld [vmem:[#allocation34_spill] sm:$0xff]  ;;  %v6360_v20 = vmul.f32 (%p17117_p5), %v17574_v5, %v19319_v46 }
 0x602   : >> { %19226 = vst [vmem:[#allocation39_spill] sm:$0xff] %v19225_v31  ;;  %v19235_v56 = vld [vmem:[#allocation7_spill] sm:$0xff]  ;;  %v19241_v31 = vld [vmem:[#allocation46_spill] sm:$0xff] }
 0x603   : >> { %19230 = vst [vmem:[#allocation33_spill] sm:$0xff] %v19229_v12  ;;  %v19245_v12 = vld [vmem:[#allocation70_spill] sm:$0xff]  ;;  %v17511_v57 = vld [vmem:[%s18105_s5 + $0x28] sm:$0xff] (%p17117_p5) }
 0x604   : >> { %19234 = vst [vmem:[#allocation27_spill] sm:$0xff] %v19233_v54  ;;  %v19249_v54 = vld [vmem:[#allocation92_spill] sm:$0xff]  ;;  %v6351_v38 = vmul.f32 (%p17117_p5), %v17511_v57, %v19310_v32  ;;  %v19314_v36 = vld [vmem:[#allocation11_spill] sm:$0xff] (%p17117_p5)  ;;  %v19321_v9 = vld [vmem:[#allocation142_spill] sm:$0xff] (%p17117_p5) }
 0x605   : >> { %19236 = vst [vmem:[#allocation24_spill] sm:$0xff] %v19235_v56  ;;  %v19251_v56 = vld [vmem:[#allocation210_spill] sm:$0xff]  ;;  %v17521_v33 = vld [vmem:[%s18105_s5 + $0x8] sm:$0xff] (%p17117_p5)  ;;  %v6353_v25 = vmul.f32 (%p17117_p5), %v17537_v29, %v19314_v36 }
 0x606   : >> { %19238 = vst [vmem:[#allocation21_spill] sm:$0xff] %v19237_v15  ;;  %v19253_v15 = vld [vmem:[#allocation206_spill] sm:$0xff]  ;;  %v6347_v14 = vmul.f32 (%p17117_p5), %v17521_v33, %v19312_v3  ;;  %v17563_v50 = vld [vmem:[%s18105_s5 + $0x48] sm:$0xff] (%p17117_p5) }
 0x607   : >> { %19240 = vst [vmem:[#allocation17_spill] sm:$0xff] %v19239_v48  ;;  %v19255_v48 = vld [vmem:[#allocation202_spill] sm:$0xff]  ;;  %v6355_v21 = vmul.f32 (%p17117_p5), %v17563_v50, %v19318_v49  ;;  %v17579_v19 = vld [vmem:[%s18105_s5 + $0x68] sm:$0xff] (%p17117_p5) }
 0x608   : >> { %19242 = vst [vmem:[#allocation13_spill] sm:$0xff] %v19241_v31  ;;  %v19257_v31 = vld [vmem:[#allocation198_spill] sm:$0xff]  ;;  %v6359_v30 = vmul.f32 (%p17117_p5), %v17579_v19, %v19320_v28 }
 0x609   : >> { %19246 = vst [vmem:[#allocation5_spill] sm:$0xff] %v19245_v12  ;;  %v19261_v12 = vld [vmem:[#allocation190_spill] sm:$0xff] }
 0x60a   : >> { %19248 = vst [vmem:[#allocation89_spill] sm:$0xff] %v19247_v13  ;;  %v19263_v13 = vld [vmem:[#allocation186_spill] sm:$0xff] }
 0x60b   : >> { %19250 = vst [vmem:[#allocation86_spill] sm:$0xff] %v19249_v54  ;;  %v19265_v54 = vld [vmem:[#allocation182_spill] sm:$0xff] }
 0x60c   : >> { %19252 = vst [vmem:[#allocation83_spill] sm:$0xff] %v19251_v56  ;;  %v19267_v56 = vld [vmem:[#allocation178_spill] sm:$0xff] }
 0x60d   : >> { %19254 = vst [vmem:[#allocation80_spill] sm:$0xff] %v19253_v15  ;;  %v19269_v15 = vld [vmem:[#allocation174_spill] sm:$0xff] }
 0x60e   : >> { %19256 = vst [vmem:[#allocation77_spill] sm:$0xff] %v19255_v48  ;;  %v19271_v48 = vld [vmem:[#allocation170_spill] sm:$0xff] }
 0x60f   : >> { %19258 = vst [vmem:[#allocation74_spill] sm:$0xff] %v19257_v31  ;;  %v19273_v31 = vld [vmem:[#allocation166_spill] sm:$0xff] }
 0x610   : >> { %19260 = vst [vmem:[#allocation71_spill] sm:$0xff] %v19259_v51  ;;  %v19275_v51 = vld [vmem:[#allocation162_spill] sm:$0xff] }
 0x611   : >> { %19262 = vst [vmem:[#allocation68_spill] sm:$0xff] %v19261_v12  ;;  %v19277_v12 = vld [vmem:[#allocation158_spill] sm:$0xff] }
 0x612   : >> { %19264 = vst [vmem:[#allocation65_spill] sm:$0xff] %v19263_v13  ;;  %v19279_v13 = vld [vmem:[#allocation154_spill] sm:$0xff] }
 0x613   : >> { %19266 = vst [vmem:[#allocation62_spill] sm:$0xff] %v19265_v54  ;;  %v19281_v54 = vld [vmem:[#allocation150_spill] sm:$0xff] }
 0x614   : >> { %19268 = vst [vmem:[#allocation59_spill] sm:$0xff] %v19267_v56  ;;  %v19283_v56 = vld [vmem:[#allocation146_spill] sm:$0xff] }
 0x615   : >> { %19270 = vst [vmem:[#allocation56_spill] sm:$0xff] %v19269_v15  ;;  %v19285_v15 = vld [vmem:[#allocation142_spill] sm:$0xff] }
 0x616   : >> { %19272 = vst [vmem:[#allocation53_spill] sm:$0xff] %v19271_v48  ;;  %v19287_v48 = vld [vmem:[#allocation138_spill] sm:$0xff] }
 0x617   : >> { %19274 = vst [vmem:[#allocation50_spill] sm:$0xff] %v19273_v31  ;;  %v19289_v31 = vld [vmem:[#allocation134_spill] sm:$0xff] }
 0x618   : >> { %19276 = vst [vmem:[#allocation47_spill] sm:$0xff] %v19275_v51  ;;  %v19291_v51 = vld [vmem:[#allocation130_spill] sm:$0xff] }
 0x619   : >> { %19278 = vst [vmem:[#allocation44_spill] sm:$0xff] %v19277_v12  ;;  %v19293_v12 = vld [vmem:[#allocation126_spill] sm:$0xff] }
 0x61a   : >> { %19280 = vst [vmem:[#allocation41_spill] sm:$0xff] %v19279_v13  ;;  %v19300_v13 = vld [vmem:[#allocation61_spill] sm:$0xff]  ;;  %v17584_v23 = vld [vmem:[%s18105_s5 + $0x60] sm:$0xff] (%p17117_p5) }
 0x61b   : >> { %19282 = vst [vmem:[#allocation38_spill] sm:$0xff] %v19281_v54  ;;  %v19297_v54 = vld [vmem:[#allocation37_spill] sm:$0xff]  ;;  %v6358_v45 = vmul.f32 (%p17117_p5), %v17584_v23, %v19321_v9  ;;  %v19322_v44 = vld [vmem:[#allocation162_spill] sm:$0xff] (%p17117_p5) }
 0x61c   : >> { %19284 = vst [vmem:[#allocation35_spill] sm:$0xff] %v19283_v56  ;;  %v19296_v56 = vld [vmem:[#allocation25_spill] sm:$0xff]  ;;  %v19323_v24 = vld [vmem:[#allocation158_spill] sm:$0xff] (%p17117_p5) }
 0x61d   : >> { %19286 = vst [vmem:[#allocation32_spill] sm:$0xff] %v19285_v15  ;;  %v19303_v15 = vld [vmem:[#allocation85_spill] sm:$0xff]  ;;  %v6362_v43 = vmul.f32 (%p17117_p5), %v17521_v33, %v19323_v24  ;;  %v19324_v42 = vld [vmem:[#allocation154_spill] sm:$0xff] (%p17117_p5) }
 0x61e   : >> { %19288 = vst [vmem:[#allocation29_spill] sm:$0xff] %v19287_v48  ;;  %v19295_v48 = vld [vmem:[#allocation11_spill] sm:$0xff]  ;;  %v19325_v59 = vld [vmem:[#allocation174_spill] sm:$0xff] (%p17117_p5) }
 0x61f   : >> { %19290 = vst [vmem:[#allocation26_spill] sm:$0xff] %v19289_v31  ;;  %v19304_v31 = vld [vmem:[#allocation4_spill] sm:$0xff]  ;;  %v6366_v37 = vmul.f32 (%p17117_p5), %v17511_v57, %v19325_v59  ;;  %v19326_v22 = vld [vmem:[#allocation170_spill] sm:$0xff] (%p17117_p5) }
 0x620   : >> { %19292 = vst [vmem:[#allocation23_spill] sm:$0xff] %v19291_v51  ;;  %v19301_v51 = vld [vmem:[#allocation73_spill] sm:$0xff]  ;;  %3368 = sbr.rel (!%p17117_p5) target bundleno = 765 (0x2fd), region = 87  ;;  %v19327_v10 = vld [vmem:[#allocation166_spill] sm:$0xff] (%p17117_p5) }
 0x621   : >> { %19294 = vst [vmem:[#allocation20_spill] sm:$0xff] %v19293_v12  ;;  %v19298_v12 = vld [vmem:[#allocation49_spill] sm:$0xff]  ;;  %v6364_v34 = vmul.f32 (%p17117_p5), %v17516_v39, %v19327_v10  ;;  %v19328_v58 = vld [vmem:[#allocation186_spill] sm:$0xff] (%p17117_p5) }
 0x622   : >> { %19299 = vst [vmem:[#allocation16_spill] sm:$0xff] %v19298_v12  ;;  %v17490_v12 = vld [vmem:[%s18105_s5 + $0x20] sm:$0xff] (%p17117_p5)  ;;  %v6369_v4 = vmul.f32 (%p17117_p5), %v17532_v8, %v19328_v58 }
 0x623   : >> { %19302 = vst [vmem:[#allocation12_spill] sm:$0xff] %v19301_v51  ;;  %v17495_v51 = vld [vmem:[%s18105_s5 + $0x10] sm:$0xff] (%p17117_p5)  ;;  %v6350_v1 = vmul.f32 (%p17117_p5), %v17490_v12, %v19307_v0  ;;  %v6365_v52 = vmul.f32 (%p17117_p5), %v17490_v12, %v19326_v22  ;;  %v19329_v13 = vld [vmem:[#allocation182_spill] sm:$0xff] (%p17117_p5) }
 0x624   : >> { %19305 = vst [vmem:[#allocation8_spill] sm:$0xff] %v19304_v31  ;;  %v17500_v31 = vld [vmem:[%s18105_s5] sm:$0xff] (%p17117_p5)  ;;  %v6348_v62 = vmul.f32 (%p17117_p5), %v17495_v51, %v19308_v2  ;;  %v6363_v6 = vmul.f32 (%p17117_p5), %v17495_v51, %v19322_v44  ;;  %v6368_v54 = vmul.f32 (%p17117_p5), %v17537_v29, %v19329_v13 }
 0x625   : > { %v6346_v53 = vmul.f32 %v17500_v31, %v19309_v7  ;;  %6474 = vadd.xlane.f32.xlu2 %v6350_v1  ;;  %v6361_v41 = vmul.f32 %v17500_v31, %v19324_v42  ;;  %v19330_v56 = vld [vmem:[#allocation178_spill] sm:$0xff] }
 0x626   : > { %6470 = vadd.xlane.f32.xlu1 %v6348_v62  ;;  %v6367_v15 = vmul.f32 %v17542_v11, %v19330_v56  ;;  %v19331_v48 = vld [vmem:[#allocation198_spill] sm:$0xff] }
 0x627   : > { %6466 = vadd.xlane.f32.xlu0 %v6346_v53  ;;  %v6372_v0 = vmul.f32 %v17553_v40, %v19331_v48  ;;  %v19332_v1 = vld [vmem:[#allocation194_spill] sm:$0xff] }
 0x628   : > { %v6371_v2 = vmul.f32 %v17558_v35, %v19332_v1  ;;  %v19333_v62 = vld [vmem:[#allocation190_spill] sm:$0xff] }
 0x629   : > { %v6370_v7 = vmul.f32 %v17563_v50, %v19333_v62  ;;  %v19334_v53 = vld [vmem:[#allocation210_spill] sm:$0xff] }
 0x62a   : > { %v6375_v32 = vmul.f32 %v17574_v5, %v19334_v53 }
 0x62d   : > { %6476 = vadd.xlane.f32.xlu2 %v6351_v38  ;;  %v19335_v38 = vld [vmem:[#allocation206_spill] sm:$0xff] }
 0x62e   : > { %6472 = vadd.xlane.f32.xlu1 %v6349_v27  ;;  %v6374_v55 = vmul.f32 %v17579_v19, %v19335_v38  ;;  %v19336_v27 = vld [vmem:[#allocation202_spill] sm:$0xff] }
 0x62f   : > { %6468 = vadd.xlane.f32.xlu0 %v6347_v14  ;;  %v6373_v3 = vmul.f32 %v17584_v23, %v19336_v27  ;;  %v19337_v14 = vld [vmem:[#allocation70_spill] sm:$0xff] }
 0x630   : > { %v6378_v61 = vmul.f32 %v17495_v51, %v19337_v14  ;;  %v19355_v14 = vld [vmem:[#allocation175_spill] sm:$0xff] }
 0x635   : > { %6482 = vadd.xlane.f32.xlu2 %v6354_v17  ;;  %v19338_v17 = vld [vmem:[#allocation82_spill] sm:$0xff] }
 0x636   : > { %6480 = vadd.xlane.f32.xlu1 %v6353_v25  ;;  %v6377_v36 = vmul.f32 %v17521_v33, %v19338_v17  ;;  %v19339_v25 = vld [vmem:[#allocation92_spill] sm:$0xff]  ;;  %v19356_v17 = vld [vmem:[#allocation171_spill] sm:$0xff] }
 0x637   : > { %6478 = vadd.xlane.f32.xlu0 %v6352_v16  ;;  %v6376_v63 = vmul.f32 %v17500_v31, %v19339_v25  ;;  %v19340_v16 = vld [vmem:[#allocation34_spill] sm:$0xff] }
 0x638   : > { %v6381_v26 = vmul.f32 %v17511_v57, %v19340_v16  ;;  %v19357_v16 = vld [vmem:[#allocation167_spill] sm:$0xff] }
 0x63d   : > { %6488 = vadd.xlane.f32.xlu2 %v6357_v60  ;;  %v19341_v60 = vld [vmem:[#allocation46_spill] sm:$0xff] }
 0x63e   : > { %6486 = vadd.xlane.f32.xlu1 %v6356_v18  ;;  %v6380_v47 = vmul.f32 %v17490_v12, %v19341_v60  ;;  %v19342_v18 = vld [vmem:[#allocation58_spill] sm:$0xff] }
 0x63f   : > { %6484 = vadd.xlane.f32.xlu0 %v6355_v21  ;;  %v6379_v49 = vmul.f32 %v17516_v39, %v19342_v18  ;;  %v19343_v21 = vld [vmem:[#allocation127_spill] sm:$0xff] }
 0x640   : > { %v6384_v46 = vmul.f32 %v17532_v8, %v19343_v21 }
 0x645   : > { %6494 = vadd.xlane.f32.xlu2 %v6360_v20  ;;  %v19344_v20 = vld [vmem:[#allocation7_spill] sm:$0xff] }
 0x646   : > { %6492 = vadd.xlane.f32.xlu1 %v6359_v30  ;;  %v6383_v28 = vmul.f32 %v17537_v29, %v19344_v20  ;;  %v19345_v30 = vld [vmem:[#allocation22_spill] sm:$0xff] }
 0x647   : > { %6490 = vadd.xlane.f32.xlu0 %v6358_v45  ;;  %v6382_v9 = vmul.f32 %v17542_v11, %v19345_v30  ;;  %v19346_v45 = vld [vmem:[#allocation139_spill] sm:$0xff] }
 0x648   : > { %v6387_v44 = vmul.f32 %v17553_v40, %v19346_v45 }
 0x64d   : > { %6500 = vadd.xlane.f32.xlu2 %v6363_v6  ;;  %v19347_v6 = vld [vmem:[#allocation135_spill] sm:$0xff] }
 0x64e   : > { %6498 = vadd.xlane.f32.xlu1 %v6362_v43  ;;  %v6386_v24 = vmul.f32 %v17558_v35, %v19347_v6  ;;  %v19348_v43 = vld [vmem:[#allocation131_spill] sm:$0xff] }
 0x64f   : > { %6496 = vadd.xlane.f32.xlu0 %v6361_v41  ;;  %v6385_v42 = vmul.f32 %v17563_v50, %v19348_v43  ;;  %v19349_v41 = vld [vmem:[#allocation151_spill] sm:$0xff] }
 0x650   : > { %v6390_v59 = vmul.f32 %v17574_v5, %v19349_v41  ;;  %v19358_v41 = vld [vmem:[#allocation187_spill] sm:$0xff] }
 0x655   : > { %6506 = vadd.xlane.f32.xlu2 %v6366_v37  ;;  %v19350_v37 = vld [vmem:[#allocation147_spill] sm:$0xff] }
 0x656   : > { %6504 = vadd.xlane.f32.xlu1 %v6365_v52  ;;  %v6389_v22 = vmul.f32 %v17579_v19, %v19350_v37  ;;  %v19351_v52 = vld [vmem:[#allocation143_spill] sm:$0xff] }
 0x657   : > { %6502 = vadd.xlane.f32.xlu0 %v6364_v34  ;;  %v6388_v10 = vmul.f32 %v17584_v23, %v19351_v52  ;;  %v6826_v34 = vlaneseq  ;;  %v19359_v37 = vld [vmem:[#allocation183_spill] sm:$0xff] }
 0x65d   : > { %6512 = vadd.xlane.f32.xlu2 %v6369_v4 }
 0x65e   : > { %6510 = vadd.xlane.f32.xlu1 %v6368_v54  ;;  %v19352_v54 = vld [vmem:[#allocation163_spill] sm:$0xff] }
 0x65f   : > { %6508 = vadd.xlane.f32.xlu0 %v6367_v15  ;;  %v6393_v56 = vmul.f32 %v17495_v51, %v19352_v54  ;;  %v19353_v15 = vld [vmem:[#allocation159_spill] sm:$0xff] }
 0x660   : > { %v6392_v48 = vmul.f32 %v17521_v33, %v19353_v15 }
 0x665   : > { %6518 = vadd.xlane.f32.xlu2 %v6372_v0  ;;  %v19354_v0 = vld [vmem:[#allocation155_spill] sm:$0xff] }
 0x666   : > { %6516 = vadd.xlane.f32.xlu1 %v6371_v2  ;;  %v6391_v1 = vmul.f32 %v17500_v31, %v19354_v0  ;;  %v17658_v2 = vand.u32 127, %v6826_v34  ;;  %v19360_v34 = vld [vmem:[#allocation179_spill] sm:$0xff] }
 0x667   : > { %6514 = vadd.xlane.f32.xlu0 %v6370_v7 }
 0x668   : > { %v17661_v62 = vadd.s32 4294967288, %v17658_v2  ;;  %v17664_v7 = vadd.s32 4294967280, %v17658_v2  ;;  %v17667_v53 = vadd.s32 4294967264, %v17658_v2  ;;  %v17670_v38 = vadd.s32 4294967272, %v17658_v2 }
 0x669   : > { %v17673_v27 = vadd.s32 4294967256, %v17658_v2  ;;  %v17694_v30 = vadd.s32 4294967232, %v17658_v2  ;;  %v17713_v54 = vadd.s32 4294967216, %v17658_v2 }
 0x66d   : > { %6524 = vadd.xlane.f32.xlu2 %v6375_v32 }
 0x66e   : > { %6522 = vadd.xlane.f32.xlu1 %v6374_v55 }
 0x66f   : > { %6520 = vadd.xlane.f32.xlu0 %v6373_v3 }
 0x675   : > { %6530 = vadd.xlane.f32.xlu2 %v6378_v61  ;;  %v6396_v61 = vmul.f32 %v17511_v57, %v19355_v14 }
 0x676   : > { %6528 = vadd.xlane.f32.xlu1 %v6377_v36  ;;  %v6395_v36 = vmul.f32 %v17490_v12, %v19356_v17 }
 0x677   : > { %6526 = vadd.xlane.f32.xlu0 %v6376_v63 }
 0x67d   : > { %6536 = vadd.xlane.f32.xlu2 %v6381_v26  ;;  %v6394_v26 = vmul.f32 %v17516_v39, %v19357_v16 }
 0x67e   : > { %6534 = vadd.xlane.f32.xlu1 %v6380_v47 }
 0x67f   : > { %6532 = vadd.xlane.f32.xlu0 %v6379_v49 }
 0x685   : > { %6542 = vadd.xlane.f32.xlu2 %v6384_v46  ;;  %v17689_v46 = vadd.s32 4294967240, %v17658_v2 }
 0x686   : > { %6540 = vadd.xlane.f32.xlu1 %v6383_v28 }
 0x687   : > { %6538 = vadd.xlane.f32.xlu0 %v6382_v9  ;;  %v17697_v9 = vadd.s32 4294967248, %v17658_v2 }
 0x68d   : > { %6548 = vadd.xlane.f32.xlu2 %v6387_v44 }
 0x68e   : > { %6546 = vadd.xlane.f32.xlu1 %v6386_v24 }
 0x68f   : > { %6544 = vadd.xlane.f32.xlu0 %v6385_v42 }
 0x695   : > { %6554 = vadd.xlane.f32.xlu2 %v6390_v59  ;;  %v6399_v59 = vmul.f32 %v17532_v8, %v19358_v41 }
 0x696   : > { %6552 = vadd.xlane.f32.xlu1 %v6389_v22  ;;  %v6398_v22 = vmul.f32 %v17537_v29, %v19359_v37  ;;  %v19366_v37 = vld [vmem:[#allocation203_spill] sm:$0xff] }
 0x697   : > { %6550 = vadd.xlane.f32.xlu0 %v6388_v10 }
 0x698   : > { %v6475_v58 = vpop.xlane.xlu2 %6474 }
 0x699   : > { %v6471_v4 = vpop.xlane.xlu1 %6470  ;;  %v6842_v49 = vperm.slane %v6475_v58, %v17667_v53  ;;  %v6397_v58 = vmul.f32 %v17542_v11, %v19360_v34 }
 0x69a   : > { %v6467_v13 = vpop.xlane.xlu0 %6466  ;;  %v6834_v60 = vperm.slane %v6471_v4, %v17664_v7 }
 0x69b   : > { %v6828_v25 = vperm.slane %v6467_v13, %v17658_v2 }
 0x69d   : > { %6560 = vadd.xlane.f32.xlu2 %v6393_v56  ;;  %v17716_v56 = vadd.s32 4294967208, %v17658_v2 }
 0x69e   : > { %6558 = vadd.xlane.f32.xlu1 %v6392_v48  ;;  %v17720_v48 = vadd.s32 4294967224, %v17658_v2 }
 0x69f   : > { %6556 = vadd.xlane.f32.xlu0 %v6391_v1 }
 0x6a0   : > { %v6477_v32 = vpop.xlane.xlu2 %6476 }
 0x6a1   : > { %v6473_v55 = vpop.xlane.xlu1 %6472  ;;  %v6846_v20 = vperm.slane %v6477_v32, %v17673_v27 }
 0x6a2   : > { %v6469_v3 = vpop.xlane.xlu0 %6468  ;;  %v6838_v47 = vperm.slane %v6473_v55, %v17670_v38 }
 0x6a3   : > { %v6830_v63 = vperm.slane %v6469_v3, %v17661_v62  ;;  %v19361_v3 = vld [vmem:[#allocation199_spill] sm:$0xff] }
 0x6a4   : > { %v6402_v14 = vmul.f32 %v17553_v40, %v19361_v3 }
 0x6a5   : > { %v6832_v18 = vsel %vm6831_vm10, %v6830_v63, %v6828_v25  ;;  %6566 = vadd.xlane.f32.xlu2 %v6396_v61  ;;  %v19362_v61 = vld [vmem:[#allocation195_spill] sm:$0xff] }
 0x6a6   : > { %v6836_v21 = vsel %vm6835_vm12, %v6834_v60, %v6832_v18  ;;  %6564 = vadd.xlane.f32.xlu1 %v6395_v36  ;;  %v6401_v17 = vmul.f32 %v17558_v35, %v19362_v61  ;;  %v19363_v63 = vld [vmem:[#allocation191_spill] sm:$0xff]  ;;  %v17737_v18 = vadd.s32 4294967184, %v17658_v2 }
 0x6a7   : > { %v6840_v28 = vsel %vm6839_vm13, %v6838_v47, %v6836_v21  ;;  %6562 = vadd.xlane.f32.xlu0 %v6394_v26  ;;  %v6400_v16 = vmul.f32 %v17563_v50, %v19363_v63  ;;  %v17734_v47 = vadd.s32 4294967192, %v17658_v2  ;;  %v17741_v21 = vadd.s32 4294967200, %v17658_v2  ;;  %v19369_v61 = vld [vmem:[#allocation91_spill] sm:$0xff] }
 0x6a8   : > { %v6844_v45 = vsel %vm6843_vm14, %v6842_v49, %v6840_v28  ;;  %v6483_v44 = vpop.xlane.xlu2 %6482 }
 0x6a9   : > { %v6481_v6 = vpop.xlane.xlu1 %6480  ;;  %v6848_v24 = vsel %vm6847_vm15, %v6846_v20, %v6844_v45  ;;  %v6858_v52 = vperm.slane %v6483_v44, %v17694_v30 }
 0x6aa   : > { %v6854_v43 = vperm.slane %v6481_v6, %v17689_v46  ;;  %v6479_v42 = vpop.xlane.xlu0 %6478  ;;  %v19364_v6 = vld [vmem:[#allocation211_spill] sm:$0xff] }
 0x6ab   : > { %v6850_v10 = vperm.slane %v6479_v42, %v17697_v9 }
 0x6ad   : > { %v6852_v4 = vsel %vm6851_vm5, %v6850_v10, %v6848_v24  ;;  %6572 = vadd.xlane.f32.xlu2 %v6399_v59  ;;  %v6405_v24 = vmul.f32 %v17574_v5, %v19364_v6 }
 0x6ae   : > { %v6856_v13 = vsel %vm6855_vm1, %v6854_v43, %v6852_v4  ;;  %6570 = vadd.xlane.f32.xlu1 %v6398_v22  ;;  %v19365_v43 = vld [vmem:[#allocation207_spill] sm:$0xff]  ;;  %v6403_v22 = vmul.f32 %v17584_v23, %v19366_v37 }
 0x6af   : > { %6568 = vadd.xlane.f32.xlu0 %v6397_v58  ;;  %v6860_v15 = vsel %vm6859_vm2, %v6858_v52, %v6856_v13  ;;  %v6404_v42 = vmul.f32 %v17579_v19, %v19365_v43 }
 0x6b0   : > { %v6489_v0 = vpop.xlane.xlu2 %6488 }
 0x6b1   : > { %v6487_v1 = vpop.xlane.xlu1 %6486  ;;  %v6870_v36 = vperm.slane %v6489_v0, %v17716_v56 }
 0x6b2   : > { %v6866_v32 = vperm.slane %v6487_v1, %v17713_v54  ;;  %v6485_v55 = vpop.xlane.xlu0 %6484  ;;  %v19367_v1 = vld [vmem:[#allocation67_spill] sm:$0xff] }
 0x6b3   : > { %v6862_v25 = vperm.slane %v6485_v55, %v17720_v48  ;;  %v19368_v55 = vld [vmem:[#allocation79_spill] sm:$0xff] }
 0x6b4   : > { %v6407_v3 = vmul.f32 %v17521_v33, %v19368_v55 }
 0x6b5   : > { %v6864_v26 = vsel %vm6863_vm3, %v6862_v25, %v6860_v15  ;;  %6578 = vadd.xlane.f32.xlu2 %v6402_v14 }
 0x6b6   : > { %v6868_v60 = vsel %vm6867_vm0, %v6866_v32, %v6864_v26  ;;  %6576 = vadd.xlane.f32.xlu1 %v6401_v17  ;;  %v6408_v32 = vmul.f32 %v17495_v51, %v19367_v1  ;;  %v6406_v17 = vmul.f32 %v17500_v31, %v19369_v61 }
 0x6b7   : > { %6574 = vadd.xlane.f32.xlu0 %v6400_v16  ;;  %v6872_v49 = vsel %vm6871_vm6, %v6870_v36, %v6868_v60 }
 0x6b8   : > { %v6495_v20 = vpop.xlane.xlu2 %6494 }
 0x6b9   : > { %v6493_v28 = vpop.xlane.xlu1 %6492  ;;  %v6882_v41 = vperm.slane %v6495_v20, %v17737_v18 }
 0x6ba   : > { %v6878_v45 = vperm.slane %v6493_v28, %v17734_v47  ;;  %v6491_v44 = vpop.xlane.xlu0 %6490  ;;  %v19371_v28 = vld [vmem:[#allocation43_spill] sm:$0xff] }
 0x6bb   : > { %v6874_v59 = vperm.slane %v6491_v44, %v17741_v21 }
 0x6bd   : > { %v6876_v52 = vsel %vm6875_vm4, %v6874_v59, %v6872_v49  ;;  %6584 = vadd.xlane.f32.xlu2 %v6405_v24  ;;  %v19370_v49 = vld [vmem:[#allocation31_spill] sm:$0xff] }
 0x6be   : > { %v6880_v10 = vsel %vm6879_vm11, %v6878_v45, %v6876_v52  ;;  %6582 = vadd.xlane.f32.xlu1 %v6404_v42  ;;  %v6411_v20 = vmul.f32 %v17511_v57, %v19370_v49  ;;  %v6410_v45 = vmul.f32 %v17490_v12, %v19371_v28  ;;  %v19372_v24 = vld [vmem:[#allocation55_spill] sm:$0xff] }
 0x6bf   : > { %v17755_v34 = vsel %vm6883_vm7, %v6882_v41, %v6880_v10  ;;  %6580 = vadd.xlane.f32.xlu0 %v6403_v22  ;;  %v6409_v43 = vmul.f32 %v17516_v39, %v19372_v24 }
 0x6c0   : > { %v6501_v58 = vpop.xlane.xlu2 %6500 }
 0x6c1   : > { %v6499_v4 = vpop.xlane.xlu1 %6498  ;;  %v6888_v13 = vperm.slane %v6501_v58, %v17664_v7  ;;  %v19373_v58 = vld [vmem:[#allocation128_spill] sm:$0xff] }
 0x6c2   : > { %v6886_v15 = vperm.slane %v6499_v4, %v17661_v62  ;;  %v6497_v0 = vpop.xlane.xlu0 %6496  ;;  %v6414_v4 = vmul.f32 %v17532_v8, %v19373_v58 }
 0x6c3   : > { %v6885_v14 = vperm.slane %v6497_v0, %v17658_v2 }
 0x6c5   : > { %v6887_v36 = vsel %vm6831_vm10, %v6886_v15, %v6885_v14  ;;  %6590 = vadd.xlane.f32.xlu2 %v6408_v32  ;;  %v19375_v32 = vld [vmem:[#allocation19_spill] sm:$0xff] }
 0x6c6   : > { %6588 = vadd.xlane.f32.xlu1 %v6407_v3  ;;  %v6889_v25 = vsel %vm6835_vm12, %v6888_v13, %v6887_v36  ;;  %v19374_v13 = vld [vmem:[#allocation3_spill] sm:$0xff]  ;;  %v6412_v55 = vmul.f32 %v17542_v11, %v19375_v32 }
 0x6c7   : > { %6586 = vadd.xlane.f32.xlu0 %v6406_v17  ;;  %v6413_v15 = vmul.f32 %v17537_v29, %v19374_v13 }
 0x6c8   : > { %v6507_v63 = vpop.xlane.xlu2 %6506 }
 0x6c9   : > { %v6505_v16 = vpop.xlane.xlu1 %6504  ;;  %v6894_v44 = vperm.slane %v6507_v63, %v17673_v27 }
 0x6ca   : > { %v6892_v26 = vperm.slane %v6505_v16, %v17667_v53  ;;  %v6503_v60 = vpop.xlane.xlu0 %6502  ;;  %v19376_v16 = vld [vmem:[#allocation140_spill] sm:$0xff] }
 0x6cb   : > { %v6890_v6 = vperm.slane %v6503_v60, %v17670_v38  ;;  %v19377_v60 = vld [vmem:[#allocation136_spill] sm:$0xff] }
 0x6cc   : > { %v6416_v49 = vmul.f32 %v17558_v35, %v19377_v60 }
 0x6cd   : > { %v6891_v42 = vsel %vm6839_vm13, %v6890_v6, %v6889_v25  ;;  %6596 = vadd.xlane.f32.xlu2 %v6411_v20 }
 0x6ce   : > { %v6893_v41 = vsel %vm6843_vm14, %v6892_v26, %v6891_v42  ;;  %6594 = vadd.xlane.f32.xlu1 %v6410_v45  ;;  %v6417_v26 = vmul.f32 %v17553_v40, %v19376_v16  ;;  %v19378_v45 = vld [vmem:[#allocation132_spill] sm:$0xff] }
 0x6cf   : > { %6592 = vadd.xlane.f32.xlu0 %v6409_v43  ;;  %v6895_v59 = vsel %vm6847_vm15, %v6894_v44, %v6893_v41  ;;  %v6415_v44 = vmul.f32 %v17563_v50, %v19378_v45 }
 0x6d0   : > { %v6513_v37 = vpop.xlane.xlu2 %6512 }
 0x6d1   : > { %v6511_v22 = vpop.xlane.xlu1 %6510  ;;  %v6900_v0 = vperm.slane %v6513_v37, %v17694_v30 }
 0x6d2   : > { %v6898_v52 = vperm.slane %v6511_v22, %v17689_v46  ;;  %v6509_v10 = vpop.xlane.xlu0 %6508  ;;  %v19379_v22 = vld [vmem:[#allocation152_spill] sm:$0xff] }
 0x6d3   : > { %v6896_v1 = vperm.slane %v6509_v10, %v17697_v9  ;;  %v19380_v10 = vld [vmem:[#allocation148_spill] sm:$0xff] }
 0x6d4   : > { %v6419_v58 = vmul.f32 %v17579_v19, %v19380_v10  ;;  %v19387_v10 = vld [vmem:[#allocation168_spill] sm:$0xff] }
 0x6d5   : > { %v6897_v3 = vsel %vm6851_vm5, %v6896_v1, %v6895_v59  ;;  %6602 = vadd.xlane.f32.xlu2 %v6414_v4 }
 0x6d6   : > { %v6899_v14 = vsel %vm6855_vm1, %v6898_v52, %v6897_v3  ;;  %6600 = vadd.xlane.f32.xlu1 %v6413_v15  ;;  %v6420_v52 = vmul.f32 %v17574_v5, %v19379_v22  ;;  %v19381_v15 = vld [vmem:[#allocation144_spill] sm:$0xff] }
 0x6d7   : > { %6598 = vadd.xlane.f32.xlu0 %v6412_v55  ;;  %v6901_v61 = vsel %vm6859_vm2, %v6900_v0, %v6899_v14  ;;  %v6418_v0 = vmul.f32 %v17584_v23, %v19381_v15 }
 0x6d8   : > { %v6519_v17 = vpop.xlane.xlu2 %6518 }
 0x6d9   : > { %v6517_v36 = vpop.xlane.xlu1 %6516  ;;  %v6906_v20 = vperm.slane %v6519_v17, %v17716_v56 }
 0x6da   : > { %v6904_v25 = vperm.slane %v6517_v36, %v17713_v54  ;;  %v6515_v63 = vpop.xlane.xlu0 %6514 }
 0x6db   : > { %v6902_v28 = vperm.slane %v6515_v63, %v17720_v48  ;;  %v19382_v63 = vld [vmem:[#allocation164_spill] sm:$0xff] }
 0x6dc   : > { %v6423_v16 = vmul.f32 %v17495_v51, %v19382_v63 }
 0x6dd   : > { %v6903_v6 = vsel %vm6863_vm3, %v6902_v28, %v6901_v61  ;;  %6608 = vadd.xlane.f32.xlu2 %v6417_v26  ;;  %v19383_v26 = vld [vmem:[#allocation160_spill] sm:$0xff] }
 0x6de   : > { %v6905_v24 = vsel %vm6867_vm0, %v6904_v25, %v6903_v6  ;;  %6606 = vadd.xlane.f32.xlu1 %v6416_v49  ;;  %v6422_v60 = vmul.f32 %v17521_v33, %v19383_v26 }
 0x6df   : > { %6604 = vadd.xlane.f32.xlu0 %v6415_v44  ;;  %v6907_v43 = vsel %vm6871_vm6, %v6906_v20, %v6905_v24  ;;  %v19384_v20 = vld [vmem:[#allocation156_spill] sm:$0xff] }
 0x6e0   : > { %v6525_v42 = vpop.xlane.xlu2 %6524  ;;  %v6421_v28 = vmul.f32 %v17500_v31, %v19384_v20 }
 0x6e1   : > { %v6523_v41 = vpop.xlane.xlu1 %6522  ;;  %v6912_v4 = vperm.slane %v6525_v42, %v17737_v18  ;;  %v19385_v42 = vld [vmem:[#allocation176_spill] sm:$0xff] }
 0x6e2   : > { %v6910_v59 = vperm.slane %v6523_v41, %v17734_v47  ;;  %v6521_v37 = vpop.xlane.xlu0 %6520  ;;  %v6426_v41 = vmul.f32 %v17511_v57, %v19385_v42 }
 0x6e3   : > { %v6908_v13 = vperm.slane %v6521_v37, %v17741_v21 }
 0x6e5   : > { %v6909_v1 = vsel %vm6875_vm4, %v6908_v13, %v6907_v43  ;;  %6614 = vadd.xlane.f32.xlu2 %v6420_v52 }
 0x6e6   : > { %v6911_v32 = vsel %vm6879_vm11, %v6910_v59, %v6909_v1  ;;  %6612 = vadd.xlane.f32.xlu1 %v6419_v58  ;;  %v19386_v59 = vld [vmem:[#allocation172_spill] sm:$0xff]  ;;  %v6424_v58 = vmul.f32 %v17516_v39, %v19387_v10 }
 0x6e7   : > { %v6913_v55 = vsel %vm6883_vm7, %v6912_v4, %v6911_v32  ;;  %6610 = vadd.xlane.f32.xlu0 %v6418_v0  ;;  %v6425_v37 = vmul.f32 %v17490_v12, %v19386_v59 }
 0x6e8   : > { %v17817_v3 = vsel %vm7088_vm9, %v6913_v55, %v17755_v34  ;;  %v6531_v14 = vpop.xlane.xlu2 %6530  ;;  %vm7092_vm9 = vcmask 1043459  }
 0x6e9   : > { %v6529_v61 = vpop.xlane.xlu1 %6528  ;;  %v6917_v17 = vperm.slane %v6531_v14, %v17664_v7  ;;  %v19388_v14 = vld [vmem:[#allocation188_spill] sm:$0xff] }
 0x6ea   : > { %v6915_v36 = vperm.slane %v6529_v61, %v17661_v62  ;;  %v6527_v25 = vpop.xlane.xlu0 %6526  ;;  %v6429_v61 = vmul.f32 %v17532_v8, %v19388_v14 }
 0x6eb   : > { %v6914_v49 = vperm.slane %v6527_v25, %v17658_v2 }
 0x6ed   : > { %v6916_v34 = vsel %vm6831_vm10, %v6915_v36, %v6914_v49  ;;  %6620 = vadd.xlane.f32.xlu2 %v6423_v16  ;;  %v19390_v16 = vld [vmem:[#allocation180_spill] sm:$0xff] }
 0x6ee   : > { %6618 = vadd.xlane.f32.xlu1 %v6422_v60  ;;  %v6918_v45 = vsel %vm6835_vm12, %v6917_v17, %v6916_v34  ;;  %v19389_v17 = vld [vmem:[#allocation184_spill] sm:$0xff]  ;;  %v6427_v26 = vmul.f32 %v17542_v11, %v19390_v16 }
 0x6ef   : > { %6616 = vadd.xlane.f32.xlu0 %v6421_v28  ;;  %v6428_v36 = vmul.f32 %v17537_v29, %v19389_v17 }
 0x6f0   : > { %v6537_v44 = vpop.xlane.xlu2 %6536 }
 0x6f1   : > { %v6535_v6 = vpop.xlane.xlu1 %6534  ;;  %v6923_v22 = vperm.slane %v6537_v44, %v17673_v27 }
 0x6f2   : > { %v6921_v24 = vperm.slane %v6535_v6, %v17667_v53  ;;  %v6533_v43 = vpop.xlane.xlu0 %6532  ;;  %v19391_v6 = vld [vmem:[#allocation200_spill] sm:$0xff] }
 0x6f3   : > { %v6919_v52 = vperm.slane %v6533_v43, %v17670_v38  ;;  %v19392_v43 = vld [vmem:[#allocation196_spill] sm:$0xff] }
 0x6f4   : > { %v6431_v42 = vmul.f32 %v17558_v35, %v19392_v43 }
 0x6f5   : > { %v6920_v4 = vsel %vm6839_vm13, %v6919_v52, %v6918_v45  ;;  %6626 = vadd.xlane.f32.xlu2 %v6426_v41 }
 0x6f6   : > { %v6922_v13 = vsel %vm6843_vm14, %v6921_v24, %v6920_v4  ;;  %6624 = vadd.xlane.f32.xlu1 %v6425_v37  ;;  %v6432_v24 = vmul.f32 %v17553_v40, %v19391_v6  ;;  %v19393_v37 = vld [vmem:[#allocation192_spill] sm:$0xff] }
 0x6f7   : > { %6622 = vadd.xlane.f32.xlu0 %v6424_v58  ;;  %v6924_v15 = vsel %vm6847_vm15, %v6923_v22, %v6922_v13  ;;  %v6430_v22 = vmul.f32 %v17563_v50, %v19393_v37 }
 0x6f8   : > { %v6543_v0 = vpop.xlane.xlu2 %6542 }
 0x6f9   : > { %v6541_v1 = vpop.xlane.xlu1 %6540  ;;  %v6929_v25 = vperm.slane %v6543_v0, %v17694_v30 }
 0x6fa   : > { %v6927_v32 = vperm.slane %v6541_v1, %v17689_v46  ;;  %v6539_v55 = vpop.xlane.xlu0 %6538  ;;  %v19394_v1 = vld [vmem:[#allocation76_spill] sm:$0xff] }
 0x6fb   : > { %v6925_v63 = vperm.slane %v6539_v55, %v17697_v9  ;;  %v19395_v55 = vld [vmem:[#allocation88_spill] sm:$0xff] }
 0x6fc   : > { %v6436_v14 = vmul.f32 %v17500_v31, %v19395_v55 }
 0x6fd   : > { %v6926_v60 = vsel %vm6851_vm5, %v6925_v63, %v6924_v15  ;;  %6632 = vadd.xlane.f32.xlu2 %v6429_v61 }
 0x6fe   : > { %v6928_v49 = vsel %vm6855_vm1, %v6927_v32, %v6926_v60  ;;  %6630 = vadd.xlane.f32.xlu1 %v6428_v36  ;;  %v6437_v32 = vmul.f32 %v17521_v33, %v19394_v1  ;;  %v19396_v36 = vld [vmem:[#allocation204_spill] sm:$0xff] }
 0x6ff   : > { %6628 = vadd.xlane.f32.xlu0 %v6427_v26  ;;  %v6930_v20 = vsel %vm6859_vm2, %v6929_v25, %v6928_v49  ;;  %v6433_v25 = vmul.f32 %v17584_v23, %v19396_v36  ;;  %v19402_v1 = vld [vmem:[#allocation52_spill] sm:$0xff] }
 0x700   : > { %v6549_v28 = vpop.xlane.xlu2 %6548 }
 0x701   : > { %v6547_v34 = vpop.xlane.xlu1 %6546  ;;  %v6935_v41 = vperm.slane %v6549_v28, %v17716_v56 }
 0x702   : > { %v6933_v45 = vperm.slane %v6547_v34, %v17713_v54  ;;  %v6545_v44 = vpop.xlane.xlu0 %6544 }
 0x703   : > { %v6931_v59 = vperm.slane %v6545_v44, %v17720_v48  ;;  %v19397_v44 = vld [vmem:[#allocation161_spill] sm:$0xff] }
 0x704   : > { %v6452_v6 = vmul.f32 %v17521_v33, %v19397_v44 }
 0x705   : > { %v6932_v52 = vsel %vm6863_vm3, %v6931_v59, %v6930_v20  ;;  %6638 = vadd.xlane.f32.xlu2 %v6432_v24  ;;  %v19398_v24 = vld [vmem:[#allocation157_spill] sm:$0xff] }
 0x706   : > { %v6934_v10 = vsel %vm6867_vm0, %v6933_v45, %v6932_v52  ;;  %6636 = vadd.xlane.f32.xlu1 %v6431_v42  ;;  %v6451_v43 = vmul.f32 %v17500_v31, %v19398_v24 }
 0x707   : > { %6634 = vadd.xlane.f32.xlu0 %v6430_v22  ;;  %v6936_v58 = vsel %vm6871_vm6, %v6935_v41, %v6934_v10  ;;  %v19399_v41 = vld [vmem:[#allocation64_spill] sm:$0xff] }
 0x708   : > { %v6555_v4 = vpop.xlane.xlu2 %6554  ;;  %v6438_v59 = vmul.f32 %v17495_v51, %v19399_v41 }
 0x709   : > { %v6553_v13 = vpop.xlane.xlu1 %6552  ;;  %v6941_v61 = vperm.slane %v6555_v4, %v17737_v18  ;;  %v19401_v4 = vld [vmem:[#allocation165_spill] sm:$0xff] }
 0x70a   : > { %v6939_v15 = vperm.slane %v6553_v13, %v17734_v47  ;;  %v6551_v0 = vpop.xlane.xlu0 %6550  ;;  %v6453_v13 = vmul.f32 %v17495_v51, %v19401_v4 }
 0x70b   : > { %v6937_v17 = vperm.slane %v6551_v0, %v17741_v21 }
 0x70d   : > { %v6938_v63 = vsel %vm6875_vm4, %v6937_v17, %v6936_v58  ;;  %6648 = vadd.xlane.f32.xlu2 %v6437_v32  ;;  %v19400_v58 = vld [vmem:[#allocation40_spill] sm:$0xff]  ;;  %v6439_v32 = vmul.f32 %v17516_v39, %v19402_v1  ;;  %v19409_v1 = vld [vmem:[#allocation185_spill] sm:$0xff] }
 0x70e   : > { %v6940_v16 = vsel %vm6879_vm11, %v6939_v15, %v6938_v63  ;;  %6646 = vadd.xlane.f32.xlu1 %v6436_v14  ;;  %v6440_v31 = vmul.f32 %v17490_v12, %v19400_v58  ;;  %v19403_v63 = vld [vmem:[#allocation173_spill] sm:$0xff] }
 0x70f   : > { %v6942_v26 = vsel %vm6883_vm7, %v6941_v61, %v6940_v16  ;;  %6640 = vadd.xlane.f32.xlu0 %v6433_v25  ;;  %v6455_v16 = vmul.f32 %v17490_v12, %v19403_v63 }
 0x710   : > { %v17879_v60 = vsel %vm7090_vm8, %v6942_v26, %v17817_v3  ;;  %v6561_v49 = vpop.xlane.xlu2 %6560  ;;  %v19404_v26 = vld [vmem:[#allocation28_spill] sm:$0xff]  ;;  %vm7094_vm8 = vcmask 1044484  }
 0x711   : > { %v6559_v20 = vpop.xlane.xlu1 %6558  ;;  %v6946_v28 = vperm.slane %v6561_v49, %v17664_v7  ;;  %v6441_v49 = vmul.f32 %v17511_v57, %v19404_v26 }
 0x712   : > { %v6944_v34 = vperm.slane %v6559_v20, %v17661_v62  ;;  %v6557_v45 = vpop.xlane.xlu0 %6556 }
 0x713   : > { %v6943_v42 = vperm.slane %v6557_v45, %v17658_v2 }
 0x715   : > { %v6945_v3 = vsel %vm6831_vm10, %v6944_v34, %v6943_v42  ;;  %6678 = vadd.xlane.f32.xlu2 %v6452_v6  ;;  %v19405_v34 = vld [vmem:[#allocation169_spill] sm:$0xff] }
 0x716   : > { %6676 = vadd.xlane.f32.xlu1 %v6451_v43  ;;  %v6947_v37 = vsel %vm6835_vm12, %v6946_v28, %v6945_v3  ;;  %v6454_v45 = vmul.f32 %v17516_v39, %v19405_v34  ;;  %v19412_v34 = vld [vmem:[#allocation137_spill] sm:$0xff] }
 0x717   : > { %6650 = vadd.xlane.f32.xlu0 %v6438_v59  ;;  %v19406_v59 = vld [vmem:[#allocation125_spill] sm:$0xff] }
 0x718   : > { %v6567_v22 = vpop.xlane.xlu2 %6566  ;;  %v6443_v3 = vmul.f32 %v17537_v29, %v19406_v59 }
 0x719   : > { %v6565_v52 = vpop.xlane.xlu1 %6564  ;;  %v6952_v15 = vperm.slane %v6567_v22, %v17673_v27 }
 0x71a   : > { %v6950_v10 = vperm.slane %v6565_v52, %v17667_v53  ;;  %v6563_v33 = vpop.xlane.xlu0 %6562 }
 0x71b   : > { %v6948_v0 = vperm.slane %v6563_v33, %v17670_v38 }
 0x71d   : > { %v6949_v55 = vsel %vm6839_vm13, %v6948_v0, %v6947_v37  ;;  %6654 = vadd.xlane.f32.xlu2 %v6440_v31  ;;  %v19407_v37 = vld [vmem:[#allocation177_spill] sm:$0xff] }
 0x71e   : > { %v6951_v14 = vsel %vm6843_vm14, %v6950_v10, %v6949_v55  ;;  %6680 = vadd.xlane.f32.xlu1 %v6453_v13  ;;  %v6456_v39 = vmul.f32 %v17511_v57, %v19407_v37  ;;  %v19408_v10 = vld [vmem:[#allocation15_spill] sm:$0xff]  ;;  %v19410_v55 = vld [vmem:[#allocation129_spill] sm:$0xff] }
 0x71f   : > { %6652 = vadd.xlane.f32.xlu0 %v6439_v32  ;;  %v6953_v61 = vsel %vm6847_vm15, %v6952_v15, %v6951_v14  ;;  %v6442_v33 = vmul.f32 %v17542_v11, %v19408_v10  ;;  %v6458_v32 = vmul.f32 %v17537_v29, %v19409_v1  ;;  %v6444_v14 = vmul.f32 %v17532_v8, %v19410_v55 }
 0x720   : > { %v6573_v17 = vpop.xlane.xlu2 %6572 }
 0x721   : > { %v6571_v36 = vpop.xlane.xlu1 %6570  ;;  %v6958_v20 = vperm.slane %v6573_v17, %v17694_v30 }
 0x722   : > { %v6956_v51 = vperm.slane %v6571_v36, %v17689_v46  ;;  %v6569_v25 = vpop.xlane.xlu0 %6568  ;;  %v19411_v36 = vld [vmem:[#allocation181_spill] sm:$0xff] }
 0x723   : > { %v6954_v28 = vperm.slane %v6569_v25, %v17697_v9 }
 0x725   : > { %v6955_v44 = vsel %vm6851_vm5, %v6954_v28, %v6953_v61  ;;  %6684 = vadd.xlane.f32.xlu2 %v6455_v16 }
 0x726   : > { %v6957_v6 = vsel %vm6855_vm1, %v6956_v51, %v6955_v44  ;;  %6656 = vadd.xlane.f32.xlu1 %v6441_v49  ;;  %v6457_v51 = vmul.f32 %v17542_v11, %v19411_v36  ;;  %v19413_v44 = vld [vmem:[#allocation189_spill] sm:$0xff]  ;;  %v19420_v36 = vld [vmem:[#allocation208_spill] sm:$0xff] }
 0x727   : > { %6682 = vadd.xlane.f32.xlu0 %v6454_v45  ;;  %v6959_v24 = vsel %vm6859_vm2, %v6958_v20, %v6957_v6  ;;  %v6446_v45 = vmul.f32 %v17558_v35, %v19412_v34  ;;  %v6459_v6 = vmul.f32 %v17532_v8, %v19413_v44  ;;  %v19422_v34 = vld [vmem:[#allocation149_spill] sm:$0xff] }
 0x728   : > { %v6579_v12 = vpop.xlane.xlu2 %6578 }
 0x729   : > { %v6577_v43 = vpop.xlane.xlu1 %6576  ;;  %v6964_v22 = vperm.slane %v6579_v12, %v17716_v56  ;;  %v19414_v12 = vld [vmem:[#allocation133_spill] sm:$0xff] }
 0x72a   : > { %v6962_v42 = vperm.slane %v6577_v43, %v17713_v54  ;;  %v6575_v41 = vpop.xlane.xlu0 %6574  ;;  %v6445_v43 = vmul.f32 %v17563_v50, %v19414_v12 }
 0x72b   : > { %v6960_v52 = vperm.slane %v6575_v41, %v17720_v48 }
 0x72d   : > { %v6961_v58 = vsel %vm6863_vm3, %v6960_v52, %v6959_v24  ;;  %6660 = vadd.xlane.f32.xlu2 %v6443_v3 }
 0x72e   : > { %v6963_v31 = vsel %vm6867_vm0, %v6962_v42, %v6961_v58  ;;  %6686 = vadd.xlane.f32.xlu1 %v6456_v39  ;;  %v19415_v39 = vld [vmem:[#allocation197_spill] sm:$0xff] }
 0x72f   : > { %6658 = vadd.xlane.f32.xlu0 %v6442_v33  ;;  %v6965_v4 = vsel %vm6871_vm6, %v6964_v22, %v6963_v31  ;;  %v6461_v8 = vmul.f32 %v17558_v35, %v19415_v39  ;;  %v19416_v22 = vld [vmem:[#allocation141_spill] sm:$0xff] }
 0x730   : > { %v6585_v13 = vpop.xlane.xlu2 %6584  ;;  %v6447_v52 = vmul.f32 %v17553_v40, %v19416_v22  ;;  %v19417_v58 = vld [vmem:[#allocation193_spill] sm:$0xff] }
 0x731   : > { %v6583_v15 = vpop.xlane.xlu1 %6582  ;;  %v6970_v61 = vperm.slane %v6585_v13, %v17737_v18  ;;  %v6460_v31 = vmul.f32 %v17563_v50, %v19417_v58 }
 0x732   : > { %v6968_v57 = vperm.slane %v6583_v15, %v17734_v47  ;;  %v6581_v0 = vpop.xlane.xlu0 %6580 }
 0x733   : > { %v6966_v17 = vperm.slane %v6581_v0, %v17741_v21 }
 0x735   : > { %v6967_v25 = vsel %vm6875_vm4, %v6966_v17, %v6965_v4  ;;  %6690 = vadd.xlane.f32.xlu2 %v6458_v32  ;;  %v19418_v32 = vld [vmem:[#allocation201_spill] sm:$0xff] }
 0x736   : > { %v6969_v63 = vsel %vm6879_vm11, %v6968_v57, %v6967_v25  ;;  %6662 = vadd.xlane.f32.xlu1 %v6444_v14  ;;  %v6462_v55 = vmul.f32 %v17553_v40, %v19418_v32  ;;  %v19419_v14 = vld [vmem:[#allocation145_spill] sm:$0xff] }
 0x737   : > { %v6971_v16 = vsel %vm6883_vm7, %v6970_v61, %v6969_v63  ;;  %6688 = vadd.xlane.f32.xlu0 %v6457_v51  ;;  %v6448_v50 = vmul.f32 %v17584_v23, %v19419_v14  ;;  %v6434_v51 = vmul.f32 %v17579_v19, %v19420_v36 }
 0x738   : > { %v17941_v29 = vsel %vm7092_vm9, %v6971_v16, %v17879_v60  ;;  %v6591_v26 = vpop.xlane.xlu2 %6590 }
 0x739   : > { %v6589_v49 = vpop.xlane.xlu1 %6588  ;;  %v6975_v20 = vperm.slane %v6591_v26, %v17664_v7 }
 0x73a   : > { %v6973_v28 = vperm.slane %v6589_v49, %v17661_v62  ;;  %v6587_v11 = vpop.xlane.xlu0 %6586 }
 0x73b   : > { %v6972_v24 = vperm.slane %v6587_v11, %v17658_v2 }
 0x73d   : > { %v6974_v60 = vsel %vm6831_vm10, %v6973_v28, %v6972_v24  ;;  %6666 = vadd.xlane.f32.xlu2 %v6446_v45  ;;  %v19421_v28 = vld [vmem:[#allocation205_spill] sm:$0xff]  ;;  %v6449_v45 = vmul.f32 %v17579_v19, %v19422_v34  ;;  %v19423_v24 = vld [vmem:[#allocation212_spill] sm:$0xff] }
 0x73e   : > { %6692 = vadd.xlane.f32.xlu1 %v6459_v6  ;;  %v6976_v42 = vsel %vm6835_vm12, %v6975_v20, %v6974_v60  ;;  %v6463_v11 = vmul.f32 %v17584_v23, %v19421_v28  ;;  %v6435_v12 = vmul.f32 %v17574_v5, %v19423_v24 }
 0x73f   : > { %6664 = vadd.xlane.f32.xlu0 %v6445_v43 }
 0x740   : > { %v6597_v41 = vpop.xlane.xlu2 %6596 }
 0x741   : > { %v6595_v59 = vpop.xlane.xlu1 %6594  ;;  %v6981_v10 = vperm.slane %v6597_v41, %v17673_v27 }
 0x742   : > { %v6979_v3 = vperm.slane %v6595_v59, %v17667_v53  ;;  %v6593_v37 = vpop.xlane.xlu0 %6592 }
 0x743   : > { %v6977_v33 = vperm.slane %v6593_v37, %v17670_v38  ;;  %v19424_v37 = vld [vmem:[#allocation209_spill] sm:$0xff] }
 0x744   : > { %v6464_v39 = vmul.f32 %v17579_v19, %v19424_v37 }
 0x745   : > { %v6978_v4 = vsel %vm6839_vm13, %v6977_v33, %v6976_v42  ;;  %6696 = vadd.xlane.f32.xlu2 %v6461_v8  ;;  %v19425_v8 = vld [vmem:[#allocation213_spill] sm:$0xff] }
 0x746   : > { %v6980_v13 = vsel %vm6843_vm14, %v6979_v3, %v6978_v4  ;;  %6668 = vadd.xlane.f32.xlu1 %v6447_v52  ;;  %v6465_v22 = vmul.f32 %v17574_v5, %v19425_v8  ;;  %v19426_v33 = vld [vmem:[#allocation153_spill] sm:$0xff] }
 0x747   : > { %6694 = vadd.xlane.f32.xlu0 %v6460_v31  ;;  %v6982_v15 = vsel %vm6847_vm15, %v6981_v10, %v6980_v13  ;;  %v6450_v58 = vmul.f32 %v17574_v5, %v19426_v33 }
 0x748   : > { %v6603_v35 = vpop.xlane.xlu2 %6602 }
 0x749   : > { %v6601_v57 = vpop.xlane.xlu1 %6600  ;;  %v6987_v61 = vperm.slane %v6603_v35, %v17694_v30 }
 0x74a   : > { %v6985_v0 = vperm.slane %v6601_v57, %v17689_v46  ;;  %v6599_v1 = vpop.xlane.xlu0 %6598 }
 0x74b   : > { %v6983_v17 = vperm.slane %v6599_v1, %v17697_v9 }
 0x74d   : > { %v6984_v25 = vsel %vm6851_vm5, %v6983_v17, %v6982_v15  ;;  %6698 = vadd.xlane.f32.xlu2 %v6462_v55 }
 0x74e   : > { %v6986_v63 = vsel %vm6855_vm1, %v6985_v0, %v6984_v25  ;;  %6670 = vadd.xlane.f32.xlu1 %v6448_v50 }
 0x74f   : > { %6642 = vadd.xlane.f32.xlu0 %v6434_v51  ;;  %v6988_v16 = vsel %vm6859_vm2, %v6987_v61, %v6986_v63 }
 0x750   : > { %v6609_v40 = vpop.xlane.xlu2 %6608 }
 0x751   : > { %v6607_v26 = vpop.xlane.xlu1 %6606  ;;  %v6993_v44 = vperm.slane %v6609_v40, %v17716_v56 }
 0x752   : > { %v6991_v49 = vperm.slane %v6607_v26, %v17713_v54  ;;  %v6605_v20 = vpop.xlane.xlu0 %6604 }
 0x753   : > { %v6989_v6 = vperm.slane %v6605_v20, %v17720_v48 }
 0x755   : > { %v6990_v43 = vsel %vm6863_vm3, %v6989_v6, %v6988_v16  ;;  %6700 = vadd.xlane.f32.xlu2 %v6463_v11 }
 0x756   : > { %v6992_v60 = vsel %vm6867_vm0, %v6991_v49, %v6990_v43  ;;  %6672 = vadd.xlane.f32.xlu1 %v6449_v45 }
 0x757   : > { %6644 = vadd.xlane.f32.xlu0 %v6435_v12  ;;  %v6994_v42 = vsel %vm6871_vm6, %v6993_v44, %v6992_v60 }
 0x758   : > { %v6615_v23 = vpop.xlane.xlu2 %6614 }
 0x759   : > { %v6613_v41 = vpop.xlane.xlu1 %6612  ;;  %v6999_v52 = vperm.slane %v6615_v23, %v17737_v18 }
 0x75a   : > { %v6997_v59 = vperm.slane %v6613_v41, %v17734_v47  ;;  %v6611_v3 = vpop.xlane.xlu0 %6610 }
 0x75b   : > { %v6995_v10 = vperm.slane %v6611_v3, %v17741_v21 }
 0x75d   : > { %v6996_v31 = vsel %vm6875_vm4, %v6995_v10, %v6994_v42  ;;  %6704 = vadd.xlane.f32.xlu2 %v6465_v22 }
 0x75e   : > { %v6998_v4 = vsel %vm6879_vm11, %v6997_v59, %v6996_v31  ;;  %6702 = vadd.xlane.f32.xlu1 %v6464_v39 }
 0x75f   : > { %v7000_v13 = vsel %vm6883_vm7, %v6999_v52, %v6998_v4  ;;  %6674 = vadd.xlane.f32.xlu0 %v6450_v58 }
 0x760   : > { %v18003_v19 = vsel %vm7094_vm8, %v7000_v13, %v17941_v29  ;;  %v6621_v15 = vpop.xlane.xlu2 %6620 }
 0x761   : > { %v6619_v35 = vpop.xlane.xlu1 %6618  ;;  %v7004_v57 = vperm.slane %v6621_v15, %v17664_v7 }
 0x762   : > { %v7002_v0 = vperm.slane %v6619_v35, %v17661_v62  ;;  %v6617_v5 = vpop.xlane.xlu0 %6616 }
 0x763   : > { %v7001_v1 = vperm.slane %v6617_v5, %v17658_v2 }
 0x765   : > { %v7003_v32 = vsel %vm6831_vm10, %v7002_v0, %v7001_v1 }
 0x766   : > { %v7005_v55 = vsel %vm6835_vm12, %v7004_v57, %v7003_v32 }
 0x768   : > { %v6627_v14 = vpop.xlane.xlu2 %6626 }
 0x769   : > { %v6625_v50 = vpop.xlane.xlu1 %6624  ;;  %v7010_v29 = vperm.slane %v6627_v14, %v17673_v27 }
 0x76a   : > { %v7008_v61 = vperm.slane %v6625_v50, %v17667_v53  ;;  %v6623_v17 = vpop.xlane.xlu0 %6622 }
 0x76b   : > { %v7006_v36 = vperm.slane %v6623_v17, %v17670_v38 }
 0x76d   : > { %v7007_v51 = vsel %vm6839_vm13, %v7006_v36, %v7005_v55 }
 0x76e   : > { %v7009_v25 = vsel %vm6843_vm14, %v7008_v61, %v7007_v51 }
 0x76f   : > { %v7011_v63 = vsel %vm6847_vm15, %v7010_v29, %v7009_v25 }
 0x770   : > { %v6633_v16 = vpop.xlane.xlu2 %6632 }
 0x771   : > { %v6631_v40 = vpop.xlane.xlu1 %6630  ;;  %v7016_v20 = vperm.slane %v6633_v16, %v17694_v30 }
 0x772   : > { %v7014_v26 = vperm.slane %v6631_v40, %v17689_v46  ;;  %v6629_v49 = vpop.xlane.xlu0 %6628 }
 0x773   : > { %v7012_v28 = vperm.slane %v6629_v49, %v17697_v9 }
 0x775   : > { %v7013_v11 = vsel %vm6851_vm5, %v7012_v28, %v7011_v63 }
 0x776   : > { %v7015_v34 = vsel %vm6855_vm1, %v7014_v26, %v7013_v11 }
 0x777   : > { %v7017_v45 = vsel %vm6859_vm2, %v7016_v20, %v7015_v34 }
 0x778   : > { %v6639_v44 = vpop.xlane.xlu2 %6638 }
 0x779   : > { %v6637_v6 = vpop.xlane.xlu1 %6636  ;;  %v7022_v43 = vperm.slane %v6639_v44, %v17716_v56 }
 0x77a   : > { %v7020_v24 = vperm.slane %v6637_v6, %v17713_v54  ;;  %v6635_v12 = vpop.xlane.xlu0 %6634 }
 0x77b   : > { %v7018_v60 = vperm.slane %v6635_v12, %v17720_v48 }
 0x77d   : > { %v7019_v42 = vsel %vm6863_vm3, %v7018_v60, %v7017_v45 }
 0x77e   : > { %v7021_v23 = vsel %vm6867_vm0, %v7020_v24, %v7019_v42 }
 0x77f   : > { %v7023_v41 = vsel %vm6871_vm6, %v7022_v43, %v7021_v23 }
 0x780   : > { %v6649_v59 = vpop.xlane.xlu2 %6648 }
 0x781   : > { %v6647_v3 = vpop.xlane.xlu1 %6646  ;;  %v7031_v37 = vperm.slane %v6649_v59, %v17661_v62 }
 0x782   : > { %v7030_v39 = vperm.slane %v6647_v3, %v17658_v2  ;;  %v6641_v8 = vpop.xlane.xlu0 %6640 }
 0x783   : > { %v7024_v22 = vperm.slane %v6641_v8, %v17741_v21 }
 0x784   : > { %v7032_v52 = vsel %vm6831_vm10, %v7031_v37, %v7030_v39 }
 0x785   : > { %v18033_v10 = vsel %vm6875_vm4, %v7024_v22, %v7023_v41 }
 0x788   : > { %v6679_v33 = vpop.xlane.xlu2 %6678 }
 0x789   : > { %v6677_v58 = vpop.xlane.xlu1 %6676  ;;  %v7060_v63 = vperm.slane %v6679_v33, %v17661_v62 }
 0x78a   : > { %v6651_v31 = vpop.xlane.xlu0 %6650  ;;  %v7059_v16 = vperm.slane %v6677_v58, %v17658_v2 }
 0x78b   : > { %v7033_v40 = vperm.slane %v6651_v31, %v17664_v7 }
 0x78c   : > { %v7061_v28 = vsel %vm6831_vm10, %v7060_v63, %v7059_v16  ;;  %vm7096_vm10 = vcmask 1045509  }
 0x78d   : > { %v7034_v45 = vsel %vm6835_vm12, %v7033_v40, %v7032_v52 }
 0x790   : > { %v6655_v4 = vpop.xlane.xlu2 %6654 }
 0x791   : > { %v6681_v13 = vpop.xlane.xlu1 %6680  ;;  %v7037_v44 = vperm.slane %v6655_v4, %v17667_v53 }
 0x792   : > { %v6653_v15 = vpop.xlane.xlu0 %6652  ;;  %v7062_v26 = vperm.slane %v6681_v13, %v17664_v7 }
 0x793   : > { %v7035_v49 = vperm.slane %v6653_v15, %v17670_v38 }
 0x794   : > { %v7063_v62 = vsel %vm6835_vm12, %v7062_v26, %v7061_v28  ;;  %vm7098_vm12 = vcmask 1046534  }
 0x795   : > { %v7036_v24 = vsel %vm6839_vm13, %v7035_v49, %v7034_v45  ;;  %v9865_v45 = vld [vmem:[#allocation2] ss:$0 sm:$0xff] }
 0x796   : > { %v7038_v42 = vsel %vm6843_vm14, %v7037_v44, %v7036_v24 }
 0x798   : > { %v6685_v35 = vpop.xlane.xlu2 %6684 }
 0x799   : > { %v6657_v57 = vpop.xlane.xlu1 %6656  ;;  %v7066_v2 = vperm.slane %v6685_v35, %v17667_v53 }
 0x79a   : > { %v6683_v0 = vpop.xlane.xlu0 %6682  ;;  %v7039_v7 = vperm.slane %v6657_v57, %v17673_v27 }
 0x79b   : > { %v7064_v20 = vperm.slane %v6683_v0, %v17670_v38 }
 0x79c   : > { %v7040_v41 = vsel %vm6847_vm15, %v7039_v7, %v7038_v42 }
 0x79d   : > { %v7065_v12 = vsel %vm6839_vm13, %v7064_v20, %v7063_v62  ;;  %vm7100_vm13 = vcmask 1047559  }
 0x79e   : > { %v7067_v23 = vsel %vm6843_vm14, %v7066_v2, %v7065_v12  ;;  %vm7103_vm14 = vcmask 982016  }
 0x7a0   : > { %v6661_v5 = vpop.xlane.xlu2 %6660 }
 0x7a1   : > { %v6687_v1 = vpop.xlane.xlu1 %6686  ;;  %v7043_v53 = vperm.slane %v6661_v5, %v17689_v46 }
 0x7a2   : > { %v6659_v32 = vpop.xlane.xlu0 %6658  ;;  %v7068_v38 = vperm.slane %v6687_v1, %v17673_v27 }
 0x7a3   : > { %v7041_v43 = vperm.slane %v6659_v32, %v17697_v9 }
 0x7a4   : > { %v7069_v59 = vsel %vm6847_vm15, %v7068_v38, %v7067_v23  ;;  %vm7112_vm15 = vcmask 7168  }
 0x7a5   : > { %v7042_v3 = vsel %vm6851_vm5, %v7041_v43, %v7040_v41 }
 0x7a6   : > { %v7044_v4 = vsel %vm6855_vm1, %v7043_v53, %v7042_v3 }
 0x7a8   : > { %v6691_v55 = vpop.xlane.xlu2 %6690 }
 0x7a9   : > { %v6663_v14 = vpop.xlane.xlu1 %6662  ;;  %v7072_v37 = vperm.slane %v6691_v55, %v17689_v46 }
 0x7aa   : > { %v6689_v50 = vpop.xlane.xlu0 %6688  ;;  %v7045_v27 = vperm.slane %v6663_v14, %v17694_v30 }
 0x7ab   : > { %v7070_v60 = vperm.slane %v6689_v50, %v17697_v9 }
 0x7ac   : > { %v7046_v46 = vsel %vm6859_vm2, %v7045_v27, %v7044_v4 }
 0x7ad   : > { %v7071_v9 = vsel %vm6851_vm5, %v7070_v60, %v7069_v59 }
 0x7ae   : > { %v7073_v35 = vsel %vm6855_vm1, %v7072_v37, %v7071_v9 }
 0x7b0   : > { %v6667_v61 = vpop.xlane.xlu2 %6666 }
 0x7b1   : > { %v6693_v17 = vpop.xlane.xlu1 %6692  ;;  %v7049_v15 = vperm.slane %v6667_v61, %v17713_v54 }
 0x7b2   : > { %v6665_v29 = vpop.xlane.xlu0 %6664  ;;  %v7074_v8 = vperm.slane %v6693_v17, %v17694_v30 }
 0x7b3   : > { %v7047_v22 = vperm.slane %v6665_v29, %v17720_v48 }
 0x7b4   : > { %v7075_v57 = vsel %vm6859_vm2, %v7074_v8, %v7073_v35 }
 0x7b5   : > { %v7048_v0 = vsel %vm6863_vm3, %v7047_v22, %v7046_v46 }
 0x7b6   : > { %v7050_v17 = vsel %vm6867_vm0, %v7049_v15, %v7048_v0 }
 0x7b8   : > { %v6697_v36 = vpop.xlane.xlu2 %6696 }
 0x7b9   : > { %v6669_v51 = vpop.xlane.xlu1 %6668 }
 0x7ba   : > { %v6695_v25 = vpop.xlane.xlu0 %6694  ;;  %v7051_v1 = vperm.slane %v6669_v51, %v17716_v56 }
 0x7bb   : > { %v7076_v58 = vperm.slane %v6695_v25, %v17720_v48  ;;  %v7078_v48 = vperm.slane %v6697_v36, %v17713_v54 }
 0x7bc   : > { %v7052_v51 = vsel %vm6871_vm6, %v7051_v1, %v7050_v17 }
 0x7bd   : > { %v7077_v32 = vsel %vm6863_vm3, %v7076_v58, %v7075_v57 }
 0x7be   : > { %v7079_v54 = vsel %vm6867_vm0, %v7078_v48, %v7077_v32 }
 0x7c0   : > { %v6699_v11 = vpop.xlane.xlu2 %6698 }
 0x7c1   : > { %v6671_v34 = vpop.xlane.xlu1 %6670  ;;  %v7080_v55 = vperm.slane %v6699_v11, %v17716_v56 }
 0x7c2   : > { %v6643_v6 = vpop.xlane.xlu0 %6642  ;;  %v7053_v50 = vperm.slane %v6671_v34, %v17741_v21 }
 0x7c3   : > { %v7026_v39 = vperm.slane %v6643_v6, %v17734_v47  ;;  %v7081_v25 = vsel %vm6871_vm6, %v7080_v55, %v7079_v54 }
 0x7c4   : > { %v7054_v16 = vsel %vm6875_vm4, %v7053_v50, %v7052_v51 }
 0x7c5   : > { %v7027_v30 = vsel %vm6879_vm11, %v7026_v39, %v18033_v10 }
 0x7c8   : > { %v6701_v52 = vpop.xlane.xlu2 %6700 }
 0x7c9   : > { %v6673_v33 = vpop.xlane.xlu1 %6672  ;;  %v7082_v10 = vperm.slane %v6701_v52, %v17741_v21 }
 0x7ca   : > { %v6645_v31 = vpop.xlane.xlu0 %6644  ;;  %v7055_v61 = vperm.slane %v6673_v33, %v17734_v47 }
 0x7cb   : > { %v7028_v13 = vperm.slane %v6645_v31, %v17737_v18  ;;  %v7083_v21 = vsel %vm6875_vm4, %v7082_v10, %v7081_v25 }
 0x7cc   : > { %v7056_v26 = vsel %vm6879_vm11, %v7055_v61, %v7054_v16 }
 0x7cd   : > { %v7029_v5 = vsel %vm6883_vm7, %v7028_v13, %v7027_v30 }
 0x7ce   : > { %v7097_v14 = vsel %vm7096_vm10, %v7029_v5, %v18003_v19 }
 0x7d0   : > { %v6705_v36 = vpop.xlane.xlu2 %6704 }
 0x7d1   : > { %v6703_v29 = vpop.xlane.xlu1 %6702  ;;  %v7086_v19 = vperm.slane %v6705_v36, %v17737_v18 }
 0x7d2   : > { %v7084_v56 = vperm.slane %v6703_v29, %v17734_v47  ;;  %v6675_v63 = vpop.xlane.xlu0 %6674 }
 0x7d3   : > { %v7057_v40 = vperm.slane %v6675_v63, %v17737_v18 }
 0x7d4   : > { %v7085_v49 = vsel %vm6879_vm11, %v7084_v56, %v7083_v21 }
 0x7d5   : > { %v7058_v20 = vsel %vm6883_vm7, %v7057_v40, %v7056_v26  ;;  %v7087_v47 = vsel %vm6883_vm7, %v7086_v19, %v7085_v49 }
 0x7d6   : > { %v7099_v28 = vsel %vm7098_vm12, %v7058_v20, %v7097_v14 }
 0x7d7   : > { %v7101_v11 = vsel %vm7100_vm13, %v7087_v47, %v7099_v28 }
 0x7d8   : > { %v7104_v34 = vsel %vm7103_vm14, %v7101_v11, 0.0 }
 0x7d9   : > { %7105 = vadd.xlane.f32.xlu0 %v7104_v34 }
 0x84c   : > { %v7106_v44 = vpop.xlane.xlu0 %7105 }
 0x84d   : > { %v7111_v18 = vadd.f32 %v9865_v45, %v7106_v44 }
 0x84f   : > { %7113 = vst.msk [vmem:[%s10899_s10] sm:$0xff] %vm7112_vm15, %v7111_v18 }
 0x850 PF: > { %s19_s26 = sadd.s32 1, %s10356_s26  }
 0x851   : > { %p16_p6 = scmp.ge.s32.totalorder %s19_s26, 4  }
 0x853   :  { %18 = sbr.rel (!%p16_p6) target bundleno = 3 (0x3), region = 98 }

</bundles_post_ra>
